<compile_context>
chip_gen: v7x
topology: tpu7x:2x2x1
jax: 0.10.0
libtpu: 0.0.40
codegen_flags: <defaults>
</compile_context>

<pallas_src>
import functools
import numpy as np
import jax
import jax.numpy as jnp
from jax.experimental import pallas as pl
from jax.experimental.pallas import tpu as pltpu

PPM_DIM = 512            # hard-coded in the PyTorch module
LANE = 128
SUBLANE = 8
_NEG_BIG = -1e30         # masks padded class columns out of the fused softmax


def _round_up(x, m):
    return ((x + m - 1) // m) * m


def _tpu_vmem_plan():
    """Per-generation VMEM plan: (vmem_limit_bytes, block_budget_bytes, small_k_tile, want_two_chunks)."""
    kind = ""
    try:
        kind = jax.devices()[0].device_kind.lower()
    except Exception:
        pass
    if "v7" in kind or "7x" in kind:
        # v7x: 64 MiB physical VMEM per TensorCore, 2 TCs per chip -> keep headroom and keep
        # the parallel grid axis >= 2 so both cores get work.
        limit = 48 * 1024 * 1024
        return limit, limit - 6 * 1024 * 1024, True, True
    if "v2" in kind or "v3" in kind:
        limit = 14 * 1024 * 1024
        return limit, limit - 4 * 1024 * 1024, True, False
    # v4 / v5e / v6e: 128 MiB physical; default scoped limit is only 16-32 MiB -> raise it.
    limit = 100 * 1024 * 1024
    return limit, limit - 6 * 1024 * 1024, False, False


# ---------------------------------------------------------------------- Pallas kernel

def _conv3x3_cls_kernel(x_ref, w_ref, scale_ref, shift_ref, wc_ref, bc_ref,
                        o_ref, acc_ref, *, wp, rows_out, relu):
    """Fused 3x3 conv (9 shifted matmuls, K-resident f32 acc) + folded-BN affine (+ReLU)
    + 1x1 classifier + bias + log_softmax, all in the last-K epilogue.

    x_ref     : (P, tc)              row-flattened padded-image chunk, one Cin block (bf16)
    w_ref     : (9, tc, Cout_p)      tap-major 3x3 weight block (bf16)
    wc_ref    : (Cout_p, Ncls_p)     classifier weight (bf16), padded rows/cols are 0
    bc_ref    : (1, Ncls_p)          classifier bias (f32), padded classes = -1e30
    o_ref     : (rows_out, Ncls_p)   f32 log-probs; junk columns per image row cropped later
    acc_ref   : (rows_out, Cout_p)   f32 K-resident accumulator
    """
    k = pl.program_id(1)
    last = pl.num_programs(1) - 1

    @pl.when(k == 0)
    def _():
        acc_ref[...] = jnp.zeros_like(acc_ref)

    acc = acc_ref[...]
    for t in range(9):                                   # taps unrolled inside the K step
        kh, kw = divmod(t, 3)
        a = x_ref[pl.ds(kh * wp + kw, rows_out), :]      # shifted tap slab (sublane-aligned kh*wp)
        acc += jnp.dot(a, w_ref[t], preferred_element_type=jnp.float32)

    @pl.when(k < last)
    def _():
        acc_ref[...] = acc                               # only written (never re-read) on last step

    @pl.when(k == last)
    def _():
        y = acc * scale_ref[...] + shift_ref[...]        # folded BN (uses in-register acc)
        if relu:
            y = jnp.maximum(y, 0.0)
        # Dropout2d is identity at inference, so fusing the 1x1 classifier here is exact.
        logits = jnp.dot(y.astype(jnp.bfloat16), wc_ref[...],
                         preferred_element_type=jnp.float32)
        logits = logits + bc_ref[...]
        m = jnp.max(logits, axis=-1, keepdims=True)
        s = logits - m
        lse = jnp.log(jnp.sum(jnp.exp(s), axis=-1, keepdims=True))
        o_ref[...] = (s - lse).astype(o_ref.dtype)


# --------------------------------------------------------------------------- wrapper

def _pick_row_chunk(H, wp, tc, cout_p, ncls_p, budget):
    """Largest output-row chunk whose double-buffered blocks + f32 acc fit `budget` bytes."""
    fixed = (2 * (2 * 9 * tc * cout_p)            # bf16 3x3 weight block, double-buffered
             + 2 * (2 * cout_p * ncls_p)          # bf16 classifier weight, double-buffered
             + 2 * (4 * 2 * cout_p + 4 * ncls_p)  # scale/shift/bias blocks
             + 2 * (2 * 3 * wp * tc))             # 3 halo/guard rows of the input slab (bf16, db)
    per_row = wp * (2 * 2 * tc                    # bf16 input slab rows, double-buffered
                    + 2 * 4 * ncls_p              # f32 output tile, double-buffered
                    + 4 * cout_p)                 # f32 accumulator scratch
    return int(max(1, min(H, (budget - fixed) // per_row)))


def conv3x3_bn_relu_cls_logsoftmax(x_nhwc, w3_oihw, scale, shift, w1, b1, *,
                                   relu=True, out_dtype=jnp.float32):
    """3x3 conv (stride 1, pad 1, no bias) + folded BN (+ReLU) + 1x1 classifier + bias
    + log_softmax as ONE Pallas kernel.

    Returns (out_wide, meta): out_wide has shape (N*n_chunks, th*wp, Ncls_p) where every
    image row carries (wp - W) junk columns (flat-slab trick) and the class dim is lane-padded
    to a multiple of 128; `crop_wide` removes both.
    """
    N, H, W, Cin = x_nhwc.shape
    Cout = w3_oihw.shape[0]
    ncls = w1.shape[0]
    Cin_p = _round_up(Cin, LANE)
    Cout_p = _round_up(Cout, LANE)
    Ncls_p = _round_up(ncls, LANE)
    wp = _round_up(W + 2, SUBLANE)                # sublane-aligned flattened width

    vmem_limit, budget, small_k, want_two = _tpu_vmem_plan()
    if small_k:
        tc = 256 if Cin_p % 256 == 0 else LANE
    else:
        tc = 512 if Cin_p % 512 == 0 else (256 if Cin_p % 256 == 0 else LANE)

    th = _pick_row_chunk(H, wp, tc, Cout_p, Ncls_p, budget)
    n_chunks = -(-H // th)
    if want_two and N * n_chunks < 2 and H >= 2:
        # keep >= 2 iterations on the parallel G axis so both v7x TensorCores get work
        n_chunks = 2
        th = -(-H // 2)
    Hc = n_chunks * th
    rows_out = th * wp
    P = (th + 3) * wp      # th rows + 2-row conv halo + 1 guard row so tap (2,2) stays in bounds

    # single fused pad pass: bf16 cast, 1px conv halo, bottom rows to Hc+3, right cols to wp,
    # lane-padded channels
    xp = jnp.pad(x_nhwc.astype(jnp.bfloat16),
                 ((0, 0), (1, Hc + 2 - H), (1, wp - 1 - W), (0, Cin_p - Cin)))
    if n_chunks == 1:
        chunks = xp.reshape(N, P, Cin_p)          # free reshape, no extra HBM pass
    else:
        # TODO(synk): overlapping-window stack costs an extra HBM pass; only taken when a
        # full-height row chunk does not fit the per-generation VMEM budget.
        chunks = jnp.stack([xp[:, c * th:c * th + th + 3] for c in range(n_chunks)], axis=1)
        chunks = chunks.reshape(N * n_chunks, P, Cin_p)

    # 3x3 weights: OIHW -> (tap, Cin_p, Cout_p), bf16
    wt = jnp.transpose(w3_oihw, (2, 3, 1, 0)).reshape(9, Cin, Cout)
    wt = jnp.pad(wt, ((0, 0), (0, Cin_p - Cin), (0, Cout_p - Cout))).astype(jnp.bfloat16)
    sc = jnp.pad(scale.astype(jnp.float32), (0, Cout_p - Cout),
                 constant_values=1.0).reshape(1, Cout_p)
    sh = jnp.pad(shift.astype(jnp.float32), (0, Cout_p - Cout)).reshape(1, Cout_p)
    # 1x1 classifier: (ncls, Cout, 1, 1) -> (Cout_p, Ncls_p) bf16 + masked f32 bias
    wc = jnp.pad(w1.reshape(ncls, Cout).T,
                 ((0, Cout_p - Cout), (0, Ncls_p - ncls))).astype(jnp.bfloat16)
    bc = jnp.pad(b1.astype(jnp.float32), (0, Ncls_p - ncls),
                 constant_values=_NEG_BIG).reshape(1, Ncls_p)

    G = N * n_chunks
    grid = (G, Cin_p // tc)                       # rows (parallel) x in-ch (reduce, last)

    out = pl.pallas_call(
        functools.partial(_conv3x3_cls_kernel, wp=wp, rows_out=rows_out, relu=relu),
        out_shape=jax.ShapeDtypeStruct((G, rows_out, Ncls_p), out_dtype),
        grid_spec=pltpu.PrefetchScalarGridSpec(
            num_scalar_prefetch=0,
            grid=grid,
            in_specs=[
                pl.BlockSpec((None, P, tc), lambda g, k: (g, 0, k)),
                pl.BlockSpec((9, tc, Cout_p), lambda g, k: (0, k, 0)),
                pl.BlockSpec((1, Cout_p), lambda g, k: (0, 0)),
                pl.BlockSpec((1, Cout_p), lambda g, k: (0, 0)),
                pl.BlockSpec((Cout_p, Ncls_p), lambda g, k: (0, 0)),
                pl.BlockSpec((1, Ncls_p), lambda g, k: (0, 0)),
            ],
            out_specs=pl.BlockSpec((None, rows_out, Ncls_p), lambda g, k: (g, 0, 0)),
            scratch_shapes=[pltpu.VMEM((rows_out, Cout_p), jnp.float32)],
        ),
        compiler_params=pltpu.CompilerParams(
            dimension_semantics=("parallel", "arbitrary"),
            vmem_limit_bytes=vmem_limit),
    )(chunks, wt, sc, sh, wc, bc)

    meta = dict(N=N, H=H, W=W, n_chunks=n_chunks, th=th, wp=wp)
    return out, meta


def crop_wide(y, meta, channels):
    """(N*n_chunks, th*wp, C_pad) -> (N, H, W, channels): drop junk cols / rows / lanes."""
    N, H, W = meta["N"], meta["H"], meta["W"]
    n_chunks, th, wp = meta["n_chunks"], meta["th"], meta["wp"]
    y = y.reshape(N, n_chunks, th, wp, -1)[:, :, :, :W, :channels]
    y = y.reshape(N, n_chunks * th, W, channels)[:, :H]
    return y


# ------------------------------------------------------------------------------- glue

def bn_fold(gamma, beta, mean, var, eps=1e-5):
    scale = gamma / jnp.sqrt(var + eps)
    shift = beta - mean * scale
    return scale, shift


def adaptive_pool_matrix(out_size, in_size):
    """Exact torch AdaptiveAvgPool1d operator matrix (out_size, in_size)."""
    P = np.zeros((out_size, in_size), np.float32)
    for i in range(out_size):
        start = (i * in_size) // out_size
        end = -((-(i + 1) * in_size) // out_size)
        P[i, start:end] = 1.0 / (end - start)
    return P


def bilinear_matrix(out_size, in_size):
    """Exact torch bilinear (align_corners=False) 1-D interp matrix (out_size, in_size)."""
    o = np.arange(out_size, dtype=np.float64)
    scale = in_size / out_size
    src = np.maximum((o + 0.5) * scale - 0.5, 0.0)
    x0 = np.minimum(np.floor(src).astype(np.int64), in_size - 1)
    x1 = np.minimum(x0 + 1, in_size - 1)
    lam = src - x0
    W = np.zeros((out_size, in_size), np.float64)
    W[np.arange(out_size), x0] += (1.0 - lam)
    W[np.arange(out_size), x1] += lam
    return W.astype(np.float32)


# --------------------------------------------------------------------------- parameters

def init_params(key, fc_dim, num_class, pool_scales):
    ks = iter(jax.random.split(key, 64))

    def nrm(shape, std):
        return (jax.random.normal(next(ks), shape, jnp.float32) * std).astype(jnp.float32)

    def bn(c):
        gamma = 1.0 + nrm((c,), 0.1)
        beta = nrm((c,), 0.1)
        mean = nrm((c,), 0.1)
        var = jax.random.uniform(next(ks), (c,), jnp.float32, 0.5, 1.5)
        return (gamma, beta, mean, var)

    p = {}
    p["ppm_conv_w"] = [nrm((PPM_DIM, fc_dim, 1, 1), 1.0 / np.sqrt(fc_dim)) for _ in pool_scales]
    p["ppm_bn"] = [bn(PPM_DIM) for _ in pool_scales]
    c_cat = fc_dim + len(pool_scales) * PPM_DIM
    p["last_conv3_w"] = nrm((PPM_DIM, c_cat, 3, 3), 1.0 / np.sqrt(9 * c_cat))
    p["last_bn"] = bn(PPM_DIM)
    p["last_conv1_w"] = nrm((num_class, PPM_DIM, 1, 1), 1.0 / np.sqrt(PPM_DIM))
    p["last_conv1_b"] = nrm((num_class,), 0.1)
    p["deepsup_conv3_w"] = nrm((fc_dim // 4, fc_dim // 2, 3, 3), 1.0 / np.sqrt(9 * fc_dim // 2))
    p["deepsup_bn"] = bn(fc_dim // 4)
    p["deepsup_conv1_w"] = nrm((num_class, fc_dim // 4, 1, 1), 1.0 / np.sqrt(fc_dim // 4))
    p["deepsup_conv1_b"] = nrm((num_class,), 0.1)
    return p


# ------------------------------------------------------------------------------ forward

def _ppm_concat(params, conv5_nchw, pool_scales):
    """PPM branches (tiny: <= 36 spatial positions) as separable XLA einsums; concat NHWC."""
    N, C5, H, W = conv5_nchw.shape
    x5 = jnp.transpose(conv5_nchw, (0, 2, 3, 1)).astype(jnp.float32)   # NHWC
    feats = [x5.astype(jnp.bfloat16)]
    for idx, s in enumerate(pool_scales):
        Ph = jnp.asarray(adaptive_pool_matrix(s, H))
        Pw = jnp.asarray(adaptive_pool_matrix(s, W))
        pooled = jnp.einsum("ah,bw,nhwc->nabc", Ph, Pw, x5)            # adaptive avg pool
        wmat = params["ppm_conv_w"][idx].reshape(PPM_DIM, C5).T
        scale, shift = bn_fold(*params["ppm_bn"][idx])
        feat = jnp.maximum(jnp.einsum("nabc,cd->nabd", pooled, wmat) * scale + shift, 0.0)
        Uh = jnp.asarray(bilinear_matrix(H, s))
        Uw = jnp.asarray(bilinear_matrix(W, s))
        up = jnp.einsum("Ha,Wb,nabd->nHWd", Uh, Uw, feat)              # bilinear upsample
        feats.append(up.astype(jnp.bfloat16))
    return jnp.concatenate(feats, axis=-1)                             # (N, H, W, C5 + 4*512)


def ppm_deepsup_forward(params, conv4_nchw, conv5_nchw, pool_scales=(1, 2, 3, 6)):
    """use_softmax=False path: returns (log_softmax(x), log_softmax(deepsup)) in NCHW."""
    num_class = params["last_conv1_w"].shape[0]
    ppm_cat = _ppm_concat(params, conv5_nchw, pool_scales)

    # conv_last head: fused 3x3 conv + BN + ReLU + (Dropout2d identity) + 1x1 + bias + log_softmax
    scale, shift = bn_fold(*params["last_bn"])
    x_wide, meta1 = conv3x3_bn_relu_cls_logsoftmax(
        ppm_cat, params["last_conv3_w"], scale, shift,
        params["last_conv1_w"], params["last_conv1_b"])
    # NCHW transpose kept for parity with the PyTorch module's output layout.
    x_log = crop_wide(x_wide, meta1, num_class).transpose(0, 3, 1, 2)

    # deep supervision head on conv4 (dropout_deepsup: identity at inference)
    x4 = jnp.transpose(conv4_nchw, (0, 2, 3, 1))
    scale, shift = bn_fold(*params["deepsup_bn"])
    d_wide, meta2 = conv3x3_bn_relu_cls_logsoftmax(
        x4, params["deepsup_conv3_w"], scale, shift,
        params["deepsup_conv1_w"], params["deepsup_conv1_b"])
    d_log = crop_wide(d_wide, meta2, num_class).transpose(0, 3, 1, 2)

    return x_log, d_log


def ppm_deepsup_reference(params, conv4_nchw, conv5_nchw, pool_scales=(1, 2, 3, 6)):
    """Pure-JAX f32 reference (XLA convs) consuming the same bf16-rounded activations."""
    num_class = params["last_conv1_w"].shape[0]
    cat = _ppm_concat(params, conv5_nchw, pool_scales).astype(jnp.float32)

    def head(x, w3, bn_p, w1, b1):
        scale, shift = bn_fold(*bn_p)
        y = jax.lax.conv_general_dilated(
            x, jnp.transpose(w3, (2, 3, 1, 0)), (1, 1), "SAME",
            dimension_numbers=("NHWC", "HWIO", "NHWC"))
        y = jnp.maximum(y * scale + shift, 0.0)
        logits = jnp.einsum("nhwc,kc->nhwk", y, w1.reshape(w1.shape[0], -1)) + b1
        return jax.nn.log_softmax(logits, axis=-1).transpose(0, 3, 1, 2)

    x_log = head(cat, params["last_conv3_w"], params["last_bn"],
                 params["last_conv1_w"], params["last_conv1_b"])
    x4 = jnp.transpose(conv4_nchw, (0, 2, 3, 1)).astype(jnp.bfloat16).astype(jnp.float32)
    d_log = head(x4, params["deepsup_conv3_w"], params["deepsup_bn"],
                 params["deepsup_conv1_w"], params["deepsup_conv1_b"])
    return x_log, d_log


# --------------------------------------------------------------------------------- main

if __name__ == "__main__":
    fc_dim = 64
    num_class = 16
    pool_scales = (1, 2, 3, 6)
    N, H, W = 2, 8, 8

    key = jax.random.PRNGKey(0)
    k_params, k_c5, k_c4 = jax.random.split(key, 3)
    params = init_params(k_params, fc_dim, num_class, pool_scales)

    conv5 = jax.random.normal(k_c5, (N, fc_dim, H, W), jnp.float32)       # NCHW
    conv4 = jax.random.normal(k_c4, (N, fc_dim // 2, H, W), jnp.float32)  # NCHW

    fwd = jax.jit(functools.partial(ppm_deepsup_forward, pool_scales=pool_scales))
    x_log, d_log = fwd(params, conv4, conv5)
    jax.block_until_ready((x_log, d_log))

    # structural sanity: log_softmax over the class axis must exponentiate to a distribution
    assert x_log.shape == (N, num_class, H, W) and d_log.shape == (N, num_class, H, W)
    s1 = np.asarray(jnp.sum(jnp.exp(x_log), axis=1))
    s2 = np.asarray(jnp.sum(jnp.exp(d_log), axis=1))
    assert np.allclose(s1, 1.0, atol=1e-4) and np.allclose(s2, 1.0, atol=1e-4)
    assert np.all(np.isfinite(np.asarray(x_log))) and np.all(np.isfinite(np.asarray(d_log)))

    # numerical sanity vs a pure-JAX f32 reference (bf16 matmul drift -> compare probabilities)
    ref = jax.jit(functools.partial(ppm_deepsup_reference, pool_scales=pool_scales))
    x_ref, d_ref = ref(params, conv4, conv5)
    jax.block_until_ready((x_ref, d_ref))
    np.testing.assert_allclose(np.exp(np.asarray(x_log)), np.exp(np.asarray(x_ref)), atol=5e-2)
    np.testing.assert_allclose(np.exp(np.asarray(d_log)), np.exp(np.asarray(d_ref)), atol=5e-2)

    print("KERNEL_OK")
</pallas_src>

<mosaic_0001>
module attributes {stable_mosaic.version = 11 : i64} {
  func.func @_conv3x3_cls_kernel(%arg0: i32, %arg1: i32, %arg2: memref<1x176x128xbf16, #tpu.memory_space<vmem>>, %arg3: memref<9x128x512xbf16, #tpu.memory_space<vmem>>, %arg4: memref<1x512xf32, #tpu.memory_space<vmem>>, %arg5: memref<1x512xf32, #tpu.memory_space<vmem>>, %arg6: memref<512x128xbf16, #tpu.memory_space<vmem>>, %arg7: memref<1x128xf32, #tpu.memory_space<vmem>>, %arg8: memref<1x128x128xf32, #tpu.memory_space<vmem>>, %arg9: memref<128x512xf32, #tpu.memory_space<vmem>>) attributes {dimension_semantics = [#tpu.dimension_semantics<parallel>, #tpu.dimension_semantics<arbitrary>], iteration_bounds = array<i64: 2, 17>, scalar_prefetch = 0 : i64, scratch_operands = 1 : i64, tpu.core_type = #tpu.core_type<tc>, window_params = [{transform_indices = @transform_0, window_bounds = array<i64: 1, 176, 128>}, {transform_indices = @transform_1, window_bounds = array<i64: 9, 128, 512>}, {pipeline_mode = #tpu.pipeline_mode<synchronous>, transform_indices = @transform_2, window_bounds = array<i64: 1, 512>}, {pipeline_mode = #tpu.pipeline_mode<synchronous>, transform_indices = @transform_3, window_bounds = array<i64: 1, 512>}, {pipeline_mode = #tpu.pipeline_mode<synchronous>, transform_indices = @transform_4, window_bounds = array<i64: 512, 128>}, {pipeline_mode = #tpu.pipeline_mode<synchronous>, transform_indices = @transform_5, window_bounds = array<i64: 1, 128>}, {transform_indices = @transform_6, window_bounds = array<i64: 1, 128, 128>}]} {
    %c0_i32 = arith.constant 0 : i32
    %0 = arith.cmpi eq, %arg1, %c0_i32 : i32
    %1 = arith.extui %0 : i1 to i32
    %c0_i32_0 = arith.constant 0 : i32
    %2 = arith.cmpi ne, %1, %c0_i32_0 : i32
    scf.if %2 {
      %cst_53 = arith.constant 0.000000e+00 : f32
      %64 = vector.broadcast %cst_53 : f32 to vector<128x512xf32>
      %c0_54 = arith.constant 0 : index
      %c0_55 = arith.constant 0 : index
      %65 = vector.load %arg9[%c0_54, %c0_55] : memref<128x512xf32, #tpu.memory_space<vmem>>, vector<128x512xf32>
      tpu.vector_store %arg9[%c0_54, %c0_55], %64 {strides = array<i32>} : memref<128x512xf32, #tpu.memory_space<vmem>>, vector<128x512xf32>,
    } else {
    }
    %c0 = arith.constant 0 : index
    %c0_1 = arith.constant 0 : index
    %3 = vector.load %arg9[%c0, %c0_1] : memref<128x512xf32, #tpu.memory_space<vmem>>, vector<128x512xf32>
    %c0_2 = arith.constant 0 : index
    %c0_3 = arith.constant 0 : index
    %c0_4 = arith.constant 0 : index
    %4 = vector.load %arg2[%c0_2, %c0_3, %c0_4] : memref<1x176x128xbf16, #tpu.memory_space<vmem>>, vector<1x128x128xbf16>
    %5 = vector.shape_cast %4 : vector<1x128x128xbf16> to vector<128x128xbf16>
    %c0_5 = arith.constant 0 : index
    %c0_6 = arith.constant 0 : index
    %c0_7 = arith.constant 0 : index
    %6 = vector.load %arg3[%c0_5, %c0_6, %c0_7] : memref<9x128x512xbf16, #tpu.memory_space<vmem>>, vector<1x128x512xbf16>
    %7 = vector.shape_cast %6 : vector<1x128x512xbf16> to vector<128x512xbf16>
    %cst = arith.constant dense<0.000000e+00> : vector<128x512xf32>
    %8 = tpu.matmul %5, %7, %cst {dimension_numbers = #tpu.dot_dimension_numbers<[1], [0], [0], [1], [0, 0, 1, 1], [], []>} : vector<128x128xbf16>, vector<128x512xbf16>, vector<128x512xf32> -> vector<128x512xf32>
    %9 = arith.addf %3, %8 : vector<128x512xf32>
    %c0_8 = arith.constant 0 : index
    %c1 = arith.constant 1 : index
    %c0_9 = arith.constant 0 : index
    %10 = vector.load %arg2[%c0_8, %c1, %c0_9] : memref<1x176x128xbf16, #tpu.memory_space<vmem>>, vector<1x128x128xbf16>
    %11 = vector.shape_cast %10 : vector<1x128x128xbf16> to vector<128x128xbf16>
    %c1_10 = arith.constant 1 : index
    %c0_11 = arith.constant 0 : index
    %c0_12 = arith.constant 0 : index
    %12 = vector.load %arg3[%c1_10, %c0_11, %c0_12] : memref<9x128x512xbf16, #tpu.memory_space<vmem>>, vector<1x128x512xbf16>
    %13 = vector.shape_cast %12 : vector<1x128x512xbf16> to vector<128x512xbf16>
    %cst_13 = arith.constant dense<0.000000e+00> : vector<128x512xf32>
    %14 = tpu.matmul %11, %13, %cst_13 {dimension_numbers = #tpu.dot_dimension_numbers<[1], [0], [0], [1], [0, 0, 1, 1], [], []>} : vector<128x128xbf16>, vector<128x512xbf16>, vector<128x512xf32> -> vector<128x512xf32>
    %15 = arith.addf %9, %14 : vector<128x512xf32>
    %c0_14 = arith.constant 0 : index
    %c2 = arith.constant 2 : index
    %c0_15 = arith.constant 0 : index
    %16 = vector.load %arg2[%c0_14, %c2, %c0_15] : memref<1x176x128xbf16, #tpu.memory_space<vmem>>, vector<1x128x128xbf16>
    %17 = vector.shape_cast %16 : vector<1x128x128xbf16> to vector<128x128xbf16>
    %c2_16 = arith.constant 2 : index
    %c0_17 = arith.constant 0 : index
    %c0_18 = arith.constant 0 : index
    %18 = vector.load %arg3[%c2_16, %c0_17, %c0_18] : memref<9x128x512xbf16, #tpu.memory_space<vmem>>, vector<1x128x512xbf16>
    %19 = vector.shape_cast %18 : vector<1x128x512xbf16> to vector<128x512xbf16>
    %cst_19 = arith.constant dense<0.000000e+00> : vector<128x512xf32>
    %20 = tpu.matmul %17, %19, %cst_19 {dimension_numbers = #tpu.dot_dimension_numbers<[1], [0], [0], [1], [0, 0, 1, 1], [], []>} : vector<128x128xbf16>, vector<128x512xbf16>, vector<128x512xf32> -> vector<128x512xf32>
    %21 = arith.addf %15, %20 : vector<128x512xf32>
    %c0_20 = arith.constant 0 : index
    %c16 = arith.constant 16 : index
    %c0_21 = arith.constant 0 : index
    %22 = vector.load %arg2[%c0_20, %c16, %c0_21] : memref<1x176x128xbf16, #tpu.memory_space<vmem>>, vector<1x128x128xbf16>
    %23 = vector.shape_cast %22 : vector<1x128x128xbf16> to vector<128x128xbf16>
    %c3 = arith.constant 3 : index
    %c0_22 = arith.constant 0 : index
    %c0_23 = arith.constant 0 : index
    %24 = vector.load %arg3[%c3, %c0_22, %c0_23] : memref<9x128x512xbf16, #tpu.memory_space<vmem>>, vector<1x128x512xbf16>
    %25 = vector.shape_cast %24 : vector<1x128x512xbf16> to vector<128x512xbf16>
    %cst_24 = arith.constant dense<0.000000e+00> : vector<128x512xf32>
    %26 = tpu.matmul %23, %25, %cst_24 {dimension_numbers = #tpu.dot_dimension_numbers<[1], [0], [0], [1], [0, 0, 1, 1], [], []>} : vector<128x128xbf16>, vector<128x512xbf16>, vector<128x512xf32> -> vector<128x512xf32>
    %27 = arith.addf %21, %26 : vector<128x512xf32>
    %c0_25 = arith.constant 0 : index
    %c17 = arith.constant 17 : index
    %c0_26 = arith.constant 0 : index
    %28 = vector.load %arg2[%c0_25, %c17, %c0_26] : memref<1x176x128xbf16, #tpu.memory_space<vmem>>, vector<1x128x128xbf16>
    %29 = vector.shape_cast %28 : vector<1x128x128xbf16> to vector<128x128xbf16>
    %c4 = arith.constant 4 : index
    %c0_27 = arith.constant 0 : index
    %c0_28 = arith.constant 0 : index
    %30 = vector.load %arg3[%c4, %c0_27, %c0_28] : memref<9x128x512xbf16, #tpu.memory_space<vmem>>, vector<1x128x512xbf16>
    %31 = vector.shape_cast %30 : vector<1x128x512xbf16> to vector<128x512xbf16>
    %cst_29 = arith.constant dense<0.000000e+00> : vector<128x512xf32>
    %32 = tpu.matmul %29, %31, %cst_29 {dimension_numbers = #tpu.dot_dimension_numbers<[1], [0], [0], [1], [0, 0, 1, 1], [], []>} : vector<128x128xbf16>, vector<128x512xbf16>, vector<128x512xf32> -> vector<128x512xf32>
    %33 = arith.addf %27, %32 : vector<128x512xf32>
    %c0_30 = arith.constant 0 : index
    %c18 = arith.constant 18 : index
    %c0_31 = arith.constant 0 : index
    %34 = vector.load %arg2[%c0_30, %c18, %c0_31] : memref<1x176x128xbf16, #tpu.memory_space<vmem>>, vector<1x128x128xbf16>
    %35 = vector.shape_cast %34 : vector<1x128x128xbf16> to vector<128x128xbf16>
    %c5 = arith.constant 5 : index
    %c0_32 = arith.constant 0 : index
    %c0_33 = arith.constant 0 : index
    %36 = vector.load %arg3[%c5, %c0_32, %c0_33] : memref<9x128x512xbf16, #tpu.memory_space<vmem>>, vector<1x128x512xbf16>
    %37 = vector.shape_cast %36 : vector<1x128x512xbf16> to vector<128x512xbf16>
    %cst_34 = arith.constant dense<0.000000e+00> : vector<128x512xf32>
    %38 = tpu.matmul %35, %37, %cst_34 {dimension_numbers = #tpu.dot_dimension_numbers<[1], [0], [0], [1], [0, 0, 1, 1], [], []>} : vector<128x128xbf16>, vector<128x512xbf16>, vector<128x512xf32> -> vector<128x512xf32>
    %39 = arith.addf %33, %38 : vector<128x512xf32>
    %c0_35 = arith.constant 0 : index
    %c32 = arith.constant 32 : index
    %c0_36 = arith.constant 0 : index
    %40 = vector.load %arg2[%c0_35, %c32, %c0_36] : memref<1x176x128xbf16, #tpu.memory_space<vmem>>, vector<1x128x128xbf16>
    %41 = vector.shape_cast %40 : vector<1x128x128xbf16> to vector<128x128xbf16>
    %c6 = arith.constant 6 : index
    %c0_37 = arith.constant 0 : index
    %c0_38 = arith.constant 0 : index
    %42 = vector.load %arg3[%c6, %c0_37, %c0_38] : memref<9x128x512xbf16, #tpu.memory_space<vmem>>, vector<1x128x512xbf16>
    %43 = vector.shape_cast %42 : vector<1x128x512xbf16> to vector<128x512xbf16>
    %cst_39 = arith.constant dense<0.000000e+00> : vector<128x512xf32>
    %44 = tpu.matmul %41, %43, %cst_39 {dimension_numbers = #tpu.dot_dimension_numbers<[1], [0], [0], [1], [0, 0, 1, 1], [], []>} : vector<128x128xbf16>, vector<128x512xbf16>, vector<128x512xf32> -> vector<128x512xf32>
    %45 = arith.addf %39, %44 : vector<128x512xf32>
    %c0_40 = arith.constant 0 : index
    %c33 = arith.constant 33 : index
    %c0_41 = arith.constant 0 : index
    %46 = vector.load %arg2[%c0_40, %c33, %c0_41] : memref<1x176x128xbf16, #tpu.memory_space<vmem>>, vector<1x128x128xbf16>
    %47 = vector.shape_cast %46 : vector<1x128x128xbf16> to vector<128x128xbf16>
    %c7 = arith.constant 7 : index
    %c0_42 = arith.constant 0 : index
    %c0_43 = arith.constant 0 : index
    %48 = vector.load %arg3[%c7, %c0_42, %c0_43] : memref<9x128x512xbf16, #tpu.memory_space<vmem>>, vector<1x128x512xbf16>
    %49 = vector.shape_cast %48 : vector<1x128x512xbf16> to vector<128x512xbf16>
    %cst_44 = arith.constant dense<0.000000e+00> : vector<128x512xf32>
    %50 = tpu.matmul %47, %49, %cst_44 {dimension_numbers = #tpu.dot_dimension_numbers<[1], [0], [0], [1], [0, 0, 1, 1], [], []>} : vector<128x128xbf16>, vector<128x512xbf16>, vector<128x512xf32> -> vector<128x512xf32>
    %51 = arith.addf %45, %50 : vector<128x512xf32>
    %c0_45 = arith.constant 0 : index
    %c34 = arith.constant 34 : index
    %c0_46 = arith.constant 0 : index
    %52 = vector.load %arg2[%c0_45, %c34, %c0_46] : memref<1x176x128xbf16, #tpu.memory_space<vmem>>, vector<1x128x128xbf16>
    %53 = vector.shape_cast %52 : vector<1x128x128xbf16> to vector<128x128xbf16>
    %c8 = arith.constant 8 : index
    %c0_47 = arith.constant 0 : index
    %c0_48 = arith.constant 0 : index
    %54 = vector.load %arg3[%c8, %c0_47, %c0_48] : memref<9x128x512xbf16, #tpu.memory_space<vmem>>, vector<1x128x512xbf16>
    %55 = vector.shape_cast %54 : vector<1x128x512xbf16> to vector<128x512xbf16>
    %cst_49 = arith.constant dense<0.000000e+00> : vector<128x512xf32>
    %56 = tpu.matmul %53, %55, %cst_49 {dimension_numbers = #tpu.dot_dimension_numbers<[1], [0], [0], [1], [0, 0, 1, 1], [], []>} : vector<128x128xbf16>, vector<128x512xbf16>, vector<128x512xf32> -> vector<128x512xf32>
    %57 = arith.addf %51, %56 : vector<128x512xf32>
    %c16_i32 = arith.constant 16 : i32
    %58 = arith.cmpi slt, %arg1, %c16_i32 : i32
    %59 = arith.extui %58 : i1 to i32
    %c0_i32_50 = arith.constant 0 : i32
    %60 = arith.cmpi ne, %59, %c0_i32_50 : i32
    scf.if %60 {
      %c0_53 = arith.constant 0 : index
      %c0_54 = arith.constant 0 : index
      %64 = vector.load %arg9[%c0_53, %c0_54] : memref<128x512xf32, #tpu.memory_space<vmem>>, vector<128x512xf32>
      tpu.vector_store %arg9[%c0_53, %c0_54], %57 {strides = array<i32>} : memref<128x512xf32, #tpu.memory_space<vmem>>, vector<128x512xf32>,
    } else {
    }
    %c16_i32_51 = arith.constant 16 : i32
    %61 = arith.cmpi eq, %arg1, %c16_i32_51 : i32
    %62 = arith.extui %61 : i1 to i32
    %c0_i32_52 = arith.constant 0 : i32
    %63 = arith.cmpi ne, %62, %c0_i32_52 : i32
    scf.if %63 {
      %c0_53 = arith.constant 0 : index
      %c0_54 = arith.constant 0 : index
      %64 = vector.load %arg4[%c0_53, %c0_54] : memref<1x512xf32, #tpu.memory_space<vmem>>, vector<1x512xf32>
      %65 = vector.broadcast %64 : vector<1x512xf32> to vector<128x512xf32>
      %66 = arith.mulf %57, %65 : vector<128x512xf32>
      %c0_55 = arith.constant 0 : index
      %c0_56 = arith.constant 0 : index
      %67 = vector.load %arg5[%c0_55, %c0_56] : memref<1x512xf32, #tpu.memory_space<vmem>>, vector<1x512xf32>
      %68 = vector.broadcast %67 : vector<1x512xf32> to vector<128x512xf32>
      %69 = arith.addf %66, %68 : vector<128x512xf32>
      %cst_57 = arith.constant 0.000000e+00 : f32
      %70 = vector.broadcast %cst_57 : f32 to vector<128x512xf32>
      %71 = arith.maximumf %69, %70 : vector<128x512xf32>
      %72 = arith.truncf %71 : vector<128x512xf32> to vector<128x512xbf16>
      %c0_58 = arith.constant 0 : index
      %c0_59 = arith.constant 0 : index
      %73 = vector.load %arg6[%c0_58, %c0_59] : memref<512x128xbf16, #tpu.memory_space<vmem>>, vector<512x128xbf16>
      %cst_60 = arith.constant dense<0.000000e+00> : vector<128x128xf32>
      %74 = tpu.matmul %72, %73, %cst_60 {dimension_numbers = #tpu.dot_dimension_numbers<[1], [0], [0], [1], [0, 0, 1, 1], [], []>} : vector<128x512xbf16>, vector<512x128xbf16>, vector<128x128xf32> -> vector<128x128xf32>
      %c0_61 = arith.constant 0 : index
      %c0_62 = arith.constant 0 : index
      %75 = vector.load %arg7[%c0_61, %c0_62] : memref<1x128xf32, #tpu.memory_space<vmem>>, vector<1x128xf32>
      %76 = vector.broadcast %75 : vector<1x128xf32> to vector<128x128xf32>
      %77 = arith.addf %74, %76 : vector<128x128xf32>
      %cst_63 = arith.constant dense<0xFF800000> : vector<128xf32>
      %78 = vector.multi_reduction <maximumf>, %77, %cst_63 [1] : vector<128x128xf32> to vector<128xf32>
      %79 = vector.shape_cast %78 : vector<128xf32> to vector<128x1xf32>
      %80 = vector.broadcast %79 : vector<128x1xf32> to vector<128x128xf32>
      %81 = arith.subf %77, %80 : vector<128x128xf32>
      %82 = math.exp %81 : vector<128x128xf32>
      %cst_64 = arith.constant dense<0.000000e+00> : vector<128xf32>
      %83 = vector.multi_reduction <add>, %82, %cst_64 [1] : vector<128x128xf32> to vector<128xf32>
      %84 = vector.shape_cast %83 : vector<128xf32> to vector<128x1xf32>
      %85 = math.log %84 : vector<128x1xf32>
      %86 = vector.broadcast %85 : vector<128x1xf32> to vector<128x128xf32>
      %87 = arith.subf %81, %86 : vector<128x128xf32>
      %c0_65 = arith.constant 0 : index
      %c0_66 = arith.constant 0 : index
      %c0_67 = arith.constant 0 : index
      %88 = vector.load %arg8[%c0_65, %c0_66, %c0_67] : memref<1x128x128xf32, #tpu.memory_space<vmem>>, vector<1x128x128xf32>
      %89 = vector.shape_cast %88 : vector<1x128x128xf32> to vector<128x128xf32>
      %90 = vector.shape_cast %87 : vector<128x128xf32> to vector<1x128x128xf32>
      tpu.vector_store %arg8[%c0_65, %c0_66, %c0_67], %90 {strides = array<i32>} : memref<1x128x128xf32, #tpu.memory_space<vmem>>, vector<1x128x128xf32>,
    } else {
    }
    return
  }
  func.func @transform_0(%arg0: i32, %arg1: i32) -> (i32, i32, i32) {
    %c0_i32 = arith.constant 0 : i32
    %c0_i32_0 = arith.constant 0 : i32
    return %arg0, %c0_i32, %arg1 : i32, i32, i32
  }
  func.func @transform_1(%arg0: i32, %arg1: i32) -> (i32, i32, i32) {
    %c0_i32 = arith.constant 0 : i32
    %c0_i32_0 = arith.constant 0 : i32
    %c0_i32_1 = arith.constant 0 : i32
    return %c0_i32, %arg1, %c0_i32_0 : i32, i32, i32
  }
  func.func @transform_2(%arg0: i32, %arg1: i32) -> (i32, i32) {
    %c0_i32 = arith.constant 0 : i32
    %c0_i32_0 = arith.constant 0 : i32
    %c0_i32_1 = arith.constant 0 : i32
    return %c0_i32, %c0_i32_0 : i32, i32
  }
  func.func @transform_3(%arg0: i32, %arg1: i32) -> (i32, i32) {
    %c0_i32 = arith.constant 0 : i32
    %c0_i32_0 = arith.constant 0 : i32
    %c0_i32_1 = arith.constant 0 : i32
    return %c0_i32, %c0_i32_0 : i32, i32
  }
  func.func @transform_4(%arg0: i32, %arg1: i32) -> (i32, i32) {
    %c0_i32 = arith.constant 0 : i32
    %c0_i32_0 = arith.constant 0 : i32
    %c0_i32_1 = arith.constant 0 : i32
    return %c0_i32, %c0_i32_0 : i32, i32
  }
  func.func @transform_5(%arg0: i32, %arg1: i32) -> (i32, i32) {
    %c0_i32 = arith.constant 0 : i32
    %c0_i32_0 = arith.constant 0 : i32
    %c0_i32_1 = arith.constant 0 : i32
    return %c0_i32, %c0_i32_0 : i32, i32
  }
  func.func @transform_6(%arg0: i32, %arg1: i32) -> (i32, i32, i32) {
    %c0_i32 = arith.constant 0 : i32
    %c0_i32_0 = arith.constant 0 : i32
    %c0_i32_1 = arith.constant 0 : i32
    return %arg0, %c0_i32, %c0_i32_0 : i32, i32, i32
  }
}

module attributes {stable_mosaic.version = 11 : i64} {
  func.func @_conv3x3_cls_kernel(%arg0: i32, %arg1: i32, %arg2: memref<1x176x128xbf16, #tpu.memory_space<vmem>>, %arg3: memref<9x128x128xbf16, #tpu.memory_space<vmem>>, %arg4: memref<1x128xf32, #tpu.memory_space<vmem>>, %arg5: memref<1x128xf32, #tpu.memory_space<vmem>>, %arg6: memref<128x128xbf16, #tpu.memory_space<vmem>>, %arg7: memref<1x128xf32, #tpu.memory_space<vmem>>, %arg8: memref<1x128x128xf32, #tpu.memory_space<vmem>>, %arg9: memref<128x128xf32, #tpu.memory_space<vmem>>) attributes {dimension_semantics = [#tpu.dimension_semantics<parallel>, #tpu.dimension_semantics<arbitrary>], iteration_bounds = array<i64: 2, 1>, scalar_prefetch = 0 : i64, scratch_operands = 1 : i64, tpu.core_type = #tpu.core_type<tc>, window_params = [{transform_indices = @transform_0, window_bounds = array<i64: 1, 176, 128>}, {transform_indices = @transform_1, window_bounds = array<i64: 9, 128, 128>}, {pipeline_mode = #tpu.pipeline_mode<synchronous>, transform_indices = @transform_2, window_bounds = array<i64: 1, 128>}, {pipeline_mode = #tpu.pipeline_mode<synchronous>, transform_indices = @transform_3, window_bounds = array<i64: 1, 128>}, {pipeline_mode = #tpu.pipeline_mode<synchronous>, transform_indices = @transform_4, window_bounds = array<i64: 128, 128>}, {pipeline_mode = #tpu.pipeline_mode<synchronous>, transform_indices = @transform_5, window_bounds = array<i64: 1, 128>}, {transform_indices = @transform_6, window_bounds = array<i64: 1, 128, 128>}]} {
    %c0_i32 = arith.constant 0 : i32
    %0 = arith.cmpi eq, %arg1, %c0_i32 : i32
    %1 = arith.extui %0 : i1 to i32
    %c0_i32_0 = arith.constant 0 : i32
    %2 = arith.cmpi ne, %1, %c0_i32_0 : i32
    scf.if %2 {
      %cst_54 = arith.constant 0.000000e+00 : f32
      %64 = vector.broadcast %cst_54 : f32 to vector<128x128xf32>
      %c0_55 = arith.constant 0 : index
      %c0_56 = arith.constant 0 : index
      %65 = vector.load %arg9[%c0_55, %c0_56] : memref<128x128xf32, #tpu.memory_space<vmem>>, vector<128x128xf32>
      tpu.vector_store %arg9[%c0_55, %c0_56], %64 {strides = array<i32>} : memref<128x128xf32, #tpu.memory_space<vmem>>, vector<128x128xf32>,
    } else {
    }
    %c0 = arith.constant 0 : index
    %c0_1 = arith.constant 0 : index
    %3 = vector.load %arg9[%c0, %c0_1] : memref<128x128xf32, #tpu.memory_space<vmem>>, vector<128x128xf32>
    %c0_2 = arith.constant 0 : index
    %c0_3 = arith.constant 0 : index
    %c0_4 = arith.constant 0 : index
    %4 = vector.load %arg2[%c0_2, %c0_3, %c0_4] : memref<1x176x128xbf16, #tpu.memory_space<vmem>>, vector<1x128x128xbf16>
    %5 = vector.shape_cast %4 : vector<1x128x128xbf16> to vector<128x128xbf16>
    %c0_5 = arith.constant 0 : index
    %c0_6 = arith.constant 0 : index
    %c0_7 = arith.constant 0 : index
    %6 = vector.load %arg3[%c0_5, %c0_6, %c0_7] : memref<9x128x128xbf16, #tpu.memory_space<vmem>>, vector<1x128x128xbf16>
    %7 = vector.shape_cast %6 : vector<1x128x128xbf16> to vector<128x128xbf16>
    %cst = arith.constant dense<0.000000e+00> : vector<128x128xf32>
    %8 = tpu.matmul %5, %7, %cst {dimension_numbers = #tpu.dot_dimension_numbers<[1], [0], [0], [1], [0, 0, 1, 1], [], []>} : vector<128x128xbf16>, vector<128x128xbf16>, vector<128x128xf32> -> vector<128x128xf32>
    %9 = arith.addf %3, %8 : vector<128x128xf32>
    %c0_8 = arith.constant 0 : index
    %c1 = arith.constant 1 : index
    %c0_9 = arith.constant 0 : index
    %10 = vector.load %arg2[%c0_8, %c1, %c0_9] : memref<1x176x128xbf16, #tpu.memory_space<vmem>>, vector<1x128x128xbf16>
    %11 = vector.shape_cast %10 : vector<1x128x128xbf16> to vector<128x128xbf16>
    %c1_10 = arith.constant 1 : index
    %c0_11 = arith.constant 0 : index
    %c0_12 = arith.constant 0 : index
    %12 = vector.load %arg3[%c1_10, %c0_11, %c0_12] : memref<9x128x128xbf16, #tpu.memory_space<vmem>>, vector<1x128x128xbf16>
    %13 = vector.shape_cast %12 : vector<1x128x128xbf16> to vector<128x128xbf16>
    %cst_13 = arith.constant dense<0.000000e+00> : vector<128x128xf32>
    %14 = tpu.matmul %11, %13, %cst_13 {dimension_numbers = #tpu.dot_dimension_numbers<[1], [0], [0], [1], [0, 0, 1, 1], [], []>} : vector<128x128xbf16>, vector<128x128xbf16>, vector<128x128xf32> -> vector<128x128xf32>
    %15 = arith.addf %9, %14 : vector<128x128xf32>
    %c0_14 = arith.constant 0 : index
    %c2 = arith.constant 2 : index
    %c0_15 = arith.constant 0 : index
    %16 = vector.load %arg2[%c0_14, %c2, %c0_15] : memref<1x176x128xbf16, #tpu.memory_space<vmem>>, vector<1x128x128xbf16>
    %17 = vector.shape_cast %16 : vector<1x128x128xbf16> to vector<128x128xbf16>
    %c2_16 = arith.constant 2 : index
    %c0_17 = arith.constant 0 : index
    %c0_18 = arith.constant 0 : index
    %18 = vector.load %arg3[%c2_16, %c0_17, %c0_18] : memref<9x128x128xbf16, #tpu.memory_space<vmem>>, vector<1x128x128xbf16>
    %19 = vector.shape_cast %18 : vector<1x128x128xbf16> to vector<128x128xbf16>
    %cst_19 = arith.constant dense<0.000000e+00> : vector<128x128xf32>
    %20 = tpu.matmul %17, %19, %cst_19 {dimension_numbers = #tpu.dot_dimension_numbers<[1], [0], [0], [1], [0, 0, 1, 1], [], []>} : vector<128x128xbf16>, vector<128x128xbf16>, vector<128x128xf32> -> vector<128x128xf32>
    %21 = arith.addf %15, %20 : vector<128x128xf32>
    %c0_20 = arith.constant 0 : index
    %c16 = arith.constant 16 : index
    %c0_21 = arith.constant 0 : index
    %22 = vector.load %arg2[%c0_20, %c16, %c0_21] : memref<1x176x128xbf16, #tpu.memory_space<vmem>>, vector<1x128x128xbf16>
    %23 = vector.shape_cast %22 : vector<1x128x128xbf16> to vector<128x128xbf16>
    %c3 = arith.constant 3 : index
    %c0_22 = arith.constant 0 : index
    %c0_23 = arith.constant 0 : index
    %24 = vector.load %arg3[%c3, %c0_22, %c0_23] : memref<9x128x128xbf16, #tpu.memory_space<vmem>>, vector<1x128x128xbf16>
    %25 = vector.shape_cast %24 : vector<1x128x128xbf16> to vector<128x128xbf16>
    %cst_24 = arith.constant dense<0.000000e+00> : vector<128x128xf32>
    %26 = tpu.matmul %23, %25, %cst_24 {dimension_numbers = #tpu.dot_dimension_numbers<[1], [0], [0], [1], [0, 0, 1, 1], [], []>} : vector<128x128xbf16>, vector<128x128xbf16>, vector<128x128xf32> -> vector<128x128xf32>
    %27 = arith.addf %21, %26 : vector<128x128xf32>
    %c0_25 = arith.constant 0 : index
    %c17 = arith.constant 17 : index
    %c0_26 = arith.constant 0 : index
    %28 = vector.load %arg2[%c0_25, %c17, %c0_26] : memref<1x176x128xbf16, #tpu.memory_space<vmem>>, vector<1x128x128xbf16>
    %29 = vector.shape_cast %28 : vector<1x128x128xbf16> to vector<128x128xbf16>
    %c4 = arith.constant 4 : index
    %c0_27 = arith.constant 0 : index
    %c0_28 = arith.constant 0 : index
    %30 = vector.load %arg3[%c4, %c0_27, %c0_28] : memref<9x128x128xbf16, #tpu.memory_space<vmem>>, vector<1x128x128xbf16>
    %31 = vector.shape_cast %30 : vector<1x128x128xbf16> to vector<128x128xbf16>
    %cst_29 = arith.constant dense<0.000000e+00> : vector<128x128xf32>
    %32 = tpu.matmul %29, %31, %cst_29 {dimension_numbers = #tpu.dot_dimension_numbers<[1], [0], [0], [1], [0, 0, 1, 1], [], []>} : vector<128x128xbf16>, vector<128x128xbf16>, vector<128x128xf32> -> vector<128x128xf32>
    %33 = arith.addf %27, %32 : vector<128x128xf32>
    %c0_30 = arith.constant 0 : index
    %c18 = arith.constant 18 : index
    %c0_31 = arith.constant 0 : index
    %34 = vector.load %arg2[%c0_30, %c18, %c0_31] : memref<1x176x128xbf16, #tpu.memory_space<vmem>>, vector<1x128x128xbf16>
    %35 = vector.shape_cast %34 : vector<1x128x128xbf16> to vector<128x128xbf16>
    %c5 = arith.constant 5 : index
    %c0_32 = arith.constant 0 : index
    %c0_33 = arith.constant 0 : index
    %36 = vector.load %arg3[%c5, %c0_32, %c0_33] : memref<9x128x128xbf16, #tpu.memory_space<vmem>>, vector<1x128x128xbf16>
    %37 = vector.shape_cast %36 : vector<1x128x128xbf16> to vector<128x128xbf16>
    %cst_34 = arith.constant dense<0.000000e+00> : vector<128x128xf32>
    %38 = tpu.matmul %35, %37, %cst_34 {dimension_numbers = #tpu.dot_dimension_numbers<[1], [0], [0], [1], [0, 0, 1, 1], [], []>} : vector<128x128xbf16>, vector<128x128xbf16>, vector<128x128xf32> -> vector<128x128xf32>
    %39 = arith.addf %33, %38 : vector<128x128xf32>
    %c0_35 = arith.constant 0 : index
    %c32 = arith.constant 32 : index
    %c0_36 = arith.constant 0 : index
    %40 = vector.load %arg2[%c0_35, %c32, %c0_36] : memref<1x176x128xbf16, #tpu.memory_space<vmem>>, vector<1x128x128xbf16>
    %41 = vector.shape_cast %40 : vector<1x128x128xbf16> to vector<128x128xbf16>
    %c6 = arith.constant 6 : index
    %c0_37 = arith.constant 0 : index
    %c0_38 = arith.constant 0 : index
    %42 = vector.load %arg3[%c6, %c0_37, %c0_38] : memref<9x128x128xbf16, #tpu.memory_space<vmem>>, vector<1x128x128xbf16>
    %43 = vector.shape_cast %42 : vector<1x128x128xbf16> to vector<128x128xbf16>
    %cst_39 = arith.constant dense<0.000000e+00> : vector<128x128xf32>
    %44 = tpu.matmul %41, %43, %cst_39 {dimension_numbers = #tpu.dot_dimension_numbers<[1], [0], [0], [1], [0, 0, 1, 1], [], []>} : vector<128x128xbf16>, vector<128x128xbf16>, vector<128x128xf32> -> vector<128x128xf32>
    %45 = arith.addf %39, %44 : vector<128x128xf32>
    %c0_40 = arith.constant 0 : index
    %c33 = arith.constant 33 : index
    %c0_41 = arith.constant 0 : index
    %46 = vector.load %arg2[%c0_40, %c33, %c0_41] : memref<1x176x128xbf16, #tpu.memory_space<vmem>>, vector<1x128x128xbf16>
    %47 = vector.shape_cast %46 : vector<1x128x128xbf16> to vector<128x128xbf16>
    %c7 = arith.constant 7 : index
    %c0_42 = arith.constant 0 : index
    %c0_43 = arith.constant 0 : index
    %48 = vector.load %arg3[%c7, %c0_42, %c0_43] : memref<9x128x128xbf16, #tpu.memory_space<vmem>>, vector<1x128x128xbf16>
    %49 = vector.shape_cast %48 : vector<1x128x128xbf16> to vector<128x128xbf16>
    %cst_44 = arith.constant dense<0.000000e+00> : vector<128x128xf32>
    %50 = tpu.matmul %47, %49, %cst_44 {dimension_numbers = #tpu.dot_dimension_numbers<[1], [0], [0], [1], [0, 0, 1, 1], [], []>} : vector<128x128xbf16>, vector<128x128xbf16>, vector<128x128xf32> -> vector<128x128xf32>
    %51 = arith.addf %45, %50 : vector<128x128xf32>
    %c0_45 = arith.constant 0 : index
    %c34 = arith.constant 34 : index
    %c0_46 = arith.constant 0 : index
    %52 = vector.load %arg2[%c0_45, %c34, %c0_46] : memref<1x176x128xbf16, #tpu.memory_space<vmem>>, vector<1x128x128xbf16>
    %53 = vector.shape_cast %52 : vector<1x128x128xbf16> to vector<128x128xbf16>
    %c8 = arith.constant 8 : index
    %c0_47 = arith.constant 0 : index
    %c0_48 = arith.constant 0 : index
    %54 = vector.load %arg3[%c8, %c0_47, %c0_48] : memref<9x128x128xbf16, #tpu.memory_space<vmem>>, vector<1x128x128xbf16>
    %55 = vector.shape_cast %54 : vector<1x128x128xbf16> to vector<128x128xbf16>
    %cst_49 = arith.constant dense<0.000000e+00> : vector<128x128xf32>
    %56 = tpu.matmul %53, %55, %cst_49 {dimension_numbers = #tpu.dot_dimension_numbers<[1], [0], [0], [1], [0, 0, 1, 1], [], []>} : vector<128x128xbf16>, vector<128x128xbf16>, vector<128x128xf32> -> vector<128x128xf32>
    %57 = arith.addf %51, %56 : vector<128x128xf32>
    %c0_i32_50 = arith.constant 0 : i32
    %58 = arith.cmpi slt, %arg1, %c0_i32_50 : i32
    %59 = arith.extui %58 : i1 to i32
    %c0_i32_51 = arith.constant 0 : i32
    %60 = arith.cmpi ne, %59, %c0_i32_51 : i32
    scf.if %60 {
      %c0_54 = arith.constant 0 : index
      %c0_55 = arith.constant 0 : index
      %64 = vector.load %arg9[%c0_54, %c0_55] : memref<128x128xf32, #tpu.memory_space<vmem>>, vector<128x128xf32>
      tpu.vector_store %arg9[%c0_54, %c0_55], %57 {strides = array<i32>} : memref<128x128xf32, #tpu.memory_space<vmem>>, vector<128x128xf32>,
    } else {
    }
    %c0_i32_52 = arith.constant 0 : i32
    %61 = arith.cmpi eq, %arg1, %c0_i32_52 : i32
    %62 = arith.extui %61 : i1 to i32
    %c0_i32_53 = arith.constant 0 : i32
    %63 = arith.cmpi ne, %62, %c0_i32_53 : i32
    scf.if %63 {
      %c0_54 = arith.constant 0 : index
      %c0_55 = arith.constant 0 : index
      %64 = vector.load %arg4[%c0_54, %c0_55] : memref<1x128xf32, #tpu.memory_space<vmem>>, vector<1x128xf32>
      %65 = vector.broadcast %64 : vector<1x128xf32> to vector<128x128xf32>
      %66 = arith.mulf %57, %65 : vector<128x128xf32>
      %c0_56 = arith.constant 0 : index
      %c0_57 = arith.constant 0 : index
      %67 = vector.load %arg5[%c0_56, %c0_57] : memref<1x128xf32, #tpu.memory_space<vmem>>, vector<1x128xf32>
      %68 = vector.broadcast %67 : vector<1x128xf32> to vector<128x128xf32>
      %69 = arith.addf %66, %68 : vector<128x128xf32>
      %cst_58 = arith.constant 0.000000e+00 : f32
      %70 = vector.broadcast %cst_58 : f32 to vector<128x128xf32>
      %71 = arith.maximumf %69, %70 : vector<128x128xf32>
      %72 = arith.truncf %71 : vector<128x128xf32> to vector<128x128xbf16>
      %c0_59 = arith.constant 0 : index
      %c0_60 = arith.constant 0 : index
      %73 = vector.load %arg6[%c0_59, %c0_60] : memref<128x128xbf16, #tpu.memory_space<vmem>>, vector<128x128xbf16>
      %cst_61 = arith.constant dense<0.000000e+00> : vector<128x128xf32>
      %74 = tpu.matmul %72, %73, %cst_61 {dimension_numbers = #tpu.dot_dimension_numbers<[1], [0], [0], [1], [0, 0, 1, 1], [], []>} : vector<128x128xbf16>, vector<128x128xbf16>, vector<128x128xf32> -> vector<128x128xf32>
      %c0_62 = arith.constant 0 : index
      %c0_63 = arith.constant 0 : index
      %75 = vector.load %arg7[%c0_62, %c0_63] : memref<1x128xf32, #tpu.memory_space<vmem>>, vector<1x128xf32>
      %76 = vector.broadcast %75 : vector<1x128xf32> to vector<128x128xf32>
      %77 = arith.addf %74, %76 : vector<128x128xf32>
      %cst_64 = arith.constant dense<0xFF800000> : vector<128xf32>
      %78 = vector.multi_reduction <maximumf>, %77, %cst_64 [1] : vector<128x128xf32> to vector<128xf32>
      %79 = vector.shape_cast %78 : vector<128xf32> to vector<128x1xf32>
      %80 = vector.broadcast %79 : vector<128x1xf32> to vector<128x128xf32>
      %81 = arith.subf %77, %80 : vector<128x128xf32>
      %82 = math.exp %81 : vector<128x128xf32>
      %cst_65 = arith.constant dense<0.000000e+00> : vector<128xf32>
      %83 = vector.multi_reduction <add>, %82, %cst_65 [1] : vector<128x128xf32> to vector<128xf32>
      %84 = vector.shape_cast %83 : vector<128xf32> to vector<128x1xf32>
      %85 = math.log %84 : vector<128x1xf32>
      %86 = vector.broadcast %85 : vector<128x1xf32> to vector<128x128xf32>
      %87 = arith.subf %81, %86 : vector<128x128xf32>
      %c0_66 = arith.constant 0 : index
      %c0_67 = arith.constant 0 : index
      %c0_68 = arith.constant 0 : index
      %88 = vector.load %arg8[%c0_66, %c0_67, %c0_68] : memref<1x128x128xf32, #tpu.memory_space<vmem>>, vector<1x128x128xf32>
      %89 = vector.shape_cast %88 : vector<1x128x128xf32> to vector<128x128xf32>
      %90 = vector.shape_cast %87 : vector<128x128xf32> to vector<1x128x128xf32>
      tpu.vector_store %arg8[%c0_66, %c0_67, %c0_68], %90 {strides = array<i32>} : memref<1x128x128xf32, #tpu.memory_space<vmem>>, vector<1x128x128xf32>,
    } else {
    }
    return
  }
  func.func @transform_0(%arg0: i32, %arg1: i32) -> (i32, i32, i32) {
    %c0_i32 = arith.constant 0 : i32
    %c0_i32_0 = arith.constant 0 : i32
    return %arg0, %c0_i32, %arg1 : i32, i32, i32
  }
  func.func @transform_1(%arg0: i32, %arg1: i32) -> (i32, i32, i32) {
    %c0_i32 = arith.constant 0 : i32
    %c0_i32_0 = arith.constant 0 : i32
    %c0_i32_1 = arith.constant 0 : i32
    return %c0_i32, %arg1, %c0_i32_0 : i32, i32, i32
  }
  func.func @transform_2(%arg0: i32, %arg1: i32) -> (i32, i32) {
    %c0_i32 = arith.constant 0 : i32
    %c0_i32_0 = arith.constant 0 : i32
    %c0_i32_1 = arith.constant 0 : i32
    return %c0_i32, %c0_i32_0 : i32, i32
  }
  func.func @transform_3(%arg0: i32, %arg1: i32) -> (i32, i32) {
    %c0_i32 = arith.constant 0 : i32
    %c0_i32_0 = arith.constant 0 : i32
    %c0_i32_1 = arith.constant 0 : i32
    return %c0_i32, %c0_i32_0 : i32, i32
  }
  func.func @transform_4(%arg0: i32, %arg1: i32) -> (i32, i32) {
    %c0_i32 = arith.constant 0 : i32
    %c0_i32_0 = arith.constant 0 : i32
    %c0_i32_1 = arith.constant 0 : i32
    return %c0_i32, %c0_i32_0 : i32, i32
  }
  func.func @transform_5(%arg0: i32, %arg1: i32) -> (i32, i32) {
    %c0_i32 = arith.constant 0 : i32
    %c0_i32_0 = arith.constant 0 : i32
    %c0_i32_1 = arith.constant 0 : i32
    return %c0_i32, %c0_i32_0 : i32, i32
  }
  func.func @transform_6(%arg0: i32, %arg1: i32) -> (i32, i32, i32) {
    %c0_i32 = arith.constant 0 : i32
    %c0_i32_0 = arith.constant 0 : i32
    %c0_i32_1 = arith.constant 0 : i32
    return %arg0, %c0_i32, %c0_i32_0 : i32, i32, i32
  }
}

</mosaic_0001>

<bundles_post_ra>
// kernel: ppm_deepsup_forward.3
= control target key start
LH: loop header
LB: loop body
LE: loop exit
PB: predicated region body
PF: predicated region fallthrough
CT: control target
= control target key end

     0   :  { %s5386_s0 = inlined_call_operand.hbm [shape: bf16[2,176,128], index: 0, kind: input, shape index: {}]   ;;  %s5387_s1 = inlined_call_operand.hbm [shape: bf16[9,128,128], index: 1, kind: input, shape index: {}]   ;;  %s5388_s2 = inlined_call_operand.hbm [shape: f32[1,128], index: 2, kind: input, shape index: {}]   ;;  %s5389_s3 = inlined_call_operand.hbm [shape: f32[1,128], index: 3, kind: input, shape index: {}]   ;;  %s5390_s4 = inlined_call_operand.hbm [shape: bf16[128,128], index: 4, kind: input, shape index: {}]   ;;  %s5391_s5 = inlined_call_operand.hbm [shape: f32[1,128], index: 5, kind: input, shape index: {}]   ;;  %s5392_s6 = inlined_call_operand.hbm [shape: f32[2,128,128], index: 6, kind: output, shape index: {}]  }
   0x1   :  { %5401 = sst [smem:[#allocation20_spill]] %s5387_s1 }
   0x2   :  { %5402 = sst [smem:[#allocation21_spill]] %s5388_s2 }
   0x3   :  { %5403 = sst [smem:[#allocation22_spill]] %s5389_s3 }
   0x4   :  { %11 = vsyncpa [#allocation4], 0 }
   0x5   :  { %13 = vsyncpa [#allocation4 + $0x1], 0 }
   0x6   :  { %14 = vsyncpa [#allocation7], 0 }
   0x7   :  { %15 = vsyncpa [#allocation10], 0 }
   0x8   :  { %16 = vsyncpa [#allocation13], 0 }
   0x9   :  { %17 = vsyncpa [#allocation5], 0 }
   0xa   :  { %19 = vsyncpa [#allocation5 + $0x1], 0  ;;  %s4670_s21 = smov 0   ;;  %s4672_s22 = smov 0  }
   0xb   :  { %s4674_s23 = smov 0   ;;  %s4676_s24 = smov 0  }
   0xc   :  { %s4678_s25 = smov 0   ;;  %s4680_s26 = smov 0  }
   0xd LB: > { %s5393_s27 = sadd.s32 4294967295, %s4622_s26   ;;  %p3274_p0 = scmp.ge.s32.totalorder %s4622_s26, 1  ;;  %s4622_s26 = sphi %s4680_s26, %s25_s26   ;;  %s4618_s25 = sphi %s4678_s25, %s5429_s25   ;;  %s4614_s24 = sphi %s4676_s24, %s5428_s24   ;;  %s4610_s23 = sphi %s4674_s23, %s5427_s23   ;;  %s4606_s22 = sphi %s4672_s22, %s5426_s22   ;;  %s4602_s21 = sphi %s4670_s21, %s5425_s21  }
   0xe   : > { %p4704_p1 = scmp.eq.s32.totalorder %s5393_s27, 0  ;;  %p206_p2 = scmp.lt.s32.totalorder %s4622_s26, 3 }
   0xf   : > { %s4624_s30 = smov [#allocation6]   ;;  %s4625_s9 = smov [#allocation9]  }
  0x10   : > { %s5404_s28 = scalar_select %p4704_p1, 1, 0 }
  0x11   : > { %p4709_p3 = pnand %p3274_p0, %p206_p2  ;;  %s221_s7 = sshll.u32 %s4624_s30, 4  ;;  %s4713_s7 = int_to_ptr.vmem [resolvable:$true] %s221_s7 }
  0x12   : > { %s246_s10 = sshll.u32 %s4625_s9, 4  ;;  %s4626_s11 = smov [#allocation8]   ;;  %s4724_s10 = int_to_ptr.vmem [resolvable:$true] %s246_s10 }
  0x13   : > { %s5405_s29 = scalar_select %p4709_p3, 1, 0 }
  0x14   : > { %p4067_p4 = pneg %p4709_p3  ;;  %s4726_s12 = sshll.u32 %s4626_s11, 4  ;;  %s236_s12 = int_to_ptr.vmem [resolvable:$true] %s4726_s12 }
  0x15   : > { %s5407_s1 = sld [smem:[#allocation20_spill]] }
  0x16   : > { %p4720_p6 = pnand %p4067_p4, %p4704_p1 }
  0x18   : > { %p4736_p8 = pneg %p4720_p6 }
  0x1b   : > { %s4358_s15 = scalar_lea.hbm %s5407_s1, 9216 }
  0x1c   : > { %p4359_p7 = scmp.ne.s32.totalorder %s5407_s1, %s4358_s15  ;;  %p4365_p11 = scmp.lt.u32.totalorder %s4358_s15, %s5407_s1 }
  0x1e   : > { %p4361_p9 = pnand %p4736_p8, %p4359_p7 }
  0x20   : > { %p4362_p10 = pneg %p4361_p9 }
  0x22   : > { %p4367_p12 = pnand %p4365_p11, %p4362_p10 }
  0x24   : > { %4370 = shalt.err (!%p4367_p12)
}
  0x25   : > { %s4371_s30 = scalar_lea.vmem %s4713_s7, 9216  ;;  %p4379_p4 = scmp.lt.s32.totalorder %s4713_s7, %s4713_s7 }
  0x26   : > { %p4372_p13 = scmp.ne.s32.totalorder %s4713_s7, %s4371_s30  ;;  %p4380_p5 = scmp.lt.s32.totalorder %s4371_s30, %s4371_s30 }
  0x28   : > { %p4374_p0 = pnand %p4372_p13, %p4736_p8  ;;  %p4381_p7 = por %p4380_p5, %p4379_p4 }
  0x2a   : > { %p4375_p2 = pneg %p4374_p0 }
  0x2c   : > { %p4382_p9 = pnand %p4381_p7, %p4375_p2 }
  0x2e   : > { %4385 = shalt.err (!%p4382_p9)
}
  0x2f   : > { %s5397_s9 = smov 64   ;;  %s5399_s11 = smov 4  }
  0x30   : > { %4070 = dma.hbm_to_vmem [thread:$0]  (!%p4720_p6), %s5407_s1, 9216, %s4713_s7, [#allocation7], %s5397_s9, %s5397_s9, %s5399_s11  }
  0x31   : > { %s5409_s3 = sld [smem:[#allocation22_spill]] }
  0x37   : > { %s4386_s17 = scalar_lea.hbm %s5409_s3, 16 }
  0x38   : > { %p4387_p5 = scmp.ne.s32.totalorder %s5409_s3, %s4386_s17  ;;  %p4393_p12 = scmp.lt.u32.totalorder %s4386_s17, %s5409_s3 }
  0x3a   : > { %p4389_p10 = pnand %p4387_p5, %p4736_p8 }
  0x3c   : > { %p4390_p11 = pneg %p4389_p10 }
  0x3e   : > { %p4395_p13 = pnand %p4393_p12, %p4390_p11 }
  0x40   : > { %4398 = shalt.err (!%p4395_p13)
}
  0x41   : > { %s4399_s7 = scalar_lea.vmem %s4724_s10, 16  ;;  %s4406_s13 = scalar_lea.vmem %s4724_s10, 32 }
  0x42   : > { %p4400_p0 = scmp.ne.s32.totalorder %s4724_s10, %s4399_s7  ;;  %p4407_p7 = scmp.lt.s32.totalorder %s4724_s10, %s4724_s10 }
  0x43   : > { %p4408_p9 = scmp.lt.s32.totalorder %s4406_s13, %s4399_s7 }
  0x44   : > { %p4402_p2 = pnand %p4400_p0, %p4736_p8 }
  0x45   : > { %p4409_p5 = por %p4408_p9, %p4407_p7 }
  0x46   : > { %p4403_p4 = pneg %p4402_p2 }
  0x48   : > { %p4410_p10 = pnand %p4409_p5, %p4403_p4 }
  0x4a   : > { %4413 = shalt.err (!%p4410_p10)
}
  0x4b   : > { %4076 = dma.hbm_to_vmem [thread:$0]  (!%p4720_p6), %s5409_s3, 16, %s4724_s10, [#allocation10]  }
  0x4c   : > { %s5410_s2 = sld [smem:[#allocation21_spill]] }
  0x52   : > { %s4414_s17 = scalar_lea.hbm %s5410_s2, 16 }
  0x53   : > { %p4415_p11 = scmp.ne.s32.totalorder %s5410_s2, %s4414_s17  ;;  %p4421_p0 = scmp.lt.u32.totalorder %s4414_s17, %s5410_s2 }
  0x55   : > { %p4417_p12 = pnand %p4415_p11, %p4736_p8 }
  0x57   : > { %p4418_p13 = pneg %p4417_p12 }
  0x59   : > { %p4423_p2 = pnand %p4421_p0, %p4418_p13 }
  0x5b   : > { %4426 = shalt.err (!%p4423_p2)
}
  0x5c   : > { %s4427_s13 = scalar_lea.vmem %s236_s12, 16  ;;  %s4434_s10 = scalar_lea.vmem %s236_s12, 32 }
  0x5d   : > { %p4428_p4 = scmp.ne.s32.totalorder %s236_s12, %s4427_s13  ;;  %p4435_p5 = scmp.lt.s32.totalorder %s236_s12, %s236_s12 }
  0x5e   : > { %p4436_p10 = scmp.lt.s32.totalorder %s4434_s10, %s4427_s13 }
  0x5f   : > { %p4430_p7 = pnand %p4428_p4, %p4736_p8 }
  0x60   : > { %p4437_p3 = por %p4436_p10, %p4435_p5 }
  0x61   : > { %p4431_p9 = pneg %p4430_p7 }
  0x63   : > { %p4438_p1 = pnand %p4437_p3, %p4431_p9 }
  0x65   : > { %4441 = shalt.err (!%p4438_p1)
}
  0x66   : > { %4073 = dma.hbm_to_vmem [thread:$0]  (!%p4720_p6), %s5410_s2, 16, %s236_s12, [#allocation7]  }
  0x67   : > { %s4629_s15 = smov [#allocation11]   ;;  %s4630_s17 = smov [#allocation12]  }
  0x68   : > { %s256_s16 = sshll.u32 %s4629_s15, 4  ;;  %s270_s19 = sshll.u32 %s4630_s17, 4  ;;  %s257_s16 = int_to_ptr.vmem [resolvable:$true] %s256_s16  ;;  %s271_s19 = int_to_ptr.vmem [resolvable:$true] %s270_s19 }
  0x69   : > { %s4442_s7 = scalar_lea.hbm %s5390_s4, 1024 }
  0x6a   : > { %p4443_p1 = scmp.ne.s32.totalorder %s5390_s4, %s4442_s7  ;;  %p4449_p12 = scmp.lt.u32.totalorder %s4442_s7, %s5390_s4 }
  0x6c   : > { %p4445_p3 = pnand %p4443_p1, %p4736_p8 }
  0x6e   : > { %p4446_p11 = pneg %p4445_p3 }
  0x70   : > { %p4451_p13 = pnand %p4449_p12, %p4446_p11 }
  0x72   : > { %4454 = shalt.err (!%p4451_p13)
}
  0x73   : > { %s4455_s12 = scalar_lea.vmem %s257_s16, 1024  ;;  %p4463_p7 = scmp.lt.s32.totalorder %s257_s16, %s257_s16 }
  0x74   : > { %p4456_p0 = scmp.ne.s32.totalorder %s257_s16, %s4455_s12  ;;  %p4464_p9 = scmp.lt.s32.totalorder %s4455_s12, %s4455_s12 }
  0x76   : > { %p4458_p2 = pnand %p4456_p0, %p4736_p8  ;;  %p4465_p5 = por %p4464_p9, %p4463_p7 }
  0x78   : > { %p4459_p4 = pneg %p4458_p2 }
  0x7a   : > { %p4466_p10 = pnand %p4465_p5, %p4459_p4 }
  0x7c   : > { %4469 = shalt.err (!%p4466_p10)
}
  0x7d   : > { %s5411_s14 = smov 64   ;;  %s4470_s30 = scalar_lea.hbm %s5391_s5, 16 }
  0x7e   : > { %4079 = dma.hbm_to_vmem [thread:$0]  (!%p4720_p6), %s5390_s4, 1024, %s257_s16, [#allocation10], %s5411_s14, %s5411_s14, %s5399_s11  }
  0x7f   : > { %p4471_p1 = scmp.ne.s32.totalorder %s5391_s5, %s4470_s30  ;;  %p4477_p12 = scmp.lt.u32.totalorder %s4470_s30, %s5391_s5 }
  0x81   : > { %p4473_p3 = pnand %p4471_p1, %p4736_p8 }
  0x83   : > { %p4474_p11 = pneg %p4473_p3 }
  0x85   : > { %p4479_p13 = pnand %p4477_p12, %p4474_p11 }
  0x87   : > { %4482 = shalt.err (!%p4479_p13)
}
  0x88   : > { %s4483_s12 = scalar_lea.vmem %s271_s19, 16  ;;  %s4490_s16 = scalar_lea.vmem %s271_s19, 32 }
  0x89   : > { %p4484_p0 = scmp.ne.s32.totalorder %s271_s19, %s4483_s12  ;;  %p4491_p7 = scmp.lt.s32.totalorder %s271_s19, %s271_s19 }
  0x8a   : > { %p4492_p9 = scmp.lt.s32.totalorder %s4490_s16, %s4483_s12 }
  0x8b   : > { %p4486_p2 = pnand %p4484_p0, %p4736_p8 }
  0x8c   : > { %p4493_p5 = por %p4492_p9, %p4491_p7 }
  0x8d   : > { %p4487_p4 = pneg %p4486_p2 }
  0x8f   : > { %p4494_p10 = pnand %p4493_p5, %p4487_p4 }
  0x91   : > { %4497 = shalt.err (!%p4494_p10)
}
  0x92   : > { %4082 = dma.hbm_to_vmem [thread:$0]  (!%p4720_p6), %s5391_s5, 16, %s271_s19, [#allocation13]  }
  0x93   : > { %s3273_s18 = sadd.s32 4294967294, %s4622_s26   ;;  %s37_s17 = sadd.s32 1, %s4618_s25 }
  0x94   : > { %s46_s8 = sadd.s32 1, %s4610_s23  ;;  %p39_p8 = scmp.ge.s32.totalorder %s37_s17, 2 }
  0x95   : > { %p53_p1 = scmp.ne.s32.totalorder %s4610_s23, %s4606_s22  ;;  %p54_p3 = scmp.eq.s32.totalorder %s4622_s26, 0 }
  0x96   : > { %p59_p11 = scmp.ne.s32.totalorder %s4606_s22, %s4602_s21  ;;  %s5431_s17 = smov (%p39_p8, %s37_s17), 0 }
  0x97   : > { %p4852_p12 = por %p54_p3, %p53_p1  ;;  %p5413_p13 = scmp.ne.s32.totalorder %s5404_s28, 0 }
  0x98   : > { %s41_s30 = ssub.s32 %s4618_s25, %s5431_s17  ;;  %s5415_s7 = sadd.s32 4294967295, %s4622_s26  }
  0x99   : > { %p4858_p6 = por %p5413_p13, %p59_p11  ;;  %p193_p0 = scmp.eq.s32.totalorder %s5415_s7, 1 }
  0x9a   : > { %p44_p2 = scmp.eq.s32.totalorder %s41_s30, 0  ;;  %p199_p4 = scmp.eq.s32.totalorder %s3273_s18, 1 }
  0x9b   : > { %p4866_p7 = por %p193_p0, %p53_p1  ;;  %p4096_p9 = scmp.lt.s32.totalorder %s4622_s26, 2 }
  0x9c   : > { %s4872_s10 = scalar_select %p44_p2, %s4610_s23, %s46_s8  }
  0x9d   : > { %s5416_s13 = scalar_select %p4866_p7, 1, 0 }
  0x9e   : > { %p4874_p5 = por %p199_p4, %p59_p11  ;;  %s281_s12 = sand.u32 1, %s4610_s23  }
  0x9f   : > { %s4040_s16 = smul.u32 88, %s281_s12  ;;  %p4882_p10 = pnand %p4096_p9, %p4852_p12 }
  0xa0   : > { %s5417_s27 = scalar_select %p4874_p5, 1, 0 }
  0xa1   : > { %s4041_s9 = smul.u32 1408, %s4618_s25  ;;  %s285_s8 = scalar_lea.vmem [#allocation3], %s4040_s16 }
  0xa2   : > { %s293_s11 = sshll.u32 %s285_s8, 4  ;;  %s4893_s20 = scalar_lea.sflag [#allocation4], %s281_s12  ;;  %s4891_s11 = int_to_ptr.vmem [resolvable:$true] %s293_s11 }
  0xa3   : > { %s4889_s7 = scalar_lea.hbm %s5386_s0, %s4041_s9  ;;  %p4500_p1 = pneg %p4882_p10 }
  0xa4   : > { %s4498_s1 = scalar_lea.hbm %s4889_s7, 1408  ;;  %s4503_s30 = scalar_lea.hbm %s5386_s0, 2816 }
  0xa5   : > { %p4499_p8 = scmp.ne.s32.totalorder %s4889_s7, %s4498_s1  ;;  %p4504_p12 = scmp.lt.u32.totalorder %s4889_s7, %s5386_s0 }
  0xa6   : > { %p4505_p13 = scmp.lt.u32.totalorder %s4503_s30, %s4498_s1  ;;  %p4507_p2 = scmp.lt.u32.totalorder %s4498_s1, %s4889_s7 }
  0xa7   : > { %p4501_p3 = pnand %p4500_p1, %p4499_p8 }
  0xa8   : > { %p4506_p0 = por %p4505_p13, %p4504_p12 }
  0xa9   : > { %p4502_p11 = pneg %p4501_p3 }
  0xaa   : > { %p4508_p4 = por %p4507_p2, %p4506_p0 }
  0xac   : > { %p4509_p9 = pnand %p4508_p4, %p4502_p11 }
  0xae   : > { %4512 = shalt.err (!%p4509_p9)
}
  0xaf   : > { %s4513_s12 = scalar_lea.vmem %s4891_s11, 1408  ;;  %s4631_s16 = smov [#allocation3]  }
  0xb0   : > { %p4514_p8 = scmp.ne.s32.totalorder %s4891_s11, %s4513_s12  ;;  %s4518_s8 = sshll.u32 %s4631_s16, 4  ;;  %s4519_s8 = int_to_ptr.vmem [resolvable:$false] %s4518_s8 }
  0xb1   : > { %s4520_s2 = scalar_lea.vmem %s4519_s8, 2816  ;;  %p4521_p7 = scmp.lt.s32.totalorder %s4891_s11, %s4519_s8 }
  0xb2   : > { %p4516_p3 = pnand %p4514_p8, %p4500_p1  ;;  %p4522_p12 = scmp.lt.s32.totalorder %s4520_s2, %s4513_s12 }
  0xb4   : > { %p4517_p5 = pneg %p4516_p3  ;;  %p4523_p13 = por %p4522_p12, %p4521_p7 }
  0xb6   : > { %p4524_p0 = pnand %p4523_p13, %p4517_p5 }
  0xb8   : > { %4527 = shalt.err (!%p4524_p0)
}
  0xb9   : > { %s5419_s1 = smov 4   ;;  %p5420_p1 = scmp.ne.s32.totalorder %s5405_s29, 0 }
  0xba   : > { %4086 = dma.hbm_to_vmem [thread:$0]  (!%p4882_p10), %s4889_s7, 1408, %s4891_s11, %s4893_s20, %s5411_s14, %s5411_s14, %s5419_s1  }
  0xbb   : > { %305 = sbr.rel (%p5420_p1) target bundleno = 1165 (0x48d), region = 44  ;;  %s4927_s3 = sand.u32 (!%p5420_p1), 1, %s4606_s22  }
  0xbc   : > { %s4042_s9 = smul.u32 (!%p5420_p1), 88, %s4927_s3  ;;  %s308_s18 = scalar_lea.sflag (!%p5420_p1), [#allocation4], %s4927_s3 }
  0xbe   : > { %s4931_s30 = scalar_lea.vmem (!%p5420_p1), [#allocation3], %s4042_s9 }
  0xc2   : > { %4581 = dma.done.wait (%p4858_p6), %s308_s18, 1408  }
  0xc3   : > { %4583 = vsyncadd (%p4858_p6), %s308_s18, 4294965888  ;;  %p5421_p7 = scmp.ne.s32.totalorder %s5404_s28, 0 }
  0xc5   : > { %4585 = dma.done.wait (%p5421_p7), [#allocation7], 9232  }
  0xc6   : > { %4587 = vsyncadd (%p5421_p7), [#allocation7], 4294958064 }
  0xc7   : > { %4589 = dma.done.wait (%p5421_p7), [#allocation10], 1040  }
  0xc8   : > { %4591 = vsyncadd (%p5421_p7), [#allocation10], 4294966256 }
  0xc9   : > { %4593 = dma.done.wait (%p5421_p7), [#allocation13], 16  }
  0xca   : > { %4595 = vsyncadd (%p5421_p7), [#allocation13], 4294967280  ;;  %v4160_v0 = vld [vmem:[#allocation6] sm:$0xff]   ;;  %v4162_v2 = vld [vmem:[#allocation6 + $0x8] sm:$0xff]   ;;  %vm716_vm0 = vsmask.f32 7424 }
  0xcb   : > { %v4161_v1 = vld [vmem:[#allocation6 + $0x100] sm:$0xff]   ;;  %3592 = vmatprep.subr.bf16.mxu1 %v4160_v0  ;;  %v4163_v3 = vld [vmem:[#allocation6 + $0x108] sm:$0xff]   ;;  %v4164_v4 = vld [vmem:[#allocation6 + $0x10] sm:$0xff]   ;;  %vm975_vm1 = vcmask 1046528   ;;  %s3288_s28 = sshll.u32 %s4927_s3, 7  ;;  %s3431_s11 = sshll.u32 %s4614_s24, 11 }
  0xcc   : > { %3720 = vmatprep.subr.bf16.mxu0 %v4161_v1  ;;  %3593 = vmatpush3.bf16.msra.mxu1 %v4160_v0  ;;  %v4165_v5 = vld [vmem:[#allocation6 + $0x110] sm:$0xff]   ;;  %v4166_v6 = vld [vmem:[#allocation6 + $0x18] sm:$0xff]   ;;  %v4168_v8 = vld [vmem:[#allocation6 + $0x20] sm:$0xff]   ;;  %s5297_s29 = scalar_lea.vmem [#allocation14], %s3288_s28  ;;  %s5333_s7 = scalar_lea.hbm %s5392_s6, %s3431_s11 }
  0xcd   : > { %3721 = vmatpush3.bf16.msra.mxu0 %v4161_v1  ;;  %3594 = vmatprep.subr.bf16.mxu1 %v4162_v2  ;;  %v4167_v7 = vld [vmem:[#allocation6 + $0x118] sm:$0xff]   ;;  %v4169_v9 = vld [vmem:[#allocation6 + $0x120] sm:$0xff]   ;;  %v4170_v10 = vld [vmem:[#allocation6 + $0x28] sm:$0xff]   ;;  %s3139_s14 = sshll.u32 %s5297_s29, 4  ;;  %s3126_s24 = scalar_lea.sflag [#allocation5], %s4927_s3  ;;  %s5335_s14 = int_to_ptr.vmem [resolvable:$true] %s3139_s14 }
  0xce   : > { %3722 = vmatprep.subr.bf16.mxu0 %v4163_v3  ;;  %v4171_v11 = vld [vmem:[#allocation6 + $0x128] sm:$0xff]   ;;  %v1404_v13 = vld [vmem:[%s4931_s30 + $0x8] sm:$0xf]  ;;  %v4952_v14 = vld [vmem:[%s4931_s30 + $0xc] sm:$0xf]  ;;  %s4528_s20 = scalar_lea.vmem %s5335_s14, 2048 }
  0xcf   : > { %v4176_v12 = vld [vmem:[%s4931_s30] sm:$0xff]   ;;  %v3347_v15 = vcombine.low %v1404_v13, %v4952_v14  ;;  %v4956_v16 = vld [vmem:[%s4931_s30 + $0x10] sm:$0xff]   ;;  %v4960_v22 = vld [vmem:[%s4931_s30 + $0x18] sm:$0xff]   ;;  %p4529_p6 = scmp.ne.s32.totalorder %s5335_s14, %s4528_s20  ;;  %p5422_p5 = scmp.ne.s32.totalorder %s5416_s13, 0 }
  0xd0   : > { %3595 = vmatpush3.bf16.msra.mxu1 %v4162_v2  ;;  %3608 = vmatprep.mubr.bf16.mxu1 %v4176_v12  ;;  %v4172_v17 = vld [vmem:[#allocation6 + $0x30] sm:$0xff]   ;;  %v1489_v21 = vshll.u32 %v4956_v16, 16  ;;  %v4174_v25 = vld [vmem:[#allocation6 + $0x38] sm:$0xff]   ;;  %v1493_v27 = vshrl.u32 %v4956_v16, 16  ;;  %v1497_v28 = vshll.u32 %v4960_v22, 16  ;;  %v1501_v32 = vshrl.u32 %v4960_v22, 16 }
  0xd1   : > { %3723 = vmatpush3.bf16.msra.mxu0 %v4163_v3  ;;  %3596 = vmatprep.subr.bf16.mxu1 %v4164_v4  ;;  %v4173_v18 = vld [vmem:[#allocation6 + $0x130] sm:$0xff]   ;;  %v1482_v19 = vshrl.u32 %v3347_v15, 16  ;;  %v1484_v20 = vshll.u32 %v3347_v15, 16  ;;  %v4175_v29 = vld [vmem:[#allocation6 + $0x138] sm:$0xff]   ;;  %v4180_v34 = vld [vmem:[#allocation6 + $0x40] sm:$0xff]   ;;  %p4530_p10 = pnand %p4529_p6, %p5422_p5  ;;  %s4632_s12 = smov [#allocation14]  }
  0xd2   : > { %3724 = vmatprep.subr.bf16.mxu0 %v4165_v5  ;;  %v1491_v24 = vrot.slane %v1489_v21, 1  ;;  %v4966_v31 = vld [vmem:[%s4931_s30 + $0x20] sm:$0xff]   ;;  %v4179_v33 = vld [vmem:[%s4931_s30 + $0x8] sm:$0xff]   ;;  %v1499_v36 = vrot.slane %v1497_v28, 1  ;;  %v4182_v37 = vld [vmem:[#allocation6 + $0x140] sm:$0xff]   ;;  %s4532_s16 = sshll.u32 %s4632_s12, 4  ;;  %s4533_s16 = int_to_ptr.vmem [resolvable:$false] %s4532_s16 }
  0xd3   : > { %v1486_v23 = vrot.slane %v1484_v20, 1  ;;  %v1505_v38 = vshll.u32 %v4966_v31, 16  ;;  %v4183_v39 = vld [vmem:[#allocation6 + $0x48] sm:$0xff]   ;;  %v4972_v40 = vld [vmem:[%s4931_s30 + $0x28] sm:$0xff]   ;;  %v1509_v45 = vshrl.u32 %v4966_v31, 16  ;;  %v4185_v47 = vld [vmem:[%s4931_s30 + $0x10] sm:$0xff]   ;;  %p4531_p11 = pneg %p4530_p10  ;;  %p4535_p2 = scmp.lt.s32.totalorder %s5335_s14, %s4533_s16 }
  0xd4   : > { %3597 = vmatpush3.bf16.msra.mxu1 %v4164_v4  ;;  %v1495_v35 = vor.u32 %v1493_v27, %v1491_v24  ;;  %v4184_v41 = vld [vmem:[#allocation6 + $0x148] sm:$0xff]   ;;  %v1503_v42 = vor.u32 %v1501_v32, %v1499_v36  ;;  %v1513_v46 = vshll.u32 %v4972_v40, 16  ;;  %v4980_v49 = vld [vmem:[%s4931_s30 + $0x30] sm:$0xff]   ;;  %v1517_v50 = vshrl.u32 %v4972_v40, 16  ;;  %v4188_v52 = vld [vmem:[#allocation6 + $0x50] sm:$0xff]   ;;  %s4534_s8 = scalar_lea.vmem %s4533_s16, 4096 }
  0xd5   : > { %3725 = vmatpush3.bf16.msra.mxu0 %v4165_v5  ;;  %3598 = vmatprep.subr.bf16.mxu1 %v4166_v6  ;;  %v1487_v26 = vor.u32 %v1486_v23, %v1482_v19  ;;  %v1507_v43 = vrot.slane %v1505_v38, 1  ;;  %v4187_v51 = vld [vmem:[%s4931_s30 + $0x18] sm:$0xff]   ;;  %v4190_v55 = vld [vmem:[#allocation6 + $0x150] sm:$0xff]   ;;  %v1521_v56 = vshll.u32 %v4980_v49, 16  ;;  %v4191_v57 = vld [vmem:[#allocation6 + $0x58] sm:$0xff]   ;;  %v1525_v63 = vshrl.u32 %v4980_v49, 16  ;;  %p4536_p4 = scmp.lt.s32.totalorder %s4534_s8, %s4528_s20 }
  0xd6   : > { %3726 = vmatprep.subr.bf16.mxu0 %v4167_v7  ;;  %v1500_v44 = vsel %vm716_vm0, %v1495_v35, %v1499_v36  ;;  %v1515_v54 = vrot.slane %v1513_v46, 1  ;;  %v4986_v58 = vld [vmem:[%s4931_s30 + $0x38] sm:$0xff]   ;;  %v4192_v59 = vld [vmem:[#allocation6 + $0x158] sm:$0xff]   ;;  %v4193_v1 = vld [vmem:[%s4931_s30 + $0x20] sm:$0xff]  }
  0xd7   : > { %v1492_v30 = vsel %vm716_vm0, %v1487_v26, %v1491_v24  ;;  %v1508_v48 = vsel %vm716_vm0, %v1503_v42, %v1507_v43  ;;  %v1511_v53 = vor.u32 %v1509_v45, %v1507_v43  ;;  %v1523_v61 = vrot.slane %v1521_v56, 1  ;;  %v4994_v3 = vld [vmem:[%s4931_s30 + $0x40] sm:$0xff]   ;;  %v4196_v5 = vld [vmem:[#allocation6 + $0x60] sm:$0xff]   ;;  %v5000_v12 = vld [vmem:[%s4931_s30 + $0x48] ss:$0 sps:$4 sm:$0x11]   ;;  %p4537_p9 = por %p4536_p4, %p4535_p2 }
  0xd8   : > { %3599 = vmatpush3.bf16.msra.mxu1 %v4166_v6  ;;  %3736 = vmatprep.mubr.bf16.mxu0 %v1492_v30  ;;  %v1519_v60 = vor.u32 %v1517_v50, %v1515_v54  ;;  %v1529_v0 = vshll.u32 %v4986_v58, 16  ;;  %v1533_v4 = vshrl.u32 %v4986_v58, 16  ;;  %v4200_v13 = vld [vmem:[#allocation6 + $0x168] sm:$0xff]   ;;  %v4201_v15 = vld [vmem:[%s4931_s30 + $0x30] sm:$0xff]   ;;  %v1541_v19 = vshrl.u32 %v4994_v3, 16  ;;  %v5007_v23 = vld [vmem:[%s4931_s30 + $0x8] sm:$0xff]  }
  0xd9   : > { %3727 = vmatpush3.bf16.msra.mxu0 %v4167_v7  ;;  %3600 = vmatprep.subr.bf16.mxu1 %v4168_v8  ;;  %v1516_v62 = vsel %vm716_vm0, %v1511_v53, %v1515_v54  ;;  %v1527_v6 = vor.u32 %v1525_v63, %v1523_v61  ;;  %v1545_v21 = vshll.u32 %v5000_v12, 16  ;;  %v639_v24 = vld [vmem:[%s4931_s30] sm:$0xf]  ;;  %v725_v27 = vshll.u32 %v5007_v23, 16  ;;  %v5019_v32 = vld [vmem:[%s4931_s30 + $0x10] sm:$0xff]   ;;  %p4538_p8 = pnand %p4537_p9, %p4531_p11 }
  0xda   : > { %3728 = vmatprep.subr.bf16.mxu0 %v4169_v9  ;;  %v1524_v2 = vsel %vm716_vm0, %v1519_v60, %v1523_v61  ;;  %v1531_v7 = vrot.slane %v1529_v0, 1  ;;  %v1740_v30 = vrot.slane %v4956_v16, 1  ;;  %v4207_v43 = vld [vmem:[#allocation6 + $0x78] sm:$0xff]   ;;  %v729_v45 = vshrl.u32 %v5007_v23, 16  ;;  %v4214_v61 = vld [vmem:[#allocation6 + $0x180] sm:$0xff]   ;;  %v4215_v63 = vld [vmem:[#allocation6 + $0x88] sm:$0xff]  }
  0xdb   : > { %v1547_v36 = vrot.slane %v1545_v21, 1  ;;  %v737_v53 = vshrl.u32 %v5019_v32, 16  ;;  %v1742_v60 = vrot.slane %v4960_v22, 1 }
  0xdc   : > { %3601 = vmatpush3.bf16.msra.mxu1 %v4168_v8  ;;  %v4195_v8 = vld [vmem:[%s4931_s30 + $0x28] sm:$0xff]   ;;  %v1532_v20 = vsel %vm716_vm0, %v1527_v6, %v1531_v7 }
  0xdd   : > { %3729 = vmatpush3.bf16.msra.mxu0 %v4169_v9  ;;  %3602 = vmatprep.subr.bf16.mxu1 %v4170_v10  ;;  %v4198_v9 = vld [vmem:[#allocation6 + $0x160] sm:$0xff]   ;;  %v1743_v22 = vsel %vm975_vm1, %v1740_v30, %v1742_v60  ;;  %v5043_v6 = vld [vmem:[%s4931_s30 + $0x28] sm:$0xff]  }
  0xde   : > { %3730 = vmatprep.subr.bf16.mxu0 %v4171_v11 }
  0xe0   : > { %3603 = vmatpush3.bf16.msra.mxu1 %v4170_v10  ;;  %v1537_v10 = vshll.u32 %v4994_v3, 16 }
  0xe1   : > { %3731 = vmatpush3.bf16.msra.mxu0 %v4171_v11  ;;  %3604 = vmatprep.subr.bf16.mxu1 %v4172_v17  ;;  %v4199_v11 = vld [vmem:[#allocation6 + $0x68] sm:$0xff]  }
  0xe2   : > { %3732 = vmatprep.subr.bf16.mxu0 %v4173_v18 }
  0xe4   : > { %3605 = vmatpush3.bf16.msra.mxu1 %v4172_v17  ;;  %v1535_v17 = vor.u32 %v1533_v4, %v1531_v7 }
  0xe5   : > { %3733 = vmatpush3.bf16.msra.mxu0 %v4173_v18  ;;  %3606 = vmatprep.subr.bf16.mxu1 %v4174_v25  ;;  %v1539_v18 = vrot.slane %v1537_v10, 1 }
  0xe6   : > { %3734 = vmatprep.subr.bf16.mxu0 %v4175_v29 }
  0xe7   : > { %v1540_v28 = vsel %vm716_vm0, %v1535_v17, %v1539_v18  ;;  %v1543_v35 = vor.u32 %v1541_v19, %v1539_v18  ;;  %v4219_v17 = vld [vmem:[#allocation6 + $0x90] sm:$0xff]   ;;  %v1746_v18 = vrot.slane %v4972_v40, 1 }
  0xe8   : > { %3607 = vmatpush3.bf16.msra.mxu1 %v4174_v25  ;;  %v5011_v25 = vld [vmem:[%s4931_s30 + $0x4] sm:$0xf] }
  0xe9   : > { %3735 = vmatpush3.bf16.msra.mxu0 %v4175_v29  ;;  %3624 = vmatprep.subr.bf16.mxu1 %v4180_v34  ;;  %v3305_v26 = vcombine.low %v639_v24, %v5011_v25  ;;  %v1718_v29 = vld [vmem:[%s4931_s30 + $0x8] sm:$0xe]  ;;  %v5054_v24 = vld [vmem:[%s4931_s30 + $0x38] sm:$0xff]  }
  0xea   : > { %3752 = vmatprep.subr.bf16.mxu0 %v4182_v37  ;;  %v3364_v42 = vcombine.low %v1718_v29, %v4952_v14  ;;  %v4220_v19 = vld [vmem:[#allocation6 + $0x190] sm:$0xff]   ;;  %v761_v29 = vshrl.u32 %v5043_v6, 16 }
  0xeb   : > { %3609 = vmatmul.mubr.bf16.vlgmr.msra.gmra.mrb[0].mxu1 %v4179_v33  ;;  %v4203_v33 = vld [vmem:[%s4931_s30 + $0x38] sm:$0xff]   ;;  %v720_v38 = vshll.u32 %v3305_v26, 16 }
  0xec   : > { %3737 = vmatmul.mubr.bf16.vlgmr.msra.gmra.mrb[0].mxu0 %v1500_v44  ;;  %3625 = vmatpush3.bf16.msra.mxu1 %v4180_v34  ;;  %v4204_v34 = vld [vmem:[#allocation6 + $0x70] sm:$0xff]   ;;  %v733_v44 = vshll.u32 %v5019_v32, 16  ;;  %v1739_v46 = vrot.slane %v3364_v42, 1  ;;  %v4225_v42 = vld [vmem:[#allocation6 + $0xa0] sm:$0xff]  }
  0xed   : > { %3753 = vmatpush3.bf16.msra.mxu0 %v4182_v37  ;;  %3626 = vmatprep.subr.bf16.mxu1 %v4183_v39  ;;  %v718_v37 = vshrl.u32 %v3305_v26, 16  ;;  %v722_v16 = vrot.slane %v720_v38, 1 }
  0xee   : > { %3754 = vmatprep.subr.bf16.mxu0 %v4184_v41  ;;  %3612 = vmatprep.mubr.bf16.mxu1 %v4185_v47  ;;  %v1548_v47 = vsel %vm716_vm0, %v1543_v35, %v1547_v36 }
  0xef   : > { %3740 = vmatprep.mubr.bf16.mxu0 %v1508_v48  ;;  %v4208_v48 = vld [vmem:[#allocation6 + $0x178] sm:$0xff]   ;;  %v723_v50 = vor.u32 %v722_v16, %v718_v37  ;;  %v773_v37 = vshll.u32 %v5054_v24, 16  ;;  %v4226_v16 = vld [vmem:[#allocation6 + $0x1a0] sm:$0xff]  }
  0xf0   : > { %3627 = vmatpush3.bf16.msra.mxu1 %v4183_v39  ;;  %v4206_v39 = vld [vmem:[#allocation6 + $0x170] sm:$0xff]  }
  0xf1   : > { %3755 = vmatpush3.bf16.msra.mxu0 %v4184_v41  ;;  %3628 = vmatprep.subr.bf16.mxu1 %v4188_v52  ;;  %v727_v41 = vrot.slane %v725_v27, 1  ;;  %v4221_v27 = vld [vmem:[#allocation6 + $0x98] sm:$0xff]  }
  0xf2   : > { %3756 = vmatprep.subr.bf16.mxu0 %v4190_v55 }
  0xf3   : > { %3613 = vmatmul.mubr.bf16.gmra.mrb[4].mxu1 %v4187_v51  ;;  %v5027_v51 = vld [vmem:[%s4931_s30 + $0x18] sm:$0xff]   ;;  %v728_v14 = vsel %vm716_vm0, %v723_v50, %v727_v41  ;;  %v731_v54 = vor.u32 %v729_v45, %v727_v41  ;;  %v1750_v41 = vrot.slane %v4986_v58, 1  ;;  %v954_v50 = vld [vmem:[%s4931_s30] sm:$0xe] }
  0xf4   : > { %3741 = vmatmul.mubr.bf16.gmra.mrb[4].mxu0 %v1516_v62  ;;  %3629 = vmatpush3.bf16.msra.mxu1 %v4188_v52  ;;  %v735_v52 = vrot.slane %v733_v44, 1  ;;  %v741_v56 = vshll.u32 %v5027_v51, 16  ;;  %v1744_v62 = vrot.slane %v4966_v31, 1  ;;  %v745_v4 = vshrl.u32 %v5027_v51, 16  ;;  %v4216_v31 = vld [vmem:[#allocation6 + $0x188] sm:$0xff]  }
  0xf5   : > { %3757 = vmatpush3.bf16.msra.mxu0 %v4190_v55  ;;  %3630 = vmatprep.subr.bf16.mxu1 %v4191_v57  ;;  %v1741_v55 = vsel %vm975_vm1, %v1739_v46, %v1740_v30  ;;  %v777_v44 = vshrl.u32 %v5054_v24, 16  ;;  %v775_v46 = vrot.slane %v773_v37, 1 }
  0xf6   : > { %3758 = vmatprep.subr.bf16.mxu0 %v4192_v59  ;;  %3616 = vmatprep.mubr.bf16.mxu1 %v4193_v1  ;;  %v739_v0 = vor.u32 %v737_v53, %v735_v52  ;;  %v743_v1 = vrot.slane %v741_v56, 1  ;;  %v1745_v10 = vsel %vm975_vm1, %v1742_v60, %v1744_v62  ;;  %v1747_v40 = vsel %vm975_vm1, %v1744_v62, %v1746_v18 }
  0xf7   : > { %3744 = vmatprep.mubr.bf16.mxu0 %v1524_v2  ;;  %v736_v2 = vsel %vm716_vm0, %v731_v54, %v735_v52  ;;  %v3322_v53 = vcombine.low %v954_v50, %v5011_v25  ;;  %v1754_v60 = vrot.slane %v5000_v12, 1 }
  0xf8   : > { %3631 = vmatpush3.bf16.msra.mxu1 %v4191_v57  ;;  %v5034_v57 = vld [vmem:[%s4931_s30 + $0x20] sm:$0xff]   ;;  %v744_v7 = vsel %vm716_vm0, %v739_v0, %v743_v1 }
  0xf9   : > { %3759 = vmatpush3.bf16.msra.mxu0 %v4192_v59  ;;  %3632 = vmatprep.subr.bf16.mxu1 %v4196_v5  ;;  %v4213_v59 = vld [vmem:[#allocation6 + $0x80] sm:$0xff]   ;;  %v976_v62 = vrot.slane %v3322_v53, 1 }
  0xfa   : > { %3760 = vmatprep.subr.bf16.mxu0 %v4198_v9 }
  0xfb   : > { %3617 = vmatmul.mubr.bf16.gmra.mrb[8].mxu1 %v4195_v8  ;;  %v753_v8 = vshrl.u32 %v5034_v57, 16 }
  0xfc   : > { %3745 = vmatmul.mubr.bf16.gmra.mrb[8].mxu0 %v1532_v20  ;;  %3633 = vmatpush3.bf16.msra.mxu1 %v4196_v5  ;;  %v749_v5 = vshll.u32 %v5034_v57, 16 }
  0xfd   : > { %3761 = vmatpush3.bf16.msra.mxu0 %v4198_v9  ;;  %3634 = vmatprep.subr.bf16.mxu1 %v4199_v11  ;;  %v757_v9 = vshll.u32 %v5043_v6, 16 }
  0xfe   : > { %3762 = vmatprep.subr.bf16.mxu0 %v4200_v13  ;;  %3620 = vmatprep.mubr.bf16.mxu1 %v4201_v15  ;;  %v5050_v15 = vld [vmem:[%s4931_s30 + $0x30] sm:$0xff]  }
  0xff   : > { %3748 = vmatprep.mubr.bf16.mxu0 %v1540_v28  ;;  %v759_v21 = vrot.slane %v757_v9, 1  ;;  %v1748_v28 = vrot.slane %v4980_v49, 1  ;;  %v765_v30 = vshll.u32 %v5050_v15, 16  ;;  %v769_v36 = vshrl.u32 %v5050_v15, 16  ;;  %v4240_v9 = vld [vmem:[#allocation6 + $0xc8] sm:$0xff]  }
 0x100   : > { %3635 = vmatpush3.bf16.msra.mxu1 %v4199_v11  ;;  %v747_v11 = vor.u32 %v745_v4, %v743_v1  ;;  %v4233_v1 = vld [vmem:[#allocation6 + $0xb8] sm:$0xff]  }
 0x101   : > { %3763 = vmatpush3.bf16.msra.mxu0 %v4200_v13  ;;  %3636 = vmatprep.subr.bf16.mxu1 %v4204_v34  ;;  %v751_v13 = vrot.slane %v749_v5, 1  ;;  %v1749_v49 = vsel %vm975_vm1, %v1746_v18, %v1748_v28  ;;  %v763_v38 = vor.u32 %v761_v29, %v759_v21  ;;  %v1751_v58 = vsel %vm975_vm1, %v1748_v28, %v1750_v41  ;;  %v4236_v4 = vld [vmem:[%s4931_s30 + $0x10] sm:$0xff]   ;;  %v4244_v18 = vld [vmem:[%s4931_s30 + $0x28] sm:$0xff]  }
 0x102   : > { %3764 = vmatprep.subr.bf16.mxu0 %v4206_v39  ;;  %v979_v5 = vrot.slane %v5019_v32, 1  ;;  %v4241_v32 = vld [vmem:[#allocation6 + $0x1c8] sm:$0xff]   ;;  %v4248_v29 = vld [vmem:[%s4931_s30 + $0x30] sm:$0xff]  }
 0x103   : > { %3621 = vmatmul.mubr.bf16.gmra.mrb[12].mxu1 %v4203_v33  ;;  %v755_v20 = vor.u32 %v753_v8, %v751_v13  ;;  %v752_v26 = vsel %vm716_vm0, %v747_v11, %v751_v13  ;;  %v5062_v33 = vld [vmem:[%s4931_s30 + $0x40] ss:$0 sps:$4 sm:$0x11]   ;;  %v4238_v8 = vld [vmem:[%s4931_s30 + $0x18] sm:$0xff]   ;;  %v983_v13 = vrot.slane %v5034_v57, 1 }
 0x104   : > { %3749 = vmatmul.mubr.bf16.gmra.mrb[12].mxu0 %v1548_v47  ;;  %3637 = vmatpush3.bf16.msra.mxu1 %v4204_v34  ;;  %v4222_v34 = vld [vmem:[#allocation6 + $0x198] sm:$0xff]   ;;  %v781_v47 = vshll.u32 %v5062_v33, 16  ;;  %v4242_v11 = vld [vmem:[%s4931_s30 + $0x20] sm:$0xff]  }
 0x105   : > { %3765 = vmatpush3.bf16.msra.mxu0 %v4206_v39  ;;  %3638 = vmatprep.subr.bf16.mxu1 %v4207_v43  ;;  %v760_v35 = vsel %vm716_vm0, %v755_v20, %v759_v21  ;;  %v767_v39 = vrot.slane %v765_v30, 1  ;;  %v4246_v21 = vld [vmem:[#allocation6 + $0xd8] sm:$0xff]   ;;  %v4249_v30 = vld [vmem:[#allocation6 + $0xe0] sm:$0xff]  }
 0x106   : > { %3766 = vmatprep.subr.bf16.mxu0 %v4208_v48  ;;  %3640 = vmatprep.mubr.bf16.mxu1 %v728_v14  ;;  %v4227_v14 = vld [vmem:[#allocation6 + $0xa8] sm:$0xff]   ;;  %v783_v56 = vrot.slane %v781_v47, 1  ;;  %v5096_v57 = vld [vmem:[%s4931_s30 + $0x14] sm:$0xf]  ;;  %v4256_v47 = vld [vmem:[%s4931_s30 + $0x48] sm:$0xff]  }
 0x107   : > { %3768 = vmatprep.mubr.bf16.mxu0 %v1741_v55  ;;  %v771_v45 = vor.u32 %v769_v36, %v767_v39  ;;  %v779_v55 = vor.u32 %v777_v44, %v775_v46  ;;  %v989_v36 = vrot.slane %v5054_v24, 1 }
 0x108   : > { %3639 = vmatpush3.bf16.msra.mxu1 %v4207_v43  ;;  %v1752_v43 = vrot.slane %v4994_v3, 1  ;;  %v4228_v3 = vld [vmem:[#allocation6 + $0x1a8] sm:$0xff]  }
 0x109   : > { %3767 = vmatpush3.bf16.msra.mxu0 %v4208_v48  ;;  %3656 = vmatprep.subr.bf16.mxu1 %v4213_v59  ;;  %v768_v48 = vsel %vm716_vm0, %v763_v38, %v767_v39  ;;  %v776_v52 = vsel %vm716_vm0, %v771_v45, %v775_v46  ;;  %v784_v25 = vsel %vm716_vm0, %v779_v55, %v783_v56  ;;  %v5106_v38 = vld [vmem:[%s4931_s30 + $0x18] sm:$0xff]   ;;  %v5113_v46 = vld [vmem:[%s4931_s30 + $0x20] sm:$0xff]   ;;  %v4260_v55 = vld [vmem:[%s4931_s30 + $0x8] sm:$0xff]  }
 0x10a   : > { %3784 = vmatprep.subr.bf16.mxu0 %v4214_v61  ;;  %v1753_v54 = vsel %vm975_vm1, %v1750_v41, %v1752_v43  ;;  %v1755_v0 = vsel %vm975_vm1, %v1752_v43, %v1754_v60  ;;  %v4253_v39 = vld [vmem:[#allocation6 + $0x1e8] sm:$0xff]   ;;  %v4255_v43 = vld [vmem:[#allocation6 + $0xf0] sm:$0xff]   ;;  %v2252_v45 = vshll.u32 %v5106_v38, 16  ;;  %v2256_v53 = vshrl.u32 %v5106_v38, 16  ;;  %v5126_v60 = vld [vmem:[%s4931_s30 + $0x30] sm:$0xff]  }
 0x10b   : > { %3641 = vmatmul.mubr.bf16.vlgmr.msra.gmra.mrb[0].mxu1 %v736_v2  ;;  %v4234_v2 = vld [vmem:[#allocation6 + $0x1b8] sm:$0xff]   ;;  %v4254_v41 = vld [vmem:[%s4931_s30 + $0x40] sm:$0xff]   ;;  %v2264_v56 = vshrl.u32 %v5113_v46, 16 }
 0x10c   : > { %3769 = vmatmul.mubr.bf16.vlgmr.msra.gmra.mrb[0].mxu0 %v1743_v22  ;;  %3657 = vmatpush3.bf16.msra.mxu1 %v4213_v59  ;;  %v4231_v59 = vld [vmem:[#allocation6 + $0xb0] sm:$0xff]   ;;  %v4239_v22 = vld [vmem:[#allocation6 + $0x1c0] sm:$0xff]  }
 0x10d   : > { %3785 = vmatpush3.bf16.msra.mxu0 %v4214_v61  ;;  %3658 = vmatprep.subr.bf16.mxu1 %v4215_v63  ;;  %v4232_v61 = vld [vmem:[#allocation6 + $0x1b0] sm:$0xff]  }
 0x10e   : > { %3786 = vmatprep.subr.bf16.mxu0 %v4216_v31  ;;  %3644 = vmatprep.mubr.bf16.mxu1 %v744_v7 }
 0x10f   : > { %3772 = vmatprep.mubr.bf16.mxu0 %v1745_v10 }
 0x110   : > { %3659 = vmatpush3.bf16.msra.mxu1 %v4215_v63  ;;  %v977_v63 = vrot.slane %v5007_v23, 1  ;;  %v4237_v23 = vld [vmem:[#allocation6 + $0xc0] sm:$0xff]  }
 0x111   : > { %3787 = vmatpush3.bf16.msra.mxu0 %v4216_v31  ;;  %3660 = vmatprep.subr.bf16.mxu1 %v4219_v17  ;;  %v981_v31 = vrot.slane %v5027_v51, 1  ;;  %v4243_v51 = vld [vmem:[#allocation6 + $0xd0] sm:$0xff]  }
 0x112   : > { %3788 = vmatprep.subr.bf16.mxu0 %v4220_v19  ;;  %v978_v12 = vsel %vm975_vm1, %v976_v62, %v977_v63  ;;  %v980_v7 = vsel %vm975_vm1, %v977_v63, %v979_v5 }
 0x113   : > { %3645 = vmatmul.mubr.bf16.gmra.mrb[4].mxu1 %v752_v26  ;;  %v982_v10 = vsel %vm975_vm1, %v979_v5, %v981_v31  ;;  %v984_v20 = vsel %vm975_vm1, %v981_v31, %v983_v13  ;;  %v2167_v26 = vld [vmem:[%s4931_s30 + $0x10] sm:$0xf]  ;;  %v4267_v5 = vld [vmem:[%s4931_s30 + $0x18] sm:$0xff]  }
 0x114   : > { %3773 = vmatmul.mubr.bf16.gmra.mrb[4].mxu0 %v1747_v40  ;;  %3661 = vmatpush3.bf16.msra.mxu1 %v4219_v17  ;;  %v4245_v17 = vld [vmem:[#allocation6 + $0x1d0] sm:$0xff]   ;;  %v3389_v40 = vcombine.low %v2167_v26, %v5096_v57 }
 0x115   : > { %3789 = vmatpush3.bf16.msra.mxu0 %v4220_v19  ;;  %3662 = vmatprep.subr.bf16.mxu1 %v4221_v27  ;;  %v985_v19 = vrot.slane %v5043_v6, 1  ;;  %v987_v6 = vrot.slane %v5050_v15, 1 }
 0x116   : > { %3790 = vmatprep.subr.bf16.mxu0 %v4222_v34  ;;  %3648 = vmatprep.mubr.bf16.mxu1 %v760_v35  ;;  %v4251_v35 = vld [vmem:[#allocation6 + $0x1e0] sm:$0xff]   ;;  %v2247_v15 = vshll.u32 %v3389_v40, 16 }
 0x117   : > { %3776 = vmatprep.mubr.bf16.mxu0 %v1749_v49  ;;  %v986_v28 = vsel %vm975_vm1, %v983_v13, %v985_v19  ;;  %v988_v37 = vsel %vm975_vm1, %v985_v19, %v987_v6  ;;  %v4252_v49 = vld [vmem:[#allocation6 + $0xe8] sm:$0xff]   ;;  %v990_v24 = vsel %vm975_vm1, %v987_v6, %v989_v36  ;;  %v4271_v13 = vld [vmem:[#allocation6 + $0x210] sm:$0xff]  }
 0x118   : > { %3663 = vmatpush3.bf16.msra.mxu1 %v4221_v27  ;;  %v4247_v27 = vld [vmem:[#allocation6 + $0x1d8] sm:$0xff]   ;;  %v2249_v44 = vrot.slane %v2247_v15, 1  ;;  %v4269_v19 = vld [vmem:[%s4931_s30 + $0x20] sm:$0xff]  }
 0x119   : > { %3791 = vmatpush3.bf16.msra.mxu0 %v4222_v34  ;;  %3664 = vmatprep.subr.bf16.mxu1 %v4225_v42  ;;  %v4250_v34 = vld [vmem:[%s4931_s30 + $0x38] sm:$0xff]   ;;  %v4275_v15 = vld [vmem:[%s4931_s30 + $0x30] sm:$0xff]  }
 0x11a   : > { %3792 = vmatprep.subr.bf16.mxu0 %v4226_v16 }
 0x11b   : > { %3649 = vmatmul.mubr.bf16.gmra.mrb[8].mxu1 %v768_v48  ;;  %v5117_v48 = vld [vmem:[%s4931_s30 + $0x28] sm:$0xff]  }
 0x11c   : > { %3777 = vmatmul.mubr.bf16.gmra.mrb[8].mxu0 %v1751_v58  ;;  %3665 = vmatpush3.bf16.msra.mxu1 %v4225_v42  ;;  %v991_v42 = vrot.slane %v5062_v33, 1  ;;  %v4257_v33 = vld [vmem:[#allocation6 + $0x1f0] sm:$0xff]   ;;  %v4258_v58 = vld [vmem:[#allocation6 + $0xf8] sm:$0xff]   ;;  %v2272_v31 = vshrl.u32 %v5117_v48, 16 }
 0x11d   : > { %3793 = vmatpush3.bf16.msra.mxu0 %v4226_v16  ;;  %3666 = vmatprep.subr.bf16.mxu1 %v4227_v14  ;;  %v2245_v16 = vshrl.u32 %v3389_v40, 16 }
 0x11e   : > { %3794 = vmatprep.subr.bf16.mxu0 %v4228_v3  ;;  %3652 = vmatprep.mubr.bf16.mxu1 %v776_v52  ;;  %v992_v50 = vsel %vm975_vm1, %v989_v36, %v991_v42  ;;  %v2254_v52 = vrot.slane %v2252_v45, 1  ;;  %v4277_v36 = vld [vmem:[#allocation6 + $0x220] sm:$0xff]  }
 0x11f   : > { %3780 = vmatprep.mubr.bf16.mxu0 %v1753_v54  ;;  %v2260_v54 = vshll.u32 %v5113_v46, 16 }
 0x120   : > { %3667 = vmatpush3.bf16.msra.mxu1 %v4227_v14  ;;  %v4259_v14 = vld [vmem:[#allocation6 + $0x1f8] sm:$0xff]   ;;  %v2258_v63 = vor.u32 %v2256_v53, %v2254_v52 }
 0x121   : > { %3795 = vmatpush3.bf16.msra.mxu0 %v4228_v3  ;;  %3668 = vmatprep.subr.bf16.mxu1 %v4231_v59  ;;  %v2250_v3 = vor.u32 %v2249_v44, %v2245_v16  ;;  %v2262_v62 = vrot.slane %v2260_v54, 1  ;;  %v4278_v16 = vld [vmem:[#allocation6 + $0x228] sm:$0xff]   ;;  %v4284_v53 = vld [vmem:[#allocation6 + $0x238] sm:$0xff]   ;;  %v2505_v54 = vrot.slane %v5113_v46, 1 }
 0x122   : > { %3796 = vmatprep.subr.bf16.mxu0 %v4232_v61 }
 0x123   : > { %3653 = vmatmul.mubr.bf16.gmra.mrb[12].mxu1 %v784_v25  ;;  %v4265_v25 = vld [vmem:[#allocation6 + $0x200] sm:$0xff]  }
 0x124   : > { %3781 = vmatmul.mubr.bf16.gmra.mrb[12].mxu0 %v1755_v0  ;;  %3669 = vmatpush3.bf16.msra.mxu1 %v4231_v59  ;;  %v2268_v59 = vshll.u32 %v5117_v48, 16  ;;  %v2266_v0 = vor.u32 %v2264_v56, %v2262_v62 }
 0x125   : > { %3797 = vmatpush3.bf16.msra.mxu0 %v4232_v61  ;;  %3670 = vmatprep.subr.bf16.mxu1 %v4233_v1  ;;  %v2255_v61 = vsel %vm716_vm0, %v2250_v3, %v2254_v52  ;;  %v4281_v3 = vld [vmem:[%s4931_s30 + $0x40] sm:$0xff]  }
 0x126   : > { %3798 = vmatprep.subr.bf16.mxu0 %v4234_v2  ;;  %3672 = vmatprep.mubr.bf16.mxu1 %v978_v12  ;;  %v5131_v12 = vld [vmem:[%s4931_s30 + $0x38] sm:$0xff]  }
 0x127   : > { %3800 = vmatprep.mubr.bf16.mxu0 %v4236_v4  ;;  %v4263_v4 = vld [vmem:[%s4931_s30 + $0x10] sm:$0xff]  }
 0x128   : > { %3671 = vmatpush3.bf16.msra.mxu1 %v4233_v1  ;;  %v2270_v1 = vrot.slane %v2268_v59, 1  ;;  %v2509_v59 = vrot.slane %v5126_v60, 1 }
 0x129   : > { %3799 = vmatpush3.bf16.msra.mxu0 %v4234_v2  ;;  %3688 = vmatprep.subr.bf16.mxu1 %v4237_v23  ;;  %v2276_v2 = vshll.u32 %v5126_v60, 16 }
 0x12a   : > { %3816 = vmatprep.subr.bf16.mxu0 %v4239_v22 }
 0x12b   : > { %3673 = vmatmul.mubr.bf16.vlgmr.msra.gmra.mrb[0].mxu1 %v980_v7  ;;  %v2271_v7 = vsel %vm716_vm0, %v2266_v0, %v2270_v1 }
 0x12c   : > { %3801 = vmatmul.mubr.bf16.vlgmr.msra.gmra.mrb[0].mxu0 %v4238_v8  ;;  %3689 = vmatpush3.bf16.msra.mxu1 %v4237_v23  ;;  %v2263_v23 = vsel %vm716_vm0, %v2258_v63, %v2262_v62  ;;  %v2278_v8 = vrot.slane %v2276_v2, 1  ;;  %v4286_v2 = vld [vmem:[#allocation11] sm:$0xff]  }
 0x12d   : > { %3817 = vmatpush3.bf16.msra.mxu0 %v4239_v22  ;;  %3690 = vmatprep.subr.bf16.mxu1 %v4240_v9  ;;  %v4266_v22 = vld [vmem:[#allocation6 + $0x208] sm:$0xff]  }
 0x12e   : > { %3818 = vmatprep.subr.bf16.mxu0 %v4241_v32  ;;  %3676 = vmatprep.mubr.bf16.mxu1 %v982_v10  ;;  %v5141_v10 = vld [vmem:[%s4931_s30 + $0x40] sm:$0xff]  }
 0x12f   : > { %3804 = vmatprep.mubr.bf16.mxu0 %v4242_v11  ;;  %v2274_v11 = vor.u32 %v2272_v31, %v2270_v1  ;;  %v2296_v6 = vshrl.u32 %v5141_v10, 16  ;;  %v2513_v46 = vrot.slane %v5141_v10, 1  ;;  %v4292_v31 = vld [vmem:[#allocation11 + $0x30] sm:$0xff]  }
 0x130   : > { %3691 = vmatpush3.bf16.msra.mxu1 %v4240_v9  ;;  %v2280_v9 = vshrl.u32 %v5126_v60, 16 }
 0x131   : > { %3819 = vmatpush3.bf16.msra.mxu0 %v4241_v32  ;;  %3692 = vmatprep.subr.bf16.mxu1 %v4243_v51  ;;  %v2284_v32 = vshll.u32 %v5131_v12, 16  ;;  %v2279_v26 = vsel %vm716_vm0, %v2274_v11, %v2278_v8 }
 0x132   : > { %3820 = vmatprep.subr.bf16.mxu0 %v4245_v17 }
 0x133   : > { %3677 = vmatmul.mubr.bf16.gmra.mrb[4].mxu1 %v984_v20  ;;  %v4273_v20 = vld [vmem:[%s4931_s30 + $0x28] sm:$0xff]  }
 0x134   : > { %3805 = vmatmul.mubr.bf16.gmra.mrb[4].mxu0 %v4244_v18  ;;  %3693 = vmatpush3.bf16.msra.mxu1 %v4243_v51  ;;  %v2282_v51 = vor.u32 %v2280_v9, %v2278_v8  ;;  %v5144_v18 = vld [vmem:[%s4931_s30 + $0x48] sm:$0xff]  }
 0x135   : > { %3821 = vmatpush3.bf16.msra.mxu0 %v4245_v17  ;;  %3694 = vmatprep.subr.bf16.mxu1 %v4246_v21  ;;  %v2286_v17 = vrot.slane %v2284_v32, 1 }
 0x136   : > { %3822 = vmatprep.subr.bf16.mxu0 %v4247_v27  ;;  %3680 = vmatprep.mubr.bf16.mxu1 %v986_v28  ;;  %v4272_v28 = vld [vmem:[#allocation6 + $0x218] sm:$0xff]  }
 0x137   : > { %3808 = vmatprep.mubr.bf16.mxu0 %v4248_v29  ;;  %v2287_v29 = vsel %vm716_vm0, %v2282_v51, %v2286_v17 }
 0x138   : > { %3695 = vmatpush3.bf16.msra.mxu1 %v4246_v21  ;;  %v2292_v21 = vshll.u32 %v5141_v10, 16 }
 0x139   : > { %3823 = vmatpush3.bf16.msra.mxu0 %v4247_v27  ;;  %3696 = vmatprep.subr.bf16.mxu1 %v4249_v30  ;;  %v2288_v27 = vshrl.u32 %v5131_v12, 16 }
 0x13a   : > { %3824 = vmatprep.subr.bf16.mxu0 %v4251_v35  ;;  %v2294_v40 = vrot.slane %v2292_v21, 1 }
 0x13b   : > { %3681 = vmatmul.mubr.bf16.gmra.mrb[8].mxu1 %v988_v37 }
 0x13c   : > { %3809 = vmatmul.mubr.bf16.gmra.mrb[8].mxu0 %v4250_v34  ;;  %3697 = vmatpush3.bf16.msra.mxu1 %v4249_v30  ;;  %v2300_v30 = vshll.u32 %v5144_v18, 16  ;;  %v2290_v34 = vor.u32 %v2288_v27, %v2286_v17  ;;  %v2298_v37 = vor.u32 %v2296_v6, %v2294_v40 }
 0x13d   : > { %3825 = vmatpush3.bf16.msra.mxu0 %v4251_v35  ;;  %3698 = vmatprep.subr.bf16.mxu1 %v4252_v49  ;;  %v4282_v35 = vld [vmem:[%s4931_s30 + $0x50] ss:$0 sps:$4 sm:$0x11]  }
 0x13e   : > { %3826 = vmatprep.subr.bf16.mxu0 %v4253_v39  ;;  %3684 = vmatprep.mubr.bf16.mxu1 %v990_v24  ;;  %v2295_v42 = vsel %vm716_vm0, %v2290_v34, %v2294_v40  ;;  %v2304_v24 = vshrl.u32 %v5144_v18, 16  ;;  %v2517_v1 = vrot.slane %v4282_v35, 1 }
 0x13f   : > { %3812 = vmatprep.mubr.bf16.mxu0 %v4254_v41  ;;  %v4279_v41 = vld [vmem:[%s4931_s30 + $0x38] sm:$0xff]  }
 0x140   : > { %3699 = vmatpush3.bf16.msra.mxu1 %v4252_v49  ;;  %v2302_v49 = vrot.slane %v2300_v30, 1  ;;  %v5187_v30 = vld [vmem:[#allocation8] ss:$0 sm:$0xff] }
 0x141   : > { %3827 = vmatpush3.bf16.msra.mxu0 %v4253_v39  ;;  %3700 = vmatprep.subr.bf16.mxu1 %v4255_v43  ;;  %v2481_v39 = vld [vmem:[%s4931_s30 + $0x10] sm:$0xe] }
 0x142   : > { %3828 = vmatprep.subr.bf16.mxu0 %v4257_v33  ;;  %v2303_v44 = vsel %vm716_vm0, %v2298_v37, %v2302_v49  ;;  %v3406_v45 = vcombine.low %v2481_v39, %v5096_v57 }
 0x143   : > { %3685 = vmatmul.mubr.bf16.gmra.mrb[12].mxu1 %v992_v50  ;;  %v4283_v50 = vld [vmem:[#allocation6 + $0x230] sm:$0xff]  }
 0x144   : > { %3813 = vmatmul.mubr.bf16.gmra.mrb[12].mxu0 %v4256_v47  ;;  %3701 = vmatpush3.bf16.msra.mxu1 %v4255_v43  ;;  %v2308_v43 = vshll.u32 %v4282_v35, 16  ;;  %v2306_v47 = vor.u32 %v2304_v24, %v2302_v49  ;;  %v5189_v35 = vld [vmem:[#allocation9] ss:$0 sm:$0xff] }
 0x145   : > { %3829 = vmatpush3.bf16.msra.mxu0 %v4257_v33  ;;  %3702 = vmatprep.subr.bf16.mxu1 %v4258_v58 }
 0x146   : > { %3830 = vmatprep.subr.bf16.mxu0 %v4259_v14  ;;  %3704 = vmatprep.mubr.bf16.mxu1 %v4260_v55  ;;  %v2310_v33 = vrot.slane %v2308_v43, 1  ;;  %v2507_v55 = vrot.slane %v5117_v48, 1  ;;  %v2515_v48 = vrot.slane %v5144_v18, 1 }
 0x147   : > { %3832 = vmatprep.mubr.bf16.mxu0 %v2255_v61  ;;  %v2511_v61 = vrot.slane %v5131_v12, 1  ;;  %v4287_v12 = vld [vmem:[#allocation11 + $0x8] sm:$0xff]  }
 0x148   : > { %3703 = vmatpush3.bf16.msra.mxu1 %v4258_v58  ;;  %v2502_v58 = vrot.slane %v3406_v45, 1  ;;  %v2311_v52 = vsel %vm716_vm0, %v2306_v47, %v2310_v33  ;;  %v2508_v56 = vsel %vm975_vm1, %v2505_v54, %v2507_v55  ;;  %v2510_v62 = vsel %vm975_vm1, %v2507_v55, %v2509_v59 }
 0x149   : > { %3831 = vmatpush3.bf16.msra.mxu0 %v4259_v14  ;;  %v2503_v14 = vrot.slane %v5106_v38, 1  ;;  %v2512_v63 = vsel %vm975_vm1, %v2509_v59, %v2511_v61  ;;  %v2516_v0 = vsel %vm975_vm1, %v2513_v46, %v2515_v48  ;;  %v2518_v60 = vsel %vm975_vm1, %v2515_v48, %v2517_v1  ;;  %3880 = vmatprep.subr.bf16.mxu1 %v4286_v2 }
 0x14a   : > { %3848 = vmatprep.subr.bf16.mxu0 %v4265_v25 }
 0x14b   : > { %3705 = vmatmul.mubr.bf16.vlgmr.msra.gmra.mrb[0].mxu1 %v4263_v4  ;;  %v2504_v57 = vsel %vm975_vm1, %v2502_v58, %v2503_v14  ;;  %v2506_v38 = vsel %vm975_vm1, %v2503_v14, %v2505_v54  ;;  %v4288_v4 = vld [vmem:[#allocation11 + $0x10] sm:$0xff]  }
 0x14c   : > { %3833 = vmatmul.mubr.bf16.vlgmr.msra.gmra.mrb[0].mxu0 %v2263_v23  ;;  %3708 = vmatprep.mubr.bf16.mxu1 %v4267_v5  ;;  %v4289_v5 = vld [vmem:[#allocation11 + $0x18] sm:$0xff]   ;;  %v4290_v23 = vld [vmem:[#allocation11 + $0x20] sm:$0xff]  }
 0x14d   : > { %3849 = vmatpush3.bf16.msra.mxu0 %v4265_v25  ;;  %3836 = vmatprep.mubr.bf16.mxu0 %v2271_v7  ;;  %v2514_v25 = vsel %vm975_vm1, %v2511_v61, %v2513_v46  ;;  %v4293_v7 = vld [vmem:[#allocation11 + $0x38] sm:$0xff]  }
 0x14e   : > { %3850 = vmatprep.subr.bf16.mxu0 %v4266_v22  ;;  %3881 = vmatpush3.bf16.msra.mxu1 %v4286_v2 }
 0x14f   : > { %3882 = vmatprep.subr.bf16.mxu1 %v4287_v12 }
 0x151   : > { %3851 = vmatpush3.bf16.msra.mxu0 %v4266_v22  ;;  %v4291_v22 = vld [vmem:[#allocation11 + $0x28] sm:$0xff]  }
 0x152   : > { %3852 = vmatprep.subr.bf16.mxu0 %v4271_v13  ;;  %3883 = vmatpush3.bf16.msra.mxu1 %v4287_v12 }
 0x153   : > { %3709 = vmatmul.mubr.bf16.gmra.mrb[4].mxu1 %v4269_v19  ;;  %3884 = vmatprep.subr.bf16.mxu1 %v4288_v4 }
 0x154   : > { %3837 = vmatmul.mubr.bf16.gmra.mrb[4].mxu0 %v2279_v26  ;;  %3712 = vmatprep.mubr.bf16.mxu1 %v4273_v20 }
 0x155   : > { %3853 = vmatpush3.bf16.msra.mxu0 %v4271_v13  ;;  %3840 = vmatprep.mubr.bf16.mxu0 %v2287_v29 }
 0x156   : > { %3854 = vmatprep.subr.bf16.mxu0 %v4272_v28  ;;  %3885 = vmatpush3.bf16.msra.mxu1 %v4288_v4 }
 0x157   : > { %3886 = vmatprep.subr.bf16.mxu1 %v4289_v5 }
 0x159   : > { %3855 = vmatpush3.bf16.msra.mxu0 %v4272_v28 }
 0x15a   : > { %3856 = vmatprep.subr.bf16.mxu0 %v4277_v36  ;;  %3887 = vmatpush3.bf16.msra.mxu1 %v4289_v5 }
 0x15b   : > { %3713 = vmatmul.mubr.bf16.gmra.mrb[8].mxu1 %v4275_v15  ;;  %3888 = vmatprep.subr.bf16.mxu1 %v4290_v23 }
 0x15c   : > { %3841 = vmatmul.mubr.bf16.gmra.mrb[8].mxu0 %v2295_v42  ;;  %3716 = vmatprep.mubr.bf16.mxu1 %v4279_v41 }
 0x15d   : > { %3857 = vmatpush3.bf16.msra.mxu0 %v4277_v36  ;;  %3844 = vmatprep.mubr.bf16.mxu0 %v2303_v44 }
 0x15e   : > { %3858 = vmatprep.subr.bf16.mxu0 %v4278_v16  ;;  %3889 = vmatpush3.bf16.msra.mxu1 %v4290_v23 }
 0x15f   : > { %3890 = vmatprep.subr.bf16.mxu1 %v4291_v22 }
 0x161   : > { %3859 = vmatpush3.bf16.msra.mxu0 %v4278_v16 }
 0x162   : > { %3860 = vmatprep.subr.bf16.mxu0 %v4283_v50  ;;  %3891 = vmatpush3.bf16.msra.mxu1 %v4291_v22 }
 0x163   : > { %3717 = vmatmul.mubr.bf16.gmra.mrb[12].mxu1 %v4281_v3  ;;  %3892 = vmatprep.subr.bf16.mxu1 %v4292_v31 }
 0x164   : > { %3845 = vmatmul.mubr.bf16.gmra.mrb[12].mxu0 %v2311_v52 }
 0x165   : > { %3861 = vmatpush3.bf16.msra.mxu0 %v4283_v50  ;;  %3864 = vmatprep.mubr.bf16.mxu0 %v2504_v57 }
 0x166   : > { %3862 = vmatprep.subr.bf16.mxu0 %v4284_v53  ;;  %3893 = vmatpush3.bf16.msra.mxu1 %v4292_v31 }
 0x167   : > { %3894 = vmatprep.subr.bf16.mxu1 %v4293_v7 }
 0x169   : > { %3863 = vmatpush3.bf16.msra.mxu0 %v4284_v53 }
 0x16a   : > { %3895 = vmatpush3.bf16.msra.mxu1 %v4293_v7 }
 0x16c   : > { %3865 = vmatmul.mubr.bf16.vlgmr.msra.gmra.mrb[0].mxu0 %v2506_v38 }
 0x16d   : > { %3868 = vmatprep.mubr.bf16.mxu0 %v2508_v56 }
 0x174   : > { %3869 = vmatmul.mubr.bf16.gmra.mrb[4].mxu0 %v2510_v62 }
 0x175   : > { %3872 = vmatprep.mubr.bf16.mxu0 %v2512_v63 }
 0x17c   : > { %3873 = vmatmul.mubr.bf16.gmra.mrb[8].mxu0 %v2514_v25 }
 0x17d   : > { %3876 = vmatprep.mubr.bf16.mxu0 %v2516_v0 }
 0x184   : > { %3877 = vmatmul.mubr.bf16.gmra.mrb[12].mxu0 %v2518_v60 }
 0x21e   : > { %v3706_v8 = vpop.f32.mrb[0].mxu1 }
 0x21f   : > { %v1325_v9 = vpop.f32.mrb[1].mxu1 }
 0x220   : > { %v3707_v32 = vpop.f32.mrb[2].mxu1 }
 0x221   : > { %v1328_v10 = vpop.f32.mrb[3].mxu1 }
 0x226   : > { %v3710_v11 = vpop.f32.mrb[4].mxu1 }
 0x227   : > { %v1341_v13 = vpop.f32.mrb[5].mxu1 }
 0x228   : > { %v3711_v51 = vpop.f32.mrb[6].mxu1 }
 0x229   : > { %v1344_v17 = vpop.f32.mrb[7].mxu1 }
 0x22e   : > { %v3714_v18 = vpop.f32.mrb[8].mxu1 }
 0x22f   : > { %v1357_v19 = vpop.f32.mrb[9].mxu1 }
 0x230   : > { %v3715_v20 = vpop.f32.mrb[10].mxu1 }
 0x231   : > { %v1360_v21 = vpop.f32.mrb[11].mxu1 }
 0x236   : > { %v5179_v26 = vpop.f32.mrb[12].mxu1 }
 0x237   : > { %v5181_v27 = vpop.f32.mrb[13].mxu1 }
 0x238   : > { %v5183_v28 = vpop.f32.mrb[14].mxu1 }
 0x239   : > { %v5185_v29 = vpop.f32.mrb[15].mxu1 }
 0x23f   : > { %v3866_v6 = vpop.f32.mrb[0].mxu0 }
 0x240   : > { %v3912_v40 = vadd.f32 %v3866_v6, %v3706_v8  ;;  %v2609_v34 = vpop.f32.mrb[1].mxu0 }
 0x241   : > { %v3913_v36 = vadd.f32 %v2609_v34, %v1325_v9  ;;  %v3867_v37 = vpop.f32.mrb[2].mxu0 }
 0x242   : > { %v2720_v49 = vmul.f32 %v3912_v40, %v5187_v30  ;;  %v3914_v15 = vadd.f32 %v3867_v37, %v3707_v32  ;;  %v2612_v39 = vpop.f32.mrb[3].mxu0 }
 0x243   : > { %v2718_v41 = vmul.f32 %v3913_v36, %v5187_v30  ;;  %v3915_v42 = vadd.f32 %v2612_v39, %v1328_v10 }
 0x244   : > { %v2743_v24 = vadd.f32 %v5189_v35, %v2720_v49  ;;  %v2721_v43 = vmul.f32 %v3914_v15, %v5187_v30 }
 0x245   : > { %v2741_v16 = vadd.f32 %v5189_v35, %v2718_v41  ;;  %v2719_v44 = vmul.f32 %v3915_v42, %v5187_v30 }
 0x246   : > { %v2744_v45 = vadd.f32 %v5189_v35, %v2721_v43  ;;  %v2759_v50 = vmax.f32 %v2743_v24, 0.0 }
 0x247   : > { %v2742_v47 = vadd.f32 %v5189_v35, %v2719_v44  ;;  %v3870_v33 = vpop.f32.mrb[4].mxu0  ;;  %v2757_v52 = vmax.f32 %v2741_v16, 0.0 }
 0x248   : > { %v2760_v58 = vmax.f32 %v2744_v45, 0.0  ;;  %v3916_v14 = vadd.f32 %v3870_v33, %v3710_v11  ;;  %v2625_v3 = vpop.f32.mrb[5].mxu0 }
 0x249   : > { %v2758_v53 = vmax.f32 %v2742_v47, 0.0  ;;  %v3917_v57 = vadd.f32 %v2625_v3, %v1341_v13  ;;  %v3871_v54 = vpop.f32.mrb[6].mxu0 }
 0x24a   : > { %v2774_v55 = vpack.c.bf16 %v2760_v58, %v2759_v50  ;;  %v2724_v38 = vmul.f32 %v3916_v14, %v5187_v30  ;;  %v3918_v56 = vadd.f32 %v3871_v54, %v3711_v51  ;;  %v2628_v59 = vpop.f32.mrb[7].mxu0 }
 0x24b   : > { %v2722_v61 = vmul.f32 %v3917_v57, %v5187_v30  ;;  %v3919_v62 = vadd.f32 %v2628_v59, %v1344_v17  ;;  %v2773_v63 = vpack.c.bf16 %v2758_v53, %v2757_v52 }
 0x24c   : > { %v2747_v46 = vadd.f32 %v5189_v35, %v2724_v38  ;;  %v2725_v48 = vmul.f32 %v3918_v56, %v5187_v30  ;;  %v3417_v38 = vld [vmem:[#allocation12] ss:$0 sm:$0xff] }
 0x24d   : > { %v2745_v25 = vadd.f32 %v5189_v35, %v2722_v61  ;;  %v2723_v0 = vmul.f32 %v3919_v62, %v5187_v30  ;;  %3896 = vmatprep.mubr.bf16.mxu1 %v2773_v63 }
 0x24e   : > { %v2748_v1 = vadd.f32 %v5189_v35, %v2725_v48  ;;  %3897 = vmatmul.mubr.bf16.vlgmr.msra.gmra.mrb[16].mxu1 %v2774_v55  ;;  %v2763_v12 = vmax.f32 %v2747_v46, 0.0 }
 0x24f   : > { %v2746_v60 = vadd.f32 %v5189_v35, %v2723_v0  ;;  %v3874_v2 = vpop.f32.mrb[8].mxu0  ;;  %v2761_v22 = vmax.f32 %v2745_v25, 0.0 }
 0x250   : > { %v2764_v4 = vmax.f32 %v2748_v1, 0.0  ;;  %v3920_v5 = vadd.f32 %v3874_v2, %v3714_v18  ;;  %v2641_v23 = vpop.f32.mrb[9].mxu0 }
 0x251   : > { %v2762_v31 = vmax.f32 %v2746_v60, 0.0  ;;  %v3921_v7 = vadd.f32 %v2641_v23, %v1357_v19  ;;  %v3875_v8 = vpop.f32.mrb[10].mxu0 }
 0x252   : > { %v2728_v9 = vmul.f32 %v3920_v5, %v5187_v30  ;;  %v3922_v32 = vadd.f32 %v3875_v8, %v3715_v20  ;;  %v2644_v10 = vpop.f32.mrb[11].mxu0  ;;  %v2776_v11 = vpack.c.bf16 %v2764_v4, %v2763_v12 }
 0x253   : > { %v2726_v13 = vmul.f32 %v3921_v7, %v5187_v30  ;;  %v3923_v51 = vadd.f32 %v2644_v10, %v1360_v21  ;;  %v2775_v17 = vpack.c.bf16 %v2762_v31, %v2761_v22 }
 0x254   : > { %v2751_v6 = vadd.f32 %v5189_v35, %v2728_v9  ;;  %v2729_v40 = vmul.f32 %v3922_v32, %v5187_v30 }
 0x255   : > { %v2749_v18 = vadd.f32 %v5189_v35, %v2726_v13  ;;  %v2727_v34 = vmul.f32 %v3923_v51, %v5187_v30  ;;  %3900 = vmatprep.mubr.bf16.mxu1 %v2775_v17 }
 0x256   : > { %v2752_v19 = vadd.f32 %v5189_v35, %v2729_v40  ;;  %3901 = vmatmul.mubr.bf16.gmra.mrb[20].mxu1 %v2776_v11  ;;  %v2767_v37 = vmax.f32 %v2751_v6, 0.0 }
 0x257   : > { %v2750_v20 = vadd.f32 %v5189_v35, %v2727_v34  ;;  %v3878_v36 = vpop.f32.mrb[12].mxu0  ;;  %v2765_v39 = vmax.f32 %v2749_v18, 0.0 }
 0x258   : > { %v2768_v49 = vmax.f32 %v2752_v19, 0.0  ;;  %v3924_v21 = vadd.f32 %v3878_v36, %v5179_v26  ;;  %v2657_v15 = vpop.f32.mrb[13].mxu0 }
 0x259   : > { %v2766_v41 = vmax.f32 %v2750_v20, 0.0  ;;  %v3925_v42 = vadd.f32 %v2657_v15, %v5181_v27  ;;  %v3879_v24 = vpop.f32.mrb[14].mxu0 }
 0x25a   : > { %v2732_v43 = vmul.f32 %v3924_v21, %v5187_v30  ;;  %v3926_v16 = vadd.f32 %v3879_v24, %v5183_v28  ;;  %v2660_v44 = vpop.f32.mrb[15].mxu0  ;;  %v2778_v45 = vpack.c.bf16 %v2768_v49, %v2767_v37 }
 0x25b   : > { %v2730_v47 = vmul.f32 %v3925_v42, %v5187_v30  ;;  %v3927_v33 = vadd.f32 %v2660_v44, %v5185_v29  ;;  %v2777_v50 = vpack.c.bf16 %v2766_v41, %v2765_v39 }
 0x25c   : > { %v2755_v58 = vadd.f32 %v5189_v35, %v2732_v43  ;;  %v2733_v26 = vmul.f32 %v3926_v16, %v5187_v30 }
 0x25d   : > { %v2753_v14 = vadd.f32 %v5189_v35, %v2730_v47  ;;  %v2731_v27 = vmul.f32 %v3927_v33, %v5187_v30  ;;  %3904 = vmatprep.mubr.bf16.mxu1 %v2777_v50 }
 0x25e   : > { %v2756_v3 = vadd.f32 %v5189_v35, %v2733_v26  ;;  %3905 = vmatmul.mubr.bf16.gmra.mrb[24].mxu1 %v2778_v45  ;;  %v2771_v52 = vmax.f32 %v2755_v58, 0.0 }
 0x25f   : > { %v2754_v28 = vadd.f32 %v5189_v35, %v2731_v27  ;;  %v2769_v57 = vmax.f32 %v2753_v14, 0.0 }
 0x260   : > { %v2772_v53 = vmax.f32 %v2756_v3, 0.0 }
 0x261   : > { %v2770_v54 = vmax.f32 %v2754_v28, 0.0 }
 0x262   : > { %v2780_v29 = vpack.c.bf16 %v2772_v53, %v2771_v52 }
 0x263   : > { %v2779_v55 = vpack.c.bf16 %v2770_v54, %v2769_v57 }
 0x265   : > { %3908 = vmatprep.mubr.bf16.mxu1 %v2779_v55 }
 0x266   : > { %3909 = vmatmul.mubr.bf16.gmra.mrb[28].mxu1 %v2780_v29 }
 0x321   : > { %v3898_v56 = vpop.f32.mrb[16].mxu1 }
 0x322   : > { %v2895_v59 = vadd.f32 %v3898_v56, %v3417_v38  ;;  %v2886_v61 = vpop.f32.mrb[17].mxu1 }
 0x323   : > { %v2887_v62 = vadd.f32 %v3417_v38, %v2886_v61  ;;  %v3899_v30 = vpop.f32.mrb[18].mxu1 }
 0x324   : > { %2953 = vmax.xlane.f32.xlu1 %v2895_v59  ;;  %v2889_v63 = vpop.f32.mrb[19].mxu1  ;;  %v2898_v46 = vadd.f32 %v3899_v30, %v3417_v38 }
 0x325   : > { %2949 = vmax.xlane.f32.xlu0 %v2887_v62  ;;  %v2890_v48 = vadd.f32 %v3417_v38, %v2889_v63 }
 0x328   : > { %2955 = vmax.xlane.f32.xlu1 %v2898_v46 }
 0x329   : > { %v3902_v35 = vpop.f32.mrb[20].mxu1  ;;  %2951 = vmax.xlane.f32.xlu0 %v2890_v48 }
 0x32a   : > { %v2911_v25 = vadd.f32 %v3902_v35, %v3417_v38  ;;  %v2902_v0 = vpop.f32.mrb[21].mxu1 }
 0x32b   : > { %v3903_v1 = vpop.f32.mrb[22].mxu1  ;;  %v2903_v12 = vadd.f32 %v3417_v38, %v2902_v0 }
 0x32c   : > { %v2914_v60 = vadd.f32 %v3903_v1, %v3417_v38  ;;  %v2905_v2 = vpop.f32.mrb[23].mxu1 }
 0x32d   : > { %2961 = vmax.xlane.f32.xlu0 %v2911_v25  ;;  %v2906_v4 = vadd.f32 %v3417_v38, %v2905_v2 }
 0x32e   : > { %2963 = vmax.xlane.f32.xlu1 %v2914_v60 }
 0x331   : > { %v3906_v5 = vpop.f32.mrb[24].mxu1  ;;  %2957 = vmax.xlane.f32.xlu0 %v2903_v12 }
 0x332   : > { %v2927_v23 = vadd.f32 %v3906_v5, %v3417_v38  ;;  %v2918_v22 = vpop.f32.mrb[25].mxu1  ;;  %2959 = vmax.xlane.f32.xlu1 %v2906_v4 }
 0x333   : > { %v3907_v31 = vpop.f32.mrb[26].mxu1  ;;  %v2919_v9 = vadd.f32 %v3417_v38, %v2918_v22 }
 0x334   : > { %v2930_v7 = vadd.f32 %v3907_v31, %v3417_v38  ;;  %v2921_v8 = vpop.f32.mrb[27].mxu1 }
 0x335   : > { %2969 = vmax.xlane.f32.xlu0 %v2927_v23  ;;  %v5227_v32 = vadd.f32 %v3417_v38, %v2921_v8 }
 0x336   : > { %2971 = vmax.xlane.f32.xlu1 %v2930_v7 }
 0x339   : > { %2965 = vmax.xlane.f32.xlu0 %v2919_v9  ;;  %v3910_v10 = vpop.f32.mrb[28].mxu1 }
 0x33a   : > { %2967 = vmax.xlane.f32.xlu1 %v5227_v32  ;;  %v2934_v11 = vpop.f32.mrb[29].mxu1  ;;  %v5235_v40 = vadd.f32 %v3910_v10, %v3417_v38 }
 0x33b   : > { %v5230_v13 = vadd.f32 %v3417_v38, %v2934_v11  ;;  %v3911_v51 = vpop.f32.mrb[30].mxu1 }
 0x33c   : > { %v2937_v17 = vpop.f32.mrb[31].mxu1  ;;  %v5238_v18 = vadd.f32 %v3911_v51, %v3417_v38 }
 0x33d   : > { %v5232_v6 = vadd.f32 %v3417_v38, %v2937_v17  ;;  %2973 = vmax.xlane.f32.xlu0 %v5230_v13 }
 0x33f   : > { %2975 = vmax.xlane.f32.xlu1 %v5232_v6 }
 0x341   : > { %2977 = vmax.xlane.f32.xlu0 %v5235_v40 }
 0x343   : > { %2979 = vmax.xlane.f32.xlu1 %v5238_v18 }
 0x3b1   : > { %v2954_v34 = vpop.xlane.xlu1 %2953 }
 0x3b2   : > { %v5242_v19 = vsub.f32 %v2895_v59, %v2954_v34  ;;  %v2950_v20 = vpop.xlane.xlu0 %2949 }
 0x3b3   : > { %v5244_v36 = vsub.f32 %v2887_v62, %v2950_v20 }
 0x3b4   : > { %v3001_v37 = vmul.f32 1.442695, %v5242_v19 }
 0x3b5   : > { %v2997_v49 = vmul.f32 1.442695, %v5244_v36  ;;  %v2956_v21 = vpop.xlane.xlu1 %2955 }
 0x3b6   : > { %4294 = vpow2.f32 %v3001_v37  ;;  %v5248_v15 = vsub.f32 %v2898_v46, %v2956_v21  ;;  %v2952_v39 = vpop.xlane.xlu0 %2951 }
 0x3b7   : > { %v5250_v41 = vsub.f32 %v2890_v48, %v2952_v39  ;;  %4296 = vpow2.f32 %v2997_v49 }
 0x3b8   : > { %v3003_v42 = vmul.f32 1.442695, %v5248_v15 }
 0x3b9   : > { %v2999_v24 = vmul.f32 1.442695, %v5250_v41 }
 0x3ba   : > { %4298 = vpow2.f32 %v3003_v42  ;;  %v2962_v43 = vpop.xlane.xlu0 %2961 }
 0x3bb   : > { %v5254_v16 = vsub.f32 %v2911_v25, %v2962_v43  ;;  %v2964_v44 = vpop.xlane.xlu1 %2963  ;;  %4300 = vpow2.f32 %v2999_v24 }
 0x3bc   : > { %v5256_v45 = vsub.f32 %v2914_v60, %v2964_v44 }
 0x3bd   : > { %v3009_v47 = vmul.f32 1.442695, %v5254_v16 }
 0x3be   : > { %v3011_v33 = vmul.f32 1.442695, %v5256_v45  ;;  %v2958_v50 = vpop.xlane.xlu0 %2957 }
 0x3bf   : > { %4302 = vpow2.f32 %v3009_v47  ;;  %v5260_v58 = vsub.f32 %v2903_v12, %v2958_v50  ;;  %v2960_v26 = vpop.xlane.xlu1 %2959 }
 0x3c0   : > { %v4295_v14 = vpop.eup %4294  ;;  %v5262_v27 = vsub.f32 %v2906_v4, %v2960_v26  ;;  %4304 = vpow2.f32 %v3011_v33 }
 0x3c1   : > { %v3005_v3 = vmul.f32 1.442695, %v5260_v58  ;;  %3033 = vadd.xlane.f32.xlu0 %v4295_v14  ;;  %v4297_v53 = vpop.eup %4296 }
 0x3c2   : > { %v3007_v28 = vmul.f32 1.442695, %v5262_v27  ;;  %v2970_v52 = vpop.xlane.xlu0 %2969 }
 0x3c3   : > { %4306 = vpow2.f32 %v3005_v3  ;;  %v5266_v57 = vsub.f32 %v2927_v23, %v2970_v52  ;;  %v2972_v54 = vpop.xlane.xlu1 %2971 }
 0x3c4   : > { %v4299_v29 = vpop.eup %4298  ;;  %v5268_v55 = vsub.f32 %v2930_v7, %v2972_v54  ;;  %4308 = vpow2.f32 %v3007_v28 }
 0x3c5   : > { %v3017_v38 = vmul.f32 1.442695, %v5266_v57  ;;  %3035 = vadd.xlane.f32.xlu1 %v4299_v29  ;;  %3029 = vadd.xlane.f32.xlu0 %v4297_v53  ;;  %v4301_v30 = vpop.eup %4300 }
 0x3c6   : > { %v3019_v56 = vmul.f32 1.442695, %v5268_v55  ;;  %v2966_v59 = vpop.xlane.xlu0 %2965 }
 0x3c7   : > { %4310 = vpow2.f32 %v3017_v38  ;;  %v5272_v61 = vsub.f32 %v2919_v9, %v2966_v59  ;;  %v2968_v62 = vpop.xlane.xlu1 %2967 }
 0x3c8   : > { %v5275_v63 = vsub.f32 %v5227_v32, %v2968_v62  ;;  %4312 = vpow2.f32 %v3019_v56 }
 0x3c9   : > { %v4303_v46 = vpop.eup %4302  ;;  %v3013_v48 = vmul.f32 1.442695, %v5272_v61  ;;  %3031 = vadd.xlane.f32.xlu1 %v4301_v30 }
 0x3ca   : > { %v3015_v35 = vmul.f32 1.442695, %v5275_v63  ;;  %3041 = vadd.xlane.f32.xlu0 %v4303_v46  ;;  %v2974_v25 = vpop.xlane.xlu0 %2973  ;;  %v4305_v1 = vpop.eup %4304 }
 0x3cb   : > { %4314 = vpow2.f32 %v3013_v48  ;;  %v5280_v0 = vsub.f32 %v5230_v13, %v2974_v25 }
 0x3cc   : > { %v2976_v60 = vpop.xlane.xlu1 %2975  ;;  %4316 = vpow2.f32 %v3015_v35 }
 0x3cd   : > { %v4307_v2 = vpop.eup %4306  ;;  %v3021_v12 = vmul.f32 1.442695, %v5280_v0  ;;  %v5284_v4 = vsub.f32 %v5232_v6, %v2976_v60  ;;  %3043 = vadd.xlane.f32.xlu1 %v4305_v1 }
 0x3ce   : > { %3037 = vadd.xlane.f32.xlu0 %v4307_v2  ;;  %v2978_v5 = vpop.xlane.xlu0 %2977  ;;  %v4309_v31 = vpop.eup %4308 }
 0x3cf   : > { %4318 = vpow2.f32 %v3021_v12  ;;  %v3023_v23 = vmul.f32 1.442695, %v5284_v4  ;;  %v5288_v22 = vsub.f32 %v5235_v40, %v2978_v5 }
 0x3d0   : > { %v2980_v7 = vpop.xlane.xlu1 %2979 }
 0x3d1   : > { %v4311_v8 = vpop.eup %4310  ;;  %4320 = vpow2.f32 %v3023_v23  ;;  %v3025_v9 = vmul.f32 1.442695, %v5288_v22  ;;  %v5292_v32 = vsub.f32 %v5238_v18, %v2980_v7  ;;  %3039 = vadd.xlane.f32.xlu1 %v4309_v31 }
 0x3d2   : > { %3049 = vadd.xlane.f32.xlu0 %v4311_v8  ;;  %v4313_v11 = vpop.eup %4312 }
 0x3d3   : > { %4322 = vpow2.f32 %v3025_v9  ;;  %v3027_v10 = vmul.f32 1.442695, %v5292_v32 }
 0x3d5   : > { %v4315_v13 = vpop.eup %4314  ;;  %4324 = vpow2.f32 %v3027_v10  ;;  %3051 = vadd.xlane.f32.xlu1 %v4313_v11 }
 0x3d6   : > { %3045 = vadd.xlane.f32.xlu0 %v4315_v13  ;;  %v4317_v51 = vpop.eup %4316 }
 0x3d9   : > { %v4319_v17 = vpop.eup %4318  ;;  %3047 = vadd.xlane.f32.xlu1 %v4317_v51 }
 0x3da   : > { %3053 = vadd.xlane.f32.xlu0 %v4319_v17 }
 0x3db   : > { %v4321_v6 = vpop.eup %4320 }
 0x3dd   : > { %v4323_v40 = vpop.eup %4322  ;;  %3055 = vadd.xlane.f32.xlu1 %v4321_v6 }
 0x3de   : > { %3057 = vadd.xlane.f32.xlu0 %v4323_v40 }
 0x3df   : > { %v4325_v18 = vpop.eup %4324 }
 0x3e1   : > { %3059 = vadd.xlane.f32.xlu1 %v4325_v18 }
 0x44e   : > { %v3034_v34 = vpop.xlane.xlu0 %3033 }
 0x44f   : > { %4326 = vlog2.f32 %v3034_v34 }
 0x452   : > { %v3036_v20 = vpop.xlane.xlu1 %3035  ;;  %v3030_v37 = vpop.xlane.xlu0 %3029 }
 0x453   : > { %4328 = vlog2.f32 %v3036_v20 }
 0x454   : > { %4330 = vlog2.f32 %v3030_v37 }
 0x456   : > { %v3032_v49 = vpop.xlane.xlu1 %3031 }
 0x457   : > { %4332 = vlog2.f32 %v3032_v49  ;;  %v3042_v21 = vpop.xlane.xlu0 %3041 }
 0x458   : > { %4334 = vlog2.f32 %v3042_v21 }
 0x459   : > { %v4327_v39 = vpop.eup %4326 }
 0x45a   : > { %v3066_v42 = vmul.f32 0.6931472, %v4327_v39  ;;  %v3044_v24 = vpop.xlane.xlu1 %3043 }
 0x45b   : > { %4336 = vlog2.f32 %v3044_v24  ;;  %v3038_v43 = vpop.xlane.xlu0 %3037 }
 0x45c   : > { %v3095_v44 = vsub.f32 %v5242_v19, %v3066_v42  ;;  %4338 = vlog2.f32 %v3038_v43 }
 0x45d   : > { %v4329_v47 = vpop.eup %4328 }
 0x45e   : > { %v4331_v33 = vpop.eup %4330  ;;  %3111 = vst [vmem:[%s5297_s29 + $0x10] sm:$0xff] %v3095_v44  ;;  %v3068_v50 = vmul.f32 0.6931472, %v4329_v47  ;;  %v3040_v26 = vpop.xlane.xlu1 %3039 }
 0x45f   : > { %v3062_v14 = vmul.f32 0.6931472, %v4331_v33  ;;  %4340 = vlog2.f32 %v3040_v26  ;;  %v3050_v3 = vpop.xlane.xlu0 %3049 }
 0x460   : > { %v3096_v28 = vsub.f32 %v5248_v15, %v3068_v50  ;;  %4342 = vlog2.f32 %v3050_v3 }
 0x461   : > { %v4333_v52 = vpop.eup %4332  ;;  %v3093_v19 = vsub.f32 %v5244_v36, %v3062_v14 }
 0x462   : > { %v4335_v53 = vpop.eup %4334  ;;  %3112 = vst [vmem:[%s5297_s29 + $0x18] sm:$0xff] %v3096_v28  ;;  %v3064_v54 = vmul.f32 0.6931472, %v4333_v52  ;;  %v3052_v29 = vpop.xlane.xlu1 %3051 }
 0x463   : > { %3109 = vst [vmem:[%s5297_s29] sm:$0xff] %v3093_v19  ;;  %v3074_v38 = vmul.f32 0.6931472, %v4335_v53  ;;  %4344 = vlog2.f32 %v3052_v29  ;;  %v3046_v56 = vpop.xlane.xlu0 %3045 }
 0x464   : > { %v3094_v59 = vsub.f32 %v5250_v41, %v3064_v54  ;;  %4346 = vlog2.f32 %v3046_v56 }
 0x465   : > { %v4337_v62 = vpop.eup %4336  ;;  %v3099_v15 = vsub.f32 %v5254_v16, %v3074_v38 }
 0x466   : > { %v4339_v30 = vpop.eup %4338  ;;  %3110 = vst [vmem:[%s5297_s29 + $0x8] sm:$0xff] %v3094_v59  ;;  %v3076_v36 = vmul.f32 0.6931472, %v4337_v62  ;;  %v3048_v46 = vpop.xlane.xlu1 %3047 }
 0x467   : > { %3115 = vst [vmem:[%s5297_s29 + $0x30] sm:$0xff] %v3099_v15  ;;  %v3070_v48 = vmul.f32 0.6931472, %v4339_v30  ;;  %4348 = vlog2.f32 %v3048_v46  ;;  %v3054_v35 = vpop.xlane.xlu0 %3053 }
 0x468   : > { %v3100_v25 = vsub.f32 %v5256_v45, %v3076_v36  ;;  %4350 = vlog2.f32 %v3054_v35 }
 0x469   : > { %v4341_v1 = vpop.eup %4340  ;;  %v3097_v41 = vsub.f32 %v5260_v58, %v3070_v48 }
 0x46a   : > { %v4343_v60 = vpop.eup %4342  ;;  %3116 = vst [vmem:[%s5297_s29 + $0x38] sm:$0xff] %v3100_v25  ;;  %v3072_v16 = vmul.f32 0.6931472, %v4341_v1  ;;  %v3056_v2 = vpop.xlane.xlu1 %3055 }
 0x46b   : > { %3113 = vst [vmem:[%s5297_s29 + $0x20] sm:$0xff] %v3097_v41  ;;  %v3082_v12 = vmul.f32 0.6931472, %v4343_v60  ;;  %4352 = vlog2.f32 %v3056_v2  ;;  %v3058_v5 = vpop.xlane.xlu0 %3057 }
 0x46c   : > { %v3098_v23 = vsub.f32 %v5262_v27, %v3072_v16  ;;  %4354 = vlog2.f32 %v3058_v5 }
 0x46d   : > { %v4345_v45 = vpop.eup %4344  ;;  %v3103_v31 = vsub.f32 %v5266_v57, %v3082_v12 }
 0x46e   : > { %v4347_v7 = vpop.eup %4346  ;;  %3114 = vst [vmem:[%s5297_s29 + $0x28] sm:$0xff] %v3098_v23  ;;  %v3084_v58 = vmul.f32 0.6931472, %v4345_v45  ;;  %v3060_v8 = vpop.xlane.xlu1 %3059 }
 0x46f   : > { %3119 = vst [vmem:[%s5297_s29 + $0x50] sm:$0xff] %v3103_v31  ;;  %v3078_v9 = vmul.f32 0.6931472, %v4347_v7  ;;  %4356 = vlog2.f32 %v3060_v8 }
 0x470   : > { %v3104_v10 = vsub.f32 %v5268_v55, %v3084_v58 }
 0x471   : > { %v4349_v11 = vpop.eup %4348  ;;  %v3101_v27 = vsub.f32 %v5272_v61, %v3078_v9 }
 0x472   : > { %v4351_v13 = vpop.eup %4350  ;;  %3120 = vst [vmem:[%s5297_s29 + $0x58] sm:$0xff] %v3104_v10  ;;  %v3080_v51 = vmul.f32 0.6931472, %v4349_v11 }
 0x473   : > { %3117 = vst [vmem:[%s5297_s29 + $0x40] sm:$0xff] %v3101_v27  ;;  %v3086_v57 = vmul.f32 0.6931472, %v4351_v13 }
 0x474   : > { %v3102_v17 = vsub.f32 %v5275_v63, %v3080_v51 }
 0x475   : > { %v4353_v6 = vpop.eup %4352  ;;  %v3105_v40 = vsub.f32 %v5280_v0, %v3086_v57 }
 0x476   : > { %v4355_v18 = vpop.eup %4354  ;;  %3118 = vst [vmem:[%s5297_s29 + $0x48] sm:$0xff] %v3102_v17  ;;  %v3088_v55 = vmul.f32 0.6931472, %v4353_v6 }
 0x477   : > { %3121 = vst [vmem:[%s5297_s29 + $0x60] sm:$0xff] %v3105_v40  ;;  %v3090_v61 = vmul.f32 0.6931472, %v4355_v18 }
 0x478   : > { %v3106_v34 = vsub.f32 %v5284_v4, %v3088_v55 }
 0x479   : > { %v4357_v20 = vpop.eup %4356  ;;  %v3107_v37 = vsub.f32 %v5288_v22, %v3090_v61 }
 0x47a   : > { %3122 = vst [vmem:[%s5297_s29 + $0x68] sm:$0xff] %v3106_v34  ;;  %v3092_v63 = vmul.f32 0.6931472, %v4357_v20 }
 0x47b   : > { %3123 = vst [vmem:[%s5297_s29 + $0x70] sm:$0xff] %v3107_v37 }
 0x47c   : > { %v3108_v0 = vsub.f32 %v5292_v32, %v3092_v63 }
 0x47e   : > { %3124 = vst [vmem:[%s5297_s29 + $0x78] sm:$0xff] %v3108_v0 }
 0x47f   : > { %4541 = shalt.err (!%p4538_p8)
}
 0x480   : > { %s4542_s2 = scalar_lea.hbm %s5333_s7, 2048  ;;  %s4546_s18 = scalar_lea.hbm %s5392_s6, 4096 }
 0x481   : > { %p4543_p3 = scmp.ne.s32.totalorder %s5333_s7, %s4542_s2  ;;  %p4547_p0 = scmp.lt.u32.totalorder %s5333_s7, %s5392_s6 }
 0x482   : > { %p4548_p1 = scmp.lt.u32.totalorder %s4546_s18, %s4542_s2  ;;  %p4550_p6 = scmp.lt.u32.totalorder %s4542_s2, %s5333_s7 }
 0x483   : > { %p4544_p12 = pnand %p4543_p3, %p5422_p5 }
 0x484   : > { %p4549_p7 = por %p4548_p1, %p4547_p0 }
 0x485   : > { %p4545_p13 = pneg %p4544_p12 }
 0x486   : > { %p4551_p10 = por %p4550_p6, %p4549_p7 }
 0x488   : > { %p4552_p11 = pnand %p4551_p10, %p4545_p13 }
 0x48a   : > { %4555 = shalt.err (!%p4552_p11)
}
 0x48b   : > { %s4633_s29 = smov 128   ;;  %s4634_s11 = smov 8  }
 0x48c   : > { %4065 = dma.vmem_to_hbm [thread:$0]  (%p5422_p5), %s5335_s14, 2048, %s5333_s7, %s3126_s24, %s4633_s29, %s4633_s29, %s4634_s11  }
 0x48d PF: > { %s3154_s19 = sand.u32 1, %s4602_s21   ;;  %p5423_p2 = scmp.ne.s32.totalorder %s5417_s27, 0 }
 0x48e   : > { %p5424_p4 = scmp.ge.s32.totalorder %s4622_s26, 2  ;;  %s3155_s15 = scalar_lea.sflag [#allocation5], %s3154_s19 }
 0x490   : > { %p4088_p9 = pnand %p5424_p4, %p5423_p2 }
 0x492   : > { %4597 = dma.done.wait (!%p4088_p9), %s3155_s15, 2048  }
 0x493   : > { %4599 = vsyncadd (!%p4088_p9), %s3155_s15, 4294965248  ;;  %s25_s26 = sadd.s32 1, %s4622_s26   ;;  %s5425_s21 = smov %s4606_s22 }
 0x494   : > { %p22_p8 = scmp.ge.s32.totalorder %s25_s26, 4   ;;  %s5426_s22 = smov %s4610_s23 }
 0x495   : > { %s5427_s23 = smov %s4872_s10  ;;  %s5428_s24 = smov %s4618_s25 }
 0x496   : > { %s5429_s25 = smov %s5431_s17  ;;  %24 = sbr.rel (!%p22_p8) target bundleno = 13 (0xd), region = 130 }
 0x49d   :  { %3160 = vsyncpa [#allocation4], 1 }
 0x49e   :  { %3162 = vsyncpa [#allocation4 + $0x1], 1 }
 0x49f   :  { %3163 = vsyncpa [#allocation7], 1 }
 0x4a0   :  { %3164 = vsyncpa [#allocation10], 1 }
 0x4a1   :  { %3165 = vsyncpa [#allocation13], 1 }
 0x4a2   :  { %3166 = vsyncpa [#allocation5], 1 }
 0x4a3   :  { %3168 = vsyncpa [#allocation5 + $0x1], 1 }

// kernel: ppm_deepsup_forward.2
= control target key start
LH: loop header
LB: loop body
LE: loop exit
PB: predicated region body
PF: predicated region fallthrough
CT: control target
= control target key end

     0   :  { %s11003_s0 = inlined_call_operand.hbm [shape: bf16[2,176,2176], index: 0, kind: input, shape index: {}]   ;;  %s11004_s1 = inlined_call_operand.hbm [shape: bf16[9,2176,512], index: 1, kind: input, shape index: {}]   ;;  %s11005_s2 = inlined_call_operand.hbm [shape: f32[1,512], index: 2, kind: input, shape index: {}]   ;;  %s11006_s3 = inlined_call_operand.hbm [shape: f32[1,512], index: 3, kind: input, shape index: {}]   ;;  %s11007_s4 = inlined_call_operand.hbm [shape: bf16[512,128], index: 4, kind: input, shape index: {}]   ;;  %s11008_s5 = inlined_call_operand.hbm [shape: f32[1,128], index: 5, kind: input, shape index: {}]   ;;  %s11009_s6 = inlined_call_operand.hbm [shape: f32[2,128,128], index: 6, kind: output, shape index: {}]  }
   0x1   :  { %11041 = sst [smem:[#allocation62_spill]] %s11005_s2 }
   0x2   :  { %11042 = sst [smem:[#allocation63_spill]] %s11009_s6 }
   0x3   :  { %11 = vsyncpa [#allocation4], 0 }
   0x4   :  { %13 = vsyncpa [#allocation4 + $0x1], 0 }
   0x5   :  { %14 = vsyncpa [#allocation7], 0 }
   0x6   :  { %16 = vsyncpa [#allocation7 + $0x1], 0 }
   0x7   :  { %17 = vsyncpa [#allocation10], 0 }
   0x8   :  { %18 = vsyncpa [#allocation13], 0 }
   0x9   :  { %19 = vsyncpa [#allocation5], 0 }
   0xa   :  { %21 = vsyncpa [#allocation5 + $0x1], 0  ;;  %s9203_s21 = smov 0   ;;  %s9205_s22 = smov 0  }
   0xb   :  { %s9207_s23 = smov 0   ;;  %s9209_s24 = smov 0  }
   0xc   :  { %s9211_s25 = smov 0   ;;  %s9213_s26 = smov 0  }
   0xd   :  { %s9215_s27 = smov 0   ;;  %s9217_s28 = smov 0  }
   0xe   :  { %s9219_s29 = smov 0   ;;  %s9221_s30 = smov 0  }
   0xf   :  { %s9223_s7 = smov 0   ;;  %s9225_s8 = smov 0  }
  0x10   :  { %s9227_s9 = smov 0   ;;  %s9229_s10 = smov 0  }
  0x11 LB: > { %11043 = sst [smem:[#allocation24_spill]] %s9094_s21  ;;  %s9272_s11 = sadd.s32 4294967295, %s9146_s10   ;;  %s9146_s10 = sphi %s9229_s10, %s27_s10   ;;  %s9142_s9 = sphi %s9227_s9, %s11173_s9   ;;  %s9138_s8 = sphi %s9225_s8, %s11172_s8   ;;  %s9134_s7 = sphi %s9223_s7, %s11171_s7   ;;  %s9130_s30 = sphi %s9221_s30, %s11170_s30   ;;  %s9126_s29 = sphi %s9219_s29, %s11169_s29   ;;  %s9122_s28 = sphi %s9217_s28, %s11168_s28   ;;  %s9118_s27 = sphi %s9215_s27, %s11167_s27   ;;  %s9114_s26 = sphi %s9213_s26, %s11166_s26   ;;  %s9110_s25 = sphi %s9211_s25, %s11165_s25   ;;  %s9106_s24 = sphi %s9209_s24, %s11160_s24   ;;  %s9102_s23 = sphi %s9207_s23, %s11159_s23   ;;  %s9098_s22 = sphi %s9205_s22, %s11158_s22   ;;  %s9094_s21 = sphi %s9203_s21, %s11157_s21  }
  0x12   : > { %11044 = sst [smem:[#allocation25_spill]] %s9098_s22  ;;  %s36_s13 = sadd.s32 1, %s9138_s8 }
  0x13   : > { %11045 = sst [smem:[#allocation26_spill]] %s9102_s23  ;;  %s39_s14 = sadd.s32 1, %s9142_s9 }
  0x14   : > { %11046 = sst [smem:[#allocation27_spill]] %s9110_s25  ;;  %p37_p0 = scmp.ge.s32.totalorder %s36_s13, 17 }
  0x15   : > { %11047 = sst [smem:[#allocation28_spill]] %s9130_s30  ;;  %s48_s15 = sadd.s32 1, %s9126_s29 }
  0x16   : > { %11048 = sst [smem:[#allocation29_spill]] %s9134_s7  ;;  %p55_p1 = scmp.ne.s32.totalorder %s9126_s29, %s9122_s28 }
  0x17   : > { %11049 = sst [smem:[#allocation30_spill]] %s9272_s11  ;;  %p56_p2 = scmp.eq.s32.totalorder %s9146_s10, 0 }
  0x18   : > { %s11175_s13 = smov (%p37_p0, %s36_s13), 0  ;;  %s11177_s14 = smov (!%p37_p0, %s39_s14), %s9142_s9 }
  0x19   : > { %11050 = sst [smem:[#allocation31_spill]] %s11175_s13  ;;  %s44_s16 = ssub.s32 %s9138_s8, %s11175_s13 }
  0x1a   : > { %p9288_p3 = por %p56_p2, %p55_p1  ;;  %p41_p4 = scmp.ge.s32.totalorder %s11177_s14, 2 }
  0x1b   : > { %p61_p5 = scmp.ne.s32.totalorder %s9122_s28, %s9118_s27  ;;  %p11012_p6 = scmp.eq.s32.totalorder %s9272_s11, 0 }
  0x1c   : > { %s11051_s17 = scalar_select %p9288_p3, 1, 0 }
  0x1d   : > { %p72_p7 = scmp.eq.s32.totalorder %s44_s16, 0  ;;  %s11179_s14 = smov (%p41_p4, %s11177_s14), 0 }
  0x1e   : > { %11052 = sst [smem:[#allocation32_spill]] %s11179_s14  ;;  %p9298_p8 = por %p11012_p6, %p61_p5 }
  0x1f   : > { %s74_s19 = sadd.s32 1, %s9114_s26  ;;  %s43_s20 = ssub.s32 %s9142_s9, %s11179_s14 }
  0x20   : > { %s11053_s18 = scalar_select %p9298_p8, 1, 0 }
  0x21   : > { %p81_p9 = scmp.ne.s32.totalorder %s9114_s26, %s9110_s25  ;;  %s45_s27 = sor.u32 %s44_s16, %s43_s20 }
  0x22   : > { %p87_p10 = scmp.ne.s32.totalorder %s9110_s25, %s9106_s24  ;;  %p46_p11 = scmp.eq.s32.totalorder %s45_s27, 0 }
  0x23   : > { %p9311_p12 = por %p81_p9, %p56_p2  ;;  %p182_p0 = scmp.eq.s32.totalorder %s43_s20, 0 }
  0x24   : > { %s9316_s13 = scalar_select %p72_p7, %s9114_s26, %s74_s19  }
  0x25   : > { %s11054_s12 = scalar_select %p9311_p12, 1, 0 }
  0x26   : > { %11055 = sst [smem:[#allocation33_spill]] %s9316_s13  ;;  %p9323_p13 = por %p87_p10, %p11012_p6 }
  0x27   : > { %s9319_s6 = scalar_select %p46_p11, %s9126_s29, %s48_s15  }
  0x28   : > { %s11057_s7 = scalar_select %p9323_p13, 1, 0 }
  0x29   : > { %11056 = sst [smem:[#allocation34_spill]] %s9319_s6  ;;  %s184_s16 = sadd.s32 1, %s9102_s23 }
  0x2a   : > { %11058 = sst [smem:[#allocation35_spill]] %s11057_s7  ;;  %p194_p1 = scmp.ne.s32.totalorder %s9102_s23, %s9098_s22 }
  0x2b   : > { %s9331_s24 = scalar_select %p182_p0, %s9102_s23, %s184_s16  }
  0x2c   : > { %p195_p4 = scmp.eq.s32.totalorder %s9272_s11, 33  ;;  %p200_p2 = scmp.ne.s32.totalorder %s9098_s22, %s9094_s21 }
  0x2d   : > { %11059 = sst [smem:[#allocation36_spill]] %s9331_s24  ;;  %s11060_s27 = sadd.s32 4294967294, %s9146_s10  }
  0x2e   : > { %p201_p5 = scmp.eq.s32.totalorder %s11060_s27, 33  ;;  %p6708_p9 = scmp.ge.s32.totalorder %s9146_s10, 1 }
  0x2f   : > { %p9339_p7 = por %p195_p4, %p194_p1  ;;  %p208_p11 = scmp.lt.s32.totalorder %s9146_s10, 35 }
  0x30   : > { %p9344_p10 = por %p201_p5, %p200_p2  ;;  %s9148_s16 = smov [#allocation9]  }
  0x31   : > { %s11061_s19 = scalar_select %p9339_p7, 1, 0 }
  0x32   : > { %s11063_s15 = scalar_select %p9344_p10, 1, 0 }
  0x33   : > { %11062 = sst [smem:[#allocation37_spill]] %s11061_s19  ;;  %p9348_p6 = pnand %p6708_p9, %p208_p11 }
  0x34   : > { %11064 = sst [smem:[#allocation38_spill]] %s11063_s15  ;;  %s232_s14 = sshll.u32 %s9148_s16, 4  ;;  %s233_s14 = int_to_ptr.vmem [resolvable:$true] %s232_s14 }
  0x35   : > { %s11065_s20 = scalar_select %p9348_p6, 1, 0 }
  0x36   : > { %p8106_p0 = pneg %p9348_p6  ;;  %p11066_p13 = scmp.eq.s32.totalorder %s9272_s11, 0 }
  0x37   : > { %s9149_s6 = smov [#allocation8]   ;;  %s8844_s15 = scalar_lea.hbm %s11006_s3, 64 }
  0x38   : > { %p9356_p1 = pnand %p8106_p0, %p11066_p13  ;;  %s221_s13 = sshll.u32 %s9149_s6, 4  ;;  %s222_s13 = int_to_ptr.vmem [resolvable:$true] %s221_s13 }
  0x39   : > { %p8845_p4 = scmp.ne.s32.totalorder %s11006_s3, %s8844_s15  ;;  %p8851_p9 = scmp.lt.u32.totalorder %s8844_s15, %s11006_s3 }
  0x3a   : > { %p9368_p2 = pneg %p9356_p1 }
  0x3c   : > { %p8847_p13 = pnand %p9368_p2, %p8845_p4 }
  0x3e   : > { %p8848_p5 = pneg %p8847_p13 }
  0x40   : > { %p8853_p11 = pnand %p8851_p9, %p8848_p5 }
  0x42   : > { %8856 = shalt.err (!%p8853_p11)
}
  0x43   : > { %s8857_s6 = scalar_lea.vmem %s233_s14, 64  ;;  %p8865_p8 = scmp.lt.s32.totalorder %s233_s14, %s233_s14 }
  0x44   : > { %p8858_p0 = scmp.ne.s32.totalorder %s233_s14, %s8857_s6  ;;  %p8866_p6 = scmp.lt.s32.totalorder %s8857_s6, %s8857_s6 }
  0x46   : > { %p8860_p10 = pnand %p8858_p0, %p9368_p2  ;;  %p8867_p12 = por %p8866_p6, %p8865_p8 }
  0x48   : > { %p8861_p7 = pneg %p8860_p10 }
  0x4a   : > { %p8868_p3 = pnand %p8867_p12, %p8861_p7 }
  0x4c   : > { %8871 = shalt.err (!%p8868_p3)
}
  0x4d   : > { %8112 = dma.hbm_to_vmem [thread:$0]  (!%p9356_p1), %s11006_s3, 64, %s233_s14, [#allocation10]  }
  0x4e   : > { %s9150_s22 = smov [#allocation11]   ;;  %s11069_s2 = sld [smem:[#allocation62_spill]] }
  0x4f   : > { %s242_s30 = sshll.u32 %s9150_s22, 4  ;;  %s243_s30 = int_to_ptr.vmem [resolvable:$true] %s242_s30 }
  0x54   : > { %s8872_s15 = scalar_lea.hbm %s11069_s2, 64 }
  0x55   : > { %p8873_p6 = scmp.ne.s32.totalorder %s11069_s2, %s8872_s15  ;;  %p8879_p12 = scmp.lt.u32.totalorder %s8872_s15, %s11069_s2 }
  0x57   : > { %p8875_p3 = pnand %p8873_p6, %p9368_p2 }
  0x59   : > { %p8876_p8 = pneg %p8875_p3 }
  0x5b   : > { %p8881_p7 = pnand %p8879_p12, %p8876_p8 }
  0x5d   : > { %8884 = shalt.err (!%p8881_p7)
}
  0x5e   : > { %s8885_s14 = scalar_lea.vmem %s222_s13, 64  ;;  %p8893_p5 = scmp.lt.s32.totalorder %s222_s13, %s222_s13 }
  0x5f   : > { %p8886_p10 = scmp.ne.s32.totalorder %s222_s13, %s8885_s14  ;;  %p8894_p9 = scmp.lt.s32.totalorder %s8885_s14, %s8885_s14 }
  0x61   : > { %p8888_p4 = pnand %p8886_p10, %p9368_p2  ;;  %p8895_p11 = por %p8894_p9, %p8893_p5 }
  0x63   : > { %p8889_p13 = pneg %p8888_p4 }
  0x65   : > { %p8896_p0 = pnand %p8895_p11, %p8889_p13 }
  0x67   : > { %8899 = shalt.err (!%p8896_p0)
}
  0x68   : > { %8109 = dma.hbm_to_vmem [thread:$0]  (!%p9356_p1), %s11069_s2, 64, %s222_s13, [#allocation7]  }
  0x69   : > { %s8900_s23 = scalar_lea.hbm %s11007_s4, 4096 }
  0x6a   : > { %p8901_p6 = scmp.ne.s32.totalorder %s11007_s4, %s8900_s23  ;;  %p8907_p12 = scmp.lt.u32.totalorder %s8900_s23, %s11007_s4 }
  0x6c   : > { %p8903_p3 = pnand %p8901_p6, %p9368_p2 }
  0x6e   : > { %p8904_p8 = pneg %p8903_p3 }
  0x70   : > { %p8909_p7 = pnand %p8907_p12, %p8904_p8 }
  0x72   : > { %8912 = shalt.err (!%p8909_p7)
}
  0x73   : > { %s8913_s6 = scalar_lea.vmem %s243_s30, 4096  ;;  %p8921_p5 = scmp.lt.s32.totalorder %s243_s30, %s243_s30 }
  0x74   : > { %p8914_p10 = scmp.ne.s32.totalorder %s243_s30, %s8913_s6  ;;  %p8922_p9 = scmp.lt.s32.totalorder %s8913_s6, %s8913_s6 }
  0x76   : > { %p8916_p4 = pnand %p8914_p10, %p9368_p2  ;;  %p8923_p11 = por %p8922_p9, %p8921_p5 }
  0x78   : > { %p8917_p13 = pneg %p8916_p4 }
  0x7a   : > { %p8924_p0 = pnand %p8923_p11, %p8917_p13 }
  0x7c   : > { %8927 = shalt.err (!%p8924_p0)
}
  0x7d   : > { %s9151_s13 = smov 64   ;;  %s9152_s14 = smov 4  }
  0x7e   : > { %8115 = dma.hbm_to_vmem [thread:$0]  (!%p9356_p1), %s11007_s4, 4096, %s243_s30, [#allocation10], %s9151_s13, %s9151_s13, %s9152_s14  }
  0x7f   : > { %s9153_s11 = smov [#allocation12]   ;;  %s8928_s24 = scalar_lea.hbm %s11008_s5, 16 }
  0x80   : > { %s256_s21 = sshll.u32 %s9153_s11, 4  ;;  %p8929_p6 = scmp.ne.s32.totalorder %s11008_s5, %s8928_s24  ;;  %s257_s21 = int_to_ptr.vmem [resolvable:$true] %s256_s21 }
  0x81   : > { %p8935_p12 = scmp.lt.u32.totalorder %s8928_s24, %s11008_s5 }
  0x82   : > { %p8931_p3 = pnand %p8929_p6, %p9368_p2 }
  0x84   : > { %p8932_p8 = pneg %p8931_p3 }
  0x86   : > { %p8937_p7 = pnand %p8935_p12, %p8932_p8 }
  0x88   : > { %8940 = shalt.err (!%p8937_p7)
}
  0x89   : > { %s8941_s30 = scalar_lea.vmem %s257_s21, 16  ;;  %s8948_s13 = scalar_lea.vmem %s257_s21, 32 }
  0x8a   : > { %p8942_p10 = scmp.ne.s32.totalorder %s257_s21, %s8941_s30  ;;  %p8949_p5 = scmp.lt.s32.totalorder %s257_s21, %s257_s21 }
  0x8b   : > { %p8950_p9 = scmp.lt.s32.totalorder %s8948_s13, %s8941_s30 }
  0x8c   : > { %p8944_p4 = pnand %p8942_p10, %p9368_p2 }
  0x8d   : > { %p8951_p11 = por %p8950_p9, %p8949_p5 }
  0x8e   : > { %p8945_p13 = pneg %p8944_p4 }
  0x90   : > { %p8952_p0 = pnand %p8951_p11, %p8945_p13 }
  0x92   : > { %8955 = shalt.err (!%p8952_p0)
}
  0x93   : > { %8118 = dma.hbm_to_vmem [thread:$0]  (!%p9356_p1), %s11008_s5, 16, %s257_s21, [#allocation13]  }
  0x94   : > { %p6713_p6 = scmp.ge.s32.totalorder %s9146_s10, 34 }
  0x95   : > { %s267_s2 = sand.u32 (!%p6713_p6), 1, %s9126_s29   ;;  %s8073_s16 = smul.u32 (!%p6713_p6), 374, %s9142_s9 }
  0x96   : > { %263 = sbr.rel (%p6713_p6) target bundleno = 192 (0xc0), region = 32  ;;  %s9449_s15 = scalar_lea.sflag (!%p6713_p6), [#allocation4], %s267_s2 }
  0x97   : > { %s8072_s7 = smul.u32 (!%p6713_p6), 88, %s267_s2  ;;  %s276_s11 = sadd.s32 (!%p6713_p6), %s9138_s8, %s8073_s16 }
  0x98   : > { %s6714_s23 = sshll.u32 (!%p6713_p6), %s276_s11, 6  ;;  %p11070_p2 = scmp.ne.s32.totalorder (!%p6713_p6), %s11051_s17, 0 }
  0x99   : > { %s9445_s27 = scalar_lea.hbm (!%p6713_p6), %s11003_s0, %s6714_s23  ;;  %s271_s21 = scalar_lea.vmem (!%p6713_p6), [#allocation3], %s8072_s7 }
  0x9a   : > { %s279_s19 = sshll.u32 (!%p6713_p6), %s271_s21, 4  ;;  %s8956_s6 = scalar_lea.hbm (!%p6713_p6), %s9445_s27, 1408  ;;  %s9447_s19 = int_to_ptr.vmem [resolvable:$true] %s279_s19 }
  0x9b   : > { %p8957_p1 = scmp.ne.s32.totalorder (!%p6713_p6), %s9445_s27, %s8956_s6  ;;  %s8960_s14 = scalar_lea.hbm (!%p6713_p6), %s11003_s0, 47872 }
  0x9c   : > { %p8961_p12 = scmp.lt.u32.totalorder (!%p6713_p6), %s9445_s27, %s11003_s0  ;;  %p8962_p7 = scmp.lt.u32.totalorder (!%p6713_p6), %s8960_s14, %s8956_s6 }
  0x9d   : > { %p8958_p3 = pnand %p8957_p1, %p11070_p2  ;;  %p8964_p4 = scmp.lt.u32.totalorder %s8956_s6, %s9445_s27 }
  0x9e   : > { %p8963_p10 = por %p8962_p7, %p8961_p12 }
  0x9f   : > { %p8959_p8 = pneg %p8958_p3 }
  0xa0   : > { %p8965_p13 = por %p8964_p4, %p8963_p10 }
  0xa2   : > { %p8966_p5 = pnand %p8965_p13, %p8959_p8 }
  0xa4   : > { %8969 = shalt.err (!%p8966_p5)
}
  0xa5   : > { %s8970_s2 = scalar_lea.vmem %s9447_s19, 1408  ;;  %s9154_s7 = smov [#allocation3]  }
  0xa6   : > { %p8971_p9 = scmp.ne.s32.totalorder %s9447_s19, %s8970_s2  ;;  %s8974_s11 = sshll.u32 %s9154_s7, 4  ;;  %s8975_s11 = int_to_ptr.vmem [resolvable:$false] %s8974_s11 }
  0xa7   : > { %s8976_s23 = scalar_lea.vmem %s8975_s11, 2816  ;;  %p8977_p6 = scmp.lt.s32.totalorder %s9447_s19, %s8975_s11 }
  0xa8   : > { %p8972_p11 = pnand %p8971_p9, %p11070_p2  ;;  %p8978_p1 = scmp.lt.s32.totalorder %s8976_s23, %s8970_s2 }
  0xaa   : > { %p8973_p0 = pneg %p8972_p11  ;;  %p8979_p3 = por %p8978_p1, %p8977_p6 }
  0xac   : > { %p8980_p12 = pnand %p8979_p3, %p8973_p0 }
  0xae   : > { %8983 = shalt.err (!%p8980_p12)
}
  0xaf   : > { %s9155_s22 = smov 1088   ;;  %s9156_s24 = smov 64  }
  0xb0   : > { %s9157_s21 = smov 4  }
  0xb1   : > { %8085 = dma.hbm_to_vmem [thread:$0]  (%p11070_p2), %s9445_s27, 1408, %s9447_s19, %s9449_s15, %s9155_s22, %s9156_s24, %s9157_s21  }
  0xb2   : > { %s289_s6 = sand.u32 1, %s9146_s10   ;;  %s291_s30 = sand.u32 1, %s9114_s26  }
  0xb3   : > { %s8074_s13 = smul.u32 2304, %s291_s30  ;;  %p11071_p8 = scmp.ne.s32.totalorder %s11054_s12, 0 }
  0xb4   : > { %s7366_s25 = sshll.u32 %s9138_s8, 12  ;;  %s9158_s16 = smov 69632  }
  0xb5   : > { %s8086_s14 = scalar_select %p11071_p8, [#allocation0], [#allocation17] }
  0xb6   : > { %8087 = sst [smem:[#allocation16]] (%p11071_p8), %s9158_s16  ;;  %s293_s27 = scalar_lea.vmem [#allocation6], %s8074_s13 }
  0xb7   : > { %s305_s17 = sld [smem:[%s8086_s14]]   ;;  %s313_s19 = sshll.u32 %s293_s27, 4  ;;  %s314_s19 = int_to_ptr.vmem [resolvable:$true] %s313_s19 }
  0xb8   : > { %s9159_s15 = smov 4096   ;;  %s300_s11 = scalar_lea.hbm %s11004_s1, %s7366_s25 }
  0xb9   : > { %8088 = sst [smem:[#allocation16 + $0x1]] (%p11071_p8), %s9159_s15  ;;  %s9160_s23 = smov 16  }
  0xba   : > { %8089 = sst [smem:[#allocation16 + $0x2]] (%p11071_p8), %s9160_s23  ;;  %s9161_s22 = smov 256  }
  0xbb   : > { %8090 = sst [smem:[#allocation16 + $0x3]] (%p11071_p8), %s9161_s22  ;;  %s290_s30 = scalar_lea.sflag [#allocation7], %s289_s6 }
  0xbc   : > { %8091 = sst [smem:[#allocation16 + $0x4]] (%p11071_p8), %s9161_s22  ;;  %s9162_s13 = smov [#allocation15]  }
  0xbd   : > { %s6718_s24 = sshll.u32 %s305_s17, 26  ;;  %8092 = sst [smem:[#allocation16 + $0x5]] (%p11071_p8), %s9160_s23 }
  0xbe   : > { %s6719_s21 = sadd.s32 134217728, %s6718_s24 }
  0xbf   : > { %8093 = dma.general (%p11071_p8), %s300_s11, 36864, %s314_s19, %s290_s30, %s9162_s13, [#allocation16], %s6719_s21, 0  }
  0xc0 PF: > { %p11072_p2 = scmp.ne.s32.totalorder %s11065_s20, 0 }
  0xc2   : > { %338 = sbr.rel (%p11072_p2) target bundleno = 1764 (0x6e4), region = 44 }
  0xc9   : > { %s340_s14 = sand.u32 1, %s9122_s28   ;;  %p11073_p7 = scmp.ne.s32.totalorder %s11053_s18, 0 }
  0xca   : > { %s8075_s25 = smul.u32 88, %s340_s14  ;;  %s341_s16 = scalar_lea.sflag [#allocation4], %s340_s14 }
  0xcc   : > { %s9498_s27 = scalar_lea.vmem [#allocation3], %s8075_s25 }
  0xcd   : > { %9069 = dma.done.wait (%p11073_p7), %s341_s16, 1408  }
  0xce   : > { %9071 = vsyncadd (%p11073_p7), %s341_s16, 4294965888  ;;  %s11074_s6 = sld [smem:[#allocation30_spill]]  ;;  %s11075_s17 = sld [smem:[#allocation27_spill]] }
  0xcf   : > { %s11076_s12 = sld [smem:[#allocation35_spill]] }
  0xd4   : > { %s349_s19 = sand.u32 1, %s11074_s6   ;;  %s351_s15 = sand.u32 1, %s11075_s17  }
  0xd5   : > { %s8076_s2 = smul.u32 2304, %s351_s15  ;;  %s350_s20 = scalar_lea.sflag [#allocation7], %s349_s19 }
  0xd6   : > { %p11077_p10 = scmp.ne.s32.totalorder %s11076_s12, 0 }
  0xd7   : > { %s9506_s7 = scalar_lea.vmem [#allocation6], %s8076_s2 }
  0xd8   : > { %9073 = dma.done.wait (%p11077_p10), %s350_s20, 36864  }
  0xd9   : > { %9075 = vsyncadd (%p11077_p10), %s350_s20, 4294930432  ;;  %p11078_p4 = scmp.eq.s32.totalorder %s11074_s6, 0 }
  0xdb   : > { %9077 = dma.done.wait (%p11078_p4), [#allocation7], 64   ;;  %p11079_p13 = pmov %p11078_p4 }
  0xdc   : > { %p11080_p5 = pmov %p11078_p4 }
  0xdd   : > { %9079 = vsyncadd (%p11079_p13), [#allocation7], 4294967232 }
  0xde   : > { %9081 = dma.done.wait (%p11080_p5), [#allocation10], 4160   ;;  %p11081_p9 = pmov %p11078_p4 }
  0xdf   : > { %p11082_p11 = pmov %p11078_p4 }
  0xe0   : > { %9083 = vsyncadd (%p11081_p9), [#allocation10], 4294963136 }
  0xe1   : > { %9085 = dma.done.wait (%p11082_p11), [#allocation13], 16   ;;  %p11083_p0 = pmov %p11078_p4 }
  0xe2   : > { %s11084_s18 = sld [smem:[#allocation25_spill]]  ;;  %s11085_s24 = sld [smem:[#allocation28_spill]] }
  0xe3   : > { %9087 = vsyncadd (%p11083_p0), [#allocation13], 4294967280 }
  0xe8   : > { %s400_s11 = sand.u32 1, %s11084_s18   ;;  %p6726_p6 = scmp.ne.s32.totalorder %s11085_s24, 0 }
  0xe9   : > { %s6725_s23 = sshll.u32 %s400_s11, 7  ;;  %v9163_v0 = vmov (!%p6726_p6), 0.0  }
  0xea   : > { %s9527_s22 = scalar_lea.vmem [#allocation14], %s6725_s23  ;;  %408 = sbr.rel (%p6726_p6) target bundleno = 266 (0x10a), region = 72  ;;  %409 = vst [vmem:[#allocation2] sm:$0xff] (!%p6726_p6), %v9163_v0  ;;  %410 = vst [vmem:[#allocation2 + $0x8] sm:$0xff] (!%p6726_p6), %v9163_v0 }
  0xeb   : > { %411 = vst [vmem:[#allocation2 + $0x10] sm:$0xff] (!%p6726_p6), %v9163_v0  ;;  %412 = vst [vmem:[#allocation2 + $0x18] sm:$0xff] (!%p6726_p6), %v9163_v0 }
  0xec   : > { %413 = vst [vmem:[#allocation2 + $0x20] sm:$0xff] (!%p6726_p6), %v9163_v0  ;;  %414 = vst [vmem:[#allocation2 + $0x28] sm:$0xff] (!%p6726_p6), %v9163_v0 }
  0xed   : > { %415 = vst [vmem:[#allocation2 + $0x30] sm:$0xff] (!%p6726_p6), %v9163_v0  ;;  %416 = vst [vmem:[#allocation2 + $0x38] sm:$0xff] (!%p6726_p6), %v9163_v0 }
  0xee   : > { %417 = vst [vmem:[#allocation2 + $0x40] sm:$0xff] (!%p6726_p6), %v9163_v0  ;;  %418 = vst [vmem:[#allocation2 + $0x48] sm:$0xff] (!%p6726_p6), %v9163_v0 }
  0xef   : > { %419 = vst [vmem:[#allocation2 + $0x50] sm:$0xff] (!%p6726_p6), %v9163_v0  ;;  %420 = vst [vmem:[#allocation2 + $0x58] sm:$0xff] (!%p6726_p6), %v9163_v0 }
  0xf0   : > { %421 = vst [vmem:[#allocation2 + $0x60] sm:$0xff] (!%p6726_p6), %v9163_v0  ;;  %422 = vst [vmem:[#allocation2 + $0x68] sm:$0xff] (!%p6726_p6), %v9163_v0 }
  0xf1   : > { %423 = vst [vmem:[#allocation2 + $0x70] sm:$0xff] %v9163_v0  ;;  %424 = vst [vmem:[#allocation2 + $0x78] sm:$0xff] %v9163_v0 }
  0xf2   : > { %425 = vst [vmem:[#allocation2 + $0x80] sm:$0xff] %v9163_v0  ;;  %426 = vst [vmem:[#allocation2 + $0x88] sm:$0xff] %v9163_v0 }
  0xf3   : > { %427 = vst [vmem:[#allocation2 + $0x90] sm:$0xff] %v9163_v0  ;;  %428 = vst [vmem:[#allocation2 + $0x98] sm:$0xff] %v9163_v0 }
  0xf4   : > { %429 = vst [vmem:[#allocation2 + $0xa0] sm:$0xff] %v9163_v0  ;;  %430 = vst [vmem:[#allocation2 + $0xa8] sm:$0xff] %v9163_v0 }
  0xf5   : > { %431 = vst [vmem:[#allocation2 + $0xb0] sm:$0xff] %v9163_v0  ;;  %432 = vst [vmem:[#allocation2 + $0xb8] sm:$0xff] %v9163_v0 }
  0xf6   : > { %433 = vst [vmem:[#allocation2 + $0xc0] sm:$0xff] %v9163_v0  ;;  %434 = vst [vmem:[#allocation2 + $0xc8] sm:$0xff] %v9163_v0 }
  0xf7   : > { %435 = vst [vmem:[#allocation2 + $0xd0] sm:$0xff] %v9163_v0  ;;  %436 = vst [vmem:[#allocation2 + $0xd8] sm:$0xff] %v9163_v0 }
  0xf8   : > { %437 = vst [vmem:[#allocation2 + $0xe0] sm:$0xff] %v9163_v0  ;;  %438 = vst [vmem:[#allocation2 + $0xe8] sm:$0xff] %v9163_v0 }
  0xf9   : > { %439 = vst [vmem:[#allocation2 + $0xf0] sm:$0xff] %v9163_v0  ;;  %440 = vst [vmem:[#allocation2 + $0xf8] sm:$0xff] %v9163_v0 }
  0xfa   : > { %441 = vst [vmem:[#allocation2 + $0x100] sm:$0xff] %v9163_v0  ;;  %442 = vst [vmem:[#allocation2 + $0x108] sm:$0xff] %v9163_v0 }
  0xfb   : > { %443 = vst [vmem:[#allocation2 + $0x110] sm:$0xff] %v9163_v0  ;;  %444 = vst [vmem:[#allocation2 + $0x118] sm:$0xff] %v9163_v0 }
  0xfc   : > { %445 = vst [vmem:[#allocation2 + $0x120] sm:$0xff] %v9163_v0  ;;  %446 = vst [vmem:[#allocation2 + $0x128] sm:$0xff] %v9163_v0 }
  0xfd   : > { %447 = vst [vmem:[#allocation2 + $0x130] sm:$0xff] %v9163_v0  ;;  %448 = vst [vmem:[#allocation2 + $0x138] sm:$0xff] %v9163_v0 }
  0xfe   : > { %449 = vst [vmem:[#allocation2 + $0x140] sm:$0xff] %v9163_v0  ;;  %450 = vst [vmem:[#allocation2 + $0x148] sm:$0xff] %v9163_v0 }
  0xff   : > { %451 = vst [vmem:[#allocation2 + $0x150] sm:$0xff] %v9163_v0  ;;  %452 = vst [vmem:[#allocation2 + $0x158] sm:$0xff] %v9163_v0 }
 0x100   : > { %453 = vst [vmem:[#allocation2 + $0x160] sm:$0xff] %v9163_v0  ;;  %454 = vst [vmem:[#allocation2 + $0x168] sm:$0xff] %v9163_v0 }
 0x101   : > { %455 = vst [vmem:[#allocation2 + $0x170] sm:$0xff] %v9163_v0  ;;  %456 = vst [vmem:[#allocation2 + $0x178] sm:$0xff] %v9163_v0 }
 0x102   : > { %457 = vst [vmem:[#allocation2 + $0x180] sm:$0xff] %v9163_v0  ;;  %458 = vst [vmem:[#allocation2 + $0x188] sm:$0xff] %v9163_v0 }
 0x103   : > { %459 = vst [vmem:[#allocation2 + $0x190] sm:$0xff] %v9163_v0  ;;  %460 = vst [vmem:[#allocation2 + $0x198] sm:$0xff] %v9163_v0 }
 0x104   : > { %461 = vst [vmem:[#allocation2 + $0x1a0] sm:$0xff] %v9163_v0  ;;  %462 = vst [vmem:[#allocation2 + $0x1a8] sm:$0xff] %v9163_v0 }
 0x105   : > { %463 = vst [vmem:[#allocation2 + $0x1b0] sm:$0xff] %v9163_v0  ;;  %464 = vst [vmem:[#allocation2 + $0x1b8] sm:$0xff] %v9163_v0 }
 0x106   : > { %465 = vst [vmem:[#allocation2 + $0x1c0] sm:$0xff] %v9163_v0  ;;  %466 = vst [vmem:[#allocation2 + $0x1c8] sm:$0xff] %v9163_v0 }
 0x107   : > { %467 = vst [vmem:[#allocation2 + $0x1d0] sm:$0xff] %v9163_v0  ;;  %468 = vst [vmem:[#allocation2 + $0x1d8] sm:$0xff] %v9163_v0 }
 0x108   : > { %469 = vst [vmem:[#allocation2 + $0x1e0] sm:$0xff] %v9163_v0  ;;  %470 = vst [vmem:[#allocation2 + $0x1e8] sm:$0xff] %v9163_v0 }
 0x109   : > { %471 = vst [vmem:[#allocation2 + $0x1f0] sm:$0xff] %v9163_v0  ;;  %472 = vst [vmem:[#allocation2 + $0x1f8] sm:$0xff] %v9163_v0 }
 0x10a PF: > { %v8262_v1 = vld [vmem:[%s9506_s7 + $0x4] ss:$16 sps:$4 sm:$0xff]   ;;  %v8264_v2 = vld [vmem:[%s9506_s7 + $0xc] ss:$16 sps:$4 sm:$0xff]   ;;  %v9164_v3 = vmov 0   ;;  %vm1740_vm0 = vcmask 1046528  }
 0x10b   : > { %825 = vmatprep.mubr.bf16.mxu0 %v9164_v3  ;;  %938 = vmatprep.mubr.bf16.mxu1 %v9164_v3  ;;  %v8266_v4 = vld [vmem:[%s9506_s7] ss:$16 sps:$4 sm:$0xff]   ;;  %v8267_v5 = vld [vmem:[%s9506_s7 + $0x8] ss:$16 sps:$4 sm:$0xff]   ;;  %v8268_v6 = vld [vmem:[%s9506_s7 + $0x24] ss:$16 sps:$4 sm:$0xff]  }
 0x10c   : > { %793 = vmatprep.subr.bf16.mxu0 %v8262_v1  ;;  %906 = vmatprep.subr.bf16.mxu1 %v8264_v2  ;;  %v8270_v7 = vld [vmem:[%s9506_s7 + $0x2c] ss:$16 sps:$4 sm:$0xff]   ;;  %v8272_v8 = vld [vmem:[%s9506_s7 + $0x20] ss:$16 sps:$4 sm:$0xff]   ;;  %v8273_v9 = vld [vmem:[%s9506_s7 + $0x28] ss:$16 sps:$4 sm:$0xff]  }
 0x10d   : > { %794 = vmatpush1.bf16.msra.mxu0 %v8266_v4  ;;  %907 = vmatpush1.bf16.msra.mxu1 %v8267_v5  ;;  %v8274_v10 = vld [vmem:[%s9506_s7 + $0x44] ss:$16 sps:$4 sm:$0xff]   ;;  %v8276_v11 = vld [vmem:[%s9506_s7 + $0x4c] ss:$16 sps:$4 sm:$0xff]   ;;  %v8278_v12 = vld [vmem:[%s9506_s7 + $0x40] ss:$16 sps:$4 sm:$0xff]  }
 0x10e   : > { %795 = vmatprep.subr.bf16.mxu0 %v8268_v6  ;;  %908 = vmatprep.subr.bf16.mxu1 %v8270_v7  ;;  %v8279_v13 = vld [vmem:[%s9506_s7 + $0x48] ss:$16 sps:$4 sm:$0xff]   ;;  %v8280_v14 = vld [vmem:[%s9506_s7 + $0x64] ss:$16 sps:$4 sm:$0xff]   ;;  %v8282_v15 = vld [vmem:[%s9506_s7 + $0x6c] ss:$16 sps:$4 sm:$0xff]  }
 0x10f   : > { %v8284_v16 = vld [vmem:[%s9506_s7 + $0x60] ss:$16 sps:$4 sm:$0xff]   ;;  %v8285_v17 = vld [vmem:[%s9506_s7 + $0x68] ss:$16 sps:$4 sm:$0xff]   ;;  %v8286_v18 = vld [vmem:[%s9506_s7 + $0x84] ss:$16 sps:$4 sm:$0xff]  }
 0x110   : > { %v8288_v19 = vld [vmem:[%s9506_s7 + $0x8c] ss:$16 sps:$4 sm:$0xff]   ;;  %v8290_v20 = vld [vmem:[%s9506_s7 + $0x80] ss:$16 sps:$4 sm:$0xff]   ;;  %v8291_v21 = vld [vmem:[%s9506_s7 + $0x88] ss:$16 sps:$4 sm:$0xff]  }
 0x111   : > { %796 = vmatpush1.bf16.msra.mxu0 %v8272_v8  ;;  %909 = vmatpush1.bf16.msra.mxu1 %v8273_v9  ;;  %v8292_v22 = vld [vmem:[%s9506_s7 + $0xa4] ss:$16 sps:$4 sm:$0xff]   ;;  %v8294_v23 = vld [vmem:[%s9506_s7 + $0xac] ss:$16 sps:$4 sm:$0xff]   ;;  %v8296_v24 = vld [vmem:[%s9506_s7 + $0xa0] ss:$16 sps:$4 sm:$0xff]  }
 0x112   : > { %797 = vmatprep.subr.bf16.mxu0 %v8274_v10  ;;  %910 = vmatprep.subr.bf16.mxu1 %v8276_v11  ;;  %v8297_v25 = vld [vmem:[%s9506_s7 + $0xa8] ss:$16 sps:$4 sm:$0xff]   ;;  %v8298_v26 = vld [vmem:[%s9506_s7 + $0xc4] ss:$16 sps:$4 sm:$0xff]   ;;  %v8300_v27 = vld [vmem:[%s9506_s7 + $0xcc] ss:$16 sps:$4 sm:$0xff]  }
 0x113   : > { %v8302_v28 = vld [vmem:[%s9506_s7 + $0xc0] ss:$16 sps:$4 sm:$0xff]   ;;  %v8303_v29 = vld [vmem:[%s9506_s7 + $0xc8] ss:$16 sps:$4 sm:$0xff]   ;;  %v8304_v30 = vld [vmem:[%s9506_s7 + $0xe4] ss:$16 sps:$4 sm:$0xff]  }
 0x114   : > { %v8306_v31 = vld [vmem:[%s9506_s7 + $0xec] ss:$16 sps:$4 sm:$0xff]   ;;  %v8308_v32 = vld [vmem:[%s9506_s7 + $0xe0] ss:$16 sps:$4 sm:$0xff]   ;;  %v8309_v33 = vld [vmem:[%s9506_s7 + $0xe8] ss:$16 sps:$4 sm:$0xff]  }
 0x115   : > { %798 = vmatpush1.bf16.msra.mxu0 %v8278_v12  ;;  %911 = vmatpush1.bf16.msra.mxu1 %v8279_v13  ;;  %v8313_v34 = vld [vmem:[%s9506_s7 + $0x104] ss:$16 sps:$4 sm:$0xff]   ;;  %v8316_v35 = vld [vmem:[%s9506_s7 + $0x10c] ss:$16 sps:$4 sm:$0xff]   ;;  %v8311_v37 = vld [vmem:[%s9506_s7 + $0x100] ss:$16 sps:$4 sm:$0xff]  }
 0x116   : > { %799 = vmatprep.subr.bf16.mxu0 %v8280_v14  ;;  %912 = vmatprep.subr.bf16.mxu1 %v8282_v15  ;;  %v8310_v36 = vld [vmem:[%s9498_s27] sm:$0xff]   ;;  %v8317_v45 = vld [vmem:[%s9498_s27 + $0x8] sm:$0xff]   ;;  %v8324_v54 = vld [vmem:[%s9498_s27 + $0x10] sm:$0xff]   ;;  %vm1176_vm1 = vsmask.f32 7424  ;;  %s11109_s21 = sld [smem:[#allocation28_spill]] }
 0x117   : > { %v8314_v38 = vld [vmem:[%s9506_s7 + $0x108] ss:$16 sps:$4 sm:$0xff]   ;;  %v8320_v39 = vld [vmem:[%s9506_s7 + $0x124] ss:$16 sps:$4 sm:$0xff]   ;;  %v8323_v40 = vld [vmem:[%s9506_s7 + $0x12c] ss:$16 sps:$4 sm:$0xff]  }
 0x118   : > { %v8318_v41 = vld [vmem:[%s9506_s7 + $0x120] ss:$16 sps:$4 sm:$0xff]   ;;  %v8321_v42 = vld [vmem:[%s9506_s7 + $0x128] ss:$16 sps:$4 sm:$0xff]   ;;  %v8327_v43 = vld [vmem:[%s9506_s7 + $0x144] ss:$16 sps:$4 sm:$0xff]  }
 0x119   : > { %800 = vmatpush1.bf16.msra.mxu0 %v8284_v16  ;;  %913 = vmatpush1.bf16.msra.mxu1 %v8285_v17  ;;  %v8330_v44 = vld [vmem:[%s9506_s7 + $0x14c] ss:$16 sps:$4 sm:$0xff]   ;;  %v8325_v46 = vld [vmem:[%s9506_s7 + $0x140] ss:$16 sps:$4 sm:$0xff]   ;;  %v8328_v47 = vld [vmem:[%s9506_s7 + $0x148] ss:$16 sps:$4 sm:$0xff]  }
 0x11a   : > { %801 = vmatprep.subr.bf16.mxu0 %v8286_v18  ;;  %914 = vmatprep.subr.bf16.mxu1 %v8288_v19  ;;  %v8334_v48 = vld [vmem:[%s9506_s7 + $0x164] ss:$16 sps:$4 sm:$0xff]   ;;  %v8337_v49 = vld [vmem:[%s9506_s7 + $0x16c] ss:$16 sps:$4 sm:$0xff]   ;;  %v8332_v50 = vld [vmem:[%s9506_s7 + $0x160] ss:$16 sps:$4 sm:$0xff]  }
 0x11b   : > { %v8335_v51 = vld [vmem:[%s9506_s7 + $0x168] ss:$16 sps:$4 sm:$0xff]   ;;  %v8341_v52 = vld [vmem:[%s9506_s7 + $0x184] ss:$16 sps:$4 sm:$0xff]   ;;  %v8344_v53 = vld [vmem:[%s9506_s7 + $0x18c] ss:$16 sps:$4 sm:$0xff]  }
 0x11c   : > { %v8339_v55 = vld [vmem:[%s9506_s7 + $0x180] ss:$16 sps:$4 sm:$0xff]   ;;  %v8342_v56 = vld [vmem:[%s9506_s7 + $0x188] ss:$16 sps:$4 sm:$0xff]   ;;  %v8348_v57 = vld [vmem:[%s9506_s7 + $0x1a4] ss:$16 sps:$4 sm:$0xff]  }
 0x11d   : > { %802 = vmatpush1.bf16.msra.mxu0 %v8290_v20  ;;  %915 = vmatpush1.bf16.msra.mxu1 %v8291_v21  ;;  %v8351_v58 = vld [vmem:[%s9506_s7 + $0x1ac] ss:$16 sps:$4 sm:$0xff]   ;;  %v8346_v60 = vld [vmem:[%s9506_s7 + $0x1a0] ss:$16 sps:$4 sm:$0xff]   ;;  %v8349_v61 = vld [vmem:[%s9506_s7 + $0x1a8] ss:$16 sps:$4 sm:$0xff]  }
 0x11e   : > { %803 = vmatprep.subr.bf16.mxu0 %v8292_v22  ;;  %916 = vmatprep.subr.bf16.mxu1 %v8294_v23  ;;  %v8331_v59 = vld [vmem:[%s9498_s27 + $0x18] sm:$0xff]   ;;  %v9669_v5 = vld [vmem:[%s9498_s27 + $0x8] sm:$0xff]   ;;  %v9672_v6 = vld [vmem:[%s9498_s27 + $0x10] sm:$0xff]   ;;  %p7325_p1 = scmp.ge.s32.totalorder %s11109_s21, 16 }
 0x11f   : > { %v8355_v62 = vld [vmem:[%s9506_s7 + $0x1c4] ss:$16 sps:$4 sm:$0xff]   ;;  %v8358_v63 = vld [vmem:[%s9506_s7 + $0x1cc] ss:$16 sps:$4 sm:$0xff]   ;;  %v8353_v0 = vld [vmem:[%s9506_s7 + $0x1c0] ss:$16 sps:$4 sm:$0xff]  }
 0x120   : > { %v8356_v1 = vld [vmem:[%s9506_s7 + $0x1c8] ss:$16 sps:$4 sm:$0xff]   ;;  %v8362_v2 = vld [vmem:[%s9506_s7 + $0x1e4] ss:$16 sps:$4 sm:$0xff]   ;;  %v8365_v4 = vld [vmem:[%s9506_s7 + $0x1ec] ss:$16 sps:$4 sm:$0xff]  }
 0x121   : > { %804 = vmatpush1.bf16.msra.mxu0 %v8296_v24  ;;  %917 = vmatpush1.bf16.msra.mxu1 %v8297_v25  ;;  %v8360_v7 = vld [vmem:[%s9506_s7 + $0x1e0] ss:$16 sps:$4 sm:$0xff]   ;;  %v8363_v8 = vld [vmem:[%s9506_s7 + $0x1e8] ss:$16 sps:$4 sm:$0xff]   ;;  %v1742_v9 = vrot.slane %v9669_v5, 1  ;;  %v1744_v10 = vrot.slane %v9672_v6, 1 }
 0x122   : > { %805 = vmatprep.subr.bf16.mxu0 %v8298_v26  ;;  %918 = vmatprep.subr.bf16.mxu1 %v8300_v27  ;;  %v9681_v11 = vld [vmem:[%s9498_s27 + $0x18] sm:$0xff]   ;;  %v8338_v15 = vld [vmem:[%s9498_s27 + $0x20] sm:$0xff]   ;;  %v9700_v20 = vld [vmem:[%s9498_s27 + $0x28] sm:$0xff]  }
 0x123   : > { %v8370_v12 = vld [vmem:[%s9506_s7 + $0x204] ss:$16 sps:$4 sm:$0xff]   ;;  %v8373_v13 = vld [vmem:[%s9506_s7 + $0x20c] ss:$16 sps:$4 sm:$0xff]   ;;  %v9686_v14 = vsel %vm1740_vm0, %v1742_v9, %v1744_v10  ;;  %v1746_v16 = vrot.slane %v9681_v11, 1  ;;  %v1750_v23 = vrot.slane %v9700_v20, 1 }
 0x124   : > { %v9691_v17 = vld [vmem:[%s9498_s27 + $0x20] sm:$0xff]   ;;  %v8345_v22 = vld [vmem:[%s9498_s27 + $0x28] sm:$0xff]   ;;  %v9708_v24 = vld [vmem:[%s9498_s27 + $0x30] sm:$0xff]  }
 0x125   : > { %806 = vmatpush1.bf16.msra.mxu0 %v8302_v28  ;;  %919 = vmatpush1.bf16.msra.mxu1 %v8303_v29  ;;  %v9694_v18 = vsel %vm1740_vm0, %v1744_v10, %v1746_v16  ;;  %v1748_v19 = vrot.slane %v9691_v17, 1  ;;  %v1752_v26 = vrot.slane %v9708_v24, 1  ;;  %v9715_v27 = vld [vmem:[%s9498_s27 + $0x38] sm:$0xff]   ;;  %v1083_v28 = vld [vmem:[%s9498_s27] sm:$0xf] }
 0x126   : > { %807 = vmatprep.subr.bf16.mxu0 %v8304_v30  ;;  %920 = vmatprep.subr.bf16.mxu1 %v8306_v31  ;;  %v1084_v29 = vld [vmem:[%s9498_s27 + $0x4] sm:$0xf]  ;;  %v1754_v31 = vrot.slane %v9715_v27, 1 }
 0x127   : > { %v9703_v21 = vsel %vm1740_vm0, %v1746_v16, %v1748_v19  ;;  %v9711_v25 = vsel %vm1740_vm0, %v1748_v19, %v1750_v23  ;;  %v9722_v30 = vsel %vm1740_vm0, %v1750_v23, %v1752_v26  ;;  %v8398_v10 = vld [vmem:[%s9506_s7 + $0x284] ss:$16 sps:$4 sm:$0xff]   ;;  %v8399_v16 = vld [vmem:[%s9506_s7 + $0x288] ss:$16 sps:$4 sm:$0xff]  }
 0x128   : > { %v8405_v23 = vld [vmem:[%s9506_s7 + $0x2a4] ss:$16 sps:$4 sm:$0xff]  }
 0x129   : > { %808 = vmatpush1.bf16.msra.mxu0 %v8308_v32  ;;  %921 = vmatpush1.bf16.msra.mxu1 %v8309_v33  ;;  %v8352_v32 = vld [vmem:[%s9498_s27 + $0x30] sm:$0xff]   ;;  %v9727_v33 = vsel %vm1740_vm0, %v1752_v26, %v1754_v31 }
 0x12a   : > { %1413 = vmatprep.subr.bf16.mxu0 %v8313_v34  ;;  %1526 = vmatprep.subr.bf16.mxu1 %v8316_v35  ;;  %v6799_v34 = vcombine.low %v1083_v28, %v1084_v29  ;;  %v1703_v35 = vld [vmem:[%s9498_s27] sm:$0xe]  ;;  %v8408_v26 = vld [vmem:[%s9506_s7 + $0x2ac] ss:$16 sps:$4 sm:$0xff]  }
 0x12b   : > { %v8403_v28 = vld [vmem:[%s9506_s7 + $0x2a0] ss:$16 sps:$4 sm:$0xff]  }
 0x12c   : > { %826 = vmatmul.mubr.bf16.vlgmr.msra.gmra.mrb[0].mxu0 %v8310_v36  ;;  %939 = vmatmul.mubr.bf16.vlgmr.msra.gmra.mrb[0].mxu1 %v8310_v36  ;;  %v6872_v36 = vcombine.low %v1703_v35, %v1084_v29  ;;  %v8410_v35 = vld [vmem:[%s9506_s7 + $0x2c0] ss:$16 sps:$4 sm:$0xff]  }
 0x12d   : > { %1414 = vmatpush1.bf16.msra.mxu0 %v8311_v37  ;;  %1527 = vmatpush1.bf16.msra.mxu1 %v8314_v38  ;;  %v9731_v37 = vld [vmem:[%s9498_s27 + $0x40] ss:$0 sps:$4 sm:$0x11]   ;;  %v1180_v38 = vshll.u32 %v6799_v34, 16 }
 0x12e   : > { %835 = vmatprep.mubr.bf16.mxu0 %v9164_v3  ;;  %948 = vmatprep.mubr.bf16.mxu1 %v9164_v3 }
 0x12f   : > { %1415 = vmatprep.subr.bf16.mxu0 %v8320_v39  ;;  %1528 = vmatprep.subr.bf16.mxu1 %v8323_v40  ;;  %v1741_v39 = vrot.slane %v6872_v36, 1  ;;  %v1756_v40 = vrot.slane %v9731_v37, 1  ;;  %v8413_v36 = vld [vmem:[%s9506_s7 + $0x2c8] ss:$16 sps:$4 sm:$0xff]  }
 0x131   : > { %1416 = vmatpush1.bf16.msra.mxu0 %v8318_v41  ;;  %1529 = vmatpush1.bf16.msra.mxu1 %v8321_v42  ;;  %v9737_v41 = vsel %vm1740_vm0, %v1741_v39, %v1742_v9  ;;  %v8359_v42 = vld [vmem:[%s9498_s27 + $0x38] sm:$0xff]   ;;  %v1213_v39 = vshrl.u32 %v9691_v17, 16 }
 0x132   : > { %1417 = vmatprep.subr.bf16.mxu0 %v8327_v43  ;;  %1530 = vmatprep.subr.bf16.mxu1 %v8330_v44  ;;  %v9741_v43 = vsel %vm1740_vm0, %v1754_v31, %v1756_v40  ;;  %v1178_v44 = vshrl.u32 %v6799_v34, 16  ;;  %v8392_v9 = vld [vmem:[%s9506_s7 + $0x268] ss:$16 sps:$4 sm:$0xff]   ;;  %v8415_v34 = vld [vmem:[%s9506_s7 + $0x2cc] ss:$16 sps:$4 sm:$0xff]   ;;  %v1217_v40 = vshll.u32 %v9700_v20, 16 }
 0x134   : > { %836 = vmatmul.mubr.bf16.gmra.mrb[4].mxu0 %v8317_v45  ;;  %949 = vmatmul.mubr.bf16.gmra.mrb[4].mxu1 %v8317_v45  ;;  %v1182_v45 = vrot.slane %v1180_v38, 1 }
 0x135   : > { %845 = vmatprep.mubr.bf16.mxu0 %v9164_v3  ;;  %958 = vmatprep.mubr.bf16.mxu1 %v9164_v3 }
 0x136   : > { %1418 = vmatpush1.bf16.msra.mxu0 %v8325_v46  ;;  %1531 = vmatpush1.bf16.msra.mxu1 %v8328_v47  ;;  %v1185_v46 = vshll.u32 %v9669_v5, 16  ;;  %v1183_v47 = vor.u32 %v1182_v45, %v1178_v44  ;;  %v8422_v44 = vld [vmem:[%s9506_s7 + $0x2ec] ss:$16 sps:$4 sm:$0xff]   ;;  %v8417_v45 = vld [vmem:[%s9506_s7 + $0x2e0] ss:$16 sps:$4 sm:$0xff]  }
 0x137   : > { %1419 = vmatprep.subr.bf16.mxu0 %v8334_v48  ;;  %1532 = vmatprep.subr.bf16.mxu1 %v8337_v49  ;;  %v8368_v49 = vld [vmem:[%s9506_s7 + $0x200] ss:$16 sps:$4 sm:$0xff]  }
 0x138   : > { %v1187_v48 = vrot.slane %v1185_v46, 1  ;;  %v8420_v46 = vld [vmem:[%s9506_s7 + $0x2e8] ss:$16 sps:$4 sm:$0xff]  }
 0x13a   : > { %1420 = vmatpush1.bf16.msra.mxu0 %v8332_v50  ;;  %1533 = vmatpush1.bf16.msra.mxu1 %v8335_v51  ;;  %v1188_v50 = vsel %vm1176_vm1, %v1183_v47, %v1187_v48  ;;  %v8371_v51 = vld [vmem:[%s9506_s7 + $0x208] ss:$16 sps:$4 sm:$0xff]  }
 0x13b   : > { %1421 = vmatprep.subr.bf16.mxu0 %v8341_v52  ;;  %1534 = vmatprep.subr.bf16.mxu1 %v8344_v53  ;;  %v1189_v52 = vshrl.u32 %v9669_v5, 16  ;;  %v1193_v53 = vshll.u32 %v9672_v6, 16  ;;  %v8394_v5 = vld [vmem:[%s9506_s7 + $0x26c] ss:$16 sps:$4 sm:$0xff]  }
 0x13c   : > { %846 = vmatmul.mubr.bf16.gmra.mrb[8].mxu0 %v8324_v54  ;;  %959 = vmatmul.mubr.bf16.gmra.mrb[8].mxu1 %v8324_v54  ;;  %v8377_v54 = vld [vmem:[%s9506_s7 + $0x224] ss:$16 sps:$4 sm:$0xff]  }
 0x13d   : > { %855 = vmatprep.mubr.bf16.mxu0 %v9164_v3  ;;  %968 = vmatprep.mubr.bf16.mxu1 %v9164_v3 }
 0x13e   : > { %1422 = vmatpush1.bf16.msra.mxu0 %v8339_v55  ;;  %1535 = vmatpush1.bf16.msra.mxu1 %v8342_v56  ;;  %v8380_v55 = vld [vmem:[%s9506_s7 + $0x22c] ss:$16 sps:$4 sm:$0xff]   ;;  %v8375_v56 = vld [vmem:[%s9506_s7 + $0x220] ss:$16 sps:$4 sm:$0xff]  }
 0x13f   : > { %1423 = vmatprep.subr.bf16.mxu0 %v8348_v57  ;;  %1536 = vmatprep.subr.bf16.mxu1 %v8351_v58  ;;  %v1191_v57 = vor.u32 %v1189_v52, %v1187_v48  ;;  %v1195_v58 = vrot.slane %v1193_v53, 1  ;;  %v8426_v48 = vld [vmem:[%s9506_s7 + $0x304] ss:$16 sps:$4 sm:$0xff]   ;;  %v1225_v52 = vshll.u32 %v9708_v24, 16 }
 0x142   : > { %1424 = vmatpush1.bf16.msra.mxu0 %v8346_v60  ;;  %1537 = vmatpush1.bf16.msra.mxu1 %v8349_v61  ;;  %v8384_v60 = vld [vmem:[%s9506_s7 + $0x244] ss:$16 sps:$4 sm:$0xff]   ;;  %v8387_v61 = vld [vmem:[%s9506_s7 + $0x24c] ss:$16 sps:$4 sm:$0xff]  }
 0x143   : > { %1425 = vmatprep.subr.bf16.mxu0 %v8355_v62  ;;  %1538 = vmatprep.subr.bf16.mxu1 %v8358_v63  ;;  %v1196_v62 = vsel %vm1176_vm1, %v1191_v57, %v1195_v58  ;;  %v1197_v63 = vshrl.u32 %v9672_v6, 16 }
 0x144   : > { %856 = vmatmul.mubr.bf16.gmra.mrb[12].mxu0 %v8331_v59  ;;  %969 = vmatmul.mubr.bf16.gmra.mrb[12].mxu1 %v8331_v59  ;;  %v8378_v59 = vld [vmem:[%s9506_s7 + $0x228] ss:$16 sps:$4 sm:$0xff]  }
 0x145   : > { %865 = vmatprep.mubr.bf16.mxu0 %v9164_v3  ;;  %978 = vmatprep.mubr.bf16.mxu1 %v9164_v3  ;;  %v1199_v6 = vor.u32 %v1197_v63, %v1195_v58 }
 0x146   : > { %1426 = vmatpush1.bf16.msra.mxu0 %v8353_v0  ;;  %1539 = vmatpush1.bf16.msra.mxu1 %v8356_v1  ;;  %v1201_v0 = vshll.u32 %v9681_v11, 16  ;;  %v8382_v1 = vld [vmem:[%s9506_s7 + $0x240] ss:$16 sps:$4 sm:$0xff]  }
 0x147   : > { %1427 = vmatprep.subr.bf16.mxu0 %v8362_v2  ;;  %1540 = vmatprep.subr.bf16.mxu1 %v8365_v4  ;;  %v8385_v2 = vld [vmem:[%s9506_s7 + $0x248] ss:$16 sps:$4 sm:$0xff]   ;;  %v8391_v4 = vld [vmem:[%s9506_s7 + $0x264] ss:$16 sps:$4 sm:$0xff]  }
 0x14a   : > { %1428 = vmatpush1.bf16.msra.mxu0 %v8360_v7  ;;  %1541 = vmatpush1.bf16.msra.mxu1 %v8363_v8  ;;  %v1203_v7 = vrot.slane %v1201_v0, 1  ;;  %v8389_v8 = vld [vmem:[%s9506_s7 + $0x260] ss:$16 sps:$4 sm:$0xff]   ;;  %v8432_v0 = vld [vmem:[%s9506_s7 + $0x324] ss:$16 sps:$4 sm:$0xff]  }
 0x14b   : > { %1926 = vmatprep.subr.bf16.mxu0 %v8370_v12  ;;  %2039 = vmatprep.subr.bf16.mxu1 %v8373_v13  ;;  %v8401_v12 = vld [vmem:[%s9506_s7 + $0x28c] ss:$16 sps:$4 sm:$0xff]   ;;  %v1205_v13 = vshrl.u32 %v9681_v11, 16  ;;  %v8406_v11 = vld [vmem:[%s9506_s7 + $0x2a8] ss:$16 sps:$4 sm:$0xff]  }
 0x14c   : > { %866 = vmatmul.mubr.bf16.gmra.mrb[16].mxu0 %v8338_v15  ;;  %979 = vmatmul.mubr.bf16.gmra.mrb[16].mxu1 %v8338_v15  ;;  %v8396_v15 = vld [vmem:[%s9506_s7 + $0x280] ss:$16 sps:$4 sm:$0xff]   ;;  %v1204_v19 = vsel %vm1176_vm1, %v1199_v6, %v1203_v7  ;;  %v8441_v6 = vld [vmem:[%s9506_s7 + $0x34c] ss:$16 sps:$4 sm:$0xff]  }
 0x14d   : > { %875 = vmatprep.mubr.bf16.mxu0 %v9164_v3  ;;  %988 = vmatprep.mubr.bf16.mxu1 %v9164_v3  ;;  %v1207_v29 = vor.u32 %v1205_v13, %v1203_v7  ;;  %v8436_v7 = vld [vmem:[%s9506_s7 + $0x340] ss:$16 sps:$4 sm:$0xff]   ;;  %v8450_v13 = vld [vmem:[%s9506_s7 + $0x384] ss:$16 sps:$4 sm:$0xff]  }
 0x154   : > { %876 = vmatmul.mubr.bf16.gmra.mrb[20].mxu0 %v8345_v22  ;;  %989 = vmatmul.mubr.bf16.gmra.mrb[20].mxu1 %v8345_v22  ;;  %v1209_v22 = vshll.u32 %v9691_v17, 16  ;;  %v1219_v17 = vrot.slane %v1217_v40, 1  ;;  %v9886_v40 = vld [vmem:[%s9498_s27 + $0x10] sm:$0xff]  }
 0x155   : > { %885 = vmatprep.mubr.bf16.mxu0 %v9164_v3  ;;  %998 = vmatprep.mubr.bf16.mxu1 %v9164_v3 }
 0x156   : > { %v1211_v31 = vrot.slane %v1209_v22, 1  ;;  %v8456_v22 = vld [vmem:[%s9506_s7 + $0x3a4] ss:$16 sps:$4 sm:$0xff]  }
 0x158   : > { %v1212_v38 = vsel %vm1176_vm1, %v1207_v29, %v1211_v31  ;;  %v1215_v47 = vor.u32 %v1213_v39, %v1211_v31  ;;  %v8460_v29 = vld [vmem:[%s9506_s7 + $0x3c0] ss:$16 sps:$4 sm:$0xff]   ;;  %v8463_v31 = vld [vmem:[%s9506_s7 + $0x3c8] ss:$16 sps:$4 sm:$0xff]   ;;  %v8485_v39 = vld [vmem:[%s9506_s7 + $0x42c] ss:$16 sps:$4 sm:$0xff]  }
 0x15c   : > { %886 = vmatmul.mubr.bf16.gmra.mrb[24].mxu0 %v8352_v32  ;;  %999 = vmatmul.mubr.bf16.gmra.mrb[24].mxu1 %v8352_v32  ;;  %v8412_v32 = vld [vmem:[%s9506_s7 + $0x2c4] ss:$16 sps:$4 sm:$0xff]  }
 0x15d   : > { %895 = vmatprep.mubr.bf16.mxu0 %v9164_v3  ;;  %1008 = vmatprep.mubr.bf16.mxu1 %v9164_v3 }
 0x164   : > { %896 = vmatmul.mubr.bf16.gmra.mrb[28].mxu0 %v8359_v42  ;;  %1009 = vmatmul.mubr.bf16.gmra.mrb[28].mxu1 %v8359_v42  ;;  %v8419_v42 = vld [vmem:[%s9506_s7 + $0x2e4] ss:$16 sps:$4 sm:$0xff]  }
 0x165   : > { %1445 = vmatprep.mubr.bf16.mxu0 %v9164_v3  ;;  %1558 = vmatprep.mubr.bf16.mxu1 %v9164_v3 }
 0x16c   : > { %1446 = vmatmul.mubr.bf16.vlgmr.msra.gmra.mrb[0].mxu0 %v1188_v50  ;;  %1559 = vmatmul.mubr.bf16.vlgmr.msra.gmra.mrb[0].mxu1 %v1188_v50  ;;  %v1220_v50 = vsel %vm1176_vm1, %v1215_v47, %v1219_v17  ;;  %v3420_v47 = vrot.slane %v9886_v40, 1 }
 0x16d   : > { %1927 = vmatpush1.bf16.msra.mxu0 %v8368_v49  ;;  %2040 = vmatpush1.bf16.msra.mxu1 %v8371_v51  ;;  %v8429_v49 = vld [vmem:[%s9506_s7 + $0x30c] ss:$16 sps:$4 sm:$0xff]   ;;  %v1221_v51 = vshrl.u32 %v9700_v20, 16  ;;  %v1233_v20 = vshll.u32 %v9715_v27, 16 }
 0x16e   : > { %1455 = vmatprep.mubr.bf16.mxu0 %v9164_v3  ;;  %1568 = vmatprep.mubr.bf16.mxu1 %v9164_v3 }
 0x16f   : > { %1928 = vmatprep.subr.bf16.mxu0 %v8377_v54  ;;  %2041 = vmatprep.subr.bf16.mxu1 %v8380_v55  ;;  %v1223_v53 = vor.u32 %v1221_v51, %v1219_v17  ;;  %v1227_v54 = vrot.slane %v1225_v52, 1  ;;  %v1235_v58 = vrot.slane %v1233_v20, 1  ;;  %v8490_v51 = vld [vmem:[%s9506_s7 + $0x448] ss:$16 sps:$4 sm:$0xff]   ;;  %v8496_v52 = vld [vmem:[%s9506_s7 + $0x464] ss:$16 sps:$4 sm:$0xff]  }
 0x170   : > { %v8497_v20 = vld [vmem:[%s9506_s7 + $0x468] ss:$16 sps:$4 sm:$0xff]  }
 0x171   : > { %1929 = vmatpush1.bf16.msra.mxu0 %v8375_v56  ;;  %2042 = vmatpush1.bf16.msra.mxu1 %v8378_v59  ;;  %v1228_v55 = vsel %vm1176_vm1, %v1223_v53, %v1227_v54  ;;  %v1229_v56 = vshrl.u32 %v9708_v24, 16  ;;  %v1241_v24 = vshll.u32 %v9731_v37, 16  ;;  %v8427_v37 = vld [vmem:[%s9506_s7 + $0x308] ss:$16 sps:$4 sm:$0xff]   ;;  %v8499_v53 = vld [vmem:[%s9506_s7 + $0x46c] ss:$16 sps:$4 sm:$0xff]  }
 0x172   : > { %1930 = vmatprep.subr.bf16.mxu0 %v8384_v60  ;;  %2043 = vmatprep.subr.bf16.mxu1 %v8387_v61  ;;  %v1237_v60 = vshrl.u32 %v9715_v27, 16  ;;  %v8424_v27 = vld [vmem:[%s9506_s7 + $0x300] ss:$16 sps:$4 sm:$0xff]  }
 0x173   : > { %v1231_v57 = vor.u32 %v1229_v56, %v1227_v54  ;;  %v9910_v54 = vld [vmem:[%s9498_s27 + $0x20] sm:$0xff]  }
 0x174   : > { %1456 = vmatmul.mubr.bf16.gmra.mrb[4].mxu0 %v1196_v62  ;;  %1569 = vmatmul.mubr.bf16.gmra.mrb[4].mxu1 %v1196_v62  ;;  %v1239_v61 = vor.u32 %v1237_v60, %v1235_v58  ;;  %v1243_v62 = vrot.slane %v1241_v24, 1  ;;  %v8494_v56 = vld [vmem:[%s9506_s7 + $0x460] ss:$16 sps:$4 sm:$0xff]  }
 0x175   : > { %1465 = vmatprep.mubr.bf16.mxu0 %v9164_v3  ;;  %1578 = vmatprep.mubr.bf16.mxu1 %v9164_v3  ;;  %v1236_v59 = vsel %vm1176_vm1, %v1231_v57, %v1235_v58  ;;  %v8503_v57 = vld [vmem:[%s9506_s7 + $0x484] ss:$16 sps:$4 sm:$0xff]   ;;  %v8506_v58 = vld [vmem:[%s9506_s7 + $0x48c] ss:$16 sps:$4 sm:$0xff]   ;;  %v8501_v24 = vld [vmem:[%s9506_s7 + $0x480] ss:$16 sps:$4 sm:$0xff]  }
 0x176   : > { %1931 = vmatpush1.bf16.msra.mxu0 %v8382_v1  ;;  %2044 = vmatpush1.bf16.msra.mxu1 %v8385_v2  ;;  %v1244_v63 = vsel %vm1176_vm1, %v1239_v61, %v1243_v62  ;;  %v8435_v1 = vld [vmem:[%s9506_s7 + $0x32c] ss:$16 sps:$4 sm:$0xff]   ;;  %v8430_v2 = vld [vmem:[%s9506_s7 + $0x320] ss:$16 sps:$4 sm:$0xff]   ;;  %v8504_v61 = vld [vmem:[%s9506_s7 + $0x488] ss:$16 sps:$4 sm:$0xff]  }
 0x177   : > { %1932 = vmatprep.subr.bf16.mxu0 %v8391_v4  ;;  %2045 = vmatprep.subr.bf16.mxu1 %v8394_v5  ;;  %v8433_v4 = vld [vmem:[%s9506_s7 + $0x328] ss:$16 sps:$4 sm:$0xff]   ;;  %v8438_v5 = vld [vmem:[%s9506_s7 + $0x344] ss:$16 sps:$4 sm:$0xff]  }
 0x178   : > { %v8486_v60 = vld [vmem:[%s9498_s27 + $0x18] sm:$0xff]  }
 0x179   : > { %v8510_v62 = vld [vmem:[%s9506_s7 + $0x4a4] ss:$16 sps:$4 sm:$0xff]  }
 0x17a   : > { %1933 = vmatpush1.bf16.msra.mxu0 %v8389_v8  ;;  %2046 = vmatpush1.bf16.msra.mxu1 %v8392_v9  ;;  %v8439_v8 = vld [vmem:[%s9506_s7 + $0x348] ss:$16 sps:$4 sm:$0xff]   ;;  %v8447_v9 = vld [vmem:[%s9506_s7 + $0x36c] ss:$16 sps:$4 sm:$0xff]  }
 0x17b   : > { %1934 = vmatprep.subr.bf16.mxu0 %v8398_v10  ;;  %2047 = vmatprep.subr.bf16.mxu1 %v8401_v12  ;;  %v8442_v10 = vld [vmem:[%s9506_s7 + $0x360] ss:$16 sps:$4 sm:$0xff]   ;;  %v8445_v12 = vld [vmem:[%s9506_s7 + $0x368] ss:$16 sps:$4 sm:$0xff]  }
 0x17c   : > { %1466 = vmatmul.mubr.bf16.gmra.mrb[8].mxu0 %v1204_v19  ;;  %1579 = vmatmul.mubr.bf16.gmra.mrb[8].mxu1 %v1204_v19  ;;  %v8451_v19 = vld [vmem:[%s9506_s7 + $0x388] ss:$16 sps:$4 sm:$0xff]  }
 0x17d   : > { %1475 = vmatprep.mubr.bf16.mxu0 %v9164_v3  ;;  %1588 = vmatprep.mubr.bf16.mxu1 %v9164_v3 }
 0x17e   : > { %1935 = vmatpush1.bf16.msra.mxu0 %v8396_v15  ;;  %2048 = vmatpush1.bf16.msra.mxu1 %v8399_v16  ;;  %v8453_v15 = vld [vmem:[%s9506_s7 + $0x38c] ss:$16 sps:$4 sm:$0xff]   ;;  %v8448_v16 = vld [vmem:[%s9506_s7 + $0x380] ss:$16 sps:$4 sm:$0xff]  }
 0x17f   : > { %1936 = vmatprep.subr.bf16.mxu0 %v8405_v23  ;;  %2049 = vmatprep.subr.bf16.mxu1 %v8408_v26  ;;  %v8454_v23 = vld [vmem:[%s9506_s7 + $0x3a0] ss:$16 sps:$4 sm:$0xff]   ;;  %v8457_v26 = vld [vmem:[%s9506_s7 + $0x3a8] ss:$16 sps:$4 sm:$0xff]  }
 0x182   : > { %1937 = vmatpush1.bf16.msra.mxu0 %v8403_v28  ;;  %2050 = vmatpush1.bf16.msra.mxu1 %v8406_v11  ;;  %v8462_v28 = vld [vmem:[%s9506_s7 + $0x3c4] ss:$16 sps:$4 sm:$0xff]   ;;  %v8465_v11 = vld [vmem:[%s9506_s7 + $0x3cc] ss:$16 sps:$4 sm:$0xff]  }
 0x183   : > { %1938 = vmatprep.subr.bf16.mxu0 %v8412_v32  ;;  %2051 = vmatprep.subr.bf16.mxu1 %v8415_v34  ;;  %v8468_v32 = vld [vmem:[%s9506_s7 + $0x3e4] ss:$16 sps:$4 sm:$0xff]   ;;  %v8466_v34 = vld [vmem:[%s9506_s7 + $0x3e0] ss:$16 sps:$4 sm:$0xff]  }
 0x184   : > { %1476 = vmatmul.mubr.bf16.gmra.mrb[12].mxu0 %v1212_v38  ;;  %1589 = vmatmul.mubr.bf16.gmra.mrb[12].mxu1 %v1212_v38  ;;  %v8478_v38 = vld [vmem:[%s9506_s7 + $0x40c] ss:$16 sps:$4 sm:$0xff]  }
 0x185   : > { %1485 = vmatprep.mubr.bf16.mxu0 %v9164_v3  ;;  %1598 = vmatprep.mubr.bf16.mxu1 %v9164_v3 }
 0x186   : > { %1939 = vmatpush1.bf16.msra.mxu0 %v8410_v35  ;;  %2052 = vmatpush1.bf16.msra.mxu1 %v8413_v36  ;;  %v8469_v35 = vld [vmem:[%s9506_s7 + $0x3e8] ss:$16 sps:$4 sm:$0xff]   ;;  %v8475_v36 = vld [vmem:[%s9506_s7 + $0x404] ss:$16 sps:$4 sm:$0xff]  }
 0x187   : > { %1940 = vmatprep.subr.bf16.mxu0 %v8419_v42  ;;  %2053 = vmatprep.subr.bf16.mxu1 %v8422_v44  ;;  %v9889_v42 = vld [vmem:[%s9498_s27 + $0x18] sm:$0xff]  }
 0x188   : > { %v8483_v44 = vld [vmem:[%s9506_s7 + $0x428] ss:$16 sps:$4 sm:$0xff]   ;;  %v3422_v17 = vrot.slane %v9889_v42, 1 }
 0x18a   : > { %1941 = vmatpush1.bf16.msra.mxu0 %v8417_v45  ;;  %2054 = vmatpush1.bf16.msra.mxu1 %v8420_v46  ;;  %v8489_v45 = vld [vmem:[%s9506_s7 + $0x444] ss:$16 sps:$4 sm:$0xff]   ;;  %v8492_v46 = vld [vmem:[%s9506_s7 + $0x44c] ss:$16 sps:$4 sm:$0xff]  }
 0x18b   : > { %2473 = vmatprep.subr.bf16.mxu0 %v8426_v48  ;;  %2586 = vmatprep.subr.bf16.mxu1 %v8429_v49  ;;  %v8479_v48 = vld [vmem:[%s9498_s27 + $0x10] sm:$0xff]   ;;  %v9903_v49 = vsel %vm1740_vm0, %v3420_v47, %v3422_v17 }
 0x18c   : > { %1486 = vmatmul.mubr.bf16.gmra.mrb[16].mxu0 %v1220_v50  ;;  %1599 = vmatmul.mubr.bf16.gmra.mrb[16].mxu1 %v1220_v50  ;;  %v8487_v50 = vld [vmem:[%s9506_s7 + $0x440] ss:$16 sps:$4 sm:$0xff]  }
 0x18d   : > { %1495 = vmatprep.mubr.bf16.mxu0 %v9164_v3  ;;  %1608 = vmatprep.mubr.bf16.mxu1 %v9164_v3 }
 0x194   : > { %1496 = vmatmul.mubr.bf16.gmra.mrb[20].mxu0 %v1228_v55  ;;  %1609 = vmatmul.mubr.bf16.gmra.mrb[20].mxu1 %v1228_v55  ;;  %v3424_v55 = vrot.slane %v9910_v54, 1 }
 0x195   : > { %1505 = vmatprep.mubr.bf16.mxu0 %v9164_v3  ;;  %1618 = vmatprep.mubr.bf16.mxu1 %v9164_v3 }
 0x19c   : > { %1506 = vmatmul.mubr.bf16.gmra.mrb[24].mxu0 %v1236_v59  ;;  %1619 = vmatmul.mubr.bf16.gmra.mrb[24].mxu1 %v1236_v59  ;;  %v9920_v59 = vsel %vm1740_vm0, %v3422_v17, %v3424_v55 }
 0x19d   : > { %1515 = vmatprep.mubr.bf16.mxu0 %v9164_v3  ;;  %1628 = vmatprep.mubr.bf16.mxu1 %v9164_v3 }
 0x1a4   : > { %1516 = vmatmul.mubr.bf16.gmra.mrb[28].mxu0 %v1244_v63  ;;  %1629 = vmatmul.mubr.bf16.gmra.mrb[28].mxu1 %v1244_v63  ;;  %v8513_v63 = vld [vmem:[%s9506_s7 + $0x4ac] ss:$16 sps:$4 sm:$0xff]  }
 0x1a5   : > { %1958 = vmatprep.mubr.bf16.mxu0 %v9164_v3  ;;  %2071 = vmatprep.mubr.bf16.mxu1 %v9164_v3 }
 0x1ac   : > { %1959 = vmatmul.mubr.bf16.vlgmr.msra.gmra.mrb[0].mxu0 %v9737_v41  ;;  %2072 = vmatmul.mubr.bf16.vlgmr.msra.gmra.mrb[0].mxu1 %v9737_v41  ;;  %v8444_v41 = vld [vmem:[%s9506_s7 + $0x364] ss:$16 sps:$4 sm:$0xff]  }
 0x1ad   : > { %2474 = vmatpush1.bf16.msra.mxu0 %v8424_v27  ;;  %2587 = vmatpush1.bf16.msra.mxu1 %v8427_v37  ;;  %v9928_v27 = vld [vmem:[%s9498_s27 + $0x28] sm:$0xff]  }
 0x1ae   : > { %1968 = vmatprep.mubr.bf16.mxu0 %v9164_v3  ;;  %2081 = vmatprep.mubr.bf16.mxu1 %v9164_v3  ;;  %v3426_v37 = vrot.slane %v9928_v27, 1 }
 0x1af   : > { %2475 = vmatprep.subr.bf16.mxu0 %v8432_v0  ;;  %2588 = vmatprep.subr.bf16.mxu1 %v8435_v1  ;;  %v8508_v0 = vld [vmem:[%s9506_s7 + $0x4a0] ss:$16 sps:$4 sm:$0xff]   ;;  %v8511_v1 = vld [vmem:[%s9506_s7 + $0x4a8] ss:$16 sps:$4 sm:$0xff]  }
 0x1b1   : > { %2476 = vmatpush1.bf16.msra.mxu0 %v8430_v2  ;;  %2589 = vmatpush1.bf16.msra.mxu1 %v8433_v4  ;;  %v8517_v2 = vld [vmem:[%s9506_s7 + $0x4c4] ss:$16 sps:$4 sm:$0xff]   ;;  %v8520_v4 = vld [vmem:[%s9506_s7 + $0x4cc] ss:$16 sps:$4 sm:$0xff]  }
 0x1b2   : > { %2477 = vmatprep.subr.bf16.mxu0 %v8438_v5  ;;  %2590 = vmatprep.subr.bf16.mxu1 %v8441_v6  ;;  %v9938_v5 = vsel %vm1740_vm0, %v3424_v55, %v3426_v37  ;;  %v8493_v6 = vld [vmem:[%s9498_s27 + $0x20] sm:$0xff]  }
 0x1b3   : > { %v8542_v55 = vld [vmem:[%s9506_s7 + $0x52c] ss:$16 sps:$4 sm:$0xff]  }
 0x1b4   : > { %1969 = vmatmul.mubr.bf16.gmra.mrb[4].mxu0 %v9686_v14  ;;  %2082 = vmatmul.mubr.bf16.gmra.mrb[4].mxu1 %v9686_v14  ;;  %v8459_v14 = vld [vmem:[%s9506_s7 + $0x3ac] ss:$16 sps:$4 sm:$0xff]  }
 0x1b5   : > { %1978 = vmatprep.mubr.bf16.mxu0 %v9164_v3  ;;  %2091 = vmatprep.mubr.bf16.mxu1 %v9164_v3 }
 0x1b6   : > { %2478 = vmatpush1.bf16.msra.mxu0 %v8436_v7  ;;  %2591 = vmatpush1.bf16.msra.mxu1 %v8439_v8  ;;  %v8515_v7 = vld [vmem:[%s9506_s7 + $0x4c0] ss:$16 sps:$4 sm:$0xff]   ;;  %v8518_v8 = vld [vmem:[%s9506_s7 + $0x4c8] ss:$16 sps:$4 sm:$0xff]  }
 0x1b7   : > { %2479 = vmatprep.subr.bf16.mxu0 %v8444_v41  ;;  %2592 = vmatprep.subr.bf16.mxu1 %v8447_v9  ;;  %v8524_v41 = vld [vmem:[%s9506_s7 + $0x4e4] ss:$16 sps:$4 sm:$0xff]   ;;  %v8527_v9 = vld [vmem:[%s9506_s7 + $0x4ec] ss:$16 sps:$4 sm:$0xff]  }
 0x1ba   : > { %2480 = vmatpush1.bf16.msra.mxu0 %v8442_v10  ;;  %2593 = vmatpush1.bf16.msra.mxu1 %v8445_v12  ;;  %v9946_v10 = vld [vmem:[%s9498_s27 + $0x30] sm:$0xff]  }
 0x1bb   : > { %2481 = vmatprep.subr.bf16.mxu0 %v8450_v13  ;;  %2594 = vmatprep.subr.bf16.mxu1 %v8453_v15  ;;  %v3428_v12 = vrot.slane %v9946_v10, 1  ;;  %v8522_v13 = vld [vmem:[%s9506_s7 + $0x4e0] ss:$16 sps:$4 sm:$0xff]   ;;  %v8525_v15 = vld [vmem:[%s9506_s7 + $0x4e8] ss:$16 sps:$4 sm:$0xff]  }
 0x1bc   : > { %1979 = vmatmul.mubr.bf16.gmra.mrb[8].mxu0 %v9694_v18  ;;  %2092 = vmatmul.mubr.bf16.gmra.mrb[8].mxu1 %v9694_v18  ;;  %v8471_v18 = vld [vmem:[%s9506_s7 + $0x3ec] ss:$16 sps:$4 sm:$0xff]  }
 0x1bd   : > { %1988 = vmatprep.mubr.bf16.mxu0 %v9164_v3  ;;  %2101 = vmatprep.mubr.bf16.mxu1 %v9164_v3 }
 0x1be   : > { %2482 = vmatpush1.bf16.msra.mxu0 %v8448_v16  ;;  %2595 = vmatpush1.bf16.msra.mxu1 %v8451_v19  ;;  %v8532_v16 = vld [vmem:[%s9506_s7 + $0x504] ss:$16 sps:$4 sm:$0xff]   ;;  %v8535_v19 = vld [vmem:[%s9506_s7 + $0x50c] ss:$16 sps:$4 sm:$0xff]  }
 0x1bf   : > { %2483 = vmatprep.subr.bf16.mxu0 %v8456_v22  ;;  %2596 = vmatprep.subr.bf16.mxu1 %v8459_v14  ;;  %v9956_v22 = vsel %vm1740_vm0, %v3426_v37, %v3428_v12  ;;  %v8500_v14 = vld [vmem:[%s9498_s27 + $0x28] sm:$0xff]  }
 0x1c0   : > { %v8544_v37 = vld [vmem:[%s9506_s7 + $0x540] ss:$16 sps:$4 sm:$0xff]  }
 0x1c2   : > { %2484 = vmatpush1.bf16.msra.mxu0 %v8454_v23  ;;  %2597 = vmatpush1.bf16.msra.mxu1 %v8457_v26  ;;  %v9960_v23 = vld [vmem:[%s9498_s27 + $0x38] sm:$0xff]  }
 0x1c3   : > { %2485 = vmatprep.subr.bf16.mxu0 %v8462_v28  ;;  %2598 = vmatprep.subr.bf16.mxu1 %v8465_v11  ;;  %v3430_v26 = vrot.slane %v9960_v23, 1  ;;  %v8507_v11 = vld [vmem:[%s9498_s27 + $0x30] sm:$0xff]  }
 0x1c4   : > { %1989 = vmatmul.mubr.bf16.gmra.mrb[12].mxu0 %v9703_v21  ;;  %2102 = vmatmul.mubr.bf16.gmra.mrb[12].mxu1 %v9703_v21  ;;  %v8472_v21 = vld [vmem:[%s9498_s27 + $0x8] sm:$0xff]  }
 0x1c5   : > { %1998 = vmatprep.mubr.bf16.mxu0 %v9164_v3  ;;  %2111 = vmatprep.mubr.bf16.mxu1 %v9164_v3  ;;  %v9966_v28 = vsel %vm1740_vm0, %v3428_v12, %v3430_v26  ;;  %v2884_v12 = vshrl.u32 %v9910_v54, 16 }
 0x1c6   : > { %2486 = vmatpush1.bf16.msra.mxu0 %v8460_v29  ;;  %2599 = vmatpush1.bf16.msra.mxu1 %v8463_v31  ;;  %v9970_v29 = vld [vmem:[%s9498_s27 + $0x40] sm:$0xff]  }
 0x1c7   : > { %2487 = vmatprep.subr.bf16.mxu0 %v8468_v32  ;;  %2600 = vmatprep.subr.bf16.mxu1 %v8471_v18  ;;  %v3432_v31 = vrot.slane %v9970_v29, 1  ;;  %v2763_v32 = vld [vmem:[%s9498_s27 + $0x8] sm:$0xf]  ;;  %v9977_v18 = vld [vmem:[%s9498_s27 + $0xc] sm:$0xf] }
 0x1ca   : > { %2488 = vmatpush1.bf16.msra.mxu0 %v8466_v34  ;;  %2601 = vmatpush1.bf16.msra.mxu1 %v8469_v35  ;;  %v9980_v34 = vsel %vm1740_vm0, %v3430_v26, %v3432_v31  ;;  %v8514_v35 = vld [vmem:[%s9498_s27 + $0x38] sm:$0xff]  }
 0x1cb   : > { %3092 = vmatprep.subr.bf16.mxu0 %v8475_v36  ;;  %3205 = vmatprep.subr.bf16.mxu1 %v8478_v38  ;;  %v7009_v36 = vcombine.low %v2763_v32, %v9977_v18  ;;  %v9985_v38 = vld [vmem:[%s9498_s27 + $0x48] ss:$0 sps:$4 sm:$0x11]   ;;  %v8574_v32 = vld [vmem:[%s9506_s7 + $0x5c4] ss:$16 sps:$4 sm:$0xff]  }
 0x1cc   : > { %1999 = vmatmul.mubr.bf16.gmra.mrb[16].mxu0 %v9711_v25  ;;  %2112 = vmatmul.mubr.bf16.gmra.mrb[16].mxu1 %v9711_v25  ;;  %v8473_v25 = vld [vmem:[%s9506_s7 + $0x400] ss:$16 sps:$4 sm:$0xff]  }
 0x1cd   : > { %2008 = vmatprep.mubr.bf16.mxu0 %v9164_v3  ;;  %2121 = vmatprep.mubr.bf16.mxu1 %v9164_v3 }
 0x1d4   : > { %2009 = vmatmul.mubr.bf16.gmra.mrb[20].mxu0 %v9722_v30  ;;  %2122 = vmatmul.mubr.bf16.gmra.mrb[20].mxu1 %v9722_v30  ;;  %v8476_v30 = vld [vmem:[%s9506_s7 + $0x408] ss:$16 sps:$4 sm:$0xff]  }
 0x1d5   : > { %2018 = vmatprep.mubr.bf16.mxu0 %v9164_v3  ;;  %2131 = vmatprep.mubr.bf16.mxu1 %v9164_v3 }
 0x1dc   : > { %2019 = vmatmul.mubr.bf16.gmra.mrb[24].mxu0 %v9727_v33  ;;  %2132 = vmatmul.mubr.bf16.gmra.mrb[24].mxu1 %v9727_v33  ;;  %v8482_v33 = vld [vmem:[%s9506_s7 + $0x424] ss:$16 sps:$4 sm:$0xff]  }
 0x1dd   : > { %2028 = vmatprep.mubr.bf16.mxu0 %v9164_v3  ;;  %2141 = vmatprep.mubr.bf16.mxu1 %v9164_v3 }
 0x1e4   : > { %2029 = vmatmul.mubr.bf16.gmra.mrb[28].mxu0 %v9741_v43  ;;  %2142 = vmatmul.mubr.bf16.gmra.mrb[28].mxu1 %v9741_v43  ;;  %v8480_v43 = vld [vmem:[%s9506_s7 + $0x420] ss:$16 sps:$4 sm:$0xff]  }
 0x1e5   : > { %2505 = vmatprep.mubr.bf16.mxu0 %v9164_v3  ;;  %2618 = vmatprep.mubr.bf16.mxu1 %v9164_v3 }
 0x1ec   : > { %2506 = vmatmul.mubr.bf16.vlgmr.msra.gmra.mrb[0].mxu0 %v8472_v21  ;;  %2619 = vmatmul.mubr.bf16.vlgmr.msra.gmra.mrb[0].mxu1 %v8472_v21  ;;  %v2859_v21 = vshll.u32 %v7009_v36, 16 }
 0x1ed   : > { %3093 = vmatpush1.bf16.msra.mxu0 %v8473_v25  ;;  %3206 = vmatpush1.bf16.msra.mxu1 %v8476_v30  ;;  %v3434_v25 = vrot.slane %v9985_v38, 1 }
 0x1ee   : > { %2515 = vmatprep.mubr.bf16.mxu0 %v9164_v3  ;;  %2628 = vmatprep.mubr.bf16.mxu1 %v9164_v3 }
 0x1ef   : > { %3094 = vmatprep.subr.bf16.mxu0 %v8482_v33  ;;  %3207 = vmatprep.subr.bf16.mxu1 %v8485_v39  ;;  %v9991_v30 = vsel %vm1740_vm0, %v3432_v31, %v3434_v25  ;;  %v8521_v33 = vld [vmem:[%s9498_s27 + $0x40] sm:$0xff]   ;;  %v2857_v39 = vshrl.u32 %v7009_v36, 16  ;;  %v2896_v25 = vshll.u32 %v9946_v10, 16 }
 0x1f0   : > { %v8568_v31 = vld [vmem:[%s9506_s7 + $0x5a8] ss:$16 sps:$4 sm:$0xff]  }
 0x1f1   : > { %3095 = vmatpush1.bf16.msra.mxu0 %v8480_v43  ;;  %3208 = vmatpush1.bf16.msra.mxu1 %v8483_v44  ;;  %v2861_v43 = vrot.slane %v2859_v21, 1  ;;  %v2864_v44 = vshll.u32 %v9886_v40, 16  ;;  %v2892_v21 = vshrl.u32 %v9928_v27, 16 }
 0x1f2   : > { %3096 = vmatprep.subr.bf16.mxu0 %v8489_v45  ;;  %3209 = vmatprep.subr.bf16.mxu1 %v8492_v46 }
 0x1f3   : > { %v2862_v45 = vor.u32 %v2861_v43, %v2857_v39  ;;  %v2866_v46 = vrot.slane %v2864_v44, 1  ;;  %v8575_v39 = vld [vmem:[%s9506_s7 + $0x5c8] ss:$16 sps:$4 sm:$0xff]   ;;  %v8581_v43 = vld [vmem:[%s9506_s7 + $0x5e4] ss:$16 sps:$4 sm:$0xff]  }
 0x1f4   : > { %2516 = vmatmul.mubr.bf16.gmra.mrb[4].mxu0 %v8479_v48  ;;  %2629 = vmatmul.mubr.bf16.gmra.mrb[4].mxu1 %v8479_v48  ;;  %v8530_v48 = vld [vmem:[%s9506_s7 + $0x500] ss:$16 sps:$4 sm:$0xff]   ;;  %v8584_v44 = vld [vmem:[%s9506_s7 + $0x5ec] ss:$16 sps:$4 sm:$0xff]  }
 0x1f5   : > { %2525 = vmatprep.mubr.bf16.mxu0 %v9164_v3  ;;  %2638 = vmatprep.mubr.bf16.mxu1 %v9164_v3  ;;  %v2867_v17 = vsel %vm1176_vm1, %v2862_v45, %v2866_v46  ;;  %v2898_v45 = vrot.slane %v2896_v25, 1  ;;  %v8633_v25 = vld [vmem:[%s9506_s7 + $0x6ec] ss:$16 sps:$4 sm:$0xff]  }
 0x1f6   : > { %3097 = vmatpush1.bf16.msra.mxu0 %v8487_v50  ;;  %3210 = vmatpush1.bf16.msra.mxu1 %v8490_v51  ;;  %v8533_v50 = vld [vmem:[%s9506_s7 + $0x508] ss:$16 sps:$4 sm:$0xff]   ;;  %v2868_v51 = vshrl.u32 %v9886_v40, 16  ;;  %v8600_v40 = vld [vmem:[%s9506_s7 + $0x644] ss:$16 sps:$4 sm:$0xff]  }
 0x1f7   : > { %3098 = vmatprep.subr.bf16.mxu0 %v8496_v52  ;;  %3211 = vmatprep.subr.bf16.mxu1 %v8499_v53  ;;  %v2872_v52 = vshll.u32 %v9889_v42, 16  ;;  %v8539_v53 = vld [vmem:[%s9506_s7 + $0x524] ss:$16 sps:$4 sm:$0xff]  }
 0x1fa   : > { %3099 = vmatpush1.bf16.msra.mxu0 %v8494_v56  ;;  %3212 = vmatpush1.bf16.msra.mxu1 %v8497_v20  ;;  %v2870_v56 = vor.u32 %v2868_v51, %v2866_v46  ;;  %v2874_v20 = vrot.slane %v2872_v52, 1  ;;  %v8579_v46 = vld [vmem:[%s9506_s7 + $0x5e0] ss:$16 sps:$4 sm:$0xff]   ;;  %v2900_v52 = vshrl.u32 %v9946_v10, 16  ;;  %v2912_v10 = vshll.u32 %v9970_v29, 16 }
 0x1fb   : > { %3100 = vmatprep.subr.bf16.mxu0 %v8503_v57  ;;  %3213 = vmatprep.subr.bf16.mxu1 %v8506_v58  ;;  %v8537_v57 = vld [vmem:[%s9506_s7 + $0x520] ss:$16 sps:$4 sm:$0xff]   ;;  %v8540_v58 = vld [vmem:[%s9506_s7 + $0x528] ss:$16 sps:$4 sm:$0xff]  }
 0x1fc   : > { %2526 = vmatmul.mubr.bf16.gmra.mrb[8].mxu0 %v8486_v60  ;;  %2639 = vmatmul.mubr.bf16.gmra.mrb[8].mxu1 %v8486_v60  ;;  %v8546_v60 = vld [vmem:[%s9506_s7 + $0x544] ss:$16 sps:$4 sm:$0xff]  }
 0x1fd   : > { %2535 = vmatprep.mubr.bf16.mxu0 %v9164_v3  ;;  %2648 = vmatprep.mubr.bf16.mxu1 %v9164_v3 }
 0x1fe   : > { %3101 = vmatpush1.bf16.msra.mxu0 %v8501_v24  ;;  %3214 = vmatpush1.bf16.msra.mxu1 %v8504_v61  ;;  %v8549_v24 = vld [vmem:[%s9506_s7 + $0x54c] ss:$16 sps:$4 sm:$0xff]   ;;  %v2875_v61 = vsel %vm1176_vm1, %v2870_v56, %v2874_v20 }
 0x1ff   : > { %3102 = vmatprep.subr.bf16.mxu0 %v8510_v62  ;;  %3215 = vmatprep.subr.bf16.mxu1 %v8513_v63  ;;  %v2876_v62 = vshrl.u32 %v9889_v42, 16  ;;  %v2880_v63 = vshll.u32 %v9910_v54, 16 }
 0x201   : > { %v2878_v42 = vor.u32 %v2876_v62, %v2874_v20  ;;  %v2920_v62 = vshll.u32 %v9985_v38, 16 }
 0x202   : > { %3103 = vmatpush1.bf16.msra.mxu0 %v8508_v0  ;;  %3216 = vmatpush1.bf16.msra.mxu1 %v8511_v1  ;;  %v8547_v0 = vld [vmem:[%s9506_s7 + $0x548] ss:$16 sps:$4 sm:$0xff]   ;;  %v8553_v1 = vld [vmem:[%s9506_s7 + $0x564] ss:$16 sps:$4 sm:$0xff]  }
 0x203   : > { %3104 = vmatprep.subr.bf16.mxu0 %v8517_v2  ;;  %3217 = vmatprep.subr.bf16.mxu1 %v8520_v4  ;;  %v8556_v2 = vld [vmem:[%s9506_s7 + $0x56c] ss:$16 sps:$4 sm:$0xff]   ;;  %v2882_v4 = vrot.slane %v2880_v63, 1  ;;  %v2922_v63 = vrot.slane %v2920_v62, 1  ;;  %v8665_v62 = vld [vmem:[%s9506_s7 + $0x784] ss:$16 sps:$4 sm:$0xff]  }
 0x204   : > { %2536 = vmatmul.mubr.bf16.gmra.mrb[12].mxu0 %v8493_v6  ;;  %2649 = vmatmul.mubr.bf16.gmra.mrb[12].mxu1 %v8493_v6  ;;  %v8551_v6 = vld [vmem:[%s9506_s7 + $0x560] ss:$16 sps:$4 sm:$0xff]  }
 0x205   : > { %2545 = vmatprep.mubr.bf16.mxu0 %v9164_v3  ;;  %2658 = vmatprep.mubr.bf16.mxu1 %v9164_v3  ;;  %v2886_v54 = vor.u32 %v2884_v12, %v2882_v4  ;;  %v8609_v12 = vld [vmem:[%s9506_s7 + $0x66c] ss:$16 sps:$4 sm:$0xff]  }
 0x206   : > { %3105 = vmatpush1.bf16.msra.mxu0 %v8515_v7  ;;  %3218 = vmatpush1.bf16.msra.mxu1 %v8518_v8  ;;  %v8554_v7 = vld [vmem:[%s9506_s7 + $0x568] ss:$16 sps:$4 sm:$0xff]   ;;  %v8560_v8 = vld [vmem:[%s9506_s7 + $0x584] ss:$16 sps:$4 sm:$0xff]  }
 0x207   : > { %3106 = vmatprep.subr.bf16.mxu0 %v8524_v41  ;;  %3219 = vmatprep.subr.bf16.mxu1 %v8527_v9  ;;  %v8563_v41 = vld [vmem:[%s9506_s7 + $0x58c] ss:$16 sps:$4 sm:$0xff]   ;;  %v2883_v9 = vsel %vm1176_vm1, %v2878_v42, %v2882_v4  ;;  %v8589_v42 = vld [vmem:[%s9506_s7 + $0x608] ss:$16 sps:$4 sm:$0xff]   ;;  %v8594_v4 = vld [vmem:[%s9506_s7 + $0x624] ss:$16 sps:$4 sm:$0xff]  }
 0x20a   : > { %3107 = vmatpush1.bf16.msra.mxu0 %v8522_v13  ;;  %3220 = vmatpush1.bf16.msra.mxu1 %v8525_v15  ;;  %v2888_v13 = vshll.u32 %v9928_v27, 16  ;;  %v8558_v15 = vld [vmem:[%s9506_s7 + $0x580] ss:$16 sps:$4 sm:$0xff]  }
 0x20b   : > { %3604 = vmatprep.subr.bf16.mxu0 %v8532_v16  ;;  %3717 = vmatprep.subr.bf16.mxu1 %v8535_v19  ;;  %v8561_v16 = vld [vmem:[%s9506_s7 + $0x588] ss:$16 sps:$4 sm:$0xff]   ;;  %v8567_v19 = vld [vmem:[%s9506_s7 + $0x5a4] ss:$16 sps:$4 sm:$0xff]  }
 0x20c   : > { %2546 = vmatmul.mubr.bf16.gmra.mrb[16].mxu0 %v8500_v14  ;;  %2659 = vmatmul.mubr.bf16.gmra.mrb[16].mxu1 %v8500_v14  ;;  %v8570_v14 = vld [vmem:[%s9506_s7 + $0x5ac] ss:$16 sps:$4 sm:$0xff]   ;;  %v2890_v26 = vrot.slane %v2888_v13, 1  ;;  %v8604_v13 = vld [vmem:[%s9506_s7 + $0x660] ss:$16 sps:$4 sm:$0xff]  }
 0x20d   : > { %2555 = vmatprep.mubr.bf16.mxu0 %v9164_v3  ;;  %2668 = vmatprep.mubr.bf16.mxu1 %v9164_v3 }
 0x20e   : > { %v2891_v36 = vsel %vm1176_vm1, %v2886_v54, %v2890_v26  ;;  %v2894_v27 = vor.u32 %v2892_v21, %v2890_v26  ;;  %v8618_v54 = vld [vmem:[%s9506_s7 + $0x6a4] ss:$16 sps:$4 sm:$0xff]   ;;  %v8621_v26 = vld [vmem:[%s9506_s7 + $0x6ac] ss:$16 sps:$4 sm:$0xff]  }
 0x20f   : > { %v8630_v21 = vld [vmem:[%s9506_s7 + $0x6e4] ss:$16 sps:$4 sm:$0xff]  }
 0x210   : > { %v2899_v51 = vsel %vm1176_vm1, %v2894_v27, %v2898_v45  ;;  %v8647_v27 = vld [vmem:[%s9506_s7 + $0x72c] ss:$16 sps:$4 sm:$0xff]  }
 0x214   : > { %2556 = vmatmul.mubr.bf16.gmra.mrb[20].mxu0 %v8507_v11  ;;  %2669 = vmatmul.mubr.bf16.gmra.mrb[20].mxu1 %v8507_v11  ;;  %v8565_v11 = vld [vmem:[%s9506_s7 + $0x5a0] ss:$16 sps:$4 sm:$0xff]  }
 0x215   : > { %2565 = vmatprep.mubr.bf16.mxu0 %v9164_v3  ;;  %2678 = vmatprep.mubr.bf16.mxu1 %v9164_v3 }
 0x21c   : > { %2566 = vmatmul.mubr.bf16.gmra.mrb[24].mxu0 %v8514_v35  ;;  %2679 = vmatmul.mubr.bf16.gmra.mrb[24].mxu1 %v8514_v35  ;;  %v8577_v35 = vld [vmem:[%s9506_s7 + $0x5cc] ss:$16 sps:$4 sm:$0xff]  }
 0x21d   : > { %2575 = vmatprep.mubr.bf16.mxu0 %v9164_v3  ;;  %2688 = vmatprep.mubr.bf16.mxu1 %v9164_v3 }
 0x224   : > { %2576 = vmatmul.mubr.bf16.gmra.mrb[28].mxu0 %v8521_v33  ;;  %2689 = vmatmul.mubr.bf16.gmra.mrb[28].mxu1 %v8521_v33  ;;  %v8572_v33 = vld [vmem:[%s9506_s7 + $0x5c0] ss:$16 sps:$4 sm:$0xff]  }
 0x225   : > { %3124 = vmatprep.mubr.bf16.mxu0 %v9164_v3  ;;  %3237 = vmatprep.mubr.bf16.mxu1 %v9164_v3 }
 0x22c   : > { %3125 = vmatmul.mubr.bf16.vlgmr.msra.gmra.mrb[0].mxu0 %v2867_v17  ;;  %3238 = vmatmul.mubr.bf16.vlgmr.msra.gmra.mrb[0].mxu1 %v2867_v17  ;;  %v8582_v17 = vld [vmem:[%s9506_s7 + $0x5e8] ss:$16 sps:$4 sm:$0xff]  }
 0x22d   : > { %3605 = vmatpush1.bf16.msra.mxu0 %v8530_v48  ;;  %3718 = vmatpush1.bf16.msra.mxu1 %v8533_v50  ;;  %v8588_v48 = vld [vmem:[%s9506_s7 + $0x604] ss:$16 sps:$4 sm:$0xff]   ;;  %v8591_v50 = vld [vmem:[%s9506_s7 + $0x60c] ss:$16 sps:$4 sm:$0xff]  }
 0x22e   : > { %3134 = vmatprep.mubr.bf16.mxu0 %v9164_v3  ;;  %3247 = vmatprep.mubr.bf16.mxu1 %v9164_v3 }
 0x22f   : > { %3606 = vmatprep.subr.bf16.mxu0 %v8539_v53  ;;  %3719 = vmatprep.subr.bf16.mxu1 %v8542_v55  ;;  %v2904_v53 = vshll.u32 %v9960_v23, 16  ;;  %v2902_v55 = vor.u32 %v2900_v52, %v2898_v45  ;;  %v10140_v45 = vld [vmem:[%s9498_s27 + $0x18] sm:$0xff]  }
 0x230   : > { %v8654_v52 = vld [vmem:[%s9506_s7 + $0x74c] ss:$16 sps:$4 sm:$0xff]  }
 0x231   : > { %3607 = vmatpush1.bf16.msra.mxu0 %v8537_v57  ;;  %3720 = vmatpush1.bf16.msra.mxu1 %v8540_v58  ;;  %v2906_v56 = vrot.slane %v2904_v53, 1  ;;  %v2908_v57 = vshrl.u32 %v9960_v23, 16 }
 0x232   : > { %3608 = vmatprep.subr.bf16.mxu0 %v8546_v60  ;;  %3721 = vmatprep.subr.bf16.mxu1 %v8549_v24  ;;  %v2914_v60 = vrot.slane %v2912_v10, 1  ;;  %v8661_v10 = vld [vmem:[%s9506_s7 + $0x76c] ss:$16 sps:$4 sm:$0xff]  }
 0x233   : > { %v2907_v20 = vsel %vm1176_vm1, %v2902_v55, %v2906_v56  ;;  %v2910_v58 = vor.u32 %v2908_v57, %v2906_v56  ;;  %v8641_v55 = vld [vmem:[%s9498_s27 + $0x18] sm:$0xff]  }
 0x234   : > { %3135 = vmatmul.mubr.bf16.gmra.mrb[4].mxu0 %v2875_v61  ;;  %3248 = vmatmul.mubr.bf16.gmra.mrb[4].mxu1 %v2875_v61  ;;  %v2916_v61 = vshrl.u32 %v9970_v29, 16  ;;  %v8649_v56 = vld [vmem:[%s9506_s7 + $0x740] ss:$16 sps:$4 sm:$0xff]   ;;  %v8658_v57 = vld [vmem:[%s9506_s7 + $0x764] ss:$16 sps:$4 sm:$0xff]  }
 0x235   : > { %3144 = vmatprep.mubr.bf16.mxu0 %v9164_v3  ;;  %3257 = vmatprep.mubr.bf16.mxu1 %v9164_v3  ;;  %v2915_v24 = vsel %vm1176_vm1, %v2910_v58, %v2914_v60  ;;  %v10164_v58 = vld [vmem:[%s9498_s27 + $0x28] sm:$0xff]  }
 0x236   : > { %3609 = vmatpush1.bf16.msra.mxu0 %v8544_v37  ;;  %3722 = vmatpush1.bf16.msra.mxu1 %v8547_v0  ;;  %v2918_v23 = vor.u32 %v2916_v61, %v2914_v60  ;;  %v3382_v37 = vld [vmem:[%s9498_s27 + $0x8] sm:$0xe]  ;;  %v5102_v60 = vrot.slane %v10164_v58, 1 }
 0x237   : > { %3610 = vmatprep.subr.bf16.mxu0 %v8553_v1  ;;  %3723 = vmatprep.subr.bf16.mxu1 %v8556_v2  ;;  %v7082_v29 = vcombine.low %v3382_v37, %v9977_v18  ;;  %v8586_v2 = vld [vmem:[%s9506_s7 + $0x600] ss:$16 sps:$4 sm:$0xff]   ;;  %v8659_v61 = vld [vmem:[%s9506_s7 + $0x768] ss:$16 sps:$4 sm:$0xff]  }
 0x238   : > { %v2923_v0 = vsel %vm1176_vm1, %v2918_v23, %v2922_v63  ;;  %v8592_v18 = vld [vmem:[%s9506_s7 + $0x620] ss:$16 sps:$4 sm:$0xff]   ;;  %v8668_v23 = vld [vmem:[%s9506_s7 + $0x78c] ss:$16 sps:$4 sm:$0xff]  }
 0x239   : > { %v3419_v38 = vrot.slane %v7082_v29, 1  ;;  %v8648_v37 = vld [vmem:[%s9498_s27 + $0x20] sm:$0xff]  }
 0x23a   : > { %3611 = vmatpush1.bf16.msra.mxu0 %v8551_v6  ;;  %3724 = vmatpush1.bf16.msra.mxu1 %v8554_v7  ;;  %v8597_v6 = vld [vmem:[%s9506_s7 + $0x62c] ss:$16 sps:$4 sm:$0xff]   ;;  %v8595_v7 = vld [vmem:[%s9506_s7 + $0x628] ss:$16 sps:$4 sm:$0xff]  }
 0x23b   : > { %3612 = vmatprep.subr.bf16.mxu0 %v8560_v8  ;;  %3725 = vmatprep.subr.bf16.mxu1 %v8563_v41  ;;  %v3421_v1 = vsel %vm1740_vm0, %v3419_v38, %v3420_v47  ;;  %v8603_v47 = vld [vmem:[%s9506_s7 + $0x64c] ss:$16 sps:$4 sm:$0xff]   ;;  %v8598_v8 = vld [vmem:[%s9506_s7 + $0x640] ss:$16 sps:$4 sm:$0xff]   ;;  %v8601_v41 = vld [vmem:[%s9506_s7 + $0x648] ss:$16 sps:$4 sm:$0xff]  }
 0x23c   : > { %3145 = vmatmul.mubr.bf16.gmra.mrb[8].mxu0 %v2883_v9  ;;  %3258 = vmatmul.mubr.bf16.gmra.mrb[8].mxu1 %v2883_v9  ;;  %v8606_v9 = vld [vmem:[%s9506_s7 + $0x664] ss:$16 sps:$4 sm:$0xff]   ;;  %v8666_v29 = vld [vmem:[%s9506_s7 + $0x788] ss:$16 sps:$4 sm:$0xff]  }
 0x23d   : > { %3154 = vmatprep.mubr.bf16.mxu0 %v9164_v3  ;;  %3267 = vmatprep.mubr.bf16.mxu1 %v9164_v3  ;;  %v8672_v38 = vld [vmem:[%s9506_s7 + $0x7a4] ss:$16 sps:$4 sm:$0xff]  }
 0x23e   : > { %3613 = vmatpush1.bf16.msra.mxu0 %v8558_v15  ;;  %3726 = vmatpush1.bf16.msra.mxu1 %v8561_v16  ;;  %v8607_v15 = vld [vmem:[%s9506_s7 + $0x668] ss:$16 sps:$4 sm:$0xff]   ;;  %v8612_v16 = vld [vmem:[%s9506_s7 + $0x684] ss:$16 sps:$4 sm:$0xff]  }
 0x23f   : > { %3614 = vmatprep.subr.bf16.mxu0 %v8567_v19  ;;  %3727 = vmatprep.subr.bf16.mxu1 %v8570_v14  ;;  %v8615_v19 = vld [vmem:[%s9506_s7 + $0x68c] ss:$16 sps:$4 sm:$0xff]   ;;  %v8610_v14 = vld [vmem:[%s9506_s7 + $0x680] ss:$16 sps:$4 sm:$0xff]  }
 0x242   : > { %3615 = vmatpush1.bf16.msra.mxu0 %v8565_v11  ;;  %3728 = vmatpush1.bf16.msra.mxu1 %v8568_v31  ;;  %v8616_v11 = vld [vmem:[%s9506_s7 + $0x6a0] ss:$16 sps:$4 sm:$0xff]   ;;  %v8619_v31 = vld [vmem:[%s9506_s7 + $0x6a8] ss:$16 sps:$4 sm:$0xff]  }
 0x243   : > { %3616 = vmatprep.subr.bf16.mxu0 %v8574_v32  ;;  %3729 = vmatprep.subr.bf16.mxu1 %v8577_v35  ;;  %v8624_v32 = vld [vmem:[%s9506_s7 + $0x6c4] ss:$16 sps:$4 sm:$0xff]   ;;  %v8627_v35 = vld [vmem:[%s9506_s7 + $0x6cc] ss:$16 sps:$4 sm:$0xff]  }
 0x244   : > { %3155 = vmatmul.mubr.bf16.gmra.mrb[12].mxu0 %v2891_v36  ;;  %3268 = vmatmul.mubr.bf16.gmra.mrb[12].mxu1 %v2891_v36  ;;  %v8622_v36 = vld [vmem:[%s9506_s7 + $0x6c0] ss:$16 sps:$4 sm:$0xff]  }
 0x245   : > { %3164 = vmatprep.mubr.bf16.mxu0 %v9164_v3  ;;  %3277 = vmatprep.mubr.bf16.mxu1 %v9164_v3 }
 0x246   : > { %3617 = vmatpush1.bf16.msra.mxu0 %v8572_v33  ;;  %3730 = vmatpush1.bf16.msra.mxu1 %v8575_v39  ;;  %v8628_v33 = vld [vmem:[%s9506_s7 + $0x6e0] ss:$16 sps:$4 sm:$0xff]   ;;  %v8631_v39 = vld [vmem:[%s9506_s7 + $0x6e8] ss:$16 sps:$4 sm:$0xff]  }
 0x247   : > { %3618 = vmatprep.subr.bf16.mxu0 %v8581_v43  ;;  %3731 = vmatprep.subr.bf16.mxu1 %v8584_v44  ;;  %v8637_v43 = vld [vmem:[%s9506_s7 + $0x704] ss:$16 sps:$4 sm:$0xff]   ;;  %v8640_v44 = vld [vmem:[%s9506_s7 + $0x70c] ss:$16 sps:$4 sm:$0xff]  }
 0x24a   : > { %3619 = vmatpush1.bf16.msra.mxu0 %v8579_v46  ;;  %3732 = vmatpush1.bf16.msra.mxu1 %v8582_v17  ;;  %v10143_v46 = vld [vmem:[%s9498_s27 + $0x20] sm:$0xff]  }
 0x24b   : > { %4151 = vmatprep.subr.bf16.mxu0 %v8588_v48  ;;  %4264 = vmatprep.subr.bf16.mxu1 %v8591_v50  ;;  %v8645_v17 = vld [vmem:[%s9506_s7 + $0x728] ss:$16 sps:$4 sm:$0xff]   ;;  %v5098_v48 = vrot.slane %v10140_v45, 1  ;;  %v5100_v50 = vrot.slane %v10143_v46, 1 }
 0x24c   : > { %3165 = vmatmul.mubr.bf16.gmra.mrb[16].mxu0 %v2899_v51  ;;  %3278 = vmatmul.mubr.bf16.gmra.mrb[16].mxu1 %v2899_v51  ;;  %v8651_v51 = vld [vmem:[%s9506_s7 + $0x744] ss:$16 sps:$4 sm:$0xff]  }
 0x24d   : > { %3174 = vmatprep.mubr.bf16.mxu0 %v9164_v3  ;;  %3287 = vmatprep.mubr.bf16.mxu1 %v9164_v3  ;;  %v10156_v53 = vsel %vm1740_vm0, %v5098_v48, %v5100_v50  ;;  %v10174_v63 = vsel %vm1740_vm0, %v5100_v50, %v5102_v60 }
 0x254   : > { %3175 = vmatmul.mubr.bf16.gmra.mrb[20].mxu0 %v2907_v20  ;;  %3288 = vmatmul.mubr.bf16.gmra.mrb[20].mxu1 %v2907_v20  ;;  %v8652_v20 = vld [vmem:[%s9506_s7 + $0x748] ss:$16 sps:$4 sm:$0xff]  }
 0x255   : > { %3184 = vmatprep.mubr.bf16.mxu0 %v9164_v3  ;;  %3297 = vmatprep.mubr.bf16.mxu1 %v9164_v3 }
 0x25c   : > { %3185 = vmatmul.mubr.bf16.gmra.mrb[24].mxu0 %v2915_v24  ;;  %3298 = vmatmul.mubr.bf16.gmra.mrb[24].mxu1 %v2915_v24  ;;  %v8656_v24 = vld [vmem:[%s9506_s7 + $0x760] ss:$16 sps:$4 sm:$0xff]  }
 0x25d   : > { %3194 = vmatprep.mubr.bf16.mxu0 %v9164_v3  ;;  %3307 = vmatprep.mubr.bf16.mxu1 %v9164_v3 }
 0x264   : > { %3195 = vmatmul.mubr.bf16.gmra.mrb[28].mxu0 %v2923_v0  ;;  %3308 = vmatmul.mubr.bf16.gmra.mrb[28].mxu1 %v2923_v0  ;;  %v8663_v0 = vld [vmem:[%s9506_s7 + $0x780] ss:$16 sps:$4 sm:$0xff]  }
 0x265   : > { %3636 = vmatprep.mubr.bf16.mxu0 %v9164_v3  ;;  %3749 = vmatprep.mubr.bf16.mxu1 %v9164_v3 }
 0x26c   : > { %3637 = vmatmul.mubr.bf16.vlgmr.msra.gmra.mrb[0].mxu0 %v3421_v1  ;;  %3750 = vmatmul.mubr.bf16.vlgmr.msra.gmra.mrb[0].mxu1 %v3421_v1  ;;  %v8675_v1 = vld [vmem:[%s9506_s7 + $0x7ac] ss:$16 sps:$4 sm:$0xff]  }
 0x26d   : > { %4152 = vmatpush1.bf16.msra.mxu0 %v8586_v2  ;;  %4265 = vmatpush1.bf16.msra.mxu1 %v8589_v42  ;;  %v10182_v2 = vld [vmem:[%s9498_s27 + $0x30] sm:$0xff]  }
 0x26e   : > { %3646 = vmatprep.mubr.bf16.mxu0 %v9164_v3  ;;  %3759 = vmatprep.mubr.bf16.mxu1 %v9164_v3  ;;  %v5104_v42 = vrot.slane %v10182_v2, 1 }
 0x26f   : > { %4153 = vmatprep.subr.bf16.mxu0 %v8594_v4  ;;  %4266 = vmatprep.subr.bf16.mxu1 %v8597_v6  ;;  %v8670_v4 = vld [vmem:[%s9506_s7 + $0x7a0] ss:$16 sps:$4 sm:$0xff]   ;;  %v8673_v6 = vld [vmem:[%s9506_s7 + $0x7a8] ss:$16 sps:$4 sm:$0xff]  }
 0x271   : > { %4154 = vmatpush1.bf16.msra.mxu0 %v8592_v18  ;;  %4267 = vmatpush1.bf16.msra.mxu1 %v8595_v7  ;;  %v8679_v18 = vld [vmem:[%s9506_s7 + $0x7c4] ss:$16 sps:$4 sm:$0xff]   ;;  %v8682_v7 = vld [vmem:[%s9506_s7 + $0x7cc] ss:$16 sps:$4 sm:$0xff]  }
 0x272   : > { %4155 = vmatprep.subr.bf16.mxu0 %v8600_v40  ;;  %4268 = vmatprep.subr.bf16.mxu1 %v8603_v47  ;;  %v10192_v40 = vsel %vm1740_vm0, %v5102_v60, %v5104_v42  ;;  %v8655_v47 = vld [vmem:[%s9498_s27 + $0x28] sm:$0xff]  }
 0x273   : > { %v8704_v60 = vld [vmem:[%s9506_s7 + $0x82c] ss:$16 sps:$4 sm:$0xff]  }
 0x274   : > { %3647 = vmatmul.mubr.bf16.gmra.mrb[4].mxu0 %v9903_v49  ;;  %3760 = vmatmul.mubr.bf16.gmra.mrb[4].mxu1 %v9903_v49  ;;  %v8613_v49 = vld [vmem:[%s9506_s7 + $0x688] ss:$16 sps:$4 sm:$0xff]  }
 0x275   : > { %3656 = vmatprep.mubr.bf16.mxu0 %v9164_v3  ;;  %3769 = vmatprep.mubr.bf16.mxu1 %v9164_v3 }
 0x276   : > { %4156 = vmatpush1.bf16.msra.mxu0 %v8598_v8  ;;  %4269 = vmatpush1.bf16.msra.mxu1 %v8601_v41  ;;  %v8677_v8 = vld [vmem:[%s9506_s7 + $0x7c0] ss:$16 sps:$4 sm:$0xff]   ;;  %v8680_v41 = vld [vmem:[%s9506_s7 + $0x7c8] ss:$16 sps:$4 sm:$0xff]  }
 0x277   : > { %4157 = vmatprep.subr.bf16.mxu0 %v8606_v9  ;;  %4270 = vmatprep.subr.bf16.mxu1 %v8609_v12  ;;  %v8686_v9 = vld [vmem:[%s9506_s7 + $0x7e4] ss:$16 sps:$4 sm:$0xff]   ;;  %v8689_v12 = vld [vmem:[%s9506_s7 + $0x7ec] ss:$16 sps:$4 sm:$0xff]  }
 0x27a   : > { %4158 = vmatpush1.bf16.msra.mxu0 %v8604_v13  ;;  %4271 = vmatpush1.bf16.msra.mxu1 %v8607_v15  ;;  %v10200_v13 = vld [vmem:[%s9498_s27 + $0x38] sm:$0xff]  }
 0x27b   : > { %4159 = vmatprep.subr.bf16.mxu0 %v8612_v16  ;;  %4272 = vmatprep.subr.bf16.mxu1 %v8615_v19  ;;  %v5106_v15 = vrot.slane %v10200_v13, 1  ;;  %v8684_v16 = vld [vmem:[%s9506_s7 + $0x7e0] ss:$16 sps:$4 sm:$0xff]   ;;  %v8687_v19 = vld [vmem:[%s9506_s7 + $0x7e8] ss:$16 sps:$4 sm:$0xff]  }
 0x27c   : > { %3657 = vmatmul.mubr.bf16.gmra.mrb[8].mxu0 %v9920_v59  ;;  %3770 = vmatmul.mubr.bf16.gmra.mrb[8].mxu1 %v9920_v59  ;;  %v8625_v59 = vld [vmem:[%s9506_s7 + $0x6c8] ss:$16 sps:$4 sm:$0xff]  }
 0x27d   : > { %3666 = vmatprep.mubr.bf16.mxu0 %v9164_v3  ;;  %3779 = vmatprep.mubr.bf16.mxu1 %v9164_v3 }
 0x27e   : > { %4160 = vmatpush1.bf16.msra.mxu0 %v8610_v14  ;;  %4273 = vmatpush1.bf16.msra.mxu1 %v8613_v49  ;;  %v8694_v14 = vld [vmem:[%s9506_s7 + $0x804] ss:$16 sps:$4 sm:$0xff]   ;;  %v8697_v49 = vld [vmem:[%s9506_s7 + $0x80c] ss:$16 sps:$4 sm:$0xff]  }
 0x27f   : > { %4161 = vmatprep.subr.bf16.mxu0 %v8618_v54  ;;  %4274 = vmatprep.subr.bf16.mxu1 %v8621_v26  ;;  %v10210_v54 = vsel %vm1740_vm0, %v5104_v42, %v5106_v15  ;;  %v8662_v26 = vld [vmem:[%s9498_s27 + $0x30] sm:$0xff]  }
 0x280   : > { %v8706_v42 = vld [vmem:[%s9506_s7 + $0x840] ss:$16 sps:$4 sm:$0xff]  }
 0x282   : > { %4162 = vmatpush1.bf16.msra.mxu0 %v8616_v11  ;;  %4275 = vmatpush1.bf16.msra.mxu1 %v8619_v31  ;;  %v10214_v11 = vld [vmem:[%s9498_s27 + $0x40] sm:$0xff]  }
 0x283   : > { %4163 = vmatprep.subr.bf16.mxu0 %v8624_v32  ;;  %4276 = vmatprep.subr.bf16.mxu1 %v8627_v35  ;;  %v5108_v31 = vrot.slane %v10214_v11, 1  ;;  %v8669_v35 = vld [vmem:[%s9498_s27 + $0x38] sm:$0xff]  }
 0x284   : > { %3667 = vmatmul.mubr.bf16.gmra.mrb[12].mxu0 %v9938_v5  ;;  %3780 = vmatmul.mubr.bf16.gmra.mrb[12].mxu1 %v9938_v5  ;;  %v8634_v5 = vld [vmem:[%s9498_s27 + $0x10] sm:$0xff]  }
 0x285   : > { %3676 = vmatprep.mubr.bf16.mxu0 %v9164_v3  ;;  %3789 = vmatprep.mubr.bf16.mxu1 %v9164_v3  ;;  %v10220_v32 = vsel %vm1740_vm0, %v5106_v15, %v5108_v31  ;;  %v4562_v15 = vshrl.u32 %v10164_v58, 16 }
 0x286   : > { %4164 = vmatpush1.bf16.msra.mxu0 %v8622_v36  ;;  %4277 = vmatpush1.bf16.msra.mxu1 %v8625_v59  ;;  %v10224_v36 = vld [vmem:[%s9498_s27 + $0x48] sm:$0xff]  }
 0x287   : > { %4165 = vmatprep.subr.bf16.mxu0 %v8630_v21  ;;  %4278 = vmatprep.subr.bf16.mxu1 %v8633_v25  ;;  %v5110_v59 = vrot.slane %v10224_v36, 1  ;;  %v4441_v21 = vld [vmem:[%s9498_s27 + $0x10] sm:$0xf]  ;;  %v10231_v25 = vld [vmem:[%s9498_s27 + $0x14] sm:$0xf] }
 0x28a   : > { %4166 = vmatpush1.bf16.msra.mxu0 %v8628_v33  ;;  %4279 = vmatpush1.bf16.msra.mxu1 %v8631_v39  ;;  %v10234_v33 = vsel %vm1740_vm0, %v5108_v31, %v5110_v59  ;;  %v8676_v39 = vld [vmem:[%s9498_s27 + $0x40] sm:$0xff]  }
 0x28b   : > { %4770 = vmatprep.subr.bf16.mxu0 %v8637_v43  ;;  %4883 = vmatprep.subr.bf16.mxu1 %v8640_v44  ;;  %v7219_v43 = vcombine.low %v4441_v21, %v10231_v25  ;;  %v10239_v44 = vld [vmem:[%s9498_s27 + $0x50] ss:$0 sps:$4 sm:$0x11]   ;;  %v8736_v21 = vld [vmem:[%s9506_s7 + $0x8c4] ss:$16 sps:$4 sm:$0xff]  }
 0x28c   : > { %3677 = vmatmul.mubr.bf16.gmra.mrb[16].mxu0 %v9956_v22  ;;  %3790 = vmatmul.mubr.bf16.gmra.mrb[16].mxu1 %v9956_v22  ;;  %v8635_v22 = vld [vmem:[%s9506_s7 + $0x700] ss:$16 sps:$4 sm:$0xff]  }
 0x28d   : > { %3686 = vmatprep.mubr.bf16.mxu0 %v9164_v3  ;;  %3799 = vmatprep.mubr.bf16.mxu1 %v9164_v3 }
 0x294   : > { %3687 = vmatmul.mubr.bf16.gmra.mrb[20].mxu0 %v9966_v28  ;;  %3800 = vmatmul.mubr.bf16.gmra.mrb[20].mxu1 %v9966_v28  ;;  %v8638_v28 = vld [vmem:[%s9506_s7 + $0x708] ss:$16 sps:$4 sm:$0xff]  }
 0x295   : > { %3696 = vmatprep.mubr.bf16.mxu0 %v9164_v3  ;;  %3809 = vmatprep.mubr.bf16.mxu1 %v9164_v3 }
 0x29c   : > { %3697 = vmatmul.mubr.bf16.gmra.mrb[24].mxu0 %v9980_v34  ;;  %3810 = vmatmul.mubr.bf16.gmra.mrb[24].mxu1 %v9980_v34  ;;  %v8644_v34 = vld [vmem:[%s9506_s7 + $0x724] ss:$16 sps:$4 sm:$0xff]  }
 0x29d   : > { %3706 = vmatprep.mubr.bf16.mxu0 %v9164_v3  ;;  %3819 = vmatprep.mubr.bf16.mxu1 %v9164_v3 }
 0x2a4   : > { %3707 = vmatmul.mubr.bf16.gmra.mrb[28].mxu0 %v9991_v30  ;;  %3820 = vmatmul.mubr.bf16.gmra.mrb[28].mxu1 %v9991_v30  ;;  %v8642_v30 = vld [vmem:[%s9506_s7 + $0x720] ss:$16 sps:$4 sm:$0xff]  }
 0x2a5   : > { %4183 = vmatprep.mubr.bf16.mxu0 %v9164_v3  ;;  %4296 = vmatprep.mubr.bf16.mxu1 %v9164_v3 }
 0x2ac   : > { %4184 = vmatmul.mubr.bf16.vlgmr.msra.gmra.mrb[0].mxu0 %v8634_v5  ;;  %4297 = vmatmul.mubr.bf16.vlgmr.msra.gmra.mrb[0].mxu1 %v8634_v5  ;;  %v4537_v5 = vshll.u32 %v7219_v43, 16 }
 0x2ad   : > { %4771 = vmatpush1.bf16.msra.mxu0 %v8635_v22  ;;  %4884 = vmatpush1.bf16.msra.mxu1 %v8638_v28  ;;  %v5112_v22 = vrot.slane %v10239_v44, 1 }
 0x2ae   : > { %4193 = vmatprep.mubr.bf16.mxu0 %v9164_v3  ;;  %4306 = vmatprep.mubr.bf16.mxu1 %v9164_v3 }
 0x2af   : > { %4772 = vmatprep.subr.bf16.mxu0 %v8644_v34  ;;  %4885 = vmatprep.subr.bf16.mxu1 %v8647_v27  ;;  %v10245_v28 = vsel %vm1740_vm0, %v5110_v59, %v5112_v22  ;;  %v8683_v34 = vld [vmem:[%s9498_s27 + $0x48] sm:$0xff]   ;;  %v4535_v27 = vshrl.u32 %v7219_v43, 16  ;;  %v4574_v22 = vshll.u32 %v10200_v13, 16 }
 0x2b0   : > { %v8730_v59 = vld [vmem:[%s9506_s7 + $0x8a8] ss:$16 sps:$4 sm:$0xff]  }
 0x2b1   : > { %4773 = vmatpush1.bf16.msra.mxu0 %v8642_v30  ;;  %4886 = vmatpush1.bf16.msra.mxu1 %v8645_v17  ;;  %v4539_v30 = vrot.slane %v4537_v5, 1  ;;  %v4542_v17 = vshll.u32 %v10140_v45, 16  ;;  %v4570_v5 = vshrl.u32 %v10182_v2, 16 }
 0x2b2   : > { %4774 = vmatprep.subr.bf16.mxu0 %v8651_v51  ;;  %4887 = vmatprep.subr.bf16.mxu1 %v8654_v52 }
 0x2b3   : > { %v4540_v50 = vor.u32 %v4539_v30, %v4535_v27  ;;  %v4544_v51 = vrot.slane %v4542_v17, 1  ;;  %v8737_v27 = vld [vmem:[%s9506_s7 + $0x8c8] ss:$16 sps:$4 sm:$0xff]   ;;  %v8743_v30 = vld [vmem:[%s9506_s7 + $0x8e4] ss:$16 sps:$4 sm:$0xff]  }
 0x2b4   : > { %4194 = vmatmul.mubr.bf16.gmra.mrb[4].mxu0 %v8641_v55  ;;  %4307 = vmatmul.mubr.bf16.gmra.mrb[4].mxu1 %v8641_v55  ;;  %v8692_v55 = vld [vmem:[%s9506_s7 + $0x800] ss:$16 sps:$4 sm:$0xff]   ;;  %v8746_v17 = vld [vmem:[%s9506_s7 + $0x8ec] ss:$16 sps:$4 sm:$0xff]  }
 0x2b5   : > { %4203 = vmatprep.mubr.bf16.mxu0 %v9164_v3  ;;  %4316 = vmatprep.mubr.bf16.mxu1 %v9164_v3  ;;  %v4545_v52 = vsel %vm1176_vm1, %v4540_v50, %v4544_v51 }
 0x2b6   : > { %4775 = vmatpush1.bf16.msra.mxu0 %v8649_v56  ;;  %4888 = vmatpush1.bf16.msra.mxu1 %v8652_v20  ;;  %v8695_v56 = vld [vmem:[%s9506_s7 + $0x808] ss:$16 sps:$4 sm:$0xff]   ;;  %v4546_v20 = vshrl.u32 %v10140_v45, 16  ;;  %v473_v45 = vld [vmem:[#allocation2] sm:$0xff] }
 0x2b7   : > { %4776 = vmatprep.subr.bf16.mxu0 %v8658_v57  ;;  %4889 = vmatprep.subr.bf16.mxu1 %v8661_v10  ;;  %v4550_v57 = vshll.u32 %v10143_v46, 16  ;;  %v8701_v10 = vld [vmem:[%s9506_s7 + $0x824] ss:$16 sps:$4 sm:$0xff]  }
 0x2ba   : > { %4777 = vmatpush1.bf16.msra.mxu0 %v8656_v24  ;;  %4890 = vmatpush1.bf16.msra.mxu1 %v8659_v61  ;;  %v4548_v24 = vor.u32 %v4546_v20, %v4544_v51  ;;  %v4552_v61 = vrot.slane %v4550_v57, 1  ;;  %v8741_v51 = vld [vmem:[%s9506_s7 + $0x8e0] ss:$16 sps:$4 sm:$0xff]   ;;  %v4582_v20 = vshll.u32 %v10214_v11, 16 }
 0x2bb   : > { %4778 = vmatprep.subr.bf16.mxu0 %v8665_v62  ;;  %4891 = vmatprep.subr.bf16.mxu1 %v8668_v23  ;;  %v8699_v62 = vld [vmem:[%s9506_s7 + $0x820] ss:$16 sps:$4 sm:$0xff]   ;;  %v8702_v23 = vld [vmem:[%s9506_s7 + $0x828] ss:$16 sps:$4 sm:$0xff]  }
 0x2bc   : > { %4204 = vmatmul.mubr.bf16.gmra.mrb[8].mxu0 %v8648_v37  ;;  %4317 = vmatmul.mubr.bf16.gmra.mrb[8].mxu1 %v8648_v37  ;;  %v8708_v37 = vld [vmem:[%s9506_s7 + $0x844] ss:$16 sps:$4 sm:$0xff]  }
 0x2bd   : > { %4213 = vmatprep.mubr.bf16.mxu0 %v9164_v3  ;;  %4326 = vmatprep.mubr.bf16.mxu1 %v9164_v3 }
 0x2be   : > { %4779 = vmatpush1.bf16.msra.mxu0 %v8663_v0  ;;  %4892 = vmatpush1.bf16.msra.mxu1 %v8666_v29  ;;  %v8711_v0 = vld [vmem:[%s9506_s7 + $0x84c] ss:$16 sps:$4 sm:$0xff]   ;;  %v4553_v29 = vsel %vm1176_vm1, %v4548_v24, %v4552_v61  ;;  %v4586_v24 = vshrl.u32 %v10214_v11, 16 }
 0x2bf   : > { %4780 = vmatprep.subr.bf16.mxu0 %v8672_v38  ;;  %4893 = vmatprep.subr.bf16.mxu1 %v8675_v1  ;;  %v4554_v38 = vshrl.u32 %v10143_v46, 16  ;;  %v4558_v1 = vshll.u32 %v10164_v58, 16 }
 0x2c1   : > { %v4556_v46 = vor.u32 %v4554_v38, %v4552_v61  ;;  %v4590_v61 = vshll.u32 %v10224_v36, 16  ;;  %v5060_v38 = vld [vmem:[%s9498_s27 + $0x10] sm:$0xe] }
 0x2c2   : > { %4781 = vmatpush1.bf16.msra.mxu0 %v8670_v4  ;;  %4894 = vmatpush1.bf16.msra.mxu1 %v8673_v6  ;;  %v8709_v4 = vld [vmem:[%s9506_s7 + $0x848] ss:$16 sps:$4 sm:$0xff]   ;;  %v8715_v6 = vld [vmem:[%s9506_s7 + $0x864] ss:$16 sps:$4 sm:$0xff]  }
 0x2c3   : > { %4782 = vmatprep.subr.bf16.mxu0 %v8679_v18  ;;  %4895 = vmatprep.subr.bf16.mxu1 %v8682_v7  ;;  %v8718_v18 = vld [vmem:[%s9506_s7 + $0x86c] ss:$16 sps:$4 sm:$0xff]   ;;  %v4560_v7 = vrot.slane %v4558_v1, 1 }
 0x2c4   : > { %4214 = vmatmul.mubr.bf16.gmra.mrb[12].mxu0 %v8655_v47  ;;  %4327 = vmatmul.mubr.bf16.gmra.mrb[12].mxu1 %v8655_v47  ;;  %v8713_v47 = vld [vmem:[%s9506_s7 + $0x860] ss:$16 sps:$4 sm:$0xff]  }
 0x2c5   : > { %4223 = vmatprep.mubr.bf16.mxu0 %v9164_v3  ;;  %4336 = vmatprep.mubr.bf16.mxu1 %v9164_v3  ;;  %v4564_v58 = vor.u32 %v4562_v15, %v4560_v7 }
 0x2c6   : > { %4783 = vmatpush1.bf16.msra.mxu0 %v8677_v8  ;;  %4896 = vmatpush1.bf16.msra.mxu1 %v8680_v41  ;;  %v8716_v8 = vld [vmem:[%s9506_s7 + $0x868] ss:$16 sps:$4 sm:$0xff]   ;;  %v8722_v41 = vld [vmem:[%s9506_s7 + $0x884] ss:$16 sps:$4 sm:$0xff]  }
 0x2c7   : > { %4784 = vmatprep.subr.bf16.mxu0 %v8686_v9  ;;  %4897 = vmatprep.subr.bf16.mxu1 %v8689_v12  ;;  %v8725_v9 = vld [vmem:[%s9506_s7 + $0x88c] ss:$16 sps:$4 sm:$0xff]   ;;  %v4561_v12 = vsel %vm1176_vm1, %v4556_v46, %v4560_v7 }
 0x2c8   : > { %v478_v46 = vld [vmem:[#allocation2 + $0x28] sm:$0xff] }
 0x2ca   : > { %4785 = vmatpush1.bf16.msra.mxu0 %v8684_v16  ;;  %4898 = vmatpush1.bf16.msra.mxu1 %v8687_v19  ;;  %v4566_v16 = vshll.u32 %v10182_v2, 16  ;;  %v8720_v19 = vld [vmem:[%s9506_s7 + $0x880] ss:$16 sps:$4 sm:$0xff]   ;;  %v4576_v2 = vrot.slane %v4574_v22, 1 }
 0x2cb   : > { %5282 = vmatprep.subr.bf16.mxu0 %v8694_v14  ;;  %5395 = vmatprep.subr.bf16.mxu1 %v8697_v49  ;;  %v8723_v14 = vld [vmem:[%s9506_s7 + $0x888] ss:$16 sps:$4 sm:$0xff]   ;;  %v8729_v49 = vld [vmem:[%s9506_s7 + $0x8a4] ss:$16 sps:$4 sm:$0xff]  }
 0x2cc   : > { %4224 = vmatmul.mubr.bf16.gmra.mrb[16].mxu0 %v8662_v26  ;;  %4337 = vmatmul.mubr.bf16.gmra.mrb[16].mxu1 %v8662_v26  ;;  %v8732_v26 = vld [vmem:[%s9506_s7 + $0x8ac] ss:$16 sps:$4 sm:$0xff]   ;;  %v4568_v31 = vrot.slane %v4566_v16, 1 }
 0x2cd   : > { %4233 = vmatprep.mubr.bf16.mxu0 %v9164_v3  ;;  %4346 = vmatprep.mubr.bf16.mxu1 %v9164_v3 }
 0x2ce   : > { %v4569_v43 = vsel %vm1176_vm1, %v4564_v58, %v4568_v31  ;;  %v4572_v50 = vor.u32 %v4570_v5, %v4568_v31  ;;  %v484_v58 = vld [vmem:[#allocation2 + $0x58] sm:$0xff] }
 0x2d4   : > { %4234 = vmatmul.mubr.bf16.gmra.mrb[20].mxu0 %v8669_v35  ;;  %4347 = vmatmul.mubr.bf16.gmra.mrb[20].mxu1 %v8669_v35  ;;  %v8727_v35 = vld [vmem:[%s9506_s7 + $0x8a0] ss:$16 sps:$4 sm:$0xff]  }
 0x2d5   : > { %4243 = vmatprep.mubr.bf16.mxu0 %v9164_v3  ;;  %4356 = vmatprep.mubr.bf16.mxu1 %v9164_v3 }
 0x2dc   : > { %4244 = vmatmul.mubr.bf16.gmra.mrb[24].mxu0 %v8676_v39  ;;  %4357 = vmatmul.mubr.bf16.gmra.mrb[24].mxu1 %v8676_v39  ;;  %v8739_v39 = vld [vmem:[%s9506_s7 + $0x8cc] ss:$16 sps:$4 sm:$0xff]  }
 0x2dd   : > { %4253 = vmatprep.mubr.bf16.mxu0 %v9164_v3  ;;  %4366 = vmatprep.mubr.bf16.mxu1 %v9164_v3 }
 0x2e4   : > { %4254 = vmatmul.mubr.bf16.gmra.mrb[28].mxu0 %v8683_v34  ;;  %4367 = vmatmul.mubr.bf16.gmra.mrb[28].mxu1 %v8683_v34  ;;  %v8734_v34 = vld [vmem:[%s9506_s7 + $0x8c0] ss:$16 sps:$4 sm:$0xff]  }
 0x2e5   : > { %4802 = vmatprep.mubr.bf16.mxu0 %v9164_v3  ;;  %4915 = vmatprep.mubr.bf16.mxu1 %v9164_v3 }
 0x2ec   : > { %4803 = vmatmul.mubr.bf16.vlgmr.msra.gmra.mrb[0].mxu0 %v4545_v52  ;;  %4916 = vmatmul.mubr.bf16.vlgmr.msra.gmra.mrb[0].mxu1 %v4545_v52  ;;  %v8744_v52 = vld [vmem:[%s9506_s7 + $0x8e8] ss:$16 sps:$4 sm:$0xff]  }
 0x2ed   : > { %5283 = vmatpush1.bf16.msra.mxu0 %v8692_v55  ;;  %5396 = vmatpush1.bf16.msra.mxu1 %v8695_v56  ;;  %v4577_v55 = vsel %vm1176_vm1, %v4572_v50, %v4576_v2  ;;  %v4578_v56 = vshrl.u32 %v10200_v13, 16 }
 0x2ee   : > { %4812 = vmatprep.mubr.bf16.mxu0 %v9164_v3  ;;  %4925 = vmatprep.mubr.bf16.mxu1 %v9164_v3 }
 0x2ef   : > { %5284 = vmatprep.subr.bf16.mxu0 %v8701_v10  ;;  %5397 = vmatprep.subr.bf16.mxu1 %v8704_v60  ;;  %v4580_v57 = vor.u32 %v4578_v56, %v4576_v2  ;;  %v4584_v10 = vrot.slane %v4582_v20, 1 }
 0x2f1   : > { %5285 = vmatpush1.bf16.msra.mxu0 %v8699_v62  ;;  %5398 = vmatpush1.bf16.msra.mxu1 %v8702_v23  ;;  %v4585_v60 = vsel %vm1176_vm1, %v4580_v57, %v4584_v10  ;;  %v4588_v13 = vor.u32 %v4586_v24, %v4584_v10  ;;  %v4592_v62 = vrot.slane %v4590_v61, 1  ;;  %v489_v10 = vld [vmem:[#allocation2 + $0x80] sm:$0xff]  ;;  %v490_v24 = vld [vmem:[#allocation2 + $0x88] sm:$0xff]  ;;  %v492_v61 = vld [vmem:[#allocation2 + $0x98] sm:$0xff] }
 0x2f2   : > { %5286 = vmatprep.subr.bf16.mxu0 %v8708_v37  ;;  %5399 = vmatprep.subr.bf16.mxu1 %v8711_v0  ;;  %v4594_v37 = vshrl.u32 %v10224_v36, 16  ;;  %v4598_v0 = vshll.u32 %v10239_v44, 16 }
 0x2f3   : > { %v4593_v23 = vsel %vm1176_vm1, %v4588_v13, %v4592_v62 }
 0x2f4   : > { %4813 = vmatmul.mubr.bf16.gmra.mrb[4].mxu0 %v4553_v29  ;;  %4926 = vmatmul.mubr.bf16.gmra.mrb[4].mxu1 %v4553_v29  ;;  %v4596_v11 = vor.u32 %v4594_v37, %v4592_v62  ;;  %v4600_v29 = vrot.slane %v4598_v0, 1  ;;  %v495_v37 = vld [vmem:[#allocation2 + $0xb0] sm:$0xff] }
 0x2f5   : > { %4822 = vmatprep.mubr.bf16.mxu0 %v9164_v3  ;;  %4935 = vmatprep.mubr.bf16.mxu1 %v9164_v3 }
 0x2f6   : > { %5287 = vmatpush1.bf16.msra.mxu0 %v8706_v42  ;;  %5400 = vmatpush1.bf16.msra.mxu1 %v8709_v4  ;;  %v4601_v1 = vsel %vm1176_vm1, %v4596_v11, %v4600_v29  ;;  %v7292_v42 = vcombine.low %v5060_v38, %v10231_v25  ;;  %v479_v25 = vld [vmem:[#allocation2 + $0x30] sm:$0xff] }
 0x2f7   : > { %5288 = vmatprep.subr.bf16.mxu0 %v8715_v6  ;;  %5401 = vmatprep.subr.bf16.mxu1 %v8718_v18 }
 0x2f8   : > { %v5097_v36 = vrot.slane %v7292_v42, 1  ;;  %v496_v42 = vld [vmem:[#allocation2 + $0xb8] sm:$0xff] }
 0x2fa   : > { %5289 = vmatpush1.bf16.msra.mxu0 %v8713_v47  ;;  %5402 = vmatpush1.bf16.msra.mxu1 %v8716_v8  ;;  %v5099_v44 = vsel %vm1740_vm0, %v5097_v36, %v5098_v48  ;;  %v475_v48 = vld [vmem:[#allocation2 + $0x10] sm:$0xff] }
 0x2fb   : > { %5290 = vmatprep.subr.bf16.mxu0 %v8722_v41  ;;  %5403 = vmatprep.subr.bf16.mxu1 %v8725_v9 }
 0x2fc   : > { %4823 = vmatmul.mubr.bf16.gmra.mrb[8].mxu0 %v4561_v12  ;;  %4936 = vmatmul.mubr.bf16.gmra.mrb[8].mxu1 %v4561_v12 }
 0x2fd   : > { %4832 = vmatprep.mubr.bf16.mxu0 %v9164_v3  ;;  %4945 = vmatprep.mubr.bf16.mxu1 %v9164_v3 }
 0x2fe   : > { %5291 = vmatpush1.bf16.msra.mxu0 %v8720_v19  ;;  %5404 = vmatpush1.bf16.msra.mxu1 %v8723_v14  ;;  %v481_v14 = vld [vmem:[#allocation2 + $0x40] sm:$0xff] }
 0x2ff   : > { %5292 = vmatprep.subr.bf16.mxu0 %v8729_v49  ;;  %5405 = vmatprep.subr.bf16.mxu1 %v8732_v26  ;;  %v483_v49 = vld [vmem:[#allocation2 + $0x50] sm:$0xff]  ;;  %v482_v26 = vld [vmem:[#allocation2 + $0x48] sm:$0xff] }
 0x302   : > { %5293 = vmatpush1.bf16.msra.mxu0 %v8727_v35  ;;  %5406 = vmatpush1.bf16.msra.mxu1 %v8730_v59  ;;  %v485_v59 = vld [vmem:[#allocation2 + $0x60] sm:$0xff] }
 0x303   : > { %5294 = vmatprep.subr.bf16.mxu0 %v8736_v21  ;;  %5407 = vmatprep.subr.bf16.mxu1 %v8739_v39  ;;  %v487_v21 = vld [vmem:[#allocation2 + $0x70] sm:$0xff] }
 0x304   : > { %4833 = vmatmul.mubr.bf16.gmra.mrb[12].mxu0 %v4569_v43  ;;  %4946 = vmatmul.mubr.bf16.gmra.mrb[12].mxu1 %v4569_v43 }
 0x305   : > { %4842 = vmatprep.mubr.bf16.mxu0 %v9164_v3  ;;  %4955 = vmatprep.mubr.bf16.mxu1 %v9164_v3 }
 0x306   : > { %5295 = vmatpush1.bf16.msra.mxu0 %v8734_v34  ;;  %5408 = vmatpush1.bf16.msra.mxu1 %v8737_v27  ;;  %v486_v34 = vld [vmem:[#allocation2 + $0x68] sm:$0xff]  ;;  %v488_v27 = vld [vmem:[#allocation2 + $0x78] sm:$0xff] }
 0x307   : > { %5296 = vmatprep.subr.bf16.mxu0 %v8743_v30  ;;  %5409 = vmatprep.subr.bf16.mxu1 %v8746_v17 }
 0x30a   : > { %5297 = vmatpush1.bf16.msra.mxu0 %v8741_v51  ;;  %5410 = vmatpush1.bf16.msra.mxu1 %v8744_v52 }
 0x30c   : > { %4843 = vmatmul.mubr.bf16.gmra.mrb[16].mxu0 %v4577_v55  ;;  %4956 = vmatmul.mubr.bf16.gmra.mrb[16].mxu1 %v4577_v55 }
 0x30d   : > { %4852 = vmatprep.mubr.bf16.mxu0 %v9164_v3  ;;  %4965 = vmatprep.mubr.bf16.mxu1 %v9164_v3 }
 0x314   : > { %4853 = vmatmul.mubr.bf16.gmra.mrb[20].mxu0 %v4585_v60  ;;  %4966 = vmatmul.mubr.bf16.gmra.mrb[20].mxu1 %v4585_v60  ;;  %v491_v60 = vld [vmem:[#allocation2 + $0x90] sm:$0xff] }
 0x315   : > { %4862 = vmatprep.mubr.bf16.mxu0 %v9164_v3  ;;  %4975 = vmatprep.mubr.bf16.mxu1 %v9164_v3 }
 0x31c   : > { %4863 = vmatmul.mubr.bf16.gmra.mrb[24].mxu0 %v4593_v23  ;;  %4976 = vmatmul.mubr.bf16.gmra.mrb[24].mxu1 %v4593_v23  ;;  %v493_v23 = vld [vmem:[#allocation2 + $0xa0] sm:$0xff] }
 0x31d   : > { %4872 = vmatprep.mubr.bf16.mxu0 %v9164_v3  ;;  %4985 = vmatprep.mubr.bf16.mxu1 %v9164_v3 }
 0x324   : > { %4873 = vmatmul.mubr.bf16.gmra.mrb[28].mxu0 %v4601_v1  ;;  %4986 = vmatmul.mubr.bf16.gmra.mrb[28].mxu1 %v4601_v1  ;;  %v494_v1 = vld [vmem:[#allocation2 + $0xa8] sm:$0xff] }
 0x325   : > { %5314 = vmatprep.mubr.bf16.mxu0 %v9164_v3  ;;  %5427 = vmatprep.mubr.bf16.mxu1 %v9164_v3 }
 0x32c   : > { %5315 = vmatmul.mubr.bf16.vlgmr.msra.gmra.mrb[0].mxu0 %v5099_v44  ;;  %5428 = vmatmul.mubr.bf16.vlgmr.msra.gmra.mrb[0].mxu1 %v5099_v44 }
 0x32d   : > { %5324 = vmatprep.mubr.bf16.mxu0 %v9164_v3  ;;  %5437 = vmatprep.mubr.bf16.mxu1 %v9164_v3 }
 0x334   : > { %5325 = vmatmul.mubr.bf16.gmra.mrb[4].mxu0 %v10156_v53  ;;  %5438 = vmatmul.mubr.bf16.gmra.mrb[4].mxu1 %v10156_v53  ;;  %v474_v53 = vld [vmem:[#allocation2 + $0x8] sm:$0xff] }
 0x335   : > { %5334 = vmatprep.mubr.bf16.mxu0 %v9164_v3  ;;  %5447 = vmatprep.mubr.bf16.mxu1 %v9164_v3 }
 0x33c   : > { %5335 = vmatmul.mubr.bf16.gmra.mrb[8].mxu0 %v10174_v63  ;;  %5448 = vmatmul.mubr.bf16.gmra.mrb[8].mxu1 %v10174_v63  ;;  %v476_v63 = vld [vmem:[#allocation2 + $0x18] sm:$0xff] }
 0x33d   : > { %5344 = vmatprep.mubr.bf16.mxu0 %v9164_v3  ;;  %5457 = vmatprep.mubr.bf16.mxu1 %v9164_v3 }
 0x344   : > { %5345 = vmatmul.mubr.bf16.gmra.mrb[12].mxu0 %v10192_v40  ;;  %5458 = vmatmul.mubr.bf16.gmra.mrb[12].mxu1 %v10192_v40 }
 0x345   : > { %5354 = vmatprep.mubr.bf16.mxu0 %v9164_v3  ;;  %5467 = vmatprep.mubr.bf16.mxu1 %v9164_v3 }
 0x34c   : > { %5355 = vmatmul.mubr.bf16.gmra.mrb[16].mxu0 %v10210_v54  ;;  %5468 = vmatmul.mubr.bf16.gmra.mrb[16].mxu1 %v10210_v54 }
 0x34d   : > { %5364 = vmatprep.mubr.bf16.mxu0 %v9164_v3  ;;  %5477 = vmatprep.mubr.bf16.mxu1 %v9164_v3 }
 0x354   : > { %5365 = vmatmul.mubr.bf16.gmra.mrb[20].mxu0 %v10220_v32  ;;  %5478 = vmatmul.mubr.bf16.gmra.mrb[20].mxu1 %v10220_v32  ;;  %v477_v32 = vld [vmem:[#allocation2 + $0x20] sm:$0xff] }
 0x355   : > { %5374 = vmatprep.mubr.bf16.mxu0 %v9164_v3  ;;  %5487 = vmatprep.mubr.bf16.mxu1 %v9164_v3 }
 0x35c   : > { %5375 = vmatmul.mubr.bf16.gmra.mrb[24].mxu0 %v10234_v33  ;;  %5488 = vmatmul.mubr.bf16.gmra.mrb[24].mxu1 %v10234_v33 }
 0x35d   : > { %5384 = vmatprep.mubr.bf16.mxu0 %v9164_v3  ;;  %5497 = vmatprep.mubr.bf16.mxu1 %v9164_v3  ;;  %v480_v3 = vld [vmem:[#allocation2 + $0x38] sm:$0xff] }
 0x364   : > { %5385 = vmatmul.mubr.bf16.gmra.mrb[28].mxu0 %v10245_v28  ;;  %5498 = vmatmul.mubr.bf16.gmra.mrb[28].mxu1 %v10245_v28 }
 0x3ff   : > { %v5316_v40 = vpop.f32.mrb[0].mxu0  ;;  %v5429_v54 = vpop.f32.mrb[0].mxu1 }
 0x400   : > { %v10352_v4 = vadd.f32 %v5316_v40, %v473_v45  ;;  %v10354_v6 = vadd.f32 %v5429_v54, %v475_v48  ;;  %v5318_v33 = vpop.f32.mrb[1].mxu0  ;;  %v5431_v18 = vpop.f32.mrb[1].mxu1 }
 0x401   : > { %v10356_v7 = vadd.f32 %v5318_v33, %v474_v53  ;;  %v10358_v47 = vadd.f32 %v5431_v18, %v476_v63  ;;  %v5320_v28 = vpop.f32.mrb[2].mxu0  ;;  %v5433_v8 = vpop.f32.mrb[2].mxu1  ;;  %v497_v33 = vld [vmem:[#allocation2 + $0xc0] sm:$0xff]  ;;  %v499_v18 = vld [vmem:[#allocation2 + $0xd0] sm:$0xff] }
 0x402   : > { %v10360_v41 = vadd.f32 %v5320_v28, %v477_v32  ;;  %v10362_v9 = vadd.f32 %v5433_v8, %v479_v25  ;;  %v5322_v12 = vpop.f32.mrb[3].mxu0  ;;  %v5435_v15 = vpop.f32.mrb[3].mxu1  ;;  %5576 = vst [vmem:[#allocation2] sm:$0xff] (!%p7325_p1), %v10352_v4  ;;  %5578 = vst [vmem:[#allocation2 + $0x10] sm:$0xff] (!%p7325_p1), %v10354_v6 }
 0x403   : > { %v10364_v16 = vadd.f32 %v5322_v12, %v478_v46  ;;  %v10366_v19 = vadd.f32 %v5435_v15, %v480_v3  ;;  %v498_v46 = vld [vmem:[#allocation2 + $0xc8] sm:$0xff]  ;;  %v500_v3 = vld [vmem:[#allocation2 + $0xd8] sm:$0xff]  ;;  %v501_v12 = vld [vmem:[#allocation2 + $0xe0] sm:$0xff]  ;;  %5577 = vst [vmem:[#allocation2 + $0x8] sm:$0xff] (!%p7325_p1), %v10356_v7 }
 0x404   : > { %v503_v15 = vld [vmem:[#allocation2 + $0xf0] sm:$0xff]  ;;  %5579 = vst [vmem:[#allocation2 + $0x18] sm:$0xff] (!%p7325_p1), %v10358_v47  ;;  %5580 = vst [vmem:[#allocation2 + $0x20] sm:$0xff] (!%p7325_p1), %v10360_v41 }
 0x405   : > { %5581 = vst [vmem:[#allocation2 + $0x28] sm:$0xff] (!%p7325_p1), %v10364_v16  ;;  %5582 = vst [vmem:[#allocation2 + $0x30] sm:$0xff] (!%p7325_p1), %v10362_v9 }
 0x406   : > { %5583 = vst [vmem:[#allocation2 + $0x38] sm:$0xff] (!%p7325_p1), %v10366_v19 }
 0x407   : > { %v5326_v31 = vpop.f32.mrb[4].mxu0  ;;  %v5439_v35 = vpop.f32.mrb[4].mxu1 }
 0x408   : > { %v10368_v39 = vadd.f32 %v5326_v31, %v481_v14  ;;  %v10370_v43 = vadd.f32 %v5439_v35, %v483_v49  ;;  %v5328_v5 = vpop.f32.mrb[5].mxu0  ;;  %v5441_v22 = vpop.f32.mrb[5].mxu1  ;;  %v502_v31 = vld [vmem:[#allocation2 + $0xe8] sm:$0xff]  ;;  %v504_v35 = vld [vmem:[#allocation2 + $0xf8] sm:$0xff] }
 0x409   : > { %v10372_v30 = vadd.f32 %v5328_v5, %v482_v26  ;;  %v10374_v17 = vadd.f32 %v5441_v22, %v484_v58  ;;  %v5330_v50 = vpop.f32.mrb[6].mxu0  ;;  %v5443_v2 = vpop.f32.mrb[6].mxu1 }
 0x40a   : > { %v10376_v51 = vadd.f32 %v5330_v50, %v485_v59  ;;  %v10378_v52 = vadd.f32 %v5443_v2, %v487_v21  ;;  %v5332_v55 = vpop.f32.mrb[7].mxu0  ;;  %v5445_v56 = vpop.f32.mrb[7].mxu1  ;;  %5584 = vst [vmem:[#allocation2 + $0x40] sm:$0xff] (!%p7325_p1), %v10368_v39  ;;  %5586 = vst [vmem:[#allocation2 + $0x50] sm:$0xff] (!%p7325_p1), %v10370_v43 }
 0x40b   : > { %v10380_v20 = vadd.f32 %v5332_v55, %v486_v34  ;;  %v10382_v57 = vadd.f32 %v5445_v56, %v488_v27  ;;  %5585 = vst [vmem:[#allocation2 + $0x48] sm:$0xff] (!%p7325_p1), %v10372_v30  ;;  %5587 = vst [vmem:[#allocation2 + $0x58] sm:$0xff] (!%p7325_p1), %v10374_v17 }
 0x40c   : > { %5588 = vst [vmem:[#allocation2 + $0x60] sm:$0xff] (!%p7325_p1), %v10376_v51  ;;  %5590 = vst [vmem:[#allocation2 + $0x70] sm:$0xff] (!%p7325_p1), %v10378_v52 }
 0x40d   : > { %5589 = vst [vmem:[#allocation2 + $0x68] sm:$0xff] (!%p7325_p1), %v10380_v20  ;;  %5591 = vst [vmem:[#allocation2 + $0x78] sm:$0xff] (!%p7325_p1), %v10382_v57 }
 0x40f   : > { %v5336_v13 = vpop.f32.mrb[8].mxu0  ;;  %v5449_v62 = vpop.f32.mrb[8].mxu1 }
 0x410   : > { %v10384_v0 = vadd.f32 %v5336_v13, %v489_v10  ;;  %v10386_v11 = vadd.f32 %v5449_v62, %v491_v60  ;;  %v5338_v29 = vpop.f32.mrb[9].mxu0  ;;  %v5451_v38 = vpop.f32.mrb[9].mxu1  ;;  %v505_v10 = vld [vmem:[#allocation2 + $0x100] sm:$0xff]  ;;  %v507_v60 = vld [vmem:[#allocation2 + $0x110] sm:$0xff] }
 0x411   : > { %v10388_v36 = vadd.f32 %v5338_v29, %v490_v24  ;;  %v10390_v44 = vadd.f32 %v5451_v38, %v492_v61  ;;  %v5340_v45 = vpop.f32.mrb[10].mxu0  ;;  %v5453_v48 = vpop.f32.mrb[10].mxu1  ;;  %v506_v24 = vld [vmem:[#allocation2 + $0x108] sm:$0xff]  ;;  %v508_v61 = vld [vmem:[#allocation2 + $0x118] sm:$0xff] }
 0x412   : > { %v10392_v53 = vadd.f32 %v5340_v45, %v493_v23  ;;  %v10394_v63 = vadd.f32 %v5453_v48, %v495_v37  ;;  %v5342_v40 = vpop.f32.mrb[11].mxu0  ;;  %v5455_v54 = vpop.f32.mrb[11].mxu1  ;;  %v509_v23 = vld [vmem:[#allocation2 + $0x120] sm:$0xff]  ;;  %v511_v37 = vld [vmem:[#allocation2 + $0x130] sm:$0xff]  ;;  %v510_v45 = vld [vmem:[#allocation2 + $0x128] sm:$0xff]  ;;  %5592 = vst [vmem:[#allocation2 + $0x80] sm:$0xff] (!%p7325_p1), %v10384_v0 }
 0x413   : > { %v10396_v32 = vadd.f32 %v5342_v40, %v494_v1  ;;  %v10398_v25 = vadd.f32 %v5455_v54, %v496_v42  ;;  %v512_v48 = vld [vmem:[#allocation2 + $0x138] sm:$0xff]  ;;  %5593 = vst [vmem:[#allocation2 + $0x88] sm:$0xff] (!%p7325_p1), %v10388_v36  ;;  %5594 = vst [vmem:[#allocation2 + $0x90] sm:$0xff] (!%p7325_p1), %v10386_v11 }
 0x414   : > { %5595 = vst [vmem:[#allocation2 + $0x98] sm:$0xff] (!%p7325_p1), %v10390_v44  ;;  %5596 = vst [vmem:[#allocation2 + $0xa0] sm:$0xff] (!%p7325_p1), %v10392_v53 }
 0x415   : > { %5597 = vst [vmem:[#allocation2 + $0xa8] sm:$0xff] (!%p7325_p1), %v10396_v32  ;;  %5598 = vst [vmem:[#allocation2 + $0xb0] sm:$0xff] (!%p7325_p1), %v10394_v63 }
 0x416   : > { %5599 = vst [vmem:[#allocation2 + $0xb8] sm:$0xff] (!%p7325_p1), %v10398_v25 }
 0x417   : > { %v5346_v28 = vpop.f32.mrb[12].mxu0  ;;  %v5459_v8 = vpop.f32.mrb[12].mxu1 }
 0x418   : > { %v10400_v14 = vadd.f32 %v5346_v28, %v497_v33  ;;  %v10402_v49 = vadd.f32 %v5459_v8, %v499_v18  ;;  %v5348_v26 = vpop.f32.mrb[13].mxu0  ;;  %v5461_v58 = vpop.f32.mrb[13].mxu1 }
 0x419   : > { %v10404_v59 = vadd.f32 %v5348_v26, %v498_v46  ;;  %v10406_v21 = vadd.f32 %v5461_v58, %v500_v3  ;;  %v5350_v5 = vpop.f32.mrb[14].mxu0  ;;  %v5463_v22 = vpop.f32.mrb[14].mxu1  ;;  %v513_v26 = vld [vmem:[#allocation2 + $0x140] sm:$0xff]  ;;  %v515_v58 = vld [vmem:[#allocation2 + $0x150] sm:$0xff] }
 0x41a   : > { %v10408_v34 = vadd.f32 %v5350_v5, %v501_v12  ;;  %v10410_v27 = vadd.f32 %v5463_v22, %v503_v15  ;;  %v5352_v50 = vpop.f32.mrb[15].mxu0  ;;  %v5465_v2 = vpop.f32.mrb[15].mxu1  ;;  %5600 = vst [vmem:[#allocation2 + $0xc0] sm:$0xff] (!%p7325_p1), %v10400_v14  ;;  %5602 = vst [vmem:[#allocation2 + $0xd0] sm:$0xff] (!%p7325_p1), %v10402_v49 }
 0x41b   : > { %v10412_v55 = vadd.f32 %v5352_v50, %v502_v31  ;;  %v10414_v56 = vadd.f32 %v5465_v2, %v504_v35  ;;  %v514_v31 = vld [vmem:[#allocation2 + $0x148] sm:$0xff]  ;;  %v516_v35 = vld [vmem:[#allocation2 + $0x158] sm:$0xff]  ;;  %v517_v50 = vld [vmem:[#allocation2 + $0x160] sm:$0xff]  ;;  %5601 = vst [vmem:[#allocation2 + $0xc8] sm:$0xff] (!%p7325_p1), %v10404_v59 }
 0x41c   : > { %v519_v2 = vld [vmem:[#allocation2 + $0x170] sm:$0xff]  ;;  %5603 = vst [vmem:[#allocation2 + $0xd8] sm:$0xff] (!%p7325_p1), %v10406_v21  ;;  %5604 = vst [vmem:[#allocation2 + $0xe0] sm:$0xff] (!%p7325_p1), %v10408_v34 }
 0x41d   : > { %5605 = vst [vmem:[#allocation2 + $0xe8] sm:$0xff] (!%p7325_p1), %v10412_v55  ;;  %5606 = vst [vmem:[#allocation2 + $0xf0] sm:$0xff] (!%p7325_p1), %v10410_v27 }
 0x41e   : > { %5607 = vst [vmem:[#allocation2 + $0xf8] sm:$0xff] (!%p7325_p1), %v10414_v56 }
 0x41f   : > { %v5356_v13 = vpop.f32.mrb[16].mxu0  ;;  %v5469_v62 = vpop.f32.mrb[16].mxu1 }
 0x420   : > { %v10416_v29 = vadd.f32 %v5356_v13, %v505_v10  ;;  %v10418_v38 = vadd.f32 %v5469_v62, %v507_v60  ;;  %v5358_v1 = vpop.f32.mrb[17].mxu0  ;;  %v5471_v42 = vpop.f32.mrb[17].mxu1  ;;  %v518_v13 = vld [vmem:[#allocation2 + $0x168] sm:$0xff]  ;;  %v520_v62 = vld [vmem:[#allocation2 + $0x178] sm:$0xff] }
 0x421   : > { %v10420_v40 = vadd.f32 %v5358_v1, %v506_v24  ;;  %v10422_v54 = vadd.f32 %v5471_v42, %v508_v61  ;;  %v5360_v33 = vpop.f32.mrb[18].mxu0  ;;  %v5473_v18 = vpop.f32.mrb[18].mxu1 }
 0x422   : > { %v10424_v46 = vadd.f32 %v5360_v33, %v509_v23  ;;  %v10426_v3 = vadd.f32 %v5473_v18, %v511_v37  ;;  %v5362_v28 = vpop.f32.mrb[19].mxu0  ;;  %v5475_v8 = vpop.f32.mrb[19].mxu1  ;;  %5608 = vst [vmem:[#allocation2 + $0x100] sm:$0xff] (!%p7325_p1), %v10416_v29  ;;  %5610 = vst [vmem:[#allocation2 + $0x110] sm:$0xff] (!%p7325_p1), %v10418_v38 }
 0x423   : > { %v10428_v12 = vadd.f32 %v5362_v28, %v510_v45  ;;  %v10430_v15 = vadd.f32 %v5475_v8, %v512_v48  ;;  %5609 = vst [vmem:[#allocation2 + $0x108] sm:$0xff] (!%p7325_p1), %v10420_v40  ;;  %5611 = vst [vmem:[#allocation2 + $0x118] sm:$0xff] (!%p7325_p1), %v10422_v54 }
 0x424   : > { %5612 = vst [vmem:[#allocation2 + $0x120] sm:$0xff] (!%p7325_p1), %v10424_v46  ;;  %5614 = vst [vmem:[#allocation2 + $0x130] sm:$0xff] (!%p7325_p1), %v10426_v3 }
 0x425   : > { %5613 = vst [vmem:[#allocation2 + $0x128] sm:$0xff] (!%p7325_p1), %v10428_v12  ;;  %5615 = vst [vmem:[#allocation2 + $0x138] sm:$0xff] (!%p7325_p1), %v10430_v15 }
 0x427   : > { %v5366_v5 = vpop.f32.mrb[20].mxu0  ;;  %v5479_v22 = vpop.f32.mrb[20].mxu1 }
 0x428   : > { %v10432_v10 = vadd.f32 %v5366_v5, %v513_v26  ;;  %v10434_v60 = vadd.f32 %v5479_v22, %v515_v58  ;;  %v5368_v24 = vpop.f32.mrb[21].mxu0  ;;  %v5481_v61 = vpop.f32.mrb[21].mxu1  ;;  %v521_v26 = vld [vmem:[#allocation2 + $0x180] sm:$0xff]  ;;  %v523_v58 = vld [vmem:[#allocation2 + $0x190] sm:$0xff]  ;;  %v522_v5 = vld [vmem:[#allocation2 + $0x188] sm:$0xff] }
 0x429   : > { %v10436_v23 = vadd.f32 %v5368_v24, %v514_v31  ;;  %v10438_v37 = vadd.f32 %v5481_v61, %v516_v35  ;;  %v5370_v1 = vpop.f32.mrb[22].mxu0  ;;  %v5483_v42 = vpop.f32.mrb[22].mxu1  ;;  %v524_v22 = vld [vmem:[#allocation2 + $0x198] sm:$0xff]  ;;  %v525_v35 = vld [vmem:[#allocation2 + $0x1a0] sm:$0xff]  ;;  %v527_v61 = vld [vmem:[#allocation2 + $0x1b0] sm:$0xff] }
 0x42a   : > { %11086 = vst [vmem:[#allocation39_spill] sm:$0xff] %v10432_v10  ;;  %11087 = vst [vmem:[#allocation40_spill] sm:$0xff] %v10434_v60  ;;  %v10440_v45 = vadd.f32 %v5370_v1, %v517_v50  ;;  %v10442_v48 = vadd.f32 %v5483_v42, %v519_v2  ;;  %v5372_v33 = vpop.f32.mrb[23].mxu0  ;;  %v5485_v18 = vpop.f32.mrb[23].mxu1  ;;  %v526_v42 = vld [vmem:[#allocation2 + $0x1a8] sm:$0xff] }
 0x42b   : > { %11088 = vst [vmem:[#allocation41_spill] sm:$0xff] %v10438_v37  ;;  %v10444_v28 = vadd.f32 %v5372_v33, %v518_v13  ;;  %v10446_v8 = vadd.f32 %v5485_v18, %v520_v62  ;;  %5616 = vst [vmem:[#allocation2 + $0x140] sm:$0xff] (!%p7325_p1), %v10432_v10 }
 0x42c   : > { %11089 = vst [vmem:[#allocation42_spill] sm:$0xff] %v10440_v45  ;;  %11090 = vst [vmem:[#allocation43_spill] sm:$0xff] %v10442_v48  ;;  %v528_v48 = vld [vmem:[#allocation2 + $0x1b8] sm:$0xff] }
 0x42d   : > { %11091 = vst [vmem:[#allocation44_spill] sm:$0xff] %v10444_v28  ;;  %11092 = vst [vmem:[#allocation45_spill] sm:$0xff] %v10446_v8 }
 0x42e   : > { %5617 = vst [vmem:[#allocation2 + $0x148] sm:$0xff] (!%p7325_p1), %v10436_v23 }
 0x42f   : > { %v5376_v31 = vpop.f32.mrb[24].mxu0  ;;  %v5489_v24 = vpop.f32.mrb[24].mxu1 }
 0x430   : > { %v10448_v37 = vadd.f32 %v5376_v31, %v521_v26  ;;  %v10450_v50 = vadd.f32 %v5489_v24, %v523_v58  ;;  %v5378_v2 = vpop.f32.mrb[25].mxu0  ;;  %v5491_v1 = vpop.f32.mrb[25].mxu1  ;;  %v529_v31 = vld [vmem:[#allocation2 + $0x1c0] sm:$0xff]  ;;  %v531_v24 = vld [vmem:[#allocation2 + $0x1d0] sm:$0xff] }
 0x431   : > { %v10452_v13 = vadd.f32 %v5378_v2, %v522_v5  ;;  %v10454_v62 = vadd.f32 %v5491_v1, %v524_v22  ;;  %v5380_v33 = vpop.f32.mrb[26].mxu0  ;;  %v5493_v18 = vpop.f32.mrb[26].mxu1  ;;  %v533_v22 = vld [vmem:[#allocation2 + $0x1e0] sm:$0xff]  ;;  %v535_v1 = vld [vmem:[#allocation2 + $0x1f0] sm:$0xff] }
 0x432   : > { %11093 = vst [vmem:[#allocation46_spill] sm:$0xff] %v10448_v37  ;;  %11094 = vst [vmem:[#allocation47_spill] sm:$0xff] %v10450_v50  ;;  %v10456_v8 = vadd.f32 %v5380_v33, %v525_v35  ;;  %v10458_v28 = vadd.f32 %v5493_v18, %v527_v61  ;;  %v5382_v45 = vpop.f32.mrb[27].mxu0  ;;  %v5495_v60 = vpop.f32.mrb[27].mxu1  ;;  %v530_v50 = vld [vmem:[#allocation2 + $0x1c8] sm:$0xff]  ;;  %v532_v37 = vld [vmem:[#allocation2 + $0x1d8] sm:$0xff] }
 0x433   : > { %11095 = vst [vmem:[#allocation48_spill] sm:$0xff] %v10452_v13  ;;  %11096 = vst [vmem:[#allocation49_spill] sm:$0xff] %v10454_v62  ;;  %v10460_v26 = vadd.f32 %v5382_v45, %v526_v42  ;;  %v10462_v58 = vadd.f32 %v5495_v60, %v528_v48  ;;  %v534_v18 = vld [vmem:[#allocation2 + $0x1e8] sm:$0xff] }
 0x434   : > { %11097 = vst [vmem:[#allocation50_spill] sm:$0xff] %v10456_v8  ;;  %11098 = vst [vmem:[#allocation51_spill] sm:$0xff] %v10458_v28  ;;  %v536_v28 = vld [vmem:[#allocation2 + $0x1f8] sm:$0xff] }
 0x435   : > { %11099 = vst [vmem:[#allocation52_spill] sm:$0xff] %v10460_v26  ;;  %11100 = vst [vmem:[#allocation53_spill] sm:$0xff] %v10462_v58 }
 0x437   : > { %v5386_v5 = vpop.f32.mrb[28].mxu0  ;;  %v5499_v2 = vpop.f32.mrb[28].mxu1  ;;  %5575 = sbr.rel (%p7325_p1) target bundleno = 1097 (0x449), region = 76 }
 0x438   : > { %v10464_v62 = vadd.f32 %v5386_v5, %v529_v31  ;;  %v10466_v35 = vadd.f32 %v5499_v2, %v531_v24  ;;  %v5388_v61 = vpop.f32.mrb[29].mxu0  ;;  %v5501_v33 = vpop.f32.mrb[29].mxu1  ;;  %v11115_v5 = vld [vmem:[#allocation45_spill] sm:$0xff] (!%p7325_p1) }
 0x439   : > { %v10468_v45 = vadd.f32 %v5388_v61, %v530_v50  ;;  %v10470_v60 = vadd.f32 %v5501_v33, %v532_v37  ;;  %v5390_v48 = vpop.f32.mrb[30].mxu0  ;;  %v5503_v42 = vpop.f32.mrb[30].mxu1  ;;  %v11110_v37 = vld [vmem:[#allocation40_spill] sm:$0xff] (!%p7325_p1)  ;;  %5623 = vst [vmem:[#allocation2 + $0x178] sm:$0xff] (!%p7325_p1), %v11115_v5  ;;  %v11116_v2 = vld [vmem:[#allocation46_spill] sm:$0xff] (!%p7325_p1) }
 0x43a   : > { %11101 = vst [vmem:[#allocation54_spill] sm:$0xff] %v10464_v62  ;;  %11102 = vst [vmem:[#allocation55_spill] sm:$0xff] %v10466_v35  ;;  %v10472_v58 = vadd.f32 %v5390_v48, %v533_v22  ;;  %v10474_v26 = vadd.f32 %v5503_v42, %v535_v1  ;;  %v5392_v8 = vpop.f32.mrb[31].mxu0  ;;  %v5505_v13 = vpop.f32.mrb[31].mxu1  ;;  %v11113_v50 = vld [vmem:[#allocation44_spill] sm:$0xff] (!%p7325_p1)  ;;  %v11118_v1 = vld [vmem:[#allocation47_spill] sm:$0xff] (!%p7325_p1) }
 0x43b   : > { %11103 = vst [vmem:[#allocation56_spill] sm:$0xff] %v10468_v45  ;;  %11104 = vst [vmem:[#allocation57_spill] sm:$0xff] %v10470_v60  ;;  %v10476_v31 = vadd.f32 %v5392_v8, %v534_v18  ;;  %v10478_v24 = vadd.f32 %v5505_v13, %v536_v28  ;;  %v11111_v28 = vld [vmem:[#allocation41_spill] sm:$0xff] (!%p7325_p1)  ;;  %v11112_v8 = vld [vmem:[#allocation42_spill] sm:$0xff] (!%p7325_p1) }
 0x43c   : > { %11105 = vst [vmem:[#allocation58_spill] sm:$0xff] %v10472_v58  ;;  %11106 = vst [vmem:[#allocation59_spill] sm:$0xff] %v10474_v26  ;;  %v11114_v13 = vld [vmem:[#allocation43_spill] sm:$0xff] (!%p7325_p1)  ;;  %v11117_v22 = vld [vmem:[#allocation48_spill] sm:$0xff] (!%p7325_p1) }
 0x43d   : > { %11107 = vst [vmem:[#allocation60_spill] sm:$0xff] %v10476_v31  ;;  %11108 = vst [vmem:[#allocation61_spill] sm:$0xff] %v10478_v24  ;;  %v11119_v61 = vld [vmem:[#allocation49_spill] sm:$0xff] (!%p7325_p1)  ;;  %v11120_v33 = vld [vmem:[#allocation50_spill] sm:$0xff] (!%p7325_p1) }
 0x43e   : > { %5618 = vst [vmem:[#allocation2 + $0x150] sm:$0xff] %v11110_v37  ;;  %5619 = vst [vmem:[#allocation2 + $0x158] sm:$0xff] %v11111_v28  ;;  %v11121_v18 = vld [vmem:[#allocation52_spill] sm:$0xff]  ;;  %v11122_v48 = vld [vmem:[#allocation51_spill] sm:$0xff] }
 0x43f   : > { %5620 = vst [vmem:[#allocation2 + $0x160] sm:$0xff] %v11112_v8  ;;  %5621 = vst [vmem:[#allocation2 + $0x168] sm:$0xff] %v11113_v50  ;;  %v11123_v42 = vld [vmem:[#allocation53_spill] sm:$0xff] }
 0x440   : > { %5622 = vst [vmem:[#allocation2 + $0x170] sm:$0xff] %v11114_v13  ;;  %5624 = vst [vmem:[#allocation2 + $0x180] sm:$0xff] %v11116_v2 }
 0x441   : > { %5625 = vst [vmem:[#allocation2 + $0x188] sm:$0xff] %v11117_v22  ;;  %5626 = vst [vmem:[#allocation2 + $0x190] sm:$0xff] %v11118_v1 }
 0x442   : > { %5627 = vst [vmem:[#allocation2 + $0x198] sm:$0xff] %v11119_v61  ;;  %5628 = vst [vmem:[#allocation2 + $0x1a0] sm:$0xff] %v11120_v33 }
 0x443   : > { %5629 = vst [vmem:[#allocation2 + $0x1a8] sm:$0xff] %v11121_v18  ;;  %5630 = vst [vmem:[#allocation2 + $0x1b0] sm:$0xff] %v11122_v48 }
 0x444   : > { %5631 = vst [vmem:[#allocation2 + $0x1b8] sm:$0xff] %v11123_v42  ;;  %5632 = vst [vmem:[#allocation2 + $0x1c0] sm:$0xff] %v10464_v62 }
 0x445   : > { %5633 = vst [vmem:[#allocation2 + $0x1c8] sm:$0xff] %v10468_v45  ;;  %5634 = vst [vmem:[#allocation2 + $0x1d0] sm:$0xff] %v10466_v35 }
 0x446   : > { %5635 = vst [vmem:[#allocation2 + $0x1d8] sm:$0xff] %v10470_v60  ;;  %5636 = vst [vmem:[#allocation2 + $0x1e0] sm:$0xff] %v10472_v58 }
 0x447   : > { %5637 = vst [vmem:[#allocation2 + $0x1e8] sm:$0xff] %v10476_v31  ;;  %5638 = vst [vmem:[#allocation2 + $0x1f0] sm:$0xff] %v10474_v26 }
 0x448   : > { %5639 = vst [vmem:[#allocation2 + $0x1f8] sm:$0xff] %v10478_v24 }
 0x449 PF: > { %s11124_s30 = sld [smem:[#allocation28_spill]] }
 0x44f   : > { %p7326_p3 = scmp.ne.s32.totalorder %s11124_s30, 16 }
 0x450   : > { %v8748_v37 = vld [vmem:[#allocation11 + $0x40] sm:$0xff] (!%p7326_p3)   ;;  %v8752_v13 = vld [vmem:[#allocation11 + $0x48] sm:$0xff] (!%p7326_p3)   ;;  %v8756_v1 = vld [vmem:[#allocation11 + $0x50] sm:$0xff] (!%p7326_p3)  }
 0x451   : > { %5643 = sbr.rel (%p7326_p3) target bundleno = 1736 (0x6c8), region = 80  ;;  %v8749_v28 = vld [vmem:[#allocation11 + $0xc0] sm:$0xff] (!%p7326_p3)   ;;  %7368 = vmatprep.subr.bf16.mxu0 (!%p7326_p3), %v8748_v37  ;;  %v8753_v5 = vld [vmem:[#allocation11 + $0xc8] sm:$0xff] (!%p7326_p3)   ;;  %v8757_v61 = vld [vmem:[#allocation11 + $0xd0] sm:$0xff] (!%p7326_p3)  }
 0x452   : > { %v8750_v8 = vld [vmem:[#allocation11] sm:$0xff] (!%p7326_p3)   ;;  %7432 = vmatprep.subr.bf16.mxu1 (!%p7326_p3), %v8749_v28  ;;  %v8754_v2 = vld [vmem:[#allocation11 + $0x8] sm:$0xff] (!%p7326_p3)   ;;  %v8758_v33 = vld [vmem:[#allocation11 + $0x10] sm:$0xff] (!%p7326_p3)  }
 0x453   : > { %v8751_v50 = vld [vmem:[#allocation11 + $0x80] sm:$0xff] (!%p7326_p3)   ;;  %7369 = vmatpush3.bf16.msra.mxu0 (!%p7326_p3), %v8750_v8  ;;  %v8755_v22 = vld [vmem:[#allocation11 + $0x88] sm:$0xff] (!%p7326_p3)   ;;  %v8759_v18 = vld [vmem:[#allocation11 + $0x90] sm:$0xff] (!%p7326_p3)  }
 0x454   : > { %7433 = vmatpush3.bf16.msra.mxu1 (!%p7326_p3), %v8751_v50  ;;  %7370 = vmatprep.subr.bf16.mxu0 (!%p7326_p3), %v8752_v13  ;;  %v8760_v48 = vld [vmem:[#allocation11 + $0x58] sm:$0xff] (!%p7326_p3)   ;;  %v8764_v8 = vld [vmem:[#allocation11 + $0x60] sm:$0xff] (!%p7326_p3)  }
 0x455   : > { %7434 = vmatprep.subr.bf16.mxu1 (!%p7326_p3), %v8753_v5  ;;  %v8761_v42 = vld [vmem:[#allocation11 + $0xd8] sm:$0xff] (!%p7326_p3)   ;;  %v8765_v50 = vld [vmem:[#allocation11 + $0xe0] sm:$0xff] (!%p7326_p3)  }
 0x456   : > { %v8762_v37 = vld [vmem:[#allocation11 + $0x18] sm:$0xff] (!%p7326_p3)   ;;  %v8766_v13 = vld [vmem:[#allocation11 + $0x20] sm:$0xff] (!%p7326_p3)  }
 0x457   : > { %7371 = vmatpush3.bf16.msra.mxu0 (!%p7326_p3), %v8754_v2  ;;  %v8763_v28 = vld [vmem:[#allocation11 + $0x98] sm:$0xff] (!%p7326_p3)   ;;  %v8767_v5 = vld [vmem:[#allocation11 + $0xa0] sm:$0xff] (!%p7326_p3)   ;;  %v5646_v2 = vlaneseq (!%p7326_p3) }
 0x458   : > { %7435 = vmatpush3.bf16.msra.mxu1 %v8755_v22  ;;  %7372 = vmatprep.subr.bf16.mxu0 %v8756_v1  ;;  %v8768_v22 = vld [vmem:[#allocation11 + $0x68] sm:$0xff]  }
 0x459   : > { %7436 = vmatprep.subr.bf16.mxu1 %v8757_v61  ;;  %v8769_v1 = vld [vmem:[#allocation11 + $0xe8] sm:$0xff]  }
 0x45a   : > { %v8770_v61 = vld [vmem:[#allocation11 + $0x28] sm:$0xff]  }
 0x45b   : > { %7373 = vmatpush3.bf16.msra.mxu0 %v8758_v33  ;;  %v8771_v33 = vld [vmem:[#allocation11 + $0xa8] sm:$0xff]  }
 0x45c   : > { %7437 = vmatpush3.bf16.msra.mxu1 %v8759_v18  ;;  %7374 = vmatprep.subr.bf16.mxu0 %v8760_v48  ;;  %v5647_v18 = vshrl.u32 %v5646_v2, 7  ;;  %v8772_v48 = vld [vmem:[#allocation11 + $0x70] sm:$0xff]   ;;  %v8779_v2 = vld [vmem:[#allocation11 + $0xb8] sm:$0xff]  }
 0x45d   : > { %7438 = vmatprep.subr.bf16.mxu1 %v8761_v42  ;;  %v8773_v42 = vld [vmem:[#allocation11 + $0xf0] sm:$0xff]  }
 0x45e   : > { %v5648_v26 = vsub.s32 0, %v5647_v18 }
 0x45f   : > { %7375 = vmatpush3.bf16.msra.mxu0 %v8762_v37  ;;  %v8774_v37 = vld [vmem:[#allocation11 + $0x30] sm:$0xff]  }
 0x460   : > { %7439 = vmatpush3.bf16.msra.mxu1 %v8763_v28  ;;  %7376 = vmatprep.subr.bf16.mxu0 %v8764_v8  ;;  %v8775_v28 = vld [vmem:[#allocation11 + $0xb0] sm:$0xff]   ;;  %v5652_v8 = vsub.s32 1, %v5647_v18 }
 0x461   : > { %7440 = vmatprep.subr.bf16.mxu1 %v8765_v50  ;;  %v8776_v50 = vld [vmem:[#allocation11 + $0x78] sm:$0xff]  }
 0x463   : > { %7377 = vmatpush3.bf16.msra.mxu0 %v8766_v13  ;;  %v5660_v13 = vsub.s32 3, %v5647_v18 }
 0x464   : > { %7441 = vmatpush3.bf16.msra.mxu1 %v8767_v5  ;;  %7378 = vmatprep.subr.bf16.mxu0 %v8768_v22  ;;  %v8777_v5 = vld [vmem:[#allocation11 + $0xf8] sm:$0xff]  }
 0x465   : > { %7442 = vmatprep.subr.bf16.mxu1 %v8769_v1  ;;  %v8778_v22 = vld [vmem:[#allocation11 + $0x38] sm:$0xff]   ;;  %v5656_v1 = vsub.s32 2, %v5647_v18 }
 0x467   : > { %7379 = vmatpush3.bf16.msra.mxu0 %v8770_v61  ;;  %v5644_v61 = vld [vmem:[#allocation8] sm:$0xf] }
 0x468   : > { %7443 = vmatpush3.bf16.msra.mxu1 %v8771_v33  ;;  %7380 = vmatprep.subr.bf16.mxu0 %v8772_v48  ;;  %v5730_v33 = vld [vmem:[#allocation9] sm:$0xf]  ;;  %v10546_v48 = vrot.slane %v5644_v61, %v5652_v8  ;;  %v10550_v35 = vrot.slane %v5644_v61, %v5660_v13 }
 0x469   : > { %7444 = vmatprep.subr.bf16.mxu1 %v8773_v42  ;;  %v10548_v42 = vrot.slane %v5730_v33, %v5652_v8  ;;  %v10556_v58 = vrot.slane %v5730_v33, %v5648_v26  ;;  %v10560_v18 = vrot.slane %v5730_v33, %v5656_v1 }
 0x46a   : > { %v5669_v8 = vmul.f32 %v10358_v47, %v10550_v35 }
 0x46b   : > { %7381 = vmatpush3.bf16.msra.mxu0 %v8774_v37  ;;  %v10552_v37 = vrot.slane %v5730_v33, %v5660_v13  ;;  %v5673_v13 = vmul.f32 %v10366_v19, %v10550_v35 }
 0x46c   : > { %7445 = vmatpush3.bf16.msra.mxu1 %v8775_v28  ;;  %7382 = vmatprep.subr.bf16.mxu0 %v8776_v50  ;;  %v10554_v28 = vrot.slane %v5644_v61, %v5648_v26  ;;  %v10558_v50 = vrot.slane %v5644_v61, %v5656_v1 }
 0x46d   : > { %7446 = vmatprep.subr.bf16.mxu1 %v8777_v5  ;;  %v5667_v5 = vmul.f32 %v10356_v7, %v10546_v48  ;;  %v5755_v47 = vadd.f32 %v10552_v37, %v5669_v8  ;;  %v5759_v19 = vadd.f32 %v10552_v37, %v5673_v13  ;;  %v5675_v13 = vmul.f32 %v10372_v30, %v10546_v48 }
 0x46e   : > { %v5666_v26 = vmul.f32 %v10352_v4, %v10554_v28  ;;  %v5668_v1 = vmul.f32 %v10354_v6, %v10558_v50  ;;  %v5672_v7 = vmul.f32 %v10362_v9, %v10558_v50  ;;  %v5674_v30 = vmul.f32 %v10368_v39, %v10554_v28 }
 0x46f   : > { %7383 = vmatpush3.bf16.msra.mxu0 %v8778_v22  ;;  %v5671_v22 = vmul.f32 %v10364_v16, %v10546_v48  ;;  %v5753_v16 = vadd.f32 %v10548_v42, %v5667_v5  ;;  %v5819_v60 = vmax.f32 %v5755_v47, 0.0  ;;  %v5823_v9 = vmax.f32 %v5759_v19, 0.0 }
 0x470   : > { %7447 = vmatpush3.bf16.msra.mxu1 %v8779_v2  ;;  %v5670_v2 = vmul.f32 %v10360_v41, %v10554_v28  ;;  %v5752_v33 = vadd.f32 %v10556_v58, %v5666_v26  ;;  %v5754_v41 = vadd.f32 %v10560_v18, %v5668_v1  ;;  %v5758_v62 = vadd.f32 %v10560_v18, %v5672_v7 }
 0x471   : > { %v5757_v61 = vadd.f32 %v10548_v42, %v5671_v22  ;;  %v5817_v6 = vmax.f32 %v5753_v16, 0.0  ;;  %v5883_v8 = vpack.c.bf16 %v5823_v9, %v5819_v60  ;;  %v5679_v26 = vmul.f32 %v10380_v20, %v10546_v48 }
 0x472   : > { %v5756_v4 = vadd.f32 %v10556_v58, %v5670_v2  ;;  %v5816_v31 = vmax.f32 %v5752_v33, 0.0  ;;  %v5818_v45 = vmax.f32 %v5754_v41, 0.0  ;;  %v5822_v22 = vmax.f32 %v5758_v62, 0.0 }
 0x473   : > { %v5821_v24 = vmax.f32 %v5757_v61, 0.0  ;;  %v5677_v7 = vmul.f32 %v10374_v17, %v10550_v35  ;;  %v5681_v16 = vmul.f32 %v10382_v57, %v10550_v35  ;;  %6304 = vmatprep.mubr.bf16.mxu1 %v5883_v8  ;;  %v5761_v62 = vadd.f32 %v10548_v42, %v5675_v13 }
 0x474   : > { %v5820_v5 = vmax.f32 %v5756_v4, 0.0  ;;  %v5882_v1 = vpack.c.bf16 %v5822_v22, %v5818_v45  ;;  %v5765_v60 = vadd.f32 %v10548_v42, %v5679_v26  ;;  %v5678_v17 = vmul.f32 %v10376_v51, %v10554_v28 }
 0x475   : > { %v5881_v10 = vpack.c.bf16 %v5821_v24, %v5817_v6  ;;  %v5763_v20 = vadd.f32 %v10552_v37, %v5677_v7  ;;  %v5767_v45 = vadd.f32 %v10552_v37, %v5681_v16  ;;  %v5676_v24 = vmul.f32 %v10370_v43, %v10558_v50 }
 0x476   : > { %v5880_v2 = vpack.c.bf16 %v5820_v5, %v5816_v31  ;;  %6305 = vmatmul.mubr.bf16.vlgmr.msra.gmra.mrb[0].mxu1 %v5882_v1  ;;  %v5825_v31 = vmax.f32 %v5761_v62, 0.0  ;;  %v5829_v57 = vmax.f32 %v5765_v60, 0.0  ;;  %v5764_v39 = vadd.f32 %v10556_v58, %v5678_v17 }
 0x477   : > { %6207 = vmatprep.mubr.bf16.mxu0 %v5881_v10  ;;  %v5760_v10 = vadd.f32 %v10556_v58, %v5674_v30  ;;  %v5827_v61 = vmax.f32 %v5763_v20, 0.0  ;;  %v5831_v47 = vmax.f32 %v5767_v45, 0.0  ;;  %v5680_v19 = vmul.f32 %v10378_v52, %v10558_v50 }
 0x478   : > { %6208 = vmatmul.mubr.bf16.vlgmr.msra.gmra.mrb[0].mxu0 %v5880_v2  ;;  %v5885_v33 = vpack.c.bf16 %v5829_v57, %v5825_v31  ;;  %v5762_v41 = vadd.f32 %v10560_v18, %v5676_v24  ;;  %v5683_v51 = vmul.f32 %v10388_v36, %v10546_v48  ;;  %v5828_v9 = vmax.f32 %v5764_v39, 0.0 }
 0x479   : > { %v5824_v4 = vmax.f32 %v5760_v10, 0.0  ;;  %v5887_v6 = vpack.c.bf16 %v5831_v47, %v5827_v61  ;;  %v5766_v5 = vadd.f32 %v10560_v18, %v5680_v19  ;;  %v5687_v43 = vmul.f32 %v10396_v32, %v10546_v48 }
 0x47a   : > { %6215 = vmatprep.mubr.bf16.mxu0 %v5885_v33  ;;  %v5826_v22 = vmax.f32 %v5762_v41, 0.0  ;;  %v5769_v8 = vadd.f32 %v10548_v42, %v5683_v51  ;;  %v5685_v52 = vmul.f32 %v10390_v44, %v10550_v35  ;;  %v5689_v13 = vmul.f32 %v10398_v25, %v10550_v35 }
 0x47b   : > { %6312 = vmatprep.mubr.bf16.mxu1 %v5887_v6  ;;  %v5884_v26 = vpack.c.bf16 %v5828_v9, %v5824_v4  ;;  %v5830_v36 = vmax.f32 %v5766_v5, 0.0  ;;  %v5773_v2 = vadd.f32 %v10548_v42, %v5687_v43  ;;  %v5682_v1 = vmul.f32 %v10384_v0, %v10554_v28 }
 0x47c   : > { %v5833_v7 = vmax.f32 %v5769_v8, 0.0  ;;  %v5771_v32 = vadd.f32 %v10552_v37, %v5685_v52  ;;  %v5775_v16 = vadd.f32 %v10552_v37, %v5689_v13  ;;  %v5686_v62 = vmul.f32 %v10392_v53, %v10554_v28 }
 0x47d   : > { %v5886_v44 = vpack.c.bf16 %v5830_v36, %v5826_v22  ;;  %v5837_v60 = vmax.f32 %v5773_v2, 0.0  ;;  %v5768_v25 = vadd.f32 %v10556_v58, %v5682_v1  ;;  %v5684_v30 = vmul.f32 %v10386_v11, %v10558_v50 }
 0x47e   : > { %v5835_v20 = vmax.f32 %v5771_v32, 0.0  ;;  %v5839_v45 = vmax.f32 %v5775_v16, 0.0  ;;  %v5772_v0 = vadd.f32 %v10556_v58, %v5686_v62  ;;  %v5688_v17 = vmul.f32 %v10394_v63, %v10558_v50 }
 0x47f   : > { %6313 = vmatmul.mubr.bf16.gmra.mrb[4].mxu1 %v5886_v44  ;;  %v5889_v31 = vpack.c.bf16 %v5837_v60, %v5833_v7  ;;  %v5832_v57 = vmax.f32 %v5768_v25, 0.0  ;;  %v5770_v53 = vadd.f32 %v10560_v18, %v5684_v30  ;;  %v5691_v10 = vmul.f32 %v10404_v59, %v10546_v48 }
 0x480   : > { %6216 = vmatmul.mubr.bf16.gmra.mrb[4].mxu0 %v5884_v26  ;;  %v5891_v24 = vpack.c.bf16 %v5839_v45, %v5835_v20  ;;  %v5836_v61 = vmax.f32 %v5772_v0, 0.0  ;;  %v5774_v47 = vadd.f32 %v10560_v18, %v5688_v17  ;;  %v5695_v11 = vmul.f32 %v10412_v55, %v10546_v48 }
 0x481   : > { %6223 = vmatprep.mubr.bf16.mxu0 %v5889_v31  ;;  %v5834_v39 = vmax.f32 %v5770_v53, 0.0  ;;  %v5777_v19 = vadd.f32 %v10548_v42, %v5691_v10  ;;  %v5693_v63 = vmul.f32 %v10406_v21, %v10550_v35  ;;  %v5697_v33 = vmul.f32 %v10414_v56, %v10550_v35 }
 0x482   : > { %6320 = vmatprep.mubr.bf16.mxu1 %v5891_v24  ;;  %v5888_v4 = vpack.c.bf16 %v5836_v61, %v5832_v57  ;;  %v5838_v59 = vmax.f32 %v5774_v47, 0.0  ;;  %v5781_v41 = vadd.f32 %v10548_v42, %v5695_v11  ;;  %v5690_v51 = vmul.f32 %v10400_v14, %v10554_v28 }
 0x483   : > { %v5841_v6 = vmax.f32 %v5777_v19, 0.0  ;;  %v5779_v55 = vadd.f32 %v10552_v37, %v5693_v63  ;;  %v5783_v9 = vadd.f32 %v10552_v37, %v5697_v33  ;;  %v5694_v5 = vmul.f32 %v10408_v34, %v10554_v28 }
 0x484   : > { %v5890_v21 = vpack.c.bf16 %v5838_v59, %v5834_v39  ;;  %v5845_v43 = vmax.f32 %v5781_v41, 0.0  ;;  %v5776_v56 = vadd.f32 %v10556_v58, %v5690_v51  ;;  %v5692_v22 = vmul.f32 %v10402_v49, %v10558_v50  ;;  %v11127_v41 = vld [vmem:[#allocation45_spill] sm:$0xff] }
 0x485   : > { %v5843_v8 = vmax.f32 %v5779_v55, 0.0  ;;  %v5847_v52 = vmax.f32 %v5783_v9, 0.0  ;;  %v5780_v14 = vadd.f32 %v10556_v58, %v5694_v5  ;;  %v5696_v13 = vmul.f32 %v10410_v27, %v10558_v50  ;;  %v11128_v9 = vld [vmem:[#allocation39_spill] sm:$0xff] }
 0x486   : > { %v5893_v26 = vpack.c.bf16 %v5845_v43, %v5841_v6  ;;  %v5840_v36 = vmax.f32 %v5776_v56, 0.0  ;;  %v5778_v2 = vadd.f32 %v10560_v18, %v5692_v22  ;;  %v5699_v34 = vmul.f32 %v10420_v40, %v10546_v48  ;;  %v11129_v22 = vld [vmem:[#allocation42_spill] sm:$0xff] }
 0x487   : > { %6321 = vmatmul.mubr.bf16.gmra.mrb[8].mxu1 %v5890_v21  ;;  %v5895_v1 = vpack.c.bf16 %v5847_v52, %v5843_v8  ;;  %v5844_v7 = vmax.f32 %v5780_v14, 0.0  ;;  %v5782_v49 = vadd.f32 %v10560_v18, %v5696_v13  ;;  %v5703_v32 = vmul.f32 %v10428_v12, %v10546_v48 }
 0x488   : > { %6224 = vmatmul.mubr.bf16.gmra.mrb[8].mxu0 %v5888_v4  ;;  %v5842_v16 = vmax.f32 %v5778_v2, 0.0  ;;  %v5785_v62 = vadd.f32 %v10548_v42, %v5699_v34  ;;  %v5701_v27 = vmul.f32 %v10422_v54, %v10550_v35  ;;  %v5705_v44 = vmul.f32 %v10430_v15, %v10550_v35  ;;  %v11126_v4 = vld [vmem:[#allocation41_spill] sm:$0xff] }
 0x489   : > { %6231 = vmatprep.mubr.bf16.mxu0 %v5893_v26  ;;  %6328 = vmatprep.mubr.bf16.mxu1 %v5895_v1  ;;  %v5892_v40 = vpack.c.bf16 %v5844_v7, %v5840_v36  ;;  %v5846_v60 = vmax.f32 %v5782_v49, 0.0  ;;  %v5789_v25 = vadd.f32 %v10548_v42, %v5703_v32  ;;  %v5698_v30 = vmul.f32 %v10416_v29, %v10554_v28  ;;  %v11130_v26 = vld [vmem:[#allocation40_spill] sm:$0xff]  ;;  %v11131_v7 = vld [vmem:[#allocation43_spill] sm:$0xff] }
 0x48a   : > { %v5849_v20 = vmax.f32 %v5785_v62, 0.0  ;;  %v5787_v12 = vadd.f32 %v10552_v37, %v5701_v27  ;;  %v5791_v45 = vadd.f32 %v10552_v37, %v5705_v44  ;;  %v5702_v0 = vmul.f32 %v10424_v46, %v10554_v28  ;;  %v11132_v27 = vld [vmem:[#allocation48_spill] sm:$0xff] }
 0x48b   : > { %v5894_v54 = vpack.c.bf16 %v5846_v60, %v5842_v16  ;;  %v5853_v17 = vmax.f32 %v5789_v25, 0.0  ;;  %v5784_v15 = vadd.f32 %v10556_v58, %v5698_v30  ;;  %v5700_v31 = vmul.f32 %v10418_v38, %v10558_v50  ;;  %v11125_v38 = vld [vmem:[#allocation44_spill] sm:$0xff] }
 0x48c   : > { %v5851_v57 = vmax.f32 %v5787_v12, 0.0  ;;  %v5855_v53 = vmax.f32 %v5791_v45, 0.0  ;;  %v5788_v10 = vadd.f32 %v10556_v58, %v5702_v0  ;;  %v5704_v29 = vmul.f32 %v10426_v3, %v10558_v50  ;;  %v11133_v30 = vld [vmem:[#allocation52_spill] sm:$0xff]  ;;  %v11134_v0 = vld [vmem:[#allocation49_spill] sm:$0xff] }
 0x48d   : > { %v5897_v24 = vpack.c.bf16 %v5853_v17, %v5849_v20  ;;  %v5848_v61 = vmax.f32 %v5784_v15, 0.0  ;;  %v5786_v47 = vadd.f32 %v10560_v18, %v5700_v31  ;;  %v5707_v46 = vmul.f32 %v10436_v23, %v10546_v48  ;;  %v11135_v17 = vld [vmem:[#allocation53_spill] sm:$0xff] }
 0x48e   : > { %v5899_v11 = vpack.c.bf16 %v5855_v53, %v5851_v57  ;;  %v5852_v39 = vmax.f32 %v5788_v10, 0.0  ;;  %v5790_v19 = vadd.f32 %v10560_v18, %v5704_v29  ;;  %v5711_v63 = vmul.f32 %v11125_v38, %v10546_v48  ;;  %v11136_v10 = vld [vmem:[#allocation46_spill] sm:$0xff] }
 0x48f   : > { %6329 = vmatmul.mubr.bf16.gmra.mrb[12].mxu1 %v5894_v54  ;;  %v5850_v33 = vmax.f32 %v5786_v47, 0.0  ;;  %v5793_v3 = vadd.f32 %v10548_v42, %v5707_v46  ;;  %v5709_v59 = vmul.f32 %v11126_v4, %v10550_v35  ;;  %v5713_v51 = vmul.f32 %v11127_v41, %v10550_v35  ;;  %v11137_v46 = vld [vmem:[#allocation50_spill] sm:$0xff]  ;;  %v11139_v41 = vld [vmem:[#allocation51_spill] sm:$0xff] }
 0x490   : > { %6232 = vmatmul.mubr.bf16.gmra.mrb[12].mxu0 %v5892_v40  ;;  %6336 = vmatprep.mubr.bf16.mxu1 %v5899_v11  ;;  %v5896_v23 = vpack.c.bf16 %v5852_v39, %v5848_v61  ;;  %v5854_v6 = vmax.f32 %v5790_v19, 0.0  ;;  %v5797_v55 = vadd.f32 %v10548_v42, %v5711_v63  ;;  %v5706_v5 = vmul.f32 %v11128_v9, %v10554_v28  ;;  %v11138_v63 = vld [vmem:[#allocation47_spill] sm:$0xff]  ;;  %v11140_v9 = vld [vmem:[#allocation56_spill] sm:$0xff] }
 0x491   : > { %6239 = vmatprep.mubr.bf16.mxu0 %v5897_v24  ;;  %v5857_v21 = vmax.f32 %v5793_v3, 0.0  ;;  %v5795_v43 = vadd.f32 %v10552_v37, %v5709_v59  ;;  %v5799_v56 = vadd.f32 %v10552_v37, %v5713_v51  ;;  %v5710_v8 = vmul.f32 %v11129_v22, %v10554_v28  ;;  %v11141_v22 = vld [vmem:[#allocation60_spill] sm:$0xff] }
 0x492   : > { %v5898_v52 = vpack.c.bf16 %v5854_v6, %v5850_v33  ;;  %v5861_v14 = vmax.f32 %v5797_v55, 0.0  ;;  %v5792_v13 = vadd.f32 %v10556_v58, %v5706_v5  ;;  %v5708_v36 = vmul.f32 %v11130_v26, %v10558_v50  ;;  %v11143_v26 = vld [vmem:[#allocation61_spill] sm:$0xff] }
 0x493   : > { %v5859_v2 = vmax.f32 %v5795_v43, 0.0  ;;  %v5863_v34 = vmax.f32 %v5799_v56, 0.0  ;;  %v5796_v1 = vadd.f32 %v10556_v58, %v5710_v8  ;;  %v5712_v49 = vmul.f32 %v11131_v7, %v10558_v50  ;;  %v11144_v7 = vld [vmem:[#allocation54_spill] sm:$0xff] }
 0x494   : > { %v5901_v32 = vpack.c.bf16 %v5861_v14, %v5857_v21  ;;  %v5856_v16 = vmax.f32 %v5792_v13, 0.0  ;;  %v5794_v62 = vadd.f32 %v10560_v18, %v5708_v36  ;;  %v5715_v44 = vmul.f32 %v11132_v27, %v10546_v48  ;;  %v11142_v14 = vld [vmem:[#allocation57_spill] sm:$0xff] }
 0x495   : > { %v5903_v40 = vpack.c.bf16 %v5863_v34, %v5859_v2  ;;  %v5860_v60 = vmax.f32 %v5796_v1, 0.0  ;;  %v5798_v25 = vadd.f32 %v10560_v18, %v5712_v49  ;;  %v5719_v20 = vmul.f32 %v11133_v30, %v10546_v48 }
 0x496   : > { %v5858_v12 = vmax.f32 %v5794_v62, 0.0  ;;  %v5801_v45 = vadd.f32 %v10548_v42, %v5715_v44  ;;  %v5717_v54 = vmul.f32 %v11134_v0, %v10550_v35  ;;  %v5721_v15 = vmul.f32 %v11135_v17, %v10550_v35  ;;  %v11145_v62 = vld [vmem:[#allocation58_spill] sm:$0xff] }
 0x497   : > { %6337 = vmatmul.mubr.bf16.gmra.mrb[16].mxu1 %v5898_v52  ;;  %v5900_v31 = vpack.c.bf16 %v5860_v60, %v5856_v16  ;;  %v5862_v57 = vmax.f32 %v5798_v25, 0.0  ;;  %v5805_v53 = vadd.f32 %v10548_v42, %v5719_v20  ;;  %v5714_v29 = vmul.f32 %v11136_v10, %v10554_v28  ;;  %v11146_v60 = vld [vmem:[#allocation55_spill] sm:$0xff] }
 0x498   : > { %6240 = vmatmul.mubr.bf16.gmra.mrb[16].mxu0 %v5896_v23  ;;  %6344 = vmatprep.mubr.bf16.mxu1 %v5903_v40  ;;  %v5865_v24 = vmax.f32 %v5801_v45, 0.0  ;;  %v5803_v61 = vadd.f32 %v10552_v37, %v5717_v54  ;;  %v5807_v47 = vadd.f32 %v10552_v37, %v5721_v15  ;;  %v5718_v11 = vmul.f32 %v11137_v46, %v10554_v28 }
 0x499   : > { %6247 = vmatprep.mubr.bf16.mxu0 %v5901_v32  ;;  %v5902_v39 = vpack.c.bf16 %v5862_v57, %v5858_v12  ;;  %v5869_v19 = vmax.f32 %v5805_v53, 0.0  ;;  %v5800_v38 = vadd.f32 %v10556_v58, %v5714_v29  ;;  %v5716_v33 = vmul.f32 %v11138_v63, %v10558_v50  ;;  %v11147_v12 = vld [vmem:[#allocation59_spill] sm:$0xff] }
 0x49a   : > { %v5867_v3 = vmax.f32 %v5803_v61, 0.0  ;;  %v5871_v4 = vmax.f32 %v5807_v47, 0.0  ;;  %v5804_v59 = vadd.f32 %v10556_v58, %v5718_v11  ;;  %v5720_v51 = vmul.f32 %v11139_v41, %v10558_v50 }
 0x49b   : > { %v5905_v23 = vpack.c.bf16 %v5869_v19, %v5865_v24  ;;  %v5864_v6 = vmax.f32 %v5800_v38, 0.0  ;;  %v5802_v55 = vadd.f32 %v10560_v18, %v5716_v33  ;;  %v5723_v5 = vmul.f32 %v11140_v9, %v10546_v48  ;;  %v10754_v24 = vld [vmem:[#allocation12] ss:$0 sm:$0xff] }
 0x49c   : > { %v5907_v21 = vpack.c.bf16 %v5871_v4, %v5867_v3  ;;  %v5868_v43 = vmax.f32 %v5804_v59, 0.0  ;;  %v5806_v56 = vadd.f32 %v10560_v18, %v5720_v51  ;;  %v5727_v8 = vmul.f32 %v11141_v22, %v10546_v48 }
 0x49d   : > { %v5809_v52 = vadd.f32 %v10548_v42, %v5723_v5  ;;  %v5725_v13 = vmul.f32 %v11142_v14, %v10550_v35  ;;  %v5729_v36 = vmul.f32 %v11143_v26, %v10550_v35  ;;  %v5866_v2 = vmax.f32 %v5802_v55, 0.0 }
 0x49e   : > { %v5870_v34 = vmax.f32 %v5806_v56, 0.0  ;;  %v5813_v1 = vadd.f32 %v10548_v42, %v5727_v8  ;;  %v5722_v49 = vmul.f32 %v11144_v7, %v10554_v28  ;;  %v5726_v27 = vmul.f32 %v11145_v62, %v10554_v28 }
 0x49f   : > { %6345 = vmatmul.mubr.bf16.gmra.mrb[20].mxu1 %v5902_v39  ;;  %v5873_v32 = vmax.f32 %v5809_v52, 0.0  ;;  %v5811_v48 = vadd.f32 %v10552_v37, %v5725_v13  ;;  %v5815_v16 = vadd.f32 %v10552_v37, %v5729_v36  ;;  %v5904_v44 = vpack.c.bf16 %v5868_v43, %v5864_v6 }
 0x4a0   : > { %6248 = vmatmul.mubr.bf16.gmra.mrb[20].mxu0 %v5900_v31  ;;  %6352 = vmatprep.mubr.bf16.mxu1 %v5907_v21  ;;  %v5877_v35 = vmax.f32 %v5813_v1, 0.0  ;;  %v5808_v40 = vadd.f32 %v10556_v58, %v5722_v49  ;;  %v5724_v42 = vmul.f32 %v11146_v60, %v10558_v50  ;;  %v5812_v20 = vadd.f32 %v10556_v58, %v5726_v27 }
 0x4a1   : > { %6255 = vmatprep.mubr.bf16.mxu0 %v5905_v23  ;;  %v5875_v25 = vmax.f32 %v5811_v48, 0.0  ;;  %v5879_v30 = vmax.f32 %v5815_v16, 0.0  ;;  %v5728_v45 = vmul.f32 %v11147_v12, %v10558_v50  ;;  %v5906_v37 = vpack.c.bf16 %v5870_v34, %v5866_v2 }
 0x4a2   : > { %v5909_v0 = vpack.c.bf16 %v5877_v35, %v5873_v32  ;;  %v5810_v54 = vadd.f32 %v10560_v18, %v5724_v42  ;;  %v5872_v15 = vmax.f32 %v5808_v40, 0.0  ;;  %v5876_v31 = vmax.f32 %v5812_v20, 0.0 }
 0x4a3   : > { %v5814_v28 = vadd.f32 %v10560_v18, %v5728_v45  ;;  %v5911_v17 = vpack.c.bf16 %v5879_v30, %v5875_v25 }
 0x4a4   : > { %v5874_v57 = vmax.f32 %v5810_v54, 0.0  ;;  %v5908_v10 = vpack.c.bf16 %v5876_v31, %v5872_v15 }
 0x4a5   : > { %v5878_v53 = vmax.f32 %v5814_v28, 0.0 }
 0x4a7   : > { %6353 = vmatmul.mubr.bf16.gmra.mrb[24].mxu1 %v5906_v37  ;;  %v5910_v58 = vpack.c.bf16 %v5878_v53, %v5874_v57 }
 0x4a8   : > { %6256 = vmatmul.mubr.bf16.gmra.mrb[24].mxu0 %v5904_v44  ;;  %6360 = vmatprep.mubr.bf16.mxu1 %v5911_v17 }
 0x4a9   : > { %6263 = vmatprep.mubr.bf16.mxu0 %v5909_v0 }
 0x4af   : > { %6361 = vmatmul.mubr.bf16.gmra.mrb[28].mxu1 %v5910_v58 }
 0x4b0   : > { %6264 = vmatmul.mubr.bf16.gmra.mrb[28].mxu0 %v5908_v10 }
 0x549   : > { %v7448_v29 = vpop.f32.mrb[0].mxu1 }
 0x54a   : > { %v7449_v47 = vpop.f32.mrb[1].mxu1 }
 0x54b   : > { %v7384_v50 = vpop.f32.mrb[0].mxu0  ;;  %v7450_v46 = vadd.f32 %v7449_v47, %v7448_v29  ;;  %v7451_v39 = vpop.f32.mrb[2].mxu1 }
 0x54c   : > { %v7385_v61 = vpop.f32.mrb[1].mxu0  ;;  %v7452_v38 = vpop.f32.mrb[3].mxu1 }
 0x54d   : > { %v7386_v18 = vadd.f32 %v7385_v61, %v7384_v50  ;;  %v7387_v11 = vpop.f32.mrb[2].mxu0  ;;  %v7453_v3 = vadd.f32 %v7452_v38, %v7451_v39 }
 0x54e   : > { %v7388_v19 = vpop.f32.mrb[3].mxu0 }
 0x54f   : > { %v6210_v63 = vadd.f32 %v7386_v18, %v10754_v24  ;;  %v7389_v33 = vadd.f32 %v7388_v19, %v7387_v11 }
 0x551   : > { %v6213_v4 = vadd.f32 %v7389_v33, %v10754_v24  ;;  %v10758_v59 = vadd.f32 %v7450_v46, %v6210_v63 }
 0x552   : > { %v7454_v6 = vpop.f32.mrb[4].mxu1 }
 0x553   : > { %v7390_v41 = vpop.f32.mrb[4].mxu0  ;;  %6369 = vmax.xlane.f32.xlu0 %v10758_v59  ;;  %v10761_v51 = vadd.f32 %v7453_v3, %v6213_v4  ;;  %v7455_v5 = vpop.f32.mrb[5].mxu1 }
 0x554   : > { %v7391_v23 = vpop.f32.mrb[5].mxu0  ;;  %v7456_v56 = vadd.f32 %v7455_v5, %v7454_v6  ;;  %v7457_v22 = vpop.f32.mrb[6].mxu1 }
 0x555   : > { %v7392_v55 = vadd.f32 %v7391_v23, %v7390_v41  ;;  %v7393_v9 = vpop.f32.mrb[6].mxu0  ;;  %v7458_v52 = vpop.f32.mrb[7].mxu1 }
 0x556   : > { %v7394_v21 = vpop.f32.mrb[7].mxu0  ;;  %v7459_v13 = vadd.f32 %v7458_v52, %v7457_v22 }
 0x557   : > { %v6218_v43 = vadd.f32 %v7392_v55, %v10754_v24  ;;  %v7395_v8 = vadd.f32 %v7394_v21, %v7393_v9  ;;  %6371 = vmax.xlane.f32.xlu0 %v10761_v51 }
 0x559   : > { %v6221_v14 = vadd.f32 %v7395_v8, %v10754_v24  ;;  %v10766_v26 = vadd.f32 %v7456_v56, %v6218_v43 }
 0x55a   : > { %v7460_v1 = vpop.f32.mrb[8].mxu1 }
 0x55b   : > { %v7396_v36 = vpop.f32.mrb[8].mxu0  ;;  %6373 = vmax.xlane.f32.xlu1 %v10766_v26  ;;  %v10769_v2 = vadd.f32 %v7459_v13, %v6221_v14  ;;  %v7461_v32 = vpop.f32.mrb[9].mxu1 }
 0x55c   : > { %v7397_v34 = vpop.f32.mrb[9].mxu0  ;;  %v7462_v62 = vadd.f32 %v7461_v32, %v7460_v1  ;;  %v7463_v27 = vpop.f32.mrb[10].mxu1 }
 0x55d   : > { %v7398_v7 = vadd.f32 %v7397_v34, %v7396_v36  ;;  %v7399_v49 = vpop.f32.mrb[10].mxu0  ;;  %v7464_v35 = vpop.f32.mrb[11].mxu1 }
 0x55e   : > { %v7400_v48 = vpop.f32.mrb[11].mxu0  ;;  %v7465_v60 = vadd.f32 %v7464_v35, %v7463_v27 }
 0x55f   : > { %v6226_v16 = vadd.f32 %v7398_v7, %v10754_v24  ;;  %v7401_v44 = vadd.f32 %v7400_v48, %v7399_v49  ;;  %6375 = vmax.xlane.f32.xlu1 %v10769_v2 }
 0x561   : > { %v6229_v40 = vadd.f32 %v7401_v44, %v10754_v24  ;;  %v10774_v42 = vadd.f32 %v7462_v62, %v6226_v16 }
 0x562   : > { %v7466_v12 = vpop.f32.mrb[12].mxu1 }
 0x563   : > { %v7402_v25 = vpop.f32.mrb[12].mxu0  ;;  %6377 = vmax.xlane.f32.xlu0 %v10774_v42  ;;  %v10777_v30 = vadd.f32 %v7465_v60, %v6229_v40  ;;  %v7467_v37 = vpop.f32.mrb[13].mxu1 }
 0x564   : > { %v7403_v20 = vpop.f32.mrb[13].mxu0  ;;  %v7468_v17 = vadd.f32 %v7467_v37, %v7466_v12  ;;  %v7469_v15 = vpop.f32.mrb[14].mxu1 }
 0x565   : > { %v7404_v45 = vadd.f32 %v7403_v20, %v7402_v25  ;;  %v7405_v0 = vpop.f32.mrb[14].mxu0  ;;  %6379 = vmax.xlane.f32.xlu1 %v10777_v30  ;;  %v7470_v57 = vpop.f32.mrb[15].mxu1 }
 0x566   : > { %v7406_v54 = vpop.f32.mrb[15].mxu0  ;;  %v7471_v10 = vadd.f32 %v7470_v57, %v7469_v15 }
 0x567   : > { %v6234_v28 = vadd.f32 %v7404_v45, %v10754_v24  ;;  %v7407_v31 = vadd.f32 %v7406_v54, %v7405_v0 }
 0x569   : > { %v6237_v53 = vadd.f32 %v7407_v31, %v10754_v24  ;;  %v10782_v58 = vadd.f32 %v7468_v17, %v6234_v28 }
 0x56a   : > { %v7472_v47 = vpop.f32.mrb[16].mxu1 }
 0x56b   : > { %v7408_v50 = vpop.f32.mrb[16].mxu0  ;;  %6381 = vmax.xlane.f32.xlu0 %v10782_v58  ;;  %v10785_v29 = vadd.f32 %v7471_v10, %v6237_v53  ;;  %v7473_v11 = vpop.f32.mrb[17].mxu1 }
 0x56c   : > { %v7409_v61 = vpop.f32.mrb[17].mxu0  ;;  %v7474_v38 = vadd.f32 %v7473_v11, %v7472_v47  ;;  %v7475_v63 = vpop.f32.mrb[18].mxu1 }
 0x56d   : > { %v7410_v18 = vadd.f32 %v7409_v61, %v7408_v50  ;;  %v7411_v46 = vpop.f32.mrb[18].mxu0  ;;  %6383 = vmax.xlane.f32.xlu1 %v10785_v29  ;;  %v7476_v3 = vpop.f32.mrb[19].mxu1 }
 0x56e   : > { %v7412_v39 = vpop.f32.mrb[19].mxu0  ;;  %v7477_v41 = vadd.f32 %v7476_v3, %v7475_v63 }
 0x56f   : > { %v6242_v19 = vadd.f32 %v7410_v18, %v10754_v24  ;;  %v7413_v33 = vadd.f32 %v7412_v39, %v7411_v46 }
 0x571   : > { %v6245_v4 = vadd.f32 %v7413_v33, %v10754_v24  ;;  %v10790_v23 = vadd.f32 %v7474_v38, %v6242_v19 }
 0x572   : > { %v7478_v5 = vpop.f32.mrb[20].mxu1 }
 0x573   : > { %v7414_v6 = vpop.f32.mrb[20].mxu0  ;;  %6385 = vmax.xlane.f32.xlu0 %v10790_v23  ;;  %v10793_v55 = vadd.f32 %v7477_v41, %v6245_v4  ;;  %v7479_v56 = vpop.f32.mrb[21].mxu1 }
 0x574   : > { %v7415_v9 = vpop.f32.mrb[21].mxu0  ;;  %v7480_v52 = vadd.f32 %v7479_v56, %v7478_v5  ;;  %v7481_v14 = vpop.f32.mrb[22].mxu1 }
 0x575   : > { %v7416_v21 = vadd.f32 %v7415_v9, %v7414_v6  ;;  %v7417_v43 = vpop.f32.mrb[22].mxu0  ;;  %6387 = vmax.xlane.f32.xlu1 %v10793_v55  ;;  %v7482_v36 = vpop.f32.mrb[23].mxu1 }
 0x576   : > { %v7418_v22 = vpop.f32.mrb[23].mxu0  ;;  %v7483_v1 = vadd.f32 %v7482_v36, %v7481_v14 }
 0x577   : > { %v6250_v8 = vadd.f32 %v7416_v21, %v10754_v24  ;;  %v7419_v13 = vadd.f32 %v7418_v22, %v7417_v43 }
 0x579   : > { %v6253_v34 = vadd.f32 %v7419_v13, %v10754_v24  ;;  %v10798_v7 = vadd.f32 %v7480_v52, %v6250_v8 }
 0x57a   : > { %v7484_v16 = vpop.f32.mrb[24].mxu1 }
 0x57b   : > { %v7420_v49 = vpop.f32.mrb[24].mxu0  ;;  %6389 = vmax.xlane.f32.xlu0 %v10798_v7  ;;  %v10801_v32 = vadd.f32 %v7483_v1, %v6253_v34  ;;  %v7485_v44 = vpop.f32.mrb[25].mxu1 }
 0x57c   : > { %v7421_v48 = vpop.f32.mrb[25].mxu0  ;;  %v7486_v60 = vadd.f32 %v7485_v44, %v7484_v16  ;;  %v7487_v25 = vpop.f32.mrb[26].mxu1 }
 0x57d   : > { %v7422_v62 = vadd.f32 %v7421_v48, %v7420_v49  ;;  %v7423_v27 = vpop.f32.mrb[26].mxu0  ;;  %6391 = vmax.xlane.f32.xlu1 %v10801_v32  ;;  %v7488_v12 = vpop.f32.mrb[27].mxu1 }
 0x57e   : > { %v7424_v35 = vpop.f32.mrb[27].mxu0  ;;  %v7489_v0 = vadd.f32 %v7488_v12, %v7487_v25 }
 0x57f   : > { %v6258_v40 = vadd.f32 %v7422_v62, %v10754_v24  ;;  %v7425_v20 = vadd.f32 %v7424_v35, %v7423_v27 }
 0x581   : > { %v6261_v45 = vadd.f32 %v7425_v20, %v10754_v24  ;;  %v10806_v37 = vadd.f32 %v7486_v60, %v6258_v40 }
 0x582   : > { %v7490_v15 = vpop.f32.mrb[28].mxu1 }
 0x583   : > { %v7426_v54 = vpop.f32.mrb[28].mxu0  ;;  %6393 = vmax.xlane.f32.xlu0 %v10806_v37  ;;  %v10809_v28 = vadd.f32 %v7489_v0, %v6261_v45  ;;  %v7491_v53 = vpop.f32.mrb[29].mxu1 }
 0x584   : > { %v7427_v17 = vpop.f32.mrb[29].mxu0  ;;  %v7492_v61 = vadd.f32 %v7491_v53, %v7490_v15  ;;  %v7493_v47 = vpop.f32.mrb[30].mxu1 }
 0x585   : > { %v7428_v31 = vadd.f32 %v7427_v17, %v7426_v54  ;;  %v7429_v57 = vpop.f32.mrb[30].mxu0  ;;  %6395 = vmax.xlane.f32.xlu1 %v10809_v28  ;;  %v7494_v46 = vpop.f32.mrb[31].mxu1 }
 0x586   : > { %v7430_v10 = vpop.f32.mrb[31].mxu0  ;;  %v7495_v39 = vadd.f32 %v7494_v46, %v7493_v47 }
 0x587   : > { %v6266_v50 = vadd.f32 %v7428_v31, %v10754_v24  ;;  %v7431_v18 = vadd.f32 %v7430_v10, %v7429_v57 }
 0x589   : > { %v6269_v11 = vadd.f32 %v7431_v18, %v10754_v24  ;;  %v10814_v19 = vadd.f32 %v7492_v61, %v6266_v50 }
 0x58b   : > { %6397 = vmax.xlane.f32.xlu0 %v10814_v19  ;;  %v10817_v38 = vadd.f32 %v7495_v39, %v6269_v11 }
 0x58d   : > { %6399 = vmax.xlane.f32.xlu1 %v10817_v38 }
 0x5e0   : > { %v6370_v63 = vpop.xlane.xlu0 %6369 }
 0x5e1   : > { %v10821_v33 = vsub.f32 %v10758_v59, %v6370_v63 }
 0x5e3   : > { %v6417_v3 = vmul.f32 1.442695, %v10821_v33 }
 0x5e4   : > { %v6372_v4 = vpop.xlane.xlu0 %6371 }
 0x5e5   : > { %8780 = vpow2.f32 %v6417_v3  ;;  %v10825_v41 = vsub.f32 %v10761_v51, %v6372_v4 }
 0x5e7   : > { %v6419_v24 = vmul.f32 1.442695, %v10825_v41 }
 0x5e8   : > { %v6374_v6 = vpop.xlane.xlu1 %6373 }
 0x5e9   : > { %8782 = vpow2.f32 %v6419_v24  ;;  %v10829_v9 = vsub.f32 %v10766_v26, %v6374_v6 }
 0x5eb   : > { %v6421_v5 = vmul.f32 1.442695, %v10829_v9 }
 0x5ec   : > { %v6376_v21 = vpop.xlane.xlu1 %6375 }
 0x5ed   : > { %8784 = vpow2.f32 %v6421_v5  ;;  %v10833_v59 = vsub.f32 %v10769_v2, %v6376_v21 }
 0x5ef   : > { %v8781_v43 = vpop.eup %8780  ;;  %v6423_v56 = vmul.f32 1.442695, %v10833_v59 }
 0x5f0   : > { %6449 = vadd.xlane.f32.xlu0 %v8781_v43  ;;  %v6378_v51 = vpop.xlane.xlu0 %6377 }
 0x5f1   : > { %8786 = vpow2.f32 %v6423_v56  ;;  %v10837_v22 = vsub.f32 %v10774_v42, %v6378_v51 }
 0x5f2   : > { %v6380_v8 = vpop.xlane.xlu1 %6379 }
 0x5f3   : > { %v8783_v52 = vpop.eup %8782  ;;  %v6425_v26 = vmul.f32 1.442695, %v10837_v22  ;;  %v10841_v14 = vsub.f32 %v10777_v30, %v6380_v8 }
 0x5f4   : > { %6451 = vadd.xlane.f32.xlu1 %v8783_v52 }
 0x5f5   : > { %8788 = vpow2.f32 %v6425_v26  ;;  %v6427_v2 = vmul.f32 1.442695, %v10841_v14 }
 0x5f7   : > { %v8785_v13 = vpop.eup %8784  ;;  %8790 = vpow2.f32 %v6427_v2 }
 0x5f8   : > { %6453 = vadd.xlane.f32.xlu0 %v8785_v13  ;;  %v6382_v36 = vpop.xlane.xlu0 %6381 }
 0x5f9   : > { %v10845_v34 = vsub.f32 %v10782_v58, %v6382_v36 }
 0x5fa   : > { %v6384_v42 = vpop.xlane.xlu1 %6383 }
 0x5fb   : > { %v8787_v1 = vpop.eup %8786  ;;  %v6429_v49 = vmul.f32 1.442695, %v10845_v34  ;;  %v10849_v48 = vsub.f32 %v10785_v29, %v6384_v42 }
 0x5fc   : > { %6455 = vadd.xlane.f32.xlu1 %v8787_v1 }
 0x5fd   : > { %8792 = vpow2.f32 %v6429_v49  ;;  %v6431_v30 = vmul.f32 1.442695, %v10849_v48 }
 0x5ff   : > { %v8789_v16 = vpop.eup %8788  ;;  %8794 = vpow2.f32 %v6431_v30 }
 0x600   : > { %6457 = vadd.xlane.f32.xlu0 %v8789_v16  ;;  %v6386_v62 = vpop.xlane.xlu0 %6385 }
 0x601   : > { %v8791_v27 = vpop.eup %8790  ;;  %v10853_v44 = vsub.f32 %v10790_v23, %v6386_v62 }
 0x602   : > { %v6388_v58 = vpop.xlane.xlu1 %6387  ;;  %6459 = vadd.xlane.f32.xlu1 %v8791_v27 }
 0x603   : > { %v6433_v35 = vmul.f32 1.442695, %v10853_v44  ;;  %v10857_v40 = vsub.f32 %v10793_v55, %v6388_v58 }
 0x605   : > { %8796 = vpow2.f32 %v6433_v35  ;;  %v6435_v29 = vmul.f32 1.442695, %v10857_v40 }
 0x607   : > { %v8793_v60 = vpop.eup %8792  ;;  %8798 = vpow2.f32 %v6435_v29 }
 0x608   : > { %6461 = vadd.xlane.f32.xlu0 %v8793_v60  ;;  %v6390_v25 = vpop.xlane.xlu0 %6389 }
 0x609   : > { %v8795_v20 = vpop.eup %8794  ;;  %v10861_v12 = vsub.f32 %v10798_v7, %v6390_v25 }
 0x60a   : > { %v6392_v23 = vpop.xlane.xlu1 %6391  ;;  %6463 = vadd.xlane.f32.xlu1 %v8795_v20 }
 0x60b   : > { %v6437_v45 = vmul.f32 1.442695, %v10861_v12  ;;  %v10865_v0 = vsub.f32 %v10801_v32, %v6392_v23 }
 0x60d   : > { %8800 = vpow2.f32 %v6437_v45  ;;  %v6439_v55 = vmul.f32 1.442695, %v10865_v0 }
 0x60f   : > { %v8797_v54 = vpop.eup %8796  ;;  %8802 = vpow2.f32 %v6439_v55 }
 0x610   : > { %6465 = vadd.xlane.f32.xlu0 %v8797_v54  ;;  %v6394_v17 = vpop.xlane.xlu0 %6393 }
 0x611   : > { %v8799_v15 = vpop.eup %8798  ;;  %v10869_v31 = vsub.f32 %v10806_v37, %v6394_v17 }
 0x612   : > { %v6396_v7 = vpop.xlane.xlu1 %6395  ;;  %6467 = vadd.xlane.f32.xlu1 %v8799_v15 }
 0x613   : > { %v6441_v57 = vmul.f32 1.442695, %v10869_v31  ;;  %v10873_v53 = vsub.f32 %v10809_v28, %v6396_v7 }
 0x615   : > { %8804 = vpow2.f32 %v6441_v57  ;;  %v6443_v32 = vmul.f32 1.442695, %v10873_v53 }
 0x617   : > { %v8801_v10 = vpop.eup %8800  ;;  %8806 = vpow2.f32 %v6443_v32 }
 0x618   : > { %6469 = vadd.xlane.f32.xlu0 %v8801_v10  ;;  %v6398_v50 = vpop.xlane.xlu0 %6397 }
 0x619   : > { %v8803_v61 = vpop.eup %8802  ;;  %v10877_v47 = vsub.f32 %v10814_v19, %v6398_v50 }
 0x61a   : > { %v6400_v37 = vpop.xlane.xlu1 %6399  ;;  %6471 = vadd.xlane.f32.xlu1 %v8803_v61 }
 0x61b   : > { %v6445_v18 = vmul.f32 1.442695, %v10877_v47  ;;  %v10881_v46 = vsub.f32 %v10817_v38, %v6400_v37 }
 0x61d   : > { %8808 = vpow2.f32 %v6445_v18  ;;  %v6447_v28 = vmul.f32 1.442695, %v10881_v46 }
 0x61f   : > { %v8805_v11 = vpop.eup %8804  ;;  %8810 = vpow2.f32 %v6447_v28 }
 0x620   : > { %6473 = vadd.xlane.f32.xlu0 %v8805_v11 }
 0x621   : > { %v8807_v39 = vpop.eup %8806 }
 0x622   : > { %6475 = vadd.xlane.f32.xlu1 %v8807_v39 }
 0x627   : > { %v8809_v63 = vpop.eup %8808 }
 0x628   : > { %6477 = vadd.xlane.f32.xlu0 %v8809_v63 }
 0x629   : > { %v8811_v19 = vpop.eup %8810 }
 0x62a   : > { %6479 = vadd.xlane.f32.xlu1 %v8811_v19 }
 0x67d   : > { %v6450_v3 = vpop.xlane.xlu0 %6449 }
 0x67e   : > { %8812 = vlog2.f32 %v6450_v3 }
 0x681   : > { %v6452_v4 = vpop.xlane.xlu1 %6451 }
 0x682   : > { %8814 = vlog2.f32 %v6452_v4 }
 0x685   : > { %v6454_v24 = vpop.xlane.xlu0 %6453 }
 0x686   : > { %8816 = vlog2.f32 %v6454_v24 }
 0x688   : > { %v8813_v38 = vpop.eup %8812 }
 0x689   : > { %v6482_v6 = vmul.f32 0.6931472, %v8813_v38  ;;  %v6456_v5 = vpop.xlane.xlu1 %6455 }
 0x68a   : > { %8818 = vlog2.f32 %v6456_v5 }
 0x68b   : > { %v6513_v21 = vsub.f32 %v10821_v33, %v6482_v6 }
 0x68c   : > { %v8815_v43 = vpop.eup %8814 }
 0x68d   : > { %6529 = vst [vmem:[%s9527_s22] sm:$0xff] %v6513_v21  ;;  %v6484_v56 = vmul.f32 0.6931472, %v8815_v43  ;;  %v6458_v51 = vpop.xlane.xlu0 %6457 }
 0x68e   : > { %8820 = vlog2.f32 %v6458_v51 }
 0x68f   : > { %v6514_v8 = vsub.f32 %v10825_v41, %v6484_v56  ;;  %v6460_v52 = vpop.xlane.xlu1 %6459 }
 0x690   : > { %v8817_v26 = vpop.eup %8816  ;;  %8822 = vlog2.f32 %v6460_v52 }
 0x691   : > { %6530 = vst [vmem:[%s9527_s22 + $0x8] sm:$0xff] %v6514_v8  ;;  %v6486_v2 = vmul.f32 0.6931472, %v8817_v26 }
 0x693   : > { %v6515_v13 = vsub.f32 %v10829_v9, %v6486_v2 }
 0x694   : > { %v8819_v36 = vpop.eup %8818 }
 0x695   : > { %6531 = vst [vmem:[%s9527_s22 + $0x10] sm:$0xff] %v6515_v13  ;;  %v6488_v42 = vmul.f32 0.6931472, %v8819_v36  ;;  %v6462_v33 = vpop.xlane.xlu0 %6461 }
 0x696   : > { %8824 = vlog2.f32 %v6462_v33 }
 0x697   : > { %v6516_v1 = vsub.f32 %v10833_v59, %v6488_v42  ;;  %v6464_v49 = vpop.xlane.xlu1 %6463 }
 0x698   : > { %v8821_v30 = vpop.eup %8820  ;;  %8826 = vlog2.f32 %v6464_v49 }
 0x699   : > { %6532 = vst [vmem:[%s9527_s22 + $0x18] sm:$0xff] %v6516_v1  ;;  %v6490_v41 = vmul.f32 0.6931472, %v8821_v30 }
 0x69a   : > { %v8823_v16 = vpop.eup %8822 }
 0x69b   : > { %v6517_v62 = vsub.f32 %v10837_v22, %v6490_v41  ;;  %v6492_v27 = vmul.f32 0.6931472, %v8823_v16 }
 0x69d   : > { %6533 = vst [vmem:[%s9527_s22 + $0x20] sm:$0xff] %v6517_v62  ;;  %v6518_v9 = vsub.f32 %v10841_v14, %v6492_v27  ;;  %v6466_v58 = vpop.xlane.xlu0 %6465 }
 0x69e   : > { %8828 = vlog2.f32 %v6466_v58 }
 0x69f   : > { %6534 = vst [vmem:[%s9527_s22 + $0x28] sm:$0xff] %v6518_v9  ;;  %v6468_v35 = vpop.xlane.xlu1 %6467 }
 0x6a0   : > { %v8825_v29 = vpop.eup %8824  ;;  %8830 = vlog2.f32 %v6468_v35 }
 0x6a1   : > { %v6494_v59 = vmul.f32 0.6931472, %v8825_v29 }
 0x6a2   : > { %v8827_v60 = vpop.eup %8826 }
 0x6a3   : > { %v6519_v25 = vsub.f32 %v10845_v34, %v6494_v59  ;;  %v6496_v20 = vmul.f32 0.6931472, %v8827_v60 }
 0x6a5   : > { %6535 = vst [vmem:[%s9527_s22 + $0x30] sm:$0xff] %v6519_v25  ;;  %v6520_v22 = vsub.f32 %v10849_v48, %v6496_v20  ;;  %v6470_v23 = vpop.xlane.xlu0 %6469 }
 0x6a6   : > { %8832 = vlog2.f32 %v6470_v23 }
 0x6a7   : > { %6536 = vst [vmem:[%s9527_s22 + $0x38] sm:$0xff] %v6520_v22  ;;  %v6472_v14 = vpop.xlane.xlu1 %6471 }
 0x6a8   : > { %v8829_v45 = vpop.eup %8828  ;;  %8834 = vlog2.f32 %v6472_v14 }
 0x6a9   : > { %v6498_v55 = vmul.f32 0.6931472, %v8829_v45 }
 0x6aa   : > { %v8831_v54 = vpop.eup %8830 }
 0x6ab   : > { %v6521_v17 = vsub.f32 %v10853_v44, %v6498_v55  ;;  %v6500_v15 = vmul.f32 0.6931472, %v8831_v54 }
 0x6ad   : > { %6537 = vst [vmem:[%s9527_s22 + $0x40] sm:$0xff] %v6521_v17  ;;  %v6522_v34 = vsub.f32 %v10857_v40, %v6500_v15  ;;  %v6474_v7 = vpop.xlane.xlu0 %6473 }
 0x6ae   : > { %8836 = vlog2.f32 %v6474_v7 }
 0x6af   : > { %6538 = vst [vmem:[%s9527_s22 + $0x48] sm:$0xff] %v6522_v34  ;;  %v6476_v48 = vpop.xlane.xlu1 %6475 }
 0x6b0   : > { %v8833_v57 = vpop.eup %8832  ;;  %8838 = vlog2.f32 %v6476_v48 }
 0x6b1   : > { %v6502_v32 = vmul.f32 0.6931472, %v8833_v57 }
 0x6b2   : > { %v8835_v10 = vpop.eup %8834 }
 0x6b3   : > { %v6523_v50 = vsub.f32 %v10861_v12, %v6502_v32  ;;  %v6504_v61 = vmul.f32 0.6931472, %v8835_v10 }
 0x6b5   : > { %6539 = vst [vmem:[%s9527_s22 + $0x50] sm:$0xff] %v6523_v50  ;;  %v6524_v44 = vsub.f32 %v10865_v0, %v6504_v61  ;;  %v6478_v37 = vpop.xlane.xlu0 %6477 }
 0x6b6   : > { %8840 = vlog2.f32 %v6478_v37 }
 0x6b7   : > { %6540 = vst [vmem:[%s9527_s22 + $0x58] sm:$0xff] %v6524_v44  ;;  %v6480_v40 = vpop.xlane.xlu1 %6479 }
 0x6b8   : > { %v8837_v18 = vpop.eup %8836  ;;  %8842 = vlog2.f32 %v6480_v40 }
 0x6b9   : > { %v6506_v28 = vmul.f32 0.6931472, %v8837_v18 }
 0x6ba   : > { %v8839_v11 = vpop.eup %8838 }
 0x6bb   : > { %v6525_v39 = vsub.f32 %v10869_v31, %v6506_v28  ;;  %v6508_v63 = vmul.f32 0.6931472, %v8839_v11 }
 0x6bd   : > { %6541 = vst [vmem:[%s9527_s22 + $0x60] sm:$0xff] %v6525_v39  ;;  %v6526_v12 = vsub.f32 %v10873_v53, %v6508_v63 }
 0x6bf   : > { %6542 = vst [vmem:[%s9527_s22 + $0x68] sm:$0xff] %v6526_v12 }
 0x6c0   : > { %v8841_v19 = vpop.eup %8840 }
 0x6c1   : > { %v6510_v3 = vmul.f32 0.6931472, %v8841_v19 }
 0x6c2   : > { %v8843_v0 = vpop.eup %8842 }
 0x6c3   : > { %v6527_v4 = vsub.f32 %v10877_v47, %v6510_v3  ;;  %v6512_v24 = vmul.f32 0.6931472, %v8843_v0 }
 0x6c5   : > { %6543 = vst [vmem:[%s9527_s22 + $0x70] sm:$0xff] %v6527_v4  ;;  %v6528_v38 = vsub.f32 %v10881_v46, %v6512_v24 }
 0x6c7   : > { %6544 = vst [vmem:[%s9527_s22 + $0x78] sm:$0xff] %v6528_v38 }
 0x6c8 PF: > { %s11148_s13 = sld [smem:[#allocation29_spill]]  ;;  %s11150_s25 = sld [smem:[#allocation37_spill]] }
 0x6c9   : > { %s11151_s17 = sld [smem:[#allocation63_spill]]  ;;  %s6559_s19 = sshll.u32 %s9527_s22, 4  ;;  %s10923_s19 = int_to_ptr.vmem [resolvable:$true] %s6559_s19 }
 0x6ca   : > { %s10927_s15 = scalar_lea.sflag [#allocation5], %s400_s11  ;;  %s8984_s2 = scalar_lea.vmem %s10923_s19, 2048 }
 0x6cb   : > { %p8985_p12 = scmp.ne.s32.totalorder %s10923_s19, %s8984_s2  ;;  %s9165_s20 = smov [#allocation14]  }
 0x6cc   : > { %s8988_s7 = sshll.u32 %s9165_s20, 4  ;;  %s8989_s7 = int_to_ptr.vmem [resolvable:$false] %s8988_s7 }
 0x6cd   : > { %s8990_s18 = scalar_lea.vmem %s8989_s7, 4096  ;;  %p8991_p10 = scmp.lt.s32.totalorder %s10923_s19, %s8989_s7 }
 0x6ce   : > { %s7367_s16 = sshll.u32 %s11148_s13, 11  ;;  %p11152_p8 = scmp.ne.s32.totalorder %s11150_s25, 0 }
 0x6cf   : > { %s10920_s12 = scalar_lea.hbm %s11151_s17, %s7367_s16  ;;  %p8992_p4 = scmp.lt.s32.totalorder %s8990_s18, %s8984_s2 }
 0x6d0   : > { %p8986_p2 = pnand %p8985_p12, %p11152_p8 }
 0x6d1   : > { %p8993_p13 = por %p8992_p4, %p8991_p10 }
 0x6d2   : > { %p8987_p7 = pneg %p8986_p2 }
 0x6d4   : > { %p8994_p5 = pnand %p8993_p13, %p8987_p7 }
 0x6d6   : > { %8997 = shalt.err (!%p8994_p5)
}
 0x6d7   : > { %s8998_s11 = scalar_lea.hbm %s10920_s12, 2048  ;;  %s9002_s24 = scalar_lea.hbm %s11151_s17, 4096 }
 0x6d8   : > { %p8999_p9 = scmp.ne.s32.totalorder %s10920_s12, %s8998_s11  ;;  %p9003_p6 = scmp.lt.u32.totalorder %s10920_s12, %s11151_s17 }
 0x6d9   : > { %p9004_p1 = scmp.lt.u32.totalorder %s9002_s24, %s8998_s11  ;;  %p9006_p12 = scmp.lt.u32.totalorder %s8998_s11, %s10920_s12 }
 0x6da   : > { %p9000_p11 = pnand %p8999_p9, %p11152_p8 }
 0x6db   : > { %p9005_p3 = por %p9004_p1, %p9003_p6 }
 0x6dc   : > { %p9001_p0 = pneg %p9000_p11 }
 0x6dd   : > { %p9007_p2 = por %p9006_p12, %p9005_p3 }
 0x6df   : > { %p9008_p7 = pnand %p9007_p2, %p9001_p0 }
 0x6e1   : > { %9011 = shalt.err (!%p9008_p7)
}
 0x6e2   : > { %s9166_s13 = smov 128   ;;  %s9167_s14 = smov 8  }
 0x6e3   : > { %8104 = dma.vmem_to_hbm [thread:$0]  (%p11152_p8), %s10923_s19, 2048, %s10920_s12, %s10927_s15, %s9166_s13, %s9166_s13, %s9167_s14  }
 0x6e4 PF: > { %s11153_s16 = sld [smem:[#allocation24_spill]]  ;;  %s11154_s27 = sld [smem:[#allocation38_spill]] }
 0x6e5   : > { %p8131_p10 = scmp.ge.s32.totalorder %s9146_s10, 2 }
 0x6ea   : > { %s6574_s6 = sand.u32 1, %s11153_s16   ;;  %p11155_p4 = scmp.ne.s32.totalorder %s11154_s27, 0 }
 0x6eb   : > { %s6575_s2 = scalar_lea.sflag [#allocation5], %s6574_s6 }
 0x6ec   : > { %p8120_p13 = pnand %p8131_p10, %p11155_p4 }
 0x6ee   : > { %9089 = dma.done.wait (!%p8120_p13), %s6575_s2, 2048  }
 0x6ef   : > { %9091 = vsyncadd (!%p8120_p13), %s6575_s2, 4294965248  ;;  %s27_s10 = sadd.s32 1, %s9146_s10   ;;  %s11157_s21 = sld [smem:[#allocation25_spill]] }
 0x6f0   : > { %p10956_p5 = scmp.ge.s32.totalorder %s27_s10, 36   ;;  %s11158_s22 = sld [smem:[#allocation26_spill]] }
 0x6f1   : > { %s11159_s23 = sld [smem:[#allocation36_spill]]  ;;  %s11160_s24 = sld [smem:[#allocation27_spill]] }
 0x6f2   : > { %s11161_s12 = sld [smem:[#allocation33_spill]]  ;;  %s11162_s19 = sld [smem:[#allocation34_spill]] }
 0x6f3   : > { %s11163_s15 = sld [smem:[#allocation31_spill]]  ;;  %s11164_s18 = sld [smem:[#allocation32_spill]] }
 0x6f4   : > { %s11165_s25 = smov %s9114_s26  ;;  %s11167_s27 = smov %s9122_s28 }
 0x6f5   : > { %s11168_s28 = smov %s9126_s29  ;;  %s11170_s30 = smov %s9138_s8 }
 0x6f6   : > { %s11171_s7 = smov %s9142_s9  ;;  %26 = sbr.rel (!%p10956_p5) target bundleno = 17 (0x11), region = 143 }
 0x6f8   : > { %s11166_s26 = smov %s11161_s12  ;;  %s11169_s29 = smov %s11162_s19 }
 0x6f9   : > { %s11172_s8 = smov %s11163_s15  ;;  %s11173_s9 = smov %s11164_s18 }
 0x6fd   :  { %6580 = vsyncpa [#allocation4], 1 }
 0x6fe   :  { %6582 = vsyncpa [#allocation4 + $0x1], 1 }
 0x6ff   :  { %6583 = vsyncpa [#allocation7], 1 }
 0x700   :  { %6585 = vsyncpa [#allocation7 + $0x1], 1 }
 0x701   :  { %6586 = vsyncpa [#allocation10], 1 }
 0x702   :  { %6587 = vsyncpa [#allocation13], 1 }
 0x703   :  { %6588 = vsyncpa [#allocation5], 1 }
 0x704   :  { %6590 = vsyncpa [#allocation5 + $0x1], 1 }

</bundles_post_ra>
